<compile_context>
chip_gen: v7x
topology: tpu7x:2x2x1
jax: 0.10.0
libtpu: 0.0.40
codegen_flags: <defaults>
</compile_context>

<pallas_src>
import functools

import jax
import jax.numpy as jnp
import numpy as np
from jax.experimental import pallas as pl
from jax.experimental.pallas import tpu as pltpu


# ----------------------------------------------------------------------------
# Fused generator kernel (one grid step == one image)
# ----------------------------------------------------------------------------
def _generator_kernel(gen_in_ref, w1_ref, t1_ref,
                      wres_ref, tres_ref,
                      w2_ref, t2_ref,
                      o_ref, xpad0, xpad_a,
                      *, H, W, n_res, woff):
    HW = H * W
    C2 = xpad0.shape[-1]      # 2 * num_channels
    F = xpad_a.shape[-1]      # num_filts
    Cout = o_ref.shape[-1]    # num_channels

    # Zero the padded scratch buffers (zero halo == SAME padding; interiors
    # are fully overwritten each layer).  Re-zeroed every grid step so the
    # batch grid axis can remain "parallel" on megacore parts.
    xpad0[...] = jnp.zeros(xpad0.shape, xpad0.dtype)
    xpad_a[...] = jnp.zeros(xpad_a.shape, xpad_a.dtype)

    # Generator input (img ++ fc(z), NHWC) -> interior of the padded scratch.
    xpad0[1:1 + H, woff:woff + W, :] = gen_in_ref[0]

    def conv3x3(src_ref, cin, cout, tap_w, shift):
        # 3x3 stride-1 conv: 9 shifted (H*W, cin) patches x (cin, cout) MXU
        # matmuls accumulated in f32, seeded with the (folded) bias/shift.
        # SAME padding comes from the zero halo of the scratch buffer.
        acc = jnp.broadcast_to(shift, (HW, cout)).astype(jnp.float32)
        for dh in range(3):
            for dw in range(3):
                patch = src_ref[dh:dh + H, woff - 1 + dw:woff - 1 + dw + W, :]
                acc = acc + jnp.dot(
                    patch.reshape(HW, cin), tap_w(dh * 3 + dw),
                    preferred_element_type=jnp.float32)
        return acc

    # l1: Conv2d(2C -> F) (+ bias, scale pre-folded into weights) + ReLU
    out = conv3x3(xpad0, C2, F, lambda k: w1_ref[k], t1_ref[...])
    out = jnp.maximum(out, 0.0)                                   # (HW, F)
    xpad_a[1:1 + H, woff:woff + W, :] = out.reshape(H, W, F)

    # residual blocks: x + BN2(Conv2(ReLU(BN1(Conv1(x))))), BN folded.
    # The skip value `out` is carried as a value, so a single padded
    # activation buffer suffices (h overwrites x in scratch).
    for i in range(n_res):
        j0, j1 = 2 * i, 2 * i + 1
        h = conv3x3(xpad_a, F, F, lambda k, j=j0: wres_ref[j * 9 + k],
                    tres_ref[j0])
        h = jnp.maximum(h, 0.0)
        xpad_a[1:1 + H, woff:woff + W, :] = h.reshape(H, W, F)

        r = conv3x3(xpad_a, F, F, lambda k, j=j1: wres_ref[j * 9 + k],
                    tres_ref[j1])
        out = out + r
        xpad_a[1:1 + H, woff:woff + W, :] = out.reshape(H, W, F)

    # l2: Conv2d(F -> C) (+ bias) + Tanh
    y = conv3x3(xpad_a, F, Cout, lambda k: w2_ref[k], t2_ref[...])
    y = jnp.tanh(y)
    o_ref[0] = y.reshape(H, W, Cout).astype(o_ref.dtype)


# ----------------------------------------------------------------------------
# Wrapper: tiny XLA prologue (fc + concat + layout) and one fused pallas_call
# ----------------------------------------------------------------------------
def generator_forward(params, img_nchw, z):
    B, C, H, W = img_nchw.shape
    F = params["l1_w"].shape[-1]
    n_res = len(params["res"])
    assert n_res >= 1

    # --- tiny (16 KB) prologue: fc(z), channel concat, NCHW -> NHWC ---------
    fc = z @ params["fc_w"] + params["fc_b"]                        # (B, C*H*W)
    gen_in = jnp.concatenate([img_nchw, fc.reshape(B, C, H, W)], axis=1)
    gen_in = jnp.transpose(gen_in, (0, 2, 3, 1)).astype(jnp.float32)  # (B,H,W,2C)

    # --- pack weights tap-major, fold BN/bias scale into the weights --------
    w1 = (params["l1_w"].reshape(9, 2 * C, F)
          * params["l1_scale"].reshape(1, 1, F))
    t1 = params["l1_shift"].reshape(1, F)

    wres_list, tres_list = [], []
    for i in range(n_res):
        for tag in ("1", "2"):
            w = params["res"][i]["w" + tag].reshape(9, F, F)
            s = params["res"][i]["scale" + tag].reshape(1, 1, F)
            wres_list.append(w * s)
            tres_list.append(params["res"][i]["shift" + tag])
    wres = jnp.concatenate(wres_list, axis=0)                  # (2*n_res*9, F, F)
    tres = jnp.stack(tres_list).reshape(2 * n_res, 1, F)

    w2 = (params["l2_w"].reshape(9, F, C)
          * params["l2_scale"].reshape(1, 1, C))
    t2 = params["l2_shift"].reshape(1, C)

    WOFF = 8                       # sublane-aligned interior column offset
    WP = W + 2 * WOFF              # padded scratch width (full sublane tiles)

    kernel = functools.partial(_generator_kernel, H=H, W=W, n_res=n_res,
                               woff=WOFF)

    y = pl.pallas_call(
        kernel,
        out_shape=jax.ShapeDtypeStruct((B, H, W, C), jnp.float32),
        grid=(B,),
        in_specs=[
            pl.BlockSpec((1, H, W, 2 * C), lambda b: (b, 0, 0, 0)),
            pl.BlockSpec((9, 2 * C, F), lambda b: (0, 0, 0)),
            pl.BlockSpec((1, F), lambda b: (0, 0)),
            pl.BlockSpec((2 * n_res * 9, F, F), lambda b: (0, 0, 0)),
            pl.BlockSpec((2 * n_res, 1, F), lambda b: (0, 0, 0)),
            pl.BlockSpec((9, F, C), lambda b: (0, 0, 0)),
            pl.BlockSpec((1, C), lambda b: (0, 0)),
        ],
        out_specs=pl.BlockSpec((1, H, W, C), lambda b: (b, 0, 0, 0)),
        scratch_shapes=[
            pltpu.VMEM((H + 2, WP, 2 * C), jnp.float32),   # padded l1 input
            pltpu.VMEM((H + 2, WP, F), jnp.float32),       # padded activation
        ],
        compiler_params=pltpu.CompilerParams(
            dimension_semantics=("parallel",)),
    )(gen_in, w1, t1, wres, tres, w2, t2)

    return jnp.transpose(y, (0, 3, 1, 2))                   # tiny (8 KB) NHWC->NCHW


# ----------------------------------------------------------------------------
# Parameter construction (deterministic, synthetic)
# ----------------------------------------------------------------------------
BN_EPS = 1e-5


def _conv_init(key, cin, cout):
    kw, kb = jax.random.split(key)
    w = jax.random.normal(kw, (3, 3, cin, cout), jnp.float32) * (0.5 / (3.0 * cin ** 0.5))
    b = 0.05 * jax.random.normal(kb, (cout,), jnp.float32)
    return w, b


def _bn_init(key, c):
    k1, k2, k3, k4 = jax.random.split(key, 4)
    gamma = 1.0 + 0.1 * jax.random.normal(k1, (c,), jnp.float32)
    beta = 0.05 * jax.random.normal(k2, (c,), jnp.float32)
    mean = 0.05 * jax.random.normal(k3, (c,), jnp.float32)
    var = jnp.abs(1.0 + 0.1 * jax.random.normal(k4, (c,), jnp.float32))
    return gamma, beta, mean, var


def init_params(key, latent_dim, num_channels, img_size, n_res, num_filts=64):
    keys = jax.random.split(key, 3 + 2 * n_res)
    p = {}

    out_dim = num_channels * img_size * img_size
    kfw, kfb = jax.random.split(keys[0])
    p["fc_w"] = jax.random.normal(kfw, (latent_dim, out_dim), jnp.float32) / latent_dim ** 0.5
    p["fc_b"] = 0.05 * jax.random.normal(kfb, (out_dim,), jnp.float32)

    # l1: Conv2d(2C, 64) + ReLU  (no BN -> scale = 1, shift = bias)
    w, b = _conv_init(keys[1], 2 * num_channels, num_filts)
    p["l1_w"], p["l1_scale"], p["l1_shift"] = w, jnp.ones((num_filts,), jnp.float32), b

    # residual blocks: [Conv+BN+ReLU, Conv+BN], BN folded into scale/shift.
    p["res"] = []
    for i in range(n_res):
        blk = {}
        for tag, kc in (("1", keys[2 + 2 * i]), ("2", keys[3 + 2 * i])):
            kw_, kbn = jax.random.split(kc)
            w, b = _conv_init(kw_, num_filts, num_filts)
            gamma, beta, mean, var = _bn_init(kbn, num_filts)
            s = gamma / jnp.sqrt(var + BN_EPS)
            blk["w" + tag] = w
            blk["scale" + tag] = s
            blk["shift" + tag] = s * b + beta - mean * s
        p["res"].append(blk)

    # l2: Conv2d(64, C) + Tanh  (no BN -> scale = 1, shift = bias)
    w, b = _conv_init(keys[2 + 2 * n_res], num_filts, num_channels)
    p["l2_w"], p["l2_scale"], p["l2_shift"] = w, jnp.ones((num_channels,), jnp.float32), b
    return p


# ----------------------------------------------------------------------------
# Pure-JAX reference
# ----------------------------------------------------------------------------
def reference_forward(params, img_nchw, z):
    B, C, H, W = img_nchw.shape
    fc = z @ params["fc_w"] + params["fc_b"]
    gen_in = jnp.concatenate([img_nchw, fc.reshape(B, C, H, W)], axis=1)
    x = jnp.transpose(gen_in, (0, 2, 3, 1))

    def conv(x_, w, scale, shift):
        y = jax.lax.conv_general_dilated(
            x_, w, (1, 1), "SAME",
            dimension_numbers=("NHWC", "HWIO", "NHWC"),
            precision=jax.lax.Precision.HIGHEST)
        return y * scale + shift

    out = jax.nn.relu(conv(x, params["l1_w"], params["l1_scale"], params["l1_shift"]))
    for blk in params["res"]:
        h = jax.nn.relu(conv(out, blk["w1"], blk["scale1"], blk["shift1"]))
        out = out + conv(h, blk["w2"], blk["scale2"], blk["shift2"])
    y = jnp.tanh(conv(out, params["l2_w"], params["l2_scale"], params["l2_shift"]))
    return jnp.transpose(y, (0, 3, 1, 2))


# ----------------------------------------------------------------------------
if __name__ == "__main__":
    B, C, IMG, LATENT, N_RES, N_FILTS = 2, 4, 16, 32, 2, 64

    key = jax.random.PRNGKey(0)
    k_img, k_z, k_p = jax.random.split(key, 3)
    img = jax.random.normal(k_img, (B, C, IMG, IMG), jnp.float32)   # NCHW like torch
    z = jax.random.normal(k_z, (B, LATENT), jnp.float32)
    params = init_params(k_p, LATENT, C, IMG, N_RES, N_FILTS)

    out = generator_forward(params, img, z)
    out = jax.block_until_ready(out)
    assert out.shape == (B, C, IMG, IMG), out.shape

    ref = jax.block_until_ready(reference_forward(params, img, z))
    np.testing.assert_allclose(np.asarray(out), np.asarray(ref), atol=2e-3, rtol=2e-3)

    print("KERNEL_OK")
</pallas_src>

<mosaic_0001>
module attributes {stable_mosaic.version = 11 : i64} {
  func.func @_generator_kernel(%arg0: i32, %arg1: memref<1x16x16x8xf32, #tpu.memory_space<vmem>>, %arg2: memref<9x8x64xf32, #tpu.memory_space<vmem>>, %arg3: memref<1x64xf32, #tpu.memory_space<vmem>>, %arg4: memref<36x64x64xf32, #tpu.memory_space<vmem>>, %arg5: memref<4x1x64xf32, #tpu.memory_space<vmem>>, %arg6: memref<9x64x4xf32, #tpu.memory_space<vmem>>, %arg7: memref<1x4xf32, #tpu.memory_space<vmem>>, %arg8: memref<1x16x16x4xf32, #tpu.memory_space<vmem>>, %arg9: memref<18x32x8xf32, #tpu.memory_space<vmem>>, %arg10: memref<18x32x64xf32, #tpu.memory_space<vmem>>) attributes {dimension_semantics = [#tpu.dimension_semantics<parallel>], iteration_bounds = array<i64: 2>, scalar_prefetch = 0 : i64, scratch_operands = 2 : i64, tpu.core_type = #tpu.core_type<tc>, window_params = [{transform_indices = @transform_0, window_bounds = array<i64: 1, 16, 16, 8>}, {pipeline_mode = #tpu.pipeline_mode<synchronous>, transform_indices = @transform_1, window_bounds = array<i64: 9, 8, 64>}, {pipeline_mode = #tpu.pipeline_mode<synchronous>, transform_indices = @transform_2, window_bounds = array<i64: 1, 64>}, {pipeline_mode = #tpu.pipeline_mode<synchronous>, transform_indices = @transform_3, window_bounds = array<i64: 36, 64, 64>}, {pipeline_mode = #tpu.pipeline_mode<synchronous>, transform_indices = @transform_4, window_bounds = array<i64: 4, 1, 64>}, {pipeline_mode = #tpu.pipeline_mode<synchronous>, transform_indices = @transform_5, window_bounds = array<i64: 9, 64, 4>}, {pipeline_mode = #tpu.pipeline_mode<synchronous>, transform_indices = @transform_6, window_bounds = array<i64: 1, 4>}, {transform_indices = @transform_7, window_bounds = array<i64: 1, 16, 16, 4>}]} {
    %cst = arith.constant 0.000000e+00 : f32
    %0 = vector.broadcast %cst : f32 to vector<18x32x8xf32>
    %c0 = arith.constant 0 : index
    %c0_0 = arith.constant 0 : index
    %c0_1 = arith.constant 0 : index
    %1 = vector.load %arg9[%c0, %c0_0, %c0_1] : memref<18x32x8xf32, #tpu.memory_space<vmem>>, vector<18x32x8xf32>
    tpu.vector_store %arg9[%c0, %c0_0, %c0_1], %0 {strides = array<i32>} : memref<18x32x8xf32, #tpu.memory_space<vmem>>, vector<18x32x8xf32>,
    %cst_2 = arith.constant 0.000000e+00 : f32
    %2 = vector.broadcast %cst_2 : f32 to vector<18x32x64xf32>
    %c0_3 = arith.constant 0 : index
    %c0_4 = arith.constant 0 : index
    %c0_5 = arith.constant 0 : index
    %3 = vector.load %arg10[%c0_3, %c0_4, %c0_5] : memref<18x32x64xf32, #tpu.memory_space<vmem>>, vector<18x32x64xf32>
    tpu.vector_store %arg10[%c0_3, %c0_4, %c0_5], %2 {strides = array<i32>} : memref<18x32x64xf32, #tpu.memory_space<vmem>>, vector<18x32x64xf32>,
    %c0_6 = arith.constant 0 : index
    %c0_7 = arith.constant 0 : index
    %c0_8 = arith.constant 0 : index
    %c0_9 = arith.constant 0 : index
    %4 = vector.load %arg1[%c0_6, %c0_7, %c0_8, %c0_9] : memref<1x16x16x8xf32, #tpu.memory_space<vmem>>, vector<1x16x16x8xf32>
    %5 = vector.shape_cast %4 : vector<1x16x16x8xf32> to vector<16x16x8xf32>
    %c1 = arith.constant 1 : index
    %c8 = arith.constant 8 : index
    %c0_10 = arith.constant 0 : index
    %6 = vector.load %arg9[%c1, %c8, %c0_10] : memref<18x32x8xf32, #tpu.memory_space<vmem>>, vector<16x16x8xf32>
    tpu.vector_store %arg9[%c1, %c8, %c0_10], %5 {strides = array<i32>} : memref<18x32x8xf32, #tpu.memory_space<vmem>>, vector<16x16x8xf32>,
    %c0_11 = arith.constant 0 : index
    %c0_12 = arith.constant 0 : index
    %7 = vector.load %arg3[%c0_11, %c0_12] : memref<1x64xf32, #tpu.memory_space<vmem>>, vector<1x64xf32>
    %8 = vector.shape_cast %7 : vector<1x64xf32> to vector<1x64xf32>
    %9 = vector.broadcast %8 : vector<1x64xf32> to vector<256x64xf32>
    %c0_13 = arith.constant 0 : index
    %c7 = arith.constant 7 : index
    %c0_14 = arith.constant 0 : index
    %10 = vector.load %arg9[%c0_13, %c7, %c0_14] : memref<18x32x8xf32, #tpu.memory_space<vmem>>, vector<16x16x8xf32>
    %11 = vector.shape_cast %10 : vector<16x16x8xf32> to vector<256x8xf32>
    %c0_15 = arith.constant 0 : index
    %c0_16 = arith.constant 0 : index
    %c0_17 = arith.constant 0 : index
    %12 = vector.load %arg2[%c0_15, %c0_16, %c0_17] : memref<9x8x64xf32, #tpu.memory_space<vmem>>, vector<1x8x64xf32>
    %13 = vector.shape_cast %12 : vector<1x8x64xf32> to vector<8x64xf32>
    %cst_18 = arith.constant dense<0.000000e+00> : vector<256x64xf32>
    %14 = tpu.matmul %11, %13, %cst_18 {dimension_numbers = #tpu.dot_dimension_numbers<[1], [0], [0], [1], [0, 0, 1, 1], [], []>} : vector<256x8xf32>, vector<8x64xf32>, vector<256x64xf32> -> vector<256x64xf32>
    %15 = arith.addf %9, %14 : vector<256x64xf32>
    %c0_19 = arith.constant 0 : index
    %c8_20 = arith.constant 8 : index
    %c0_21 = arith.constant 0 : index
    %16 = vector.load %arg9[%c0_19, %c8_20, %c0_21] : memref<18x32x8xf32, #tpu.memory_space<vmem>>, vector<16x16x8xf32>
    %17 = vector.shape_cast %16 : vector<16x16x8xf32> to vector<256x8xf32>
    %c1_22 = arith.constant 1 : index
    %c0_23 = arith.constant 0 : index
    %c0_24 = arith.constant 0 : index
    %18 = vector.load %arg2[%c1_22, %c0_23, %c0_24] : memref<9x8x64xf32, #tpu.memory_space<vmem>>, vector<1x8x64xf32>
    %19 = vector.shape_cast %18 : vector<1x8x64xf32> to vector<8x64xf32>
    %cst_25 = arith.constant dense<0.000000e+00> : vector<256x64xf32>
    %20 = tpu.matmul %17, %19, %cst_25 {dimension_numbers = #tpu.dot_dimension_numbers<[1], [0], [0], [1], [0, 0, 1, 1], [], []>} : vector<256x8xf32>, vector<8x64xf32>, vector<256x64xf32> -> vector<256x64xf32>
    %21 = arith.addf %15, %20 : vector<256x64xf32>
    %c0_26 = arith.constant 0 : index
    %c9 = arith.constant 9 : index
    %c0_27 = arith.constant 0 : index
    %22 = vector.load %arg9[%c0_26, %c9, %c0_27] : memref<18x32x8xf32, #tpu.memory_space<vmem>>, vector<16x16x8xf32>
    %23 = vector.shape_cast %22 : vector<16x16x8xf32> to vector<256x8xf32>
    %c2 = arith.constant 2 : index
    %c0_28 = arith.constant 0 : index
    %c0_29 = arith.constant 0 : index
    %24 = vector.load %arg2[%c2, %c0_28, %c0_29] : memref<9x8x64xf32, #tpu.memory_space<vmem>>, vector<1x8x64xf32>
    %25 = vector.shape_cast %24 : vector<1x8x64xf32> to vector<8x64xf32>
    %cst_30 = arith.constant dense<0.000000e+00> : vector<256x64xf32>
    %26 = tpu.matmul %23, %25, %cst_30 {dimension_numbers = #tpu.dot_dimension_numbers<[1], [0], [0], [1], [0, 0, 1, 1], [], []>} : vector<256x8xf32>, vector<8x64xf32>, vector<256x64xf32> -> vector<256x64xf32>
    %27 = arith.addf %21, %26 : vector<256x64xf32>
    %c1_31 = arith.constant 1 : index
    %c7_32 = arith.constant 7 : index
    %c0_33 = arith.constant 0 : index
    %28 = vector.load %arg9[%c1_31, %c7_32, %c0_33] : memref<18x32x8xf32, #tpu.memory_space<vmem>>, vector<16x16x8xf32>
    %29 = vector.shape_cast %28 : vector<16x16x8xf32> to vector<256x8xf32>
    %c3 = arith.constant 3 : index
    %c0_34 = arith.constant 0 : index
    %c0_35 = arith.constant 0 : index
    %30 = vector.load %arg2[%c3, %c0_34, %c0_35] : memref<9x8x64xf32, #tpu.memory_space<vmem>>, vector<1x8x64xf32>
    %31 = vector.shape_cast %30 : vector<1x8x64xf32> to vector<8x64xf32>
    %cst_36 = arith.constant dense<0.000000e+00> : vector<256x64xf32>
    %32 = tpu.matmul %29, %31, %cst_36 {dimension_numbers = #tpu.dot_dimension_numbers<[1], [0], [0], [1], [0, 0, 1, 1], [], []>} : vector<256x8xf32>, vector<8x64xf32>, vector<256x64xf32> -> vector<256x64xf32>
    %33 = arith.addf %27, %32 : vector<256x64xf32>
    %c1_37 = arith.constant 1 : index
    %c8_38 = arith.constant 8 : index
    %c0_39 = arith.constant 0 : index
    %34 = vector.load %arg9[%c1_37, %c8_38, %c0_39] : memref<18x32x8xf32, #tpu.memory_space<vmem>>, vector<16x16x8xf32>
    %35 = vector.shape_cast %34 : vector<16x16x8xf32> to vector<256x8xf32>
    %c4 = arith.constant 4 : index
    %c0_40 = arith.constant 0 : index
    %c0_41 = arith.constant 0 : index
    %36 = vector.load %arg2[%c4, %c0_40, %c0_41] : memref<9x8x64xf32, #tpu.memory_space<vmem>>, vector<1x8x64xf32>
    %37 = vector.shape_cast %36 : vector<1x8x64xf32> to vector<8x64xf32>
    %cst_42 = arith.constant dense<0.000000e+00> : vector<256x64xf32>
    %38 = tpu.matmul %35, %37, %cst_42 {dimension_numbers = #tpu.dot_dimension_numbers<[1], [0], [0], [1], [0, 0, 1, 1], [], []>} : vector<256x8xf32>, vector<8x64xf32>, vector<256x64xf32> -> vector<256x64xf32>
    %39 = arith.addf %33, %38 : vector<256x64xf32>
    %c1_43 = arith.constant 1 : index
    %c9_44 = arith.constant 9 : index
    %c0_45 = arith.constant 0 : index
    %40 = vector.load %arg9[%c1_43, %c9_44, %c0_45] : memref<18x32x8xf32, #tpu.memory_space<vmem>>, vector<16x16x8xf32>
    %41 = vector.shape_cast %40 : vector<16x16x8xf32> to vector<256x8xf32>
    %c5 = arith.constant 5 : index
    %c0_46 = arith.constant 0 : index
    %c0_47 = arith.constant 0 : index
    %42 = vector.load %arg2[%c5, %c0_46, %c0_47] : memref<9x8x64xf32, #tpu.memory_space<vmem>>, vector<1x8x64xf32>
    %43 = vector.shape_cast %42 : vector<1x8x64xf32> to vector<8x64xf32>
    %cst_48 = arith.constant dense<0.000000e+00> : vector<256x64xf32>
    %44 = tpu.matmul %41, %43, %cst_48 {dimension_numbers = #tpu.dot_dimension_numbers<[1], [0], [0], [1], [0, 0, 1, 1], [], []>} : vector<256x8xf32>, vector<8x64xf32>, vector<256x64xf32> -> vector<256x64xf32>
    %45 = arith.addf %39, %44 : vector<256x64xf32>
    %c2_49 = arith.constant 2 : index
    %c7_50 = arith.constant 7 : index
    %c0_51 = arith.constant 0 : index
    %46 = vector.load %arg9[%c2_49, %c7_50, %c0_51] : memref<18x32x8xf32, #tpu.memory_space<vmem>>, vector<16x16x8xf32>
    %47 = vector.shape_cast %46 : vector<16x16x8xf32> to vector<256x8xf32>
    %c6 = arith.constant 6 : index
    %c0_52 = arith.constant 0 : index
    %c0_53 = arith.constant 0 : index
    %48 = vector.load %arg2[%c6, %c0_52, %c0_53] : memref<9x8x64xf32, #tpu.memory_space<vmem>>, vector<1x8x64xf32>
    %49 = vector.shape_cast %48 : vector<1x8x64xf32> to vector<8x64xf32>
    %cst_54 = arith.constant dense<0.000000e+00> : vector<256x64xf32>
    %50 = tpu.matmul %47, %49, %cst_54 {dimension_numbers = #tpu.dot_dimension_numbers<[1], [0], [0], [1], [0, 0, 1, 1], [], []>} : vector<256x8xf32>, vector<8x64xf32>, vector<256x64xf32> -> vector<256x64xf32>
    %51 = arith.addf %45, %50 : vector<256x64xf32>
    %c2_55 = arith.constant 2 : index
    %c8_56 = arith.constant 8 : index
    %c0_57 = arith.constant 0 : index
    %52 = vector.load %arg9[%c2_55, %c8_56, %c0_57] : memref<18x32x8xf32, #tpu.memory_space<vmem>>, vector<16x16x8xf32>
    %53 = vector.shape_cast %52 : vector<16x16x8xf32> to vector<256x8xf32>
    %c7_58 = arith.constant 7 : index
    %c0_59 = arith.constant 0 : index
    %c0_60 = arith.constant 0 : index
    %54 = vector.load %arg2[%c7_58, %c0_59, %c0_60] : memref<9x8x64xf32, #tpu.memory_space<vmem>>, vector<1x8x64xf32>
    %55 = vector.shape_cast %54 : vector<1x8x64xf32> to vector<8x64xf32>
    %cst_61 = arith.constant dense<0.000000e+00> : vector<256x64xf32>
    %56 = tpu.matmul %53, %55, %cst_61 {dimension_numbers = #tpu.dot_dimension_numbers<[1], [0], [0], [1], [0, 0, 1, 1], [], []>} : vector<256x8xf32>, vector<8x64xf32>, vector<256x64xf32> -> vector<256x64xf32>
    %57 = arith.addf %51, %56 : vector<256x64xf32>
    %c2_62 = arith.constant 2 : index
    %c9_63 = arith.constant 9 : index
    %c0_64 = arith.constant 0 : index
    %58 = vector.load %arg9[%c2_62, %c9_63, %c0_64] : memref<18x32x8xf32, #tpu.memory_space<vmem>>, vector<16x16x8xf32>
    %59 = vector.shape_cast %58 : vector<16x16x8xf32> to vector<256x8xf32>
    %c8_65 = arith.constant 8 : index
    %c0_66 = arith.constant 0 : index
    %c0_67 = arith.constant 0 : index
    %60 = vector.load %arg2[%c8_65, %c0_66, %c0_67] : memref<9x8x64xf32, #tpu.memory_space<vmem>>, vector<1x8x64xf32>
    %61 = vector.shape_cast %60 : vector<1x8x64xf32> to vector<8x64xf32>
    %cst_68 = arith.constant dense<0.000000e+00> : vector<256x64xf32>
    %62 = tpu.matmul %59, %61, %cst_68 {dimension_numbers = #tpu.dot_dimension_numbers<[1], [0], [0], [1], [0, 0, 1, 1], [], []>} : vector<256x8xf32>, vector<8x64xf32>, vector<256x64xf32> -> vector<256x64xf32>
    %63 = arith.addf %57, %62 : vector<256x64xf32>
    %cst_69 = arith.constant 0.000000e+00 : f32
    %64 = vector.broadcast %cst_69 : f32 to vector<256x64xf32>
    %65 = arith.maximumf %63, %64 : vector<256x64xf32>
    %66 = vector.shape_cast %65 : vector<256x64xf32> to vector<16x16x64xf32>
    %c1_70 = arith.constant 1 : index
    %c8_71 = arith.constant 8 : index
    %c0_72 = arith.constant 0 : index
    %67 = vector.load %arg10[%c1_70, %c8_71, %c0_72] : memref<18x32x64xf32, #tpu.memory_space<vmem>>, vector<16x16x64xf32>
    tpu.vector_store %arg10[%c1_70, %c8_71, %c0_72], %66 {strides = array<i32>} : memref<18x32x64xf32, #tpu.memory_space<vmem>>, vector<16x16x64xf32>,
    %c0_73 = arith.constant 0 : index
    %c0_74 = arith.constant 0 : index
    %c0_75 = arith.constant 0 : index
    %68 = vector.load %arg5[%c0_73, %c0_74, %c0_75] : memref<4x1x64xf32, #tpu.memory_space<vmem>>, vector<1x1x64xf32>
    %69 = vector.shape_cast %68 : vector<1x1x64xf32> to vector<1x64xf32>
    %70 = vector.shape_cast %69 : vector<1x64xf32> to vector<1x64xf32>
    %71 = vector.broadcast %70 : vector<1x64xf32> to vector<256x64xf32>
    %c0_76 = arith.constant 0 : index
    %c7_77 = arith.constant 7 : index
    %c0_78 = arith.constant 0 : index
    %72 = vector.load %arg10[%c0_76, %c7_77, %c0_78] : memref<18x32x64xf32, #tpu.memory_space<vmem>>, vector<16x16x64xf32>
    %73 = vector.shape_cast %72 : vector<16x16x64xf32> to vector<256x64xf32>
    %c0_79 = arith.constant 0 : index
    %c0_80 = arith.constant 0 : index
    %c0_81 = arith.constant 0 : index
    %74 = vector.load %arg4[%c0_79, %c0_80, %c0_81] : memref<36x64x64xf32, #tpu.memory_space<vmem>>, vector<1x64x64xf32>
    %75 = vector.shape_cast %74 : vector<1x64x64xf32> to vector<64x64xf32>
    %cst_82 = arith.constant dense<0.000000e+00> : vector<256x64xf32>
    %76 = tpu.matmul %73, %75, %cst_82 {dimension_numbers = #tpu.dot_dimension_numbers<[1], [0], [0], [1], [0, 0, 1, 1], [], []>} : vector<256x64xf32>, vector<64x64xf32>, vector<256x64xf32> -> vector<256x64xf32>
    %77 = arith.addf %71, %76 : vector<256x64xf32>
    %c0_83 = arith.constant 0 : index
    %c8_84 = arith.constant 8 : index
    %c0_85 = arith.constant 0 : index
    %78 = vector.load %arg10[%c0_83, %c8_84, %c0_85] : memref<18x32x64xf32, #tpu.memory_space<vmem>>, vector<16x16x64xf32>
    %79 = vector.shape_cast %78 : vector<16x16x64xf32> to vector<256x64xf32>
    %c1_86 = arith.constant 1 : index
    %c0_87 = arith.constant 0 : index
    %c0_88 = arith.constant 0 : index
    %80 = vector.load %arg4[%c1_86, %c0_87, %c0_88] : memref<36x64x64xf32, #tpu.memory_space<vmem>>, vector<1x64x64xf32>
    %81 = vector.shape_cast %80 : vector<1x64x64xf32> to vector<64x64xf32>
    %cst_89 = arith.constant dense<0.000000e+00> : vector<256x64xf32>
    %82 = tpu.matmul %79, %81, %cst_89 {dimension_numbers = #tpu.dot_dimension_numbers<[1], [0], [0], [1], [0, 0, 1, 1], [], []>} : vector<256x64xf32>, vector<64x64xf32>, vector<256x64xf32> -> vector<256x64xf32>
    %83 = arith.addf %77, %82 : vector<256x64xf32>
    %c0_90 = arith.constant 0 : index
    %c9_91 = arith.constant 9 : index
    %c0_92 = arith.constant 0 : index
    %84 = vector.load %arg10[%c0_90, %c9_91, %c0_92] : memref<18x32x64xf32, #tpu.memory_space<vmem>>, vector<16x16x64xf32>
    %85 = vector.shape_cast %84 : vector<16x16x64xf32> to vector<256x64xf32>
    %c2_93 = arith.constant 2 : index
    %c0_94 = arith.constant 0 : index
    %c0_95 = arith.constant 0 : index
    %86 = vector.load %arg4[%c2_93, %c0_94, %c0_95] : memref<36x64x64xf32, #tpu.memory_space<vmem>>, vector<1x64x64xf32>
    %87 = vector.shape_cast %86 : vector<1x64x64xf32> to vector<64x64xf32>
    %cst_96 = arith.constant dense<0.000000e+00> : vector<256x64xf32>
    %88 = tpu.matmul %85, %87, %cst_96 {dimension_numbers = #tpu.dot_dimension_numbers<[1], [0], [0], [1], [0, 0, 1, 1], [], []>} : vector<256x64xf32>, vector<64x64xf32>, vector<256x64xf32> -> vector<256x64xf32>
    %89 = arith.addf %83, %88 : vector<256x64xf32>
    %c1_97 = arith.constant 1 : index
    %c7_98 = arith.constant 7 : index
    %c0_99 = arith.constant 0 : index
    %90 = vector.load %arg10[%c1_97, %c7_98, %c0_99] : memref<18x32x64xf32, #tpu.memory_space<vmem>>, vector<16x16x64xf32>
    %91 = vector.shape_cast %90 : vector<16x16x64xf32> to vector<256x64xf32>
    %c3_100 = arith.constant 3 : index
    %c0_101 = arith.constant 0 : index
    %c0_102 = arith.constant 0 : index
    %92 = vector.load %arg4[%c3_100, %c0_101, %c0_102] : memref<36x64x64xf32, #tpu.memory_space<vmem>>, vector<1x64x64xf32>
    %93 = vector.shape_cast %92 : vector<1x64x64xf32> to vector<64x64xf32>
    %cst_103 = arith.constant dense<0.000000e+00> : vector<256x64xf32>
    %94 = tpu.matmul %91, %93, %cst_103 {dimension_numbers = #tpu.dot_dimension_numbers<[1], [0], [0], [1], [0, 0, 1, 1], [], []>} : vector<256x64xf32>, vector<64x64xf32>, vector<256x64xf32> -> vector<256x64xf32>
    %95 = arith.addf %89, %94 : vector<256x64xf32>
    %c1_104 = arith.constant 1 : index
    %c8_105 = arith.constant 8 : index
    %c0_106 = arith.constant 0 : index
    %96 = vector.load %arg10[%c1_104, %c8_105, %c0_106] : memref<18x32x64xf32, #tpu.memory_space<vmem>>, vector<16x16x64xf32>
    %97 = vector.shape_cast %96 : vector<16x16x64xf32> to vector<256x64xf32>
    %c4_107 = arith.constant 4 : index
    %c0_108 = arith.constant 0 : index
    %c0_109 = arith.constant 0 : index
    %98 = vector.load %arg4[%c4_107, %c0_108, %c0_109] : memref<36x64x64xf32, #tpu.memory_space<vmem>>, vector<1x64x64xf32>
    %99 = vector.shape_cast %98 : vector<1x64x64xf32> to vector<64x64xf32>
    %cst_110 = arith.constant dense<0.000000e+00> : vector<256x64xf32>
    %100 = tpu.matmul %97, %99, %cst_110 {dimension_numbers = #tpu.dot_dimension_numbers<[1], [0], [0], [1], [0, 0, 1, 1], [], []>} : vector<256x64xf32>, vector<64x64xf32>, vector<256x64xf32> -> vector<256x64xf32>
    %101 = arith.addf %95, %100 : vector<256x64xf32>
    %c1_111 = arith.constant 1 : index
    %c9_112 = arith.constant 9 : index
    %c0_113 = arith.constant 0 : index
    %102 = vector.load %arg10[%c1_111, %c9_112, %c0_113] : memref<18x32x64xf32, #tpu.memory_space<vmem>>, vector<16x16x64xf32>
    %103 = vector.shape_cast %102 : vector<16x16x64xf32> to vector<256x64xf32>
    %c5_114 = arith.constant 5 : index
    %c0_115 = arith.constant 0 : index
    %c0_116 = arith.constant 0 : index
    %104 = vector.load %arg4[%c5_114, %c0_115, %c0_116] : memref<36x64x64xf32, #tpu.memory_space<vmem>>, vector<1x64x64xf32>
    %105 = vector.shape_cast %104 : vector<1x64x64xf32> to vector<64x64xf32>
    %cst_117 = arith.constant dense<0.000000e+00> : vector<256x64xf32>
    %106 = tpu.matmul %103, %105, %cst_117 {dimension_numbers = #tpu.dot_dimension_numbers<[1], [0], [0], [1], [0, 0, 1, 1], [], []>} : vector<256x64xf32>, vector<64x64xf32>, vector<256x64xf32> -> vector<256x64xf32>
    %107 = arith.addf %101, %106 : vector<256x64xf32>
    %c2_118 = arith.constant 2 : index
    %c7_119 = arith.constant 7 : index
    %c0_120 = arith.constant 0 : index
    %108 = vector.load %arg10[%c2_118, %c7_119, %c0_120] : memref<18x32x64xf32, #tpu.memory_space<vmem>>, vector<16x16x64xf32>
    %109 = vector.shape_cast %108 : vector<16x16x64xf32> to vector<256x64xf32>
    %c6_121 = arith.constant 6 : index
    %c0_122 = arith.constant 0 : index
    %c0_123 = arith.constant 0 : index
    %110 = vector.load %arg4[%c6_121, %c0_122, %c0_123] : memref<36x64x64xf32, #tpu.memory_space<vmem>>, vector<1x64x64xf32>
    %111 = vector.shape_cast %110 : vector<1x64x64xf32> to vector<64x64xf32>
    %cst_124 = arith.constant dense<0.000000e+00> : vector<256x64xf32>
    %112 = tpu.matmul %109, %111, %cst_124 {dimension_numbers = #tpu.dot_dimension_numbers<[1], [0], [0], [1], [0, 0, 1, 1], [], []>} : vector<256x64xf32>, vector<64x64xf32>, vector<256x64xf32> -> vector<256x64xf32>
    %113 = arith.addf %107, %112 : vector<256x64xf32>
    %c2_125 = arith.constant 2 : index
    %c8_126 = arith.constant 8 : index
    %c0_127 = arith.constant 0 : index
    %114 = vector.load %arg10[%c2_125, %c8_126, %c0_127] : memref<18x32x64xf32, #tpu.memory_space<vmem>>, vector<16x16x64xf32>
    %115 = vector.shape_cast %114 : vector<16x16x64xf32> to vector<256x64xf32>
    %c7_128 = arith.constant 7 : index
    %c0_129 = arith.constant 0 : index
    %c0_130 = arith.constant 0 : index
    %116 = vector.load %arg4[%c7_128, %c0_129, %c0_130] : memref<36x64x64xf32, #tpu.memory_space<vmem>>, vector<1x64x64xf32>
    %117 = vector.shape_cast %116 : vector<1x64x64xf32> to vector<64x64xf32>
    %cst_131 = arith.constant dense<0.000000e+00> : vector<256x64xf32>
    %118 = tpu.matmul %115, %117, %cst_131 {dimension_numbers = #tpu.dot_dimension_numbers<[1], [0], [0], [1], [0, 0, 1, 1], [], []>} : vector<256x64xf32>, vector<64x64xf32>, vector<256x64xf32> -> vector<256x64xf32>
    %119 = arith.addf %113, %118 : vector<256x64xf32>
    %c2_132 = arith.constant 2 : index
    %c9_133 = arith.constant 9 : index
    %c0_134 = arith.constant 0 : index
    %120 = vector.load %arg10[%c2_132, %c9_133, %c0_134] : memref<18x32x64xf32, #tpu.memory_space<vmem>>, vector<16x16x64xf32>
    %121 = vector.shape_cast %120 : vector<16x16x64xf32> to vector<256x64xf32>
    %c8_135 = arith.constant 8 : index
    %c0_136 = arith.constant 0 : index
    %c0_137 = arith.constant 0 : index
    %122 = vector.load %arg4[%c8_135, %c0_136, %c0_137] : memref<36x64x64xf32, #tpu.memory_space<vmem>>, vector<1x64x64xf32>
    %123 = vector.shape_cast %122 : vector<1x64x64xf32> to vector<64x64xf32>
    %cst_138 = arith.constant dense<0.000000e+00> : vector<256x64xf32>
    %124 = tpu.matmul %121, %123, %cst_138 {dimension_numbers = #tpu.dot_dimension_numbers<[1], [0], [0], [1], [0, 0, 1, 1], [], []>} : vector<256x64xf32>, vector<64x64xf32>, vector<256x64xf32> -> vector<256x64xf32>
    %125 = arith.addf %119, %124 : vector<256x64xf32>
    %cst_139 = arith.constant 0.000000e+00 : f32
    %126 = vector.broadcast %cst_139 : f32 to vector<256x64xf32>
    %127 = arith.maximumf %125, %126 : vector<256x64xf32>
    %128 = vector.shape_cast %127 : vector<256x64xf32> to vector<16x16x64xf32>
    %c1_140 = arith.constant 1 : index
    %c8_141 = arith.constant 8 : index
    %c0_142 = arith.constant 0 : index
    %129 = vector.load %arg10[%c1_140, %c8_141, %c0_142] : memref<18x32x64xf32, #tpu.memory_space<vmem>>, vector<16x16x64xf32>
    tpu.vector_store %arg10[%c1_140, %c8_141, %c0_142], %128 {strides = array<i32>} : memref<18x32x64xf32, #tpu.memory_space<vmem>>, vector<16x16x64xf32>,
    %c1_143 = arith.constant 1 : index
    %c0_144 = arith.constant 0 : index
    %c0_145 = arith.constant 0 : index
    %130 = vector.load %arg5[%c1_143, %c0_144, %c0_145] : memref<4x1x64xf32, #tpu.memory_space<vmem>>, vector<1x1x64xf32>
    %131 = vector.shape_cast %130 : vector<1x1x64xf32> to vector<1x64xf32>
    %132 = vector.shape_cast %131 : vector<1x64xf32> to vector<1x64xf32>
    %133 = vector.broadcast %132 : vector<1x64xf32> to vector<256x64xf32>
    %c0_146 = arith.constant 0 : index
    %c7_147 = arith.constant 7 : index
    %c0_148 = arith.constant 0 : index
    %134 = vector.load %arg10[%c0_146, %c7_147, %c0_148] : memref<18x32x64xf32, #tpu.memory_space<vmem>>, vector<16x16x64xf32>
    %135 = vector.shape_cast %134 : vector<16x16x64xf32> to vector<256x64xf32>
    %c9_149 = arith.constant 9 : index
    %c0_150 = arith.constant 0 : index
    %c0_151 = arith.constant 0 : index
    %136 = vector.load %arg4[%c9_149, %c0_150, %c0_151] : memref<36x64x64xf32, #tpu.memory_space<vmem>>, vector<1x64x64xf32>
    %137 = vector.shape_cast %136 : vector<1x64x64xf32> to vector<64x64xf32>
    %cst_152 = arith.constant dense<0.000000e+00> : vector<256x64xf32>
    %138 = tpu.matmul %135, %137, %cst_152 {dimension_numbers = #tpu.dot_dimension_numbers<[1], [0], [0], [1], [0, 0, 1, 1], [], []>} : vector<256x64xf32>, vector<64x64xf32>, vector<256x64xf32> -> vector<256x64xf32>
    %139 = arith.addf %133, %138 : vector<256x64xf32>
    %c0_153 = arith.constant 0 : index
    %c8_154 = arith.constant 8 : index
    %c0_155 = arith.constant 0 : index
    %140 = vector.load %arg10[%c0_153, %c8_154, %c0_155] : memref<18x32x64xf32, #tpu.memory_space<vmem>>, vector<16x16x64xf32>
    %141 = vector.shape_cast %140 : vector<16x16x64xf32> to vector<256x64xf32>
    %c10 = arith.constant 10 : index
    %c0_156 = arith.constant 0 : index
    %c0_157 = arith.constant 0 : index
    %142 = vector.load %arg4[%c10, %c0_156, %c0_157] : memref<36x64x64xf32, #tpu.memory_space<vmem>>, vector<1x64x64xf32>
    %143 = vector.shape_cast %142 : vector<1x64x64xf32> to vector<64x64xf32>
    %cst_158 = arith.constant dense<0.000000e+00> : vector<256x64xf32>
    %144 = tpu.matmul %141, %143, %cst_158 {dimension_numbers = #tpu.dot_dimension_numbers<[1], [0], [0], [1], [0, 0, 1, 1], [], []>} : vector<256x64xf32>, vector<64x64xf32>, vector<256x64xf32> -> vector<256x64xf32>
    %145 = arith.addf %139, %144 : vector<256x64xf32>
    %c0_159 = arith.constant 0 : index
    %c9_160 = arith.constant 9 : index
    %c0_161 = arith.constant 0 : index
    %146 = vector.load %arg10[%c0_159, %c9_160, %c0_161] : memref<18x32x64xf32, #tpu.memory_space<vmem>>, vector<16x16x64xf32>
    %147 = vector.shape_cast %146 : vector<16x16x64xf32> to vector<256x64xf32>
    %c11 = arith.constant 11 : index
    %c0_162 = arith.constant 0 : index
    %c0_163 = arith.constant 0 : index
    %148 = vector.load %arg4[%c11, %c0_162, %c0_163] : memref<36x64x64xf32, #tpu.memory_space<vmem>>, vector<1x64x64xf32>
    %149 = vector.shape_cast %148 : vector<1x64x64xf32> to vector<64x64xf32>
    %cst_164 = arith.constant dense<0.000000e+00> : vector<256x64xf32>
    %150 = tpu.matmul %147, %149, %cst_164 {dimension_numbers = #tpu.dot_dimension_numbers<[1], [0], [0], [1], [0, 0, 1, 1], [], []>} : vector<256x64xf32>, vector<64x64xf32>, vector<256x64xf32> -> vector<256x64xf32>
    %151 = arith.addf %145, %150 : vector<256x64xf32>
    %c1_165 = arith.constant 1 : index
    %c7_166 = arith.constant 7 : index
    %c0_167 = arith.constant 0 : index
    %152 = vector.load %arg10[%c1_165, %c7_166, %c0_167] : memref<18x32x64xf32, #tpu.memory_space<vmem>>, vector<16x16x64xf32>
    %153 = vector.shape_cast %152 : vector<16x16x64xf32> to vector<256x64xf32>
    %c12 = arith.constant 12 : index
    %c0_168 = arith.constant 0 : index
    %c0_169 = arith.constant 0 : index
    %154 = vector.load %arg4[%c12, %c0_168, %c0_169] : memref<36x64x64xf32, #tpu.memory_space<vmem>>, vector<1x64x64xf32>
    %155 = vector.shape_cast %154 : vector<1x64x64xf32> to vector<64x64xf32>
    %cst_170 = arith.constant dense<0.000000e+00> : vector<256x64xf32>
    %156 = tpu.matmul %153, %155, %cst_170 {dimension_numbers = #tpu.dot_dimension_numbers<[1], [0], [0], [1], [0, 0, 1, 1], [], []>} : vector<256x64xf32>, vector<64x64xf32>, vector<256x64xf32> -> vector<256x64xf32>
    %157 = arith.addf %151, %156 : vector<256x64xf32>
    %c1_171 = arith.constant 1 : index
    %c8_172 = arith.constant 8 : index
    %c0_173 = arith.constant 0 : index
    %158 = vector.load %arg10[%c1_171, %c8_172, %c0_173] : memref<18x32x64xf32, #tpu.memory_space<vmem>>, vector<16x16x64xf32>
    %159 = vector.shape_cast %158 : vector<16x16x64xf32> to vector<256x64xf32>
    %c13 = arith.constant 13 : index
    %c0_174 = arith.constant 0 : index
    %c0_175 = arith.constant 0 : index
    %160 = vector.load %arg4[%c13, %c0_174, %c0_175] : memref<36x64x64xf32, #tpu.memory_space<vmem>>, vector<1x64x64xf32>
    %161 = vector.shape_cast %160 : vector<1x64x64xf32> to vector<64x64xf32>
    %cst_176 = arith.constant dense<0.000000e+00> : vector<256x64xf32>
    %162 = tpu.matmul %159, %161, %cst_176 {dimension_numbers = #tpu.dot_dimension_numbers<[1], [0], [0], [1], [0, 0, 1, 1], [], []>} : vector<256x64xf32>, vector<64x64xf32>, vector<256x64xf32> -> vector<256x64xf32>
    %163 = arith.addf %157, %162 : vector<256x64xf32>
    %c1_177 = arith.constant 1 : index
    %c9_178 = arith.constant 9 : index
    %c0_179 = arith.constant 0 : index
    %164 = vector.load %arg10[%c1_177, %c9_178, %c0_179] : memref<18x32x64xf32, #tpu.memory_space<vmem>>, vector<16x16x64xf32>
    %165 = vector.shape_cast %164 : vector<16x16x64xf32> to vector<256x64xf32>
    %c14 = arith.constant 14 : index
    %c0_180 = arith.constant 0 : index
    %c0_181 = arith.constant 0 : index
    %166 = vector.load %arg4[%c14, %c0_180, %c0_181] : memref<36x64x64xf32, #tpu.memory_space<vmem>>, vector<1x64x64xf32>
    %167 = vector.shape_cast %166 : vector<1x64x64xf32> to vector<64x64xf32>
    %cst_182 = arith.constant dense<0.000000e+00> : vector<256x64xf32>
    %168 = tpu.matmul %165, %167, %cst_182 {dimension_numbers = #tpu.dot_dimension_numbers<[1], [0], [0], [1], [0, 0, 1, 1], [], []>} : vector<256x64xf32>, vector<64x64xf32>, vector<256x64xf32> -> vector<256x64xf32>
    %169 = arith.addf %163, %168 : vector<256x64xf32>
    %c2_183 = arith.constant 2 : index
    %c7_184 = arith.constant 7 : index
    %c0_185 = arith.constant 0 : index
    %170 = vector.load %arg10[%c2_183, %c7_184, %c0_185] : memref<18x32x64xf32, #tpu.memory_space<vmem>>, vector<16x16x64xf32>
    %171 = vector.shape_cast %170 : vector<16x16x64xf32> to vector<256x64xf32>
    %c15 = arith.constant 15 : index
    %c0_186 = arith.constant 0 : index
    %c0_187 = arith.constant 0 : index
    %172 = vector.load %arg4[%c15, %c0_186, %c0_187] : memref<36x64x64xf32, #tpu.memory_space<vmem>>, vector<1x64x64xf32>
    %173 = vector.shape_cast %172 : vector<1x64x64xf32> to vector<64x64xf32>
    %cst_188 = arith.constant dense<0.000000e+00> : vector<256x64xf32>
    %174 = tpu.matmul %171, %173, %cst_188 {dimension_numbers = #tpu.dot_dimension_numbers<[1], [0], [0], [1], [0, 0, 1, 1], [], []>} : vector<256x64xf32>, vector<64x64xf32>, vector<256x64xf32> -> vector<256x64xf32>
    %175 = arith.addf %169, %174 : vector<256x64xf32>
    %c2_189 = arith.constant 2 : index
    %c8_190 = arith.constant 8 : index
    %c0_191 = arith.constant 0 : index
    %176 = vector.load %arg10[%c2_189, %c8_190, %c0_191] : memref<18x32x64xf32, #tpu.memory_space<vmem>>, vector<16x16x64xf32>
    %177 = vector.shape_cast %176 : vector<16x16x64xf32> to vector<256x64xf32>
    %c16 = arith.constant 16 : index
    %c0_192 = arith.constant 0 : index
    %c0_193 = arith.constant 0 : index
    %178 = vector.load %arg4[%c16, %c0_192, %c0_193] : memref<36x64x64xf32, #tpu.memory_space<vmem>>, vector<1x64x64xf32>
    %179 = vector.shape_cast %178 : vector<1x64x64xf32> to vector<64x64xf32>
    %cst_194 = arith.constant dense<0.000000e+00> : vector<256x64xf32>
    %180 = tpu.matmul %177, %179, %cst_194 {dimension_numbers = #tpu.dot_dimension_numbers<[1], [0], [0], [1], [0, 0, 1, 1], [], []>} : vector<256x64xf32>, vector<64x64xf32>, vector<256x64xf32> -> vector<256x64xf32>
    %181 = arith.addf %175, %180 : vector<256x64xf32>
    %c2_195 = arith.constant 2 : index
    %c9_196 = arith.constant 9 : index
    %c0_197 = arith.constant 0 : index
    %182 = vector.load %arg10[%c2_195, %c9_196, %c0_197] : memref<18x32x64xf32, #tpu.memory_space<vmem>>, vector<16x16x64xf32>
    %183 = vector.shape_cast %182 : vector<16x16x64xf32> to vector<256x64xf32>
    %c17 = arith.constant 17 : index
    %c0_198 = arith.constant 0 : index
    %c0_199 = arith.constant 0 : index
    %184 = vector.load %arg4[%c17, %c0_198, %c0_199] : memref<36x64x64xf32, #tpu.memory_space<vmem>>, vector<1x64x64xf32>
    %185 = vector.shape_cast %184 : vector<1x64x64xf32> to vector<64x64xf32>
    %cst_200 = arith.constant dense<0.000000e+00> : vector<256x64xf32>
    %186 = tpu.matmul %183, %185, %cst_200 {dimension_numbers = #tpu.dot_dimension_numbers<[1], [0], [0], [1], [0, 0, 1, 1], [], []>} : vector<256x64xf32>, vector<64x64xf32>, vector<256x64xf32> -> vector<256x64xf32>
    %187 = arith.addf %181, %186 : vector<256x64xf32>
    %188 = arith.addf %65, %187 : vector<256x64xf32>
    %189 = vector.shape_cast %188 : vector<256x64xf32> to vector<16x16x64xf32>
    %c1_201 = arith.constant 1 : index
    %c8_202 = arith.constant 8 : index
    %c0_203 = arith.constant 0 : index
    %190 = vector.load %arg10[%c1_201, %c8_202, %c0_203] : memref<18x32x64xf32, #tpu.memory_space<vmem>>, vector<16x16x64xf32>
    tpu.vector_store %arg10[%c1_201, %c8_202, %c0_203], %189 {strides = array<i32>} : memref<18x32x64xf32, #tpu.memory_space<vmem>>, vector<16x16x64xf32>,
    %c2_204 = arith.constant 2 : index
    %c0_205 = arith.constant 0 : index
    %c0_206 = arith.constant 0 : index
    %191 = vector.load %arg5[%c2_204, %c0_205, %c0_206] : memref<4x1x64xf32, #tpu.memory_space<vmem>>, vector<1x1x64xf32>
    %192 = vector.shape_cast %191 : vector<1x1x64xf32> to vector<1x64xf32>
    %193 = vector.shape_cast %192 : vector<1x64xf32> to vector<1x64xf32>
    %194 = vector.broadcast %193 : vector<1x64xf32> to vector<256x64xf32>
    %c0_207 = arith.constant 0 : index
    %c7_208 = arith.constant 7 : index
    %c0_209 = arith.constant 0 : index
    %195 = vector.load %arg10[%c0_207, %c7_208, %c0_209] : memref<18x32x64xf32, #tpu.memory_space<vmem>>, vector<16x16x64xf32>
    %196 = vector.shape_cast %195 : vector<16x16x64xf32> to vector<256x64xf32>
    %c18 = arith.constant 18 : index
    %c0_210 = arith.constant 0 : index
    %c0_211 = arith.constant 0 : index
    %197 = vector.load %arg4[%c18, %c0_210, %c0_211] : memref<36x64x64xf32, #tpu.memory_space<vmem>>, vector<1x64x64xf32>
    %198 = vector.shape_cast %197 : vector<1x64x64xf32> to vector<64x64xf32>
    %cst_212 = arith.constant dense<0.000000e+00> : vector<256x64xf32>
    %199 = tpu.matmul %196, %198, %cst_212 {dimension_numbers = #tpu.dot_dimension_numbers<[1], [0], [0], [1], [0, 0, 1, 1], [], []>} : vector<256x64xf32>, vector<64x64xf32>, vector<256x64xf32> -> vector<256x64xf32>
    %200 = arith.addf %194, %199 : vector<256x64xf32>
    %c0_213 = arith.constant 0 : index
    %c8_214 = arith.constant 8 : index
    %c0_215 = arith.constant 0 : index
    %201 = vector.load %arg10[%c0_213, %c8_214, %c0_215] : memref<18x32x64xf32, #tpu.memory_space<vmem>>, vector<16x16x64xf32>
    %202 = vector.shape_cast %201 : vector<16x16x64xf32> to vector<256x64xf32>
    %c19 = arith.constant 19 : index
    %c0_216 = arith.constant 0 : index
    %c0_217 = arith.constant 0 : index
    %203 = vector.load %arg4[%c19, %c0_216, %c0_217] : memref<36x64x64xf32, #tpu.memory_space<vmem>>, vector<1x64x64xf32>
    %204 = vector.shape_cast %203 : vector<1x64x64xf32> to vector<64x64xf32>
    %cst_218 = arith.constant dense<0.000000e+00> : vector<256x64xf32>
    %205 = tpu.matmul %202, %204, %cst_218 {dimension_numbers = #tpu.dot_dimension_numbers<[1], [0], [0], [1], [0, 0, 1, 1], [], []>} : vector<256x64xf32>, vector<64x64xf32>, vector<256x64xf32> -> vector<256x64xf32>
    %206 = arith.addf %200, %205 : vector<256x64xf32>
    %c0_219 = arith.constant 0 : index
    %c9_220 = arith.constant 9 : index
    %c0_221 = arith.constant 0 : index
    %207 = vector.load %arg10[%c0_219, %c9_220, %c0_221] : memref<18x32x64xf32, #tpu.memory_space<vmem>>, vector<16x16x64xf32>
    %208 = vector.shape_cast %207 : vector<16x16x64xf32> to vector<256x64xf32>
    %c20 = arith.constant 20 : index
    %c0_222 = arith.constant 0 : index
    %c0_223 = arith.constant 0 : index
    %209 = vector.load %arg4[%c20, %c0_222, %c0_223] : memref<36x64x64xf32, #tpu.memory_space<vmem>>, vector<1x64x64xf32>
    %210 = vector.shape_cast %209 : vector<1x64x64xf32> to vector<64x64xf32>
    %cst_224 = arith.constant dense<0.000000e+00> : vector<256x64xf32>
    %211 = tpu.matmul %208, %210, %cst_224 {dimension_numbers = #tpu.dot_dimension_numbers<[1], [0], [0], [1], [0, 0, 1, 1], [], []>} : vector<256x64xf32>, vector<64x64xf32>, vector<256x64xf32> -> vector<256x64xf32>
    %212 = arith.addf %206, %211 : vector<256x64xf32>
    %c1_225 = arith.constant 1 : index
    %c7_226 = arith.constant 7 : index
    %c0_227 = arith.constant 0 : index
    %213 = vector.load %arg10[%c1_225, %c7_226, %c0_227] : memref<18x32x64xf32, #tpu.memory_space<vmem>>, vector<16x16x64xf32>
    %214 = vector.shape_cast %213 : vector<16x16x64xf32> to vector<256x64xf32>
    %c21 = arith.constant 21 : index
    %c0_228 = arith.constant 0 : index
    %c0_229 = arith.constant 0 : index
    %215 = vector.load %arg4[%c21, %c0_228, %c0_229] : memref<36x64x64xf32, #tpu.memory_space<vmem>>, vector<1x64x64xf32>
    %216 = vector.shape_cast %215 : vector<1x64x64xf32> to vector<64x64xf32>
    %cst_230 = arith.constant dense<0.000000e+00> : vector<256x64xf32>
    %217 = tpu.matmul %214, %216, %cst_230 {dimension_numbers = #tpu.dot_dimension_numbers<[1], [0], [0], [1], [0, 0, 1, 1], [], []>} : vector<256x64xf32>, vector<64x64xf32>, vector<256x64xf32> -> vector<256x64xf32>
    %218 = arith.addf %212, %217 : vector<256x64xf32>
    %c1_231 = arith.constant 1 : index
    %c8_232 = arith.constant 8 : index
    %c0_233 = arith.constant 0 : index
    %219 = vector.load %arg10[%c1_231, %c8_232, %c0_233] : memref<18x32x64xf32, #tpu.memory_space<vmem>>, vector<16x16x64xf32>
    %220 = vector.shape_cast %219 : vector<16x16x64xf32> to vector<256x64xf32>
    %c22 = arith.constant 22 : index
    %c0_234 = arith.constant 0 : index
    %c0_235 = arith.constant 0 : index
    %221 = vector.load %arg4[%c22, %c0_234, %c0_235] : memref<36x64x64xf32, #tpu.memory_space<vmem>>, vector<1x64x64xf32>
    %222 = vector.shape_cast %221 : vector<1x64x64xf32> to vector<64x64xf32>
    %cst_236 = arith.constant dense<0.000000e+00> : vector<256x64xf32>
    %223 = tpu.matmul %220, %222, %cst_236 {dimension_numbers = #tpu.dot_dimension_numbers<[1], [0], [0], [1], [0, 0, 1, 1], [], []>} : vector<256x64xf32>, vector<64x64xf32>, vector<256x64xf32> -> vector<256x64xf32>
    %224 = arith.addf %218, %223 : vector<256x64xf32>
    %c1_237 = arith.constant 1 : index
    %c9_238 = arith.constant 9 : index
    %c0_239 = arith.constant 0 : index
    %225 = vector.load %arg10[%c1_237, %c9_238, %c0_239] : memref<18x32x64xf32, #tpu.memory_space<vmem>>, vector<16x16x64xf32>
    %226 = vector.shape_cast %225 : vector<16x16x64xf32> to vector<256x64xf32>
    %c23 = arith.constant 23 : index
    %c0_240 = arith.constant 0 : index
    %c0_241 = arith.constant 0 : index
    %227 = vector.load %arg4[%c23, %c0_240, %c0_241] : memref<36x64x64xf32, #tpu.memory_space<vmem>>, vector<1x64x64xf32>
    %228 = vector.shape_cast %227 : vector<1x64x64xf32> to vector<64x64xf32>
    %cst_242 = arith.constant dense<0.000000e+00> : vector<256x64xf32>
    %229 = tpu.matmul %226, %228, %cst_242 {dimension_numbers = #tpu.dot_dimension_numbers<[1], [0], [0], [1], [0, 0, 1, 1], [], []>} : vector<256x64xf32>, vector<64x64xf32>, vector<256x64xf32> -> vector<256x64xf32>
    %230 = arith.addf %224, %229 : vector<256x64xf32>
    %c2_243 = arith.constant 2 : index
    %c7_244 = arith.constant 7 : index
    %c0_245 = arith.constant 0 : index
    %231 = vector.load %arg10[%c2_243, %c7_244, %c0_245] : memref<18x32x64xf32, #tpu.memory_space<vmem>>, vector<16x16x64xf32>
    %232 = vector.shape_cast %231 : vector<16x16x64xf32> to vector<256x64xf32>
    %c24 = arith.constant 24 : index
    %c0_246 = arith.constant 0 : index
    %c0_247 = arith.constant 0 : index
    %233 = vector.load %arg4[%c24, %c0_246, %c0_247] : memref<36x64x64xf32, #tpu.memory_space<vmem>>, vector<1x64x64xf32>
    %234 = vector.shape_cast %233 : vector<1x64x64xf32> to vector<64x64xf32>
    %cst_248 = arith.constant dense<0.000000e+00> : vector<256x64xf32>
    %235 = tpu.matmul %232, %234, %cst_248 {dimension_numbers = #tpu.dot_dimension_numbers<[1], [0], [0], [1], [0, 0, 1, 1], [], []>} : vector<256x64xf32>, vector<64x64xf32>, vector<256x64xf32> -> vector<256x64xf32>
    %236 = arith.addf %230, %235 : vector<256x64xf32>
    %c2_249 = arith.constant 2 : index
    %c8_250 = arith.constant 8 : index
    %c0_251 = arith.constant 0 : index
    %237 = vector.load %arg10[%c2_249, %c8_250, %c0_251] : memref<18x32x64xf32, #tpu.memory_space<vmem>>, vector<16x16x64xf32>
    %238 = vector.shape_cast %237 : vector<16x16x64xf32> to vector<256x64xf32>
    %c25 = arith.constant 25 : index
    %c0_252 = arith.constant 0 : index
    %c0_253 = arith.constant 0 : index
    %239 = vector.load %arg4[%c25, %c0_252, %c0_253] : memref<36x64x64xf32, #tpu.memory_space<vmem>>, vector<1x64x64xf32>
    %240 = vector.shape_cast %239 : vector<1x64x64xf32> to vector<64x64xf32>
    %cst_254 = arith.constant dense<0.000000e+00> : vector<256x64xf32>
    %241 = tpu.matmul %238, %240, %cst_254 {dimension_numbers = #tpu.dot_dimension_numbers<[1], [0], [0], [1], [0, 0, 1, 1], [], []>} : vector<256x64xf32>, vector<64x64xf32>, vector<256x64xf32> -> vector<256x64xf32>
    %242 = arith.addf %236, %241 : vector<256x64xf32>
    %c2_255 = arith.constant 2 : index
    %c9_256 = arith.constant 9 : index
    %c0_257 = arith.constant 0 : index
    %243 = vector.load %arg10[%c2_255, %c9_256, %c0_257] : memref<18x32x64xf32, #tpu.memory_space<vmem>>, vector<16x16x64xf32>
    %244 = vector.shape_cast %243 : vector<16x16x64xf32> to vector<256x64xf32>
    %c26 = arith.constant 26 : index
    %c0_258 = arith.constant 0 : index
    %c0_259 = arith.constant 0 : index
    %245 = vector.load %arg4[%c26, %c0_258, %c0_259] : memref<36x64x64xf32, #tpu.memory_space<vmem>>, vector<1x64x64xf32>
    %246 = vector.shape_cast %245 : vector<1x64x64xf32> to vector<64x64xf32>
    %cst_260 = arith.constant dense<0.000000e+00> : vector<256x64xf32>
    %247 = tpu.matmul %244, %246, %cst_260 {dimension_numbers = #tpu.dot_dimension_numbers<[1], [0], [0], [1], [0, 0, 1, 1], [], []>} : vector<256x64xf32>, vector<64x64xf32>, vector<256x64xf32> -> vector<256x64xf32>
    %248 = arith.addf %242, %247 : vector<256x64xf32>
    %cst_261 = arith.constant 0.000000e+00 : f32
    %249 = vector.broadcast %cst_261 : f32 to vector<256x64xf32>
    %250 = arith.maximumf %248, %249 : vector<256x64xf32>
    %251 = vector.shape_cast %250 : vector<256x64xf32> to vector<16x16x64xf32>
    %c1_262 = arith.constant 1 : index
    %c8_263 = arith.constant 8 : index
    %c0_264 = arith.constant 0 : index
    %252 = vector.load %arg10[%c1_262, %c8_263, %c0_264] : memref<18x32x64xf32, #tpu.memory_space<vmem>>, vector<16x16x64xf32>
    tpu.vector_store %arg10[%c1_262, %c8_263, %c0_264], %251 {strides = array<i32>} : memref<18x32x64xf32, #tpu.memory_space<vmem>>, vector<16x16x64xf32>,
    %c3_265 = arith.constant 3 : index
    %c0_266 = arith.constant 0 : index
    %c0_267 = arith.constant 0 : index
    %253 = vector.load %arg5[%c3_265, %c0_266, %c0_267] : memref<4x1x64xf32, #tpu.memory_space<vmem>>, vector<1x1x64xf32>
    %254 = vector.shape_cast %253 : vector<1x1x64xf32> to vector<1x64xf32>
    %255 = vector.shape_cast %254 : vector<1x64xf32> to vector<1x64xf32>
    %256 = vector.broadcast %255 : vector<1x64xf32> to vector<256x64xf32>
    %c0_268 = arith.constant 0 : index
    %c7_269 = arith.constant 7 : index
    %c0_270 = arith.constant 0 : index
    %257 = vector.load %arg10[%c0_268, %c7_269, %c0_270] : memref<18x32x64xf32, #tpu.memory_space<vmem>>, vector<16x16x64xf32>
    %258 = vector.shape_cast %257 : vector<16x16x64xf32> to vector<256x64xf32>
    %c27 = arith.constant 27 : index
    %c0_271 = arith.constant 0 : index
    %c0_272 = arith.constant 0 : index
    %259 = vector.load %arg4[%c27, %c0_271, %c0_272] : memref<36x64x64xf32, #tpu.memory_space<vmem>>, vector<1x64x64xf32>
    %260 = vector.shape_cast %259 : vector<1x64x64xf32> to vector<64x64xf32>
    %cst_273 = arith.constant dense<0.000000e+00> : vector<256x64xf32>
    %261 = tpu.matmul %258, %260, %cst_273 {dimension_numbers = #tpu.dot_dimension_numbers<[1], [0], [0], [1], [0, 0, 1, 1], [], []>} : vector<256x64xf32>, vector<64x64xf32>, vector<256x64xf32> -> vector<256x64xf32>
    %262 = arith.addf %256, %261 : vector<256x64xf32>
    %c0_274 = arith.constant 0 : index
    %c8_275 = arith.constant 8 : index
    %c0_276 = arith.constant 0 : index
    %263 = vector.load %arg10[%c0_274, %c8_275, %c0_276] : memref<18x32x64xf32, #tpu.memory_space<vmem>>, vector<16x16x64xf32>
    %264 = vector.shape_cast %263 : vector<16x16x64xf32> to vector<256x64xf32>
    %c28 = arith.constant 28 : index
    %c0_277 = arith.constant 0 : index
    %c0_278 = arith.constant 0 : index
    %265 = vector.load %arg4[%c28, %c0_277, %c0_278] : memref<36x64x64xf32, #tpu.memory_space<vmem>>, vector<1x64x64xf32>
    %266 = vector.shape_cast %265 : vector<1x64x64xf32> to vector<64x64xf32>
    %cst_279 = arith.constant dense<0.000000e+00> : vector<256x64xf32>
    %267 = tpu.matmul %264, %266, %cst_279 {dimension_numbers = #tpu.dot_dimension_numbers<[1], [0], [0], [1], [0, 0, 1, 1], [], []>} : vector<256x64xf32>, vector<64x64xf32>, vector<256x64xf32> -> vector<256x64xf32>
    %268 = arith.addf %262, %267 : vector<256x64xf32>
    %c0_280 = arith.constant 0 : index
    %c9_281 = arith.constant 9 : index
    %c0_282 = arith.constant 0 : index
    %269 = vector.load %arg10[%c0_280, %c9_281, %c0_282] : memref<18x32x64xf32, #tpu.memory_space<vmem>>, vector<16x16x64xf32>
    %270 = vector.shape_cast %269 : vector<16x16x64xf32> to vector<256x64xf32>
    %c29 = arith.constant 29 : index
    %c0_283 = arith.constant 0 : index
    %c0_284 = arith.constant 0 : index
    %271 = vector.load %arg4[%c29, %c0_283, %c0_284] : memref<36x64x64xf32, #tpu.memory_space<vmem>>, vector<1x64x64xf32>
    %272 = vector.shape_cast %271 : vector<1x64x64xf32> to vector<64x64xf32>
    %cst_285 = arith.constant dense<0.000000e+00> : vector<256x64xf32>
    %273 = tpu.matmul %270, %272, %cst_285 {dimension_numbers = #tpu.dot_dimension_numbers<[1], [0], [0], [1], [0, 0, 1, 1], [], []>} : vector<256x64xf32>, vector<64x64xf32>, vector<256x64xf32> -> vector<256x64xf32>
    %274 = arith.addf %268, %273 : vector<256x64xf32>
    %c1_286 = arith.constant 1 : index
    %c7_287 = arith.constant 7 : index
    %c0_288 = arith.constant 0 : index
    %275 = vector.load %arg10[%c1_286, %c7_287, %c0_288] : memref<18x32x64xf32, #tpu.memory_space<vmem>>, vector<16x16x64xf32>
    %276 = vector.shape_cast %275 : vector<16x16x64xf32> to vector<256x64xf32>
    %c30 = arith.constant 30 : index
    %c0_289 = arith.constant 0 : index
    %c0_290 = arith.constant 0 : index
    %277 = vector.load %arg4[%c30, %c0_289, %c0_290] : memref<36x64x64xf32, #tpu.memory_space<vmem>>, vector<1x64x64xf32>
    %278 = vector.shape_cast %277 : vector<1x64x64xf32> to vector<64x64xf32>
    %cst_291 = arith.constant dense<0.000000e+00> : vector<256x64xf32>
    %279 = tpu.matmul %276, %278, %cst_291 {dimension_numbers = #tpu.dot_dimension_numbers<[1], [0], [0], [1], [0, 0, 1, 1], [], []>} : vector<256x64xf32>, vector<64x64xf32>, vector<256x64xf32> -> vector<256x64xf32>
    %280 = arith.addf %274, %279 : vector<256x64xf32>
    %c1_292 = arith.constant 1 : index
    %c8_293 = arith.constant 8 : index
    %c0_294 = arith.constant 0 : index
    %281 = vector.load %arg10[%c1_292, %c8_293, %c0_294] : memref<18x32x64xf32, #tpu.memory_space<vmem>>, vector<16x16x64xf32>
    %282 = vector.shape_cast %281 : vector<16x16x64xf32> to vector<256x64xf32>
    %c31 = arith.constant 31 : index
    %c0_295 = arith.constant 0 : index
    %c0_296 = arith.constant 0 : index
    %283 = vector.load %arg4[%c31, %c0_295, %c0_296] : memref<36x64x64xf32, #tpu.memory_space<vmem>>, vector<1x64x64xf32>
    %284 = vector.shape_cast %283 : vector<1x64x64xf32> to vector<64x64xf32>
    %cst_297 = arith.constant dense<0.000000e+00> : vector<256x64xf32>
    %285 = tpu.matmul %282, %284, %cst_297 {dimension_numbers = #tpu.dot_dimension_numbers<[1], [0], [0], [1], [0, 0, 1, 1], [], []>} : vector<256x64xf32>, vector<64x64xf32>, vector<256x64xf32> -> vector<256x64xf32>
    %286 = arith.addf %280, %285 : vector<256x64xf32>
    %c1_298 = arith.constant 1 : index
    %c9_299 = arith.constant 9 : index
    %c0_300 = arith.constant 0 : index
    %287 = vector.load %arg10[%c1_298, %c9_299, %c0_300] : memref<18x32x64xf32, #tpu.memory_space<vmem>>, vector<16x16x64xf32>
    %288 = vector.shape_cast %287 : vector<16x16x64xf32> to vector<256x64xf32>
    %c32 = arith.constant 32 : index
    %c0_301 = arith.constant 0 : index
    %c0_302 = arith.constant 0 : index
    %289 = vector.load %arg4[%c32, %c0_301, %c0_302] : memref<36x64x64xf32, #tpu.memory_space<vmem>>, vector<1x64x64xf32>
    %290 = vector.shape_cast %289 : vector<1x64x64xf32> to vector<64x64xf32>
    %cst_303 = arith.constant dense<0.000000e+00> : vector<256x64xf32>
    %291 = tpu.matmul %288, %290, %cst_303 {dimension_numbers = #tpu.dot_dimension_numbers<[1], [0], [0], [1], [0, 0, 1, 1], [], []>} : vector<256x64xf32>, vector<64x64xf32>, vector<256x64xf32> -> vector<256x64xf32>
    %292 = arith.addf %286, %291 : vector<256x64xf32>
    %c2_304 = arith.constant 2 : index
    %c7_305 = arith.constant 7 : index
    %c0_306 = arith.constant 0 : index
    %293 = vector.load %arg10[%c2_304, %c7_305, %c0_306] : memref<18x32x64xf32, #tpu.memory_space<vmem>>, vector<16x16x64xf32>
    %294 = vector.shape_cast %293 : vector<16x16x64xf32> to vector<256x64xf32>
    %c33 = arith.constant 33 : index
    %c0_307 = arith.constant 0 : index
    %c0_308 = arith.constant 0 : index
    %295 = vector.load %arg4[%c33, %c0_307, %c0_308] : memref<36x64x64xf32, #tpu.memory_space<vmem>>, vector<1x64x64xf32>
    %296 = vector.shape_cast %295 : vector<1x64x64xf32> to vector<64x64xf32>
    %cst_309 = arith.constant dense<0.000000e+00> : vector<256x64xf32>
    %297 = tpu.matmul %294, %296, %cst_309 {dimension_numbers = #tpu.dot_dimension_numbers<[1], [0], [0], [1], [0, 0, 1, 1], [], []>} : vector<256x64xf32>, vector<64x64xf32>, vector<256x64xf32> -> vector<256x64xf32>
    %298 = arith.addf %292, %297 : vector<256x64xf32>
    %c2_310 = arith.constant 2 : index
    %c8_311 = arith.constant 8 : index
    %c0_312 = arith.constant 0 : index
    %299 = vector.load %arg10[%c2_310, %c8_311, %c0_312] : memref<18x32x64xf32, #tpu.memory_space<vmem>>, vector<16x16x64xf32>
    %300 = vector.shape_cast %299 : vector<16x16x64xf32> to vector<256x64xf32>
    %c34 = arith.constant 34 : index
    %c0_313 = arith.constant 0 : index
    %c0_314 = arith.constant 0 : index
    %301 = vector.load %arg4[%c34, %c0_313, %c0_314] : memref<36x64x64xf32, #tpu.memory_space<vmem>>, vector<1x64x64xf32>
    %302 = vector.shape_cast %301 : vector<1x64x64xf32> to vector<64x64xf32>
    %cst_315 = arith.constant dense<0.000000e+00> : vector<256x64xf32>
    %303 = tpu.matmul %300, %302, %cst_315 {dimension_numbers = #tpu.dot_dimension_numbers<[1], [0], [0], [1], [0, 0, 1, 1], [], []>} : vector<256x64xf32>, vector<64x64xf32>, vector<256x64xf32> -> vector<256x64xf32>
    %304 = arith.addf %298, %303 : vector<256x64xf32>
    %c2_316 = arith.constant 2 : index
    %c9_317 = arith.constant 9 : index
    %c0_318 = arith.constant 0 : index
    %305 = vector.load %arg10[%c2_316, %c9_317, %c0_318] : memref<18x32x64xf32, #tpu.memory_space<vmem>>, vector<16x16x64xf32>
    %306 = vector.shape_cast %305 : vector<16x16x64xf32> to vector<256x64xf32>
    %c35 = arith.constant 35 : index
    %c0_319 = arith.constant 0 : index
    %c0_320 = arith.constant 0 : index
    %307 = vector.load %arg4[%c35, %c0_319, %c0_320] : memref<36x64x64xf32, #tpu.memory_space<vmem>>, vector<1x64x64xf32>
    %308 = vector.shape_cast %307 : vector<1x64x64xf32> to vector<64x64xf32>
    %cst_321 = arith.constant dense<0.000000e+00> : vector<256x64xf32>
    %309 = tpu.matmul %306, %308, %cst_321 {dimension_numbers = #tpu.dot_dimension_numbers<[1], [0], [0], [1], [0, 0, 1, 1], [], []>} : vector<256x64xf32>, vector<64x64xf32>, vector<256x64xf32> -> vector<256x64xf32>
    %310 = arith.addf %304, %309 : vector<256x64xf32>
    %311 = arith.addf %188, %310 : vector<256x64xf32>
    %312 = vector.shape_cast %311 : vector<256x64xf32> to vector<16x16x64xf32>
    %c1_322 = arith.constant 1 : index
    %c8_323 = arith.constant 8 : index
    %c0_324 = arith.constant 0 : index
    %313 = vector.load %arg10[%c1_322, %c8_323, %c0_324] : memref<18x32x64xf32, #tpu.memory_space<vmem>>, vector<16x16x64xf32>
    tpu.vector_store %arg10[%c1_322, %c8_323, %c0_324], %312 {strides = array<i32>} : memref<18x32x64xf32, #tpu.memory_space<vmem>>, vector<16x16x64xf32>,
    %c0_325 = arith.constant 0 : index
    %c0_326 = arith.constant 0 : index
    %314 = vector.load %arg7[%c0_325, %c0_326] : memref<1x4xf32, #tpu.memory_space<vmem>>, vector<1x4xf32>
    %315 = vector.shape_cast %314 : vector<1x4xf32> to vector<1x4xf32>
    %316 = vector.broadcast %315 : vector<1x4xf32> to vector<256x4xf32>
    %c0_327 = arith.constant 0 : index
    %c7_328 = arith.constant 7 : index
    %c0_329 = arith.constant 0 : index
    %317 = vector.load %arg10[%c0_327, %c7_328, %c0_329] : memref<18x32x64xf32, #tpu.memory_space<vmem>>, vector<16x16x64xf32>
    %318 = vector.shape_cast %317 : vector<16x16x64xf32> to vector<256x64xf32>
    %c0_330 = arith.constant 0 : index
    %c0_331 = arith.constant 0 : index
    %c0_332 = arith.constant 0 : index
    %319 = vector.load %arg6[%c0_330, %c0_331, %c0_332] : memref<9x64x4xf32, #tpu.memory_space<vmem>>, vector<1x64x4xf32>
    %320 = vector.shape_cast %319 : vector<1x64x4xf32> to vector<64x4xf32>
    %cst_333 = arith.constant dense<0.000000e+00> : vector<256x4xf32>
    %321 = tpu.matmul %318, %320, %cst_333 {dimension_numbers = #tpu.dot_dimension_numbers<[1], [0], [0], [1], [0, 0, 1, 1], [], []>} : vector<256x64xf32>, vector<64x4xf32>, vector<256x4xf32> -> vector<256x4xf32>
    %322 = arith.addf %316, %321 : vector<256x4xf32>
    %c0_334 = arith.constant 0 : index
    %c8_335 = arith.constant 8 : index
    %c0_336 = arith.constant 0 : index
    %323 = vector.load %arg10[%c0_334, %c8_335, %c0_336] : memref<18x32x64xf32, #tpu.memory_space<vmem>>, vector<16x16x64xf32>
    %324 = vector.shape_cast %323 : vector<16x16x64xf32> to vector<256x64xf32>
    %c1_337 = arith.constant 1 : index
    %c0_338 = arith.constant 0 : index
    %c0_339 = arith.constant 0 : index
    %325 = vector.load %arg6[%c1_337, %c0_338, %c0_339] : memref<9x64x4xf32, #tpu.memory_space<vmem>>, vector<1x64x4xf32>
    %326 = vector.shape_cast %325 : vector<1x64x4xf32> to vector<64x4xf32>
    %cst_340 = arith.constant dense<0.000000e+00> : vector<256x4xf32>
    %327 = tpu.matmul %324, %326, %cst_340 {dimension_numbers = #tpu.dot_dimension_numbers<[1], [0], [0], [1], [0, 0, 1, 1], [], []>} : vector<256x64xf32>, vector<64x4xf32>, vector<256x4xf32> -> vector<256x4xf32>
    %328 = arith.addf %322, %327 : vector<256x4xf32>
    %c0_341 = arith.constant 0 : index
    %c9_342 = arith.constant 9 : index
    %c0_343 = arith.constant 0 : index
    %329 = vector.load %arg10[%c0_341, %c9_342, %c0_343] : memref<18x32x64xf32, #tpu.memory_space<vmem>>, vector<16x16x64xf32>
    %330 = vector.shape_cast %329 : vector<16x16x64xf32> to vector<256x64xf32>
    %c2_344 = arith.constant 2 : index
    %c0_345 = arith.constant 0 : index
    %c0_346 = arith.constant 0 : index
    %331 = vector.load %arg6[%c2_344, %c0_345, %c0_346] : memref<9x64x4xf32, #tpu.memory_space<vmem>>, vector<1x64x4xf32>
    %332 = vector.shape_cast %331 : vector<1x64x4xf32> to vector<64x4xf32>
    %cst_347 = arith.constant dense<0.000000e+00> : vector<256x4xf32>
    %333 = tpu.matmul %330, %332, %cst_347 {dimension_numbers = #tpu.dot_dimension_numbers<[1], [0], [0], [1], [0, 0, 1, 1], [], []>} : vector<256x64xf32>, vector<64x4xf32>, vector<256x4xf32> -> vector<256x4xf32>
    %334 = arith.addf %328, %333 : vector<256x4xf32>
    %c1_348 = arith.constant 1 : index
    %c7_349 = arith.constant 7 : index
    %c0_350 = arith.constant 0 : index
    %335 = vector.load %arg10[%c1_348, %c7_349, %c0_350] : memref<18x32x64xf32, #tpu.memory_space<vmem>>, vector<16x16x64xf32>
    %336 = vector.shape_cast %335 : vector<16x16x64xf32> to vector<256x64xf32>
    %c3_351 = arith.constant 3 : index
    %c0_352 = arith.constant 0 : index
    %c0_353 = arith.constant 0 : index
    %337 = vector.load %arg6[%c3_351, %c0_352, %c0_353] : memref<9x64x4xf32, #tpu.memory_space<vmem>>, vector<1x64x4xf32>
    %338 = vector.shape_cast %337 : vector<1x64x4xf32> to vector<64x4xf32>
    %cst_354 = arith.constant dense<0.000000e+00> : vector<256x4xf32>
    %339 = tpu.matmul %336, %338, %cst_354 {dimension_numbers = #tpu.dot_dimension_numbers<[1], [0], [0], [1], [0, 0, 1, 1], [], []>} : vector<256x64xf32>, vector<64x4xf32>, vector<256x4xf32> -> vector<256x4xf32>
    %340 = arith.addf %334, %339 : vector<256x4xf32>
    %c1_355 = arith.constant 1 : index
    %c8_356 = arith.constant 8 : index
    %c0_357 = arith.constant 0 : index
    %341 = vector.load %arg10[%c1_355, %c8_356, %c0_357] : memref<18x32x64xf32, #tpu.memory_space<vmem>>, vector<16x16x64xf32>
    %342 = vector.shape_cast %341 : vector<16x16x64xf32> to vector<256x64xf32>
    %c4_358 = arith.constant 4 : index
    %c0_359 = arith.constant 0 : index
    %c0_360 = arith.constant 0 : index
    %343 = vector.load %arg6[%c4_358, %c0_359, %c0_360] : memref<9x64x4xf32, #tpu.memory_space<vmem>>, vector<1x64x4xf32>
    %344 = vector.shape_cast %343 : vector<1x64x4xf32> to vector<64x4xf32>
    %cst_361 = arith.constant dense<0.000000e+00> : vector<256x4xf32>
    %345 = tpu.matmul %342, %344, %cst_361 {dimension_numbers = #tpu.dot_dimension_numbers<[1], [0], [0], [1], [0, 0, 1, 1], [], []>} : vector<256x64xf32>, vector<64x4xf32>, vector<256x4xf32> -> vector<256x4xf32>
    %346 = arith.addf %340, %345 : vector<256x4xf32>
    %c1_362 = arith.constant 1 : index
    %c9_363 = arith.constant 9 : index
    %c0_364 = arith.constant 0 : index
    %347 = vector.load %arg10[%c1_362, %c9_363, %c0_364] : memref<18x32x64xf32, #tpu.memory_space<vmem>>, vector<16x16x64xf32>
    %348 = vector.shape_cast %347 : vector<16x16x64xf32> to vector<256x64xf32>
    %c5_365 = arith.constant 5 : index
    %c0_366 = arith.constant 0 : index
    %c0_367 = arith.constant 0 : index
    %349 = vector.load %arg6[%c5_365, %c0_366, %c0_367] : memref<9x64x4xf32, #tpu.memory_space<vmem>>, vector<1x64x4xf32>
    %350 = vector.shape_cast %349 : vector<1x64x4xf32> to vector<64x4xf32>
    %cst_368 = arith.constant dense<0.000000e+00> : vector<256x4xf32>
    %351 = tpu.matmul %348, %350, %cst_368 {dimension_numbers = #tpu.dot_dimension_numbers<[1], [0], [0], [1], [0, 0, 1, 1], [], []>} : vector<256x64xf32>, vector<64x4xf32>, vector<256x4xf32> -> vector<256x4xf32>
    %352 = arith.addf %346, %351 : vector<256x4xf32>
    %c2_369 = arith.constant 2 : index
    %c7_370 = arith.constant 7 : index
    %c0_371 = arith.constant 0 : index
    %353 = vector.load %arg10[%c2_369, %c7_370, %c0_371] : memref<18x32x64xf32, #tpu.memory_space<vmem>>, vector<16x16x64xf32>
    %354 = vector.shape_cast %353 : vector<16x16x64xf32> to vector<256x64xf32>
    %c6_372 = arith.constant 6 : index
    %c0_373 = arith.constant 0 : index
    %c0_374 = arith.constant 0 : index
    %355 = vector.load %arg6[%c6_372, %c0_373, %c0_374] : memref<9x64x4xf32, #tpu.memory_space<vmem>>, vector<1x64x4xf32>
    %356 = vector.shape_cast %355 : vector<1x64x4xf32> to vector<64x4xf32>
    %cst_375 = arith.constant dense<0.000000e+00> : vector<256x4xf32>
    %357 = tpu.matmul %354, %356, %cst_375 {dimension_numbers = #tpu.dot_dimension_numbers<[1], [0], [0], [1], [0, 0, 1, 1], [], []>} : vector<256x64xf32>, vector<64x4xf32>, vector<256x4xf32> -> vector<256x4xf32>
    %358 = arith.addf %352, %357 : vector<256x4xf32>
    %c2_376 = arith.constant 2 : index
    %c8_377 = arith.constant 8 : index
    %c0_378 = arith.constant 0 : index
    %359 = vector.load %arg10[%c2_376, %c8_377, %c0_378] : memref<18x32x64xf32, #tpu.memory_space<vmem>>, vector<16x16x64xf32>
    %360 = vector.shape_cast %359 : vector<16x16x64xf32> to vector<256x64xf32>
    %c7_379 = arith.constant 7 : index
    %c0_380 = arith.constant 0 : index
    %c0_381 = arith.constant 0 : index
    %361 = vector.load %arg6[%c7_379, %c0_380, %c0_381] : memref<9x64x4xf32, #tpu.memory_space<vmem>>, vector<1x64x4xf32>
    %362 = vector.shape_cast %361 : vector<1x64x4xf32> to vector<64x4xf32>
    %cst_382 = arith.constant dense<0.000000e+00> : vector<256x4xf32>
    %363 = tpu.matmul %360, %362, %cst_382 {dimension_numbers = #tpu.dot_dimension_numbers<[1], [0], [0], [1], [0, 0, 1, 1], [], []>} : vector<256x64xf32>, vector<64x4xf32>, vector<256x4xf32> -> vector<256x4xf32>
    %364 = arith.addf %358, %363 : vector<256x4xf32>
    %c2_383 = arith.constant 2 : index
    %c9_384 = arith.constant 9 : index
    %c0_385 = arith.constant 0 : index
    %365 = vector.load %arg10[%c2_383, %c9_384, %c0_385] : memref<18x32x64xf32, #tpu.memory_space<vmem>>, vector<16x16x64xf32>
    %366 = vector.shape_cast %365 : vector<16x16x64xf32> to vector<256x64xf32>
    %c8_386 = arith.constant 8 : index
    %c0_387 = arith.constant 0 : index
    %c0_388 = arith.constant 0 : index
    %367 = vector.load %arg6[%c8_386, %c0_387, %c0_388] : memref<9x64x4xf32, #tpu.memory_space<vmem>>, vector<1x64x4xf32>
    %368 = vector.shape_cast %367 : vector<1x64x4xf32> to vector<64x4xf32>
    %cst_389 = arith.constant dense<0.000000e+00> : vector<256x4xf32>
    %369 = tpu.matmul %366, %368, %cst_389 {dimension_numbers = #tpu.dot_dimension_numbers<[1], [0], [0], [1], [0, 0, 1, 1], [], []>} : vector<256x64xf32>, vector<64x4xf32>, vector<256x4xf32> -> vector<256x4xf32>
    %370 = arith.addf %364, %369 : vector<256x4xf32>
    %371 = math.tanh %370 : vector<256x4xf32>
    %372 = vector.shape_cast %371 : vector<256x4xf32> to vector<16x16x4xf32>
    %c0_390 = arith.constant 0 : index
    %c0_391 = arith.constant 0 : index
    %c0_392 = arith.constant 0 : index
    %c0_393 = arith.constant 0 : index
    %373 = vector.load %arg8[%c0_390, %c0_391, %c0_392, %c0_393] : memref<1x16x16x4xf32, #tpu.memory_space<vmem>>, vector<1x16x16x4xf32>
    %374 = vector.shape_cast %373 : vector<1x16x16x4xf32> to vector<16x16x4xf32>
    %375 = vector.shape_cast %372 : vector<16x16x4xf32> to vector<1x16x16x4xf32>
    tpu.vector_store %arg8[%c0_390, %c0_391, %c0_392, %c0_393], %375 {strides = array<i32>} : memref<1x16x16x4xf32, #tpu.memory_space<vmem>>, vector<1x16x16x4xf32>,
    return
  }
  func.func @transform_0(%arg0: i32) -> (i32, i32, i32, i32) {
    %c0_i32 = arith.constant 0 : i32
    %c0_i32_0 = arith.constant 0 : i32
    %c0_i32_1 = arith.constant 0 : i32
    %c0_i32_2 = arith.constant 0 : i32
    return %arg0, %c0_i32, %c0_i32_0, %c0_i32_1 : i32, i32, i32, i32
  }
  func.func @transform_1(%arg0: i32) -> (i32, i32, i32) {
    %c0_i32 = arith.constant 0 : i32
    %c0_i32_0 = arith.constant 0 : i32
    %c0_i32_1 = arith.constant 0 : i32
    %c0_i32_2 = arith.constant 0 : i32
    return %c0_i32, %c0_i32_0, %c0_i32_1 : i32, i32, i32
  }
  func.func @transform_2(%arg0: i32) -> (i32, i32) {
    %c0_i32 = arith.constant 0 : i32
    %c0_i32_0 = arith.constant 0 : i32
    %c0_i32_1 = arith.constant 0 : i32
    return %c0_i32, %c0_i32_0 : i32, i32
  }
  func.func @transform_3(%arg0: i32) -> (i32, i32, i32) {
    %c0_i32 = arith.constant 0 : i32
    %c0_i32_0 = arith.constant 0 : i32
    %c0_i32_1 = arith.constant 0 : i32
    %c0_i32_2 = arith.constant 0 : i32
    return %c0_i32, %c0_i32_0, %c0_i32_1 : i32, i32, i32
  }
  func.func @transform_4(%arg0: i32) -> (i32, i32, i32) {
    %c0_i32 = arith.constant 0 : i32
    %c0_i32_0 = arith.constant 0 : i32
    %c0_i32_1 = arith.constant 0 : i32
    %c0_i32_2 = arith.constant 0 : i32
    return %c0_i32, %c0_i32_0, %c0_i32_1 : i32, i32, i32
  }
  func.func @transform_5(%arg0: i32) -> (i32, i32, i32) {
    %c0_i32 = arith.constant 0 : i32
    %c0_i32_0 = arith.constant 0 : i32
    %c0_i32_1 = arith.constant 0 : i32
    %c0_i32_2 = arith.constant 0 : i32
    return %c0_i32, %c0_i32_0, %c0_i32_1 : i32, i32, i32
  }
  func.func @transform_6(%arg0: i32) -> (i32, i32) {
    %c0_i32 = arith.constant 0 : i32
    %c0_i32_0 = arith.constant 0 : i32
    %c0_i32_1 = arith.constant 0 : i32
    return %c0_i32, %c0_i32_0 : i32, i32
  }
  func.func @transform_7(%arg0: i32) -> (i32, i32, i32, i32) {
    %c0_i32 = arith.constant 0 : i32
    %c0_i32_0 = arith.constant 0 : i32
    %c0_i32_1 = arith.constant 0 : i32
    %c0_i32_2 = arith.constant 0 : i32
    return %arg0, %c0_i32, %c0_i32_0, %c0_i32_1 : i32, i32, i32, i32
  }
}

</mosaic_0001>

<bundles_post_ra>
// kernel: tpu_custom_call.1
= control target key start
LH: loop header
LB: loop body
LE: loop exit
PB: predicated region body
PF: predicated region fallthrough
CT: control target
= control target key end

     0   :  { %12 = vsyncpa [#allocation5], 0  ;;  %s38376_s0 = inlined_call_operand.vmem [shape: f32[2,16,16,8], index: 0, kind: input, shape index: {}]   ;;  %s38377_s1 = inlined_call_operand.hbm [shape: f32[9,8,64], index: 1, kind: input, shape index: {}]   ;;  %s38378_s2 = inlined_call_operand.hbm [shape: f32[1,64], index: 2, kind: input, shape index: {}]   ;;  %s38379_s3 = inlined_call_operand.hbm [shape: f32[36,64,64], index: 3, kind: input, shape index: {}]   ;;  %s38380_s4 = inlined_call_operand.hbm [shape: f32[4,1,64], index: 4, kind: input, shape index: {}]   ;;  %s38381_s5 = inlined_call_operand.vmem [shape: f32[9,64,4], index: 5, kind: input, shape index: {}]   ;;  %s38382_s6 = inlined_call_operand.hbm [shape: f32[1,4], index: 6, kind: input, shape index: {}]   ;;  %s38383_s7 = inlined_call_operand.vmem [shape: f32[2,16,16,4], index: 7, kind: output, shape index: {}]  }
   0x1   :  { %13 = vsyncpa [#allocation7], 0 }
   0x2   :  { %14 = vsyncpa [#allocation10], 0  ;;  %s32349_s24 = smov 0  }
   0x3 LB: > { %s32299_s25 = smov [#allocation6]   ;;  %s32355_s27 = sadd.s32 4294967295, %s32297_s24   ;;  %s32297_s24 = sphi %s32349_s24, %s20_s24  }
   0x4   : > { %s229_s26 = sshll.u32 %s32299_s25, 4  ;;  %p22309_p0 = scmp.ge.s32.totalorder %s32297_s24, 1  ;;  %s230_s26 = int_to_ptr.vmem [resolvable:$true] %s229_s26 }
   0x5   : > { %p203_p1 = scmp.lt.s32.totalorder %s32297_s24, 3  ;;  %p38384_p2 = scmp.eq.s32.totalorder %s32355_s27, 0 }
   0x6   : > { %s32300_s29 = smov [#allocation9]   ;;  %s32301_s9 = smov [#allocation4]  }
   0x7   : > { %p32360_p3 = pnand %p22309_p0, %p203_p1  ;;  %s252_s30 = sshll.u32 %s32300_s29, 4  ;;  %s32366_s30 = int_to_ptr.vmem [resolvable:$true] %s252_s30 }
   0x8   : > { %s215_s10 = sshll.u32 %s32301_s9, 4  ;;  %s32139_s13 = scalar_lea.hbm %s38378_s2, 16  ;;  %s32374_s10 = int_to_ptr.vmem [resolvable:$true] %s215_s10 }
   0x9   : > { %s38900_s28 = scalar_select %p32360_p3, 1, 0 }
   0xa   : > { %p32031_p4 = pneg %p32360_p3  ;;  %p32140_p6 = scmp.ne.s32.totalorder %s38378_s2, %s32139_s13 }
   0xb   : > { %p32146_p10 = scmp.lt.u32.totalorder %s32139_s13, %s38378_s2 }
   0xc   : > { %p32370_p5 = pnand %p38384_p2, %p32031_p4 }
   0xe   : > { %p32384_p7 = pneg %p32370_p5 }
  0x10   : > { %p32142_p8 = pnand %p32384_p7, %p32140_p6 }
  0x12   : > { %p32143_p9 = pneg %p32142_p8 }
  0x14   : > { %p32148_p11 = pnand %p32146_p10, %p32143_p9 }
  0x16   : > { %32151 = shalt.err (!%p32148_p11)
}
  0x17   : > { %s32152_s19 = scalar_lea.vmem %s230_s26, 16  ;;  %s32159_s20 = scalar_lea.vmem %s230_s26, 32 }
  0x18   : > { %p32153_p12 = scmp.ne.s32.totalorder %s230_s26, %s32152_s19  ;;  %p32160_p1 = scmp.lt.s32.totalorder %s230_s26, %s230_s26 }
  0x19   : > { %p32161_p4 = scmp.lt.s32.totalorder %s32159_s20, %s32152_s19 }
  0x1a   : > { %p32155_p13 = pnand %p32153_p12, %p32384_p7 }
  0x1b   : > { %p32162_p2 = por %p32161_p4, %p32160_p1 }
  0x1c   : > { %p32156_p0 = pneg %p32155_p13 }
  0x1e   : > { %p32163_p3 = pnand %p32162_p2, %p32156_p0 }
  0x20   : > { %32166 = shalt.err (!%p32163_p3)
}
  0x21   : > { %32037 = dma.hbm_to_vmem [thread:$0]  (!%p32370_p5), %s38378_s2, 16, %s230_s26, [#allocation7]  }
  0x22   : > { %s32167_s29 = scalar_lea.hbm %s38380_s4, 64 }
  0x23   : > { %p32168_p6 = scmp.ne.s32.totalorder %s38380_s4, %s32167_s29  ;;  %p32174_p2 = scmp.lt.u32.totalorder %s32167_s29, %s38380_s4 }
  0x25   : > { %p32170_p8 = pnand %p32168_p6, %p32384_p7 }
  0x27   : > { %p32171_p9 = pneg %p32170_p8 }
  0x29   : > { %p32176_p3 = pnand %p32174_p2, %p32171_p9 }
  0x2b   : > { %32179 = shalt.err (!%p32176_p3)
}
  0x2c   : > { %s32180_s26 = scalar_lea.vmem %s32366_s30, 64  ;;  %p32188_p13 = scmp.lt.s32.totalorder %s32366_s30, %s32366_s30 }
  0x2d   : > { %p32181_p10 = scmp.ne.s32.totalorder %s32366_s30, %s32180_s26  ;;  %p32189_p0 = scmp.lt.s32.totalorder %s32180_s26, %s32180_s26 }
  0x2f   : > { %p32183_p11 = pnand %p32181_p10, %p32384_p7  ;;  %p32190_p1 = por %p32189_p0, %p32188_p13 }
  0x31   : > { %p32184_p12 = pneg %p32183_p11 }
  0x33   : > { %p32191_p4 = pnand %p32190_p1, %p32184_p12 }
  0x35   : > { %32194 = shalt.err (!%p32191_p4)
}
  0x36   : > { %s32302_s14 = smov 16   ;;  %s32303_s15 = smov 1  }
  0x37   : > { %32043 = dma.hbm_to_vmem [thread:$0]  (!%p32370_p5), %s38380_s4, 64, %s32366_s30, [#allocation10], %s32302_s14, %s32302_s14, %s32303_s15  }
  0x38   : > { %s32195_s21 = scalar_lea.hbm %s38377_s1, 1152 }
  0x39   : > { %p32196_p6 = scmp.ne.s32.totalorder %s38377_s1, %s32195_s21  ;;  %p32202_p2 = scmp.lt.u32.totalorder %s32195_s21, %s38377_s1 }
  0x3b   : > { %p32198_p8 = pnand %p32196_p6, %p32384_p7 }
  0x3d   : > { %p32199_p9 = pneg %p32198_p8 }
  0x3f   : > { %p32204_p3 = pnand %p32202_p2, %p32199_p9 }
  0x41   : > { %32207 = shalt.err (!%p32204_p3)
}
  0x42   : > { %s32208_s30 = scalar_lea.vmem %s32374_s10, 1152  ;;  %p32216_p13 = scmp.lt.s32.totalorder %s32374_s10, %s32374_s10 }
  0x43   : > { %p32209_p10 = scmp.ne.s32.totalorder %s32374_s10, %s32208_s30  ;;  %p32217_p0 = scmp.lt.s32.totalorder %s32208_s30, %s32208_s30 }
  0x45   : > { %p32211_p11 = pnand %p32209_p10, %p32384_p7  ;;  %p32218_p1 = por %p32217_p0, %p32216_p13 }
  0x47   : > { %p32212_p12 = pneg %p32211_p11 }
  0x49   : > { %p32219_p4 = pnand %p32218_p1, %p32212_p12 }
  0x4b   : > { %32222 = shalt.err (!%p32219_p4)
}
  0x4c   : > { %s32304_s9 = smov 128   ;;  %s32305_s11 = smov 8  }
  0x4d   : > { %32034 = dma.hbm_to_vmem [thread:$0]  (!%p32370_p5), %s38377_s1, 1152, %s32374_s10, [#allocation5], %s32304_s9, %s32304_s9, %s32305_s11  }
  0x4e   : > { %s32306_s26 = smov [#allocation8]   ;;  %s32307_s15 = smov [#allocation11]  }
  0x4f   : > { %s239_s14 = sshll.u32 %s32306_s26, 4  ;;  %s269_s17 = sshll.u32 %s32307_s15, 4  ;;  %s240_s14 = int_to_ptr.vmem [resolvable:$true] %s239_s14  ;;  %s32446_s17 = int_to_ptr.vmem [resolvable:$true] %s269_s17 }
  0x50   : > { %s32223_s20 = scalar_lea.hbm %s38379_s3, 36864 }
  0x51   : > { %p32224_p6 = scmp.ne.s32.totalorder %s38379_s3, %s32223_s20  ;;  %p32230_p2 = scmp.lt.u32.totalorder %s32223_s20, %s38379_s3 }
  0x53   : > { %p32226_p8 = pnand %p32224_p6, %p32384_p7 }
  0x55   : > { %p32227_p9 = pneg %p32226_p8 }
  0x57   : > { %p32232_p3 = pnand %p32230_p2, %p32227_p9 }
  0x59   : > { %32235 = shalt.err (!%p32232_p3)
}
  0x5a   : > { %s32236_s25 = scalar_lea.vmem %s240_s14, 36864  ;;  %p32244_p13 = scmp.lt.s32.totalorder %s240_s14, %s240_s14 }
  0x5b   : > { %p32237_p10 = scmp.ne.s32.totalorder %s240_s14, %s32236_s25  ;;  %p32245_p0 = scmp.lt.s32.totalorder %s32236_s25, %s32236_s25 }
  0x5d   : > { %p32239_p11 = pnand %p32237_p10, %p32384_p7  ;;  %p32246_p1 = por %p32245_p0, %p32244_p13 }
  0x5f   : > { %p32240_p12 = pneg %p32239_p11 }
  0x61   : > { %p32247_p4 = pnand %p32246_p1, %p32240_p12 }
  0x63   : > { %32250 = shalt.err (!%p32247_p4)
}
  0x64   : > { %32040 = dma.hbm_to_vmem [thread:$0]  (!%p32370_p5), %s38379_s3, 36864, %s240_s14, [#allocation7], %s32304_s9, %s32304_s9, %s32305_s11  }
  0x65   : > { %s32251_s26 = scalar_lea.hbm %s38382_s6, 16 }
  0x66   : > { %p32252_p6 = scmp.ne.s32.totalorder %s38382_s6, %s32251_s26  ;;  %p32258_p2 = scmp.lt.u32.totalorder %s32251_s26, %s38382_s6 }
  0x68   : > { %p32254_p8 = pnand %p32252_p6, %p32384_p7 }
  0x6a   : > { %p32255_p9 = pneg %p32254_p8 }
  0x6c   : > { %p32260_p3 = pnand %p32258_p2, %p32255_p9 }
  0x6e   : > { %32263 = shalt.err (!%p32260_p3)
}
  0x6f   : > { %s32264_s9 = scalar_lea.vmem %s32446_s17, 16  ;;  %s32271_s11 = scalar_lea.vmem %s32446_s17, 32 }
  0x70   : > { %p32265_p10 = scmp.ne.s32.totalorder %s32446_s17, %s32264_s9  ;;  %p32272_p13 = scmp.lt.s32.totalorder %s32446_s17, %s32446_s17 }
  0x71   : > { %p32273_p0 = scmp.lt.s32.totalorder %s32271_s11, %s32264_s9 }
  0x72   : > { %p32267_p11 = pnand %p32265_p10, %p32384_p7 }
  0x73   : > { %p32274_p1 = por %p32273_p0, %p32272_p13 }
  0x74   : > { %p32268_p12 = pneg %p32267_p11 }
  0x76   : > { %p32275_p4 = pnand %p32274_p1, %p32268_p12 }
  0x78   : > { %32278 = shalt.err (!%p32275_p4)
}
  0x79   : > { %32046 = dma.hbm_to_vmem [thread:$0]  (!%p32370_p5), %s38382_s6, 16, %s32446_s17, [#allocation10]  }
  0x7a   : > { %p38903_p6 = scmp.ne.s32.totalorder %s38900_s28, 0 }
  0x7c   : > { %290 = sbr.rel (%p38903_p6) target bundleno = 4652 (0x122c), region = 48 }
  0x83   : > { %p38904_p7 = scmp.eq.s32.totalorder %s32355_s27, 0 }
  0x85   : > { %32284 = dma.done.wait (%p38904_p7), [#allocation5], 1152   ;;  %p38905_p8 = pmov %p38904_p7 }
  0x86   : > { %p38906_p9 = pmov %p38904_p7 }
  0x87   : > { %32286 = vsyncadd (%p38905_p8), [#allocation5], 4294966144 }
  0x88   : > { %32288 = dma.done.wait (%p38906_p9), [#allocation7], 36880   ;;  %p38907_p2 = pmov %p38904_p7 }
  0x8a   : > { %32290 = vsyncadd (%p38907_p2), [#allocation7], 4294930416  ;;  %p38908_p3 = pmov %p38907_p2 }
  0x8b   : > { %p38909_p5 = pmov %p38907_p2 }
  0x8c   : > { %32292 = dma.done.wait (%p38908_p3), [#allocation10], 80  }
  0x8d   : > { %32294 = vsyncadd (%p38909_p5), [#allocation10], 4294967216  ;;  %vm348_vm0 = vcmask 64512   ;;  %p338_p10 = scmp.lt.s32.totalorder %s32355_s27, 1  ;;  %v38386_v0 = vmov 0.0   ;;  %v598_v1 = vld [vmem:[#allocation4] sm:$0xff] }
  0x8e   : > { %349 = vst.msk [vmem:[#allocation2] sm:$0xff] %vm348_vm0, %v38386_v0  ;;  %350 = vst.msk [vmem:[#allocation2 + $0x8] sm:$0xff] %vm348_vm0, %v38386_v0  ;;  %v985_v2 = vld [vmem:[#allocation4 + $0x8] sm:$0xff]  ;;  %26225 = vmatprep.subr.mxu0 %v598_v1  ;;  %v1372_v43 = vld [vmem:[#allocation4 + $0x10] sm:$0xff]  ;;  %vm421_vm1 = vcmask 523264   ;;  %vm22169_vm2 = vcmask 31744  }
  0x8f   : > { %351 = vst.msk [vmem:[#allocation2 + $0x10] sm:$0xff] %vm348_vm0, %v38386_v0  ;;  %352 = vst.msk [vmem:[#allocation2 + $0x18] sm:$0xff] %vm348_vm0, %v38386_v0  ;;  %s39631_s27 = smov (!%p338_p10, %s32355_s27), 1  ;;  %26226 = vmatpush3.msra.mxu0 %v598_v1 }
  0x90   : > { %353 = vst.msk [vmem:[#allocation2 + $0x20] sm:$0xff] %vm348_vm0, %v38386_v0  ;;  %354 = vst.msk [vmem:[#allocation2 + $0x28] sm:$0xff] %vm348_vm0, %v38386_v0  ;;  %s24126_s28 = sshll.u32 %s39631_s27, 8  ;;  %26275 = vmatprep.subr.mxu0 %v985_v2 }
  0x91   : > { %355 = vst.msk [vmem:[#allocation2 + $0x30] sm:$0xff] %vm348_vm0, %v38386_v0  ;;  %356 = vst.msk [vmem:[#allocation2 + $0x38] sm:$0xff] %vm348_vm0, %v38386_v0  ;;  %s32660_s17 = scalar_lea.vmem %s38376_s0, %s24126_s28  ;;  %s38281_s12 = scalar_lea.vmem %s38383_s7, %s24126_s28 }
  0x92   : > { %357 = vst.msk [vmem:[#allocation2 + $0x40] sm:$0xff] %vm348_vm0, %v38386_v0  ;;  %358 = vst.msk [vmem:[#allocation2 + $0x48] sm:$0xff] %vm348_vm0, %v38386_v0  ;;  %v494_v3 = vld [vmem:[%s32660_s17] sm:$0xff]  ;;  %v495_v6 = vld [vmem:[%s32660_s17 + $0x8] sm:$0xff] }
  0x93   : > { %359 = vst.msk [vmem:[#allocation2 + $0x50] sm:$0xff] %vm348_vm0, %v38386_v0  ;;  %360 = vst.msk [vmem:[#allocation2 + $0x58] sm:$0xff] %vm348_vm0, %v38386_v0  ;;  %v496_v7 = vld [vmem:[%s32660_s17 + $0x10] sm:$0xff]  ;;  %v497_v8 = vld [vmem:[%s32660_s17 + $0x18] sm:$0xff] }
  0x94   : > { %361 = vst.msk [vmem:[#allocation2 + $0x60] sm:$0xff] %vm348_vm0, %v38386_v0  ;;  %362 = vst.msk [vmem:[#allocation2 + $0x68] sm:$0xff] %vm348_vm0, %v38386_v0  ;;  %v498_v9 = vld [vmem:[%s32660_s17 + $0x20] sm:$0xff]  ;;  %v499_v10 = vld [vmem:[%s32660_s17 + $0x28] sm:$0xff] }
  0x95   : > { %363 = vst.msk [vmem:[#allocation2 + $0x70] sm:$0xff] %vm348_vm0, %v38386_v0  ;;  %364 = vst.msk [vmem:[#allocation2 + $0x78] sm:$0xff] %vm348_vm0, %v38386_v0  ;;  %v566_v4 = vld [vmem:[#allocation2 + $0x7] sm:$0xff]  ;;  %v500_v11 = vld [vmem:[%s32660_s17 + $0x30] sm:$0xff] }
  0x96   : > { %365 = vst.msk [vmem:[#allocation2 + $0x80] sm:$0xff] %vm348_vm0, %v38386_v0  ;;  %366 = vst.msk [vmem:[#allocation2 + $0x88] sm:$0xff] %vm348_vm0, %v38386_v0  ;;  %v567_v5 = vld [vmem:[#allocation2 + $0xf] sm:$0xff]  ;;  %26227 = vmatprep.mubr.msk.f32.mxu0 %vm348_vm0, %v566_v4  ;;  %v501_v12 = vld [vmem:[%s32660_s17 + $0x38] sm:$0xff] }
  0x97   : > { %367 = vst.msk [vmem:[#allocation2 + $0x90] sm:$0xff] %vm348_vm0, %v38386_v0  ;;  %368 = vst.msk [vmem:[#allocation2 + $0x98] sm:$0xff] %vm348_vm0, %v38386_v0  ;;  %26228 = vmatmul.mubr.msk.f32.vlgmr.msra.gmra.mrb[0].mxu0 %vm348_vm0, %v567_v5  ;;  %v502_v13 = vld [vmem:[%s32660_s17 + $0x40] sm:$0xff]  ;;  %v503_v14 = vld [vmem:[%s32660_s17 + $0x48] sm:$0xff] }
  0x98   : > { %369 = vst.msk [vmem:[#allocation2 + $0xa0] sm:$0xff] %vm348_vm0, %v38386_v0  ;;  %370 = vst.msk [vmem:[#allocation2 + $0xa8] sm:$0xff] %vm348_vm0, %v38386_v0  ;;  %26276 = vmatpush3.msra.mxu0 %v985_v2  ;;  %v504_v15 = vld [vmem:[%s32660_s17 + $0x50] sm:$0xff]  ;;  %v505_v16 = vld [vmem:[%s32660_s17 + $0x58] sm:$0xff] }
  0x99   : > { %371 = vst.msk [vmem:[#allocation2 + $0xb0] sm:$0xff] %vm348_vm0, %v38386_v0  ;;  %372 = vst.msk [vmem:[#allocation2 + $0xb8] sm:$0xff] %vm348_vm0, %v38386_v0  ;;  %v506_v17 = vld [vmem:[%s32660_s17 + $0x60] sm:$0xff]  ;;  %v507_v18 = vld [vmem:[%s32660_s17 + $0x68] sm:$0xff]  ;;  %26325 = vmatprep.subr.mxu0 %v1372_v43 }
  0x9a   : > { %373 = vst.msk [vmem:[#allocation2 + $0xc0] sm:$0xff] %vm348_vm0, %v38386_v0  ;;  %374 = vst.msk [vmem:[#allocation2 + $0xc8] sm:$0xff] %vm348_vm0, %v38386_v0  ;;  %v508_v19 = vld [vmem:[%s32660_s17 + $0x70] sm:$0xff]  ;;  %v509_v20 = vld [vmem:[%s32660_s17 + $0x78] sm:$0xff] }
  0x9b   : > { %375 = vst.msk [vmem:[#allocation2 + $0xd0] sm:$0xff] %vm348_vm0, %v38386_v0  ;;  %376 = vst.msk [vmem:[#allocation2 + $0xd8] sm:$0xff] %vm348_vm0, %v38386_v0  ;;  %v510_v21 = vld [vmem:[%s32660_s17 + $0x80] sm:$0xff]  ;;  %v511_v22 = vld [vmem:[%s32660_s17 + $0x88] sm:$0xff] }
  0x9c   : > { %377 = vst.msk [vmem:[#allocation2 + $0xe0] sm:$0xff] %vm348_vm0, %v38386_v0  ;;  %378 = vst.msk [vmem:[#allocation2 + $0xe8] sm:$0xff] %vm348_vm0, %v38386_v0  ;;  %v512_v23 = vld [vmem:[%s32660_s17 + $0x90] sm:$0xff]  ;;  %v513_v24 = vld [vmem:[%s32660_s17 + $0x98] sm:$0xff] }
  0x9d   : > { %379 = vst.msk [vmem:[#allocation2 + $0xf0] sm:$0xff] %vm348_vm0, %v38386_v0  ;;  %380 = vst.msk [vmem:[#allocation2 + $0xf8] sm:$0xff] %vm348_vm0, %v38386_v0  ;;  %v514_v26 = vld [vmem:[%s32660_s17 + $0xa0] sm:$0xff]  ;;  %v515_v27 = vld [vmem:[%s32660_s17 + $0xa8] sm:$0xff] }
  0x9e   : > { %381 = vst.msk [vmem:[#allocation2 + $0x100] sm:$0xff] %vm348_vm0, %v38386_v0  ;;  %382 = vst.msk [vmem:[#allocation2 + $0x108] sm:$0xff] %vm348_vm0, %v38386_v0  ;;  %v516_v29 = vld [vmem:[%s32660_s17 + $0xb0] sm:$0xff]  ;;  %v517_v30 = vld [vmem:[%s32660_s17 + $0xb8] sm:$0xff] }
  0x9f   : > { %383 = vst.msk [vmem:[#allocation2 + $0x110] sm:$0xff] %vm348_vm0, %v38386_v0  ;;  %384 = vst.msk [vmem:[#allocation2 + $0x118] sm:$0xff] %vm348_vm0, %v38386_v0  ;;  %v518_v36 = vld [vmem:[%s32660_s17 + $0xc0] sm:$0xff]  ;;  %v519_v37 = vld [vmem:[%s32660_s17 + $0xc8] sm:$0xff] }
  0xa0   : > { %385 = vst.msk [vmem:[#allocation2 + $0x120] sm:$0xff] %vm348_vm0, %v38386_v0  ;;  %386 = vst.msk [vmem:[#allocation2 + $0x128] sm:$0xff] %vm348_vm0, %v38386_v0  ;;  %v520_v38 = vld [vmem:[%s32660_s17 + $0xd0] sm:$0xff]  ;;  %v521_v39 = vld [vmem:[%s32660_s17 + $0xd8] sm:$0xff] }
  0xa1   : > { %387 = vst.msk [vmem:[#allocation2 + $0x130] sm:$0xff] %vm348_vm0, %v38386_v0  ;;  %388 = vst.msk [vmem:[#allocation2 + $0x138] sm:$0xff] %vm348_vm0, %v38386_v0  ;;  %v522_v40 = vld [vmem:[%s32660_s17 + $0xe0] sm:$0xff]  ;;  %v523_v42 = vld [vmem:[%s32660_s17 + $0xe8] sm:$0xff] }
  0xa2   : > { %389 = vst.msk [vmem:[#allocation2 + $0x140] sm:$0xff] %vm348_vm0, %v38386_v0  ;;  %390 = vst.msk [vmem:[#allocation2 + $0x148] sm:$0xff] %vm348_vm0, %v38386_v0  ;;  %v953_v4 = vld [vmem:[#allocation2 + $0x10] sm:$0xff] }
  0xa3   : > { %391 = vst.msk [vmem:[#allocation2 + $0x150] sm:$0xff] %vm348_vm0, %v38386_v0  ;;  %392 = vst.msk [vmem:[#allocation2 + $0x158] sm:$0xff] %vm348_vm0, %v38386_v0 }
  0xa4   : > { %393 = vst.msk [vmem:[#allocation2 + $0x160] sm:$0xff] %vm348_vm0, %v38386_v0  ;;  %394 = vst.msk [vmem:[#allocation2 + $0x168] sm:$0xff] %vm348_vm0, %v38386_v0 }
  0xa5   : > { %395 = vst.msk [vmem:[#allocation2 + $0x170] sm:$0xff] %vm348_vm0, %v38386_v0  ;;  %396 = vst.msk [vmem:[#allocation2 + $0x178] sm:$0xff] %vm348_vm0, %v38386_v0 }
  0xa6   : > { %397 = vst.msk [vmem:[#allocation2 + $0x180] sm:$0xff] %vm348_vm0, %v38386_v0  ;;  %398 = vst.msk [vmem:[#allocation2 + $0x188] sm:$0xff] %vm348_vm0, %v38386_v0 }
  0xa7   : > { %399 = vst.msk [vmem:[#allocation2 + $0x190] sm:$0xff] %vm348_vm0, %v38386_v0  ;;  %400 = vst.msk [vmem:[#allocation2 + $0x198] sm:$0xff] %vm348_vm0, %v38386_v0 }
  0xa8   : > { %401 = vst.msk [vmem:[#allocation2 + $0x1a0] sm:$0xff] %vm348_vm0, %v38386_v0  ;;  %402 = vst.msk [vmem:[#allocation2 + $0x1a8] sm:$0xff] %vm348_vm0, %v38386_v0 }
  0xa9   : > { %403 = vst.msk [vmem:[#allocation2 + $0x1b0] sm:$0xff] %vm348_vm0, %v38386_v0  ;;  %404 = vst.msk [vmem:[#allocation2 + $0x1b8] sm:$0xff] %vm348_vm0, %v38386_v0 }
  0xaa   : > { %405 = vst.msk [vmem:[#allocation2 + $0x1c0] sm:$0xff] %vm348_vm0, %v38386_v0  ;;  %406 = vst.msk [vmem:[#allocation2 + $0x1c8] sm:$0xff] %vm348_vm0, %v38386_v0 }
  0xab   : > { %407 = vst.msk [vmem:[#allocation2 + $0x1d0] sm:$0xff] %vm348_vm0, %v38386_v0  ;;  %408 = vst.msk [vmem:[#allocation2 + $0x1d8] sm:$0xff] %vm348_vm0, %v38386_v0 }
  0xac   : > { %409 = vst.msk [vmem:[#allocation2 + $0x1e0] sm:$0xff] %vm348_vm0, %v38386_v0  ;;  %410 = vst.msk [vmem:[#allocation2 + $0x1e8] sm:$0xff] %vm348_vm0, %v38386_v0 }
  0xad   : > { %411 = vst.msk [vmem:[#allocation2 + $0x1f0] sm:$0xff] %vm348_vm0, %v38386_v0  ;;  %412 = vst.msk [vmem:[#allocation2 + $0x1f8] sm:$0xff] %vm348_vm0, %v38386_v0 }
  0xae   : > { %413 = vst.msk [vmem:[#allocation2 + $0x200] sm:$0xff] %vm348_vm0, %v38386_v0  ;;  %414 = vst.msk [vmem:[#allocation2 + $0x208] sm:$0xff] %vm348_vm0, %v38386_v0 }
  0xaf   : > { %415 = vst.msk [vmem:[#allocation2 + $0x210] sm:$0xff] %vm348_vm0, %v38386_v0  ;;  %416 = vst.msk [vmem:[#allocation2 + $0x218] sm:$0xff] %vm348_vm0, %v38386_v0 }
  0xb0   : > { %417 = vst.msk [vmem:[#allocation2 + $0x220] sm:$0xff] %vm348_vm0, %v38386_v0  ;;  %418 = vst.msk [vmem:[#allocation2 + $0x228] sm:$0xff] %vm348_vm0, %v38386_v0 }
  0xb1   : > { %419 = vst.msk [vmem:[#allocation2 + $0x230] sm:$0xff] %vm348_vm0, %v38386_v0  ;;  %420 = vst.msk [vmem:[#allocation2 + $0x238] sm:$0xff] %vm348_vm0, %v38386_v0 }
  0xb2   : > { %527 = vst.msk [vmem:[#allocation2 + $0x28] sm:$0xff] %vm348_vm0, %v494_v3  ;;  %528 = vst.msk [vmem:[#allocation2 + $0x30] sm:$0xff] %vm348_vm0, %v495_v6  ;;  %v952_v3 = vld [vmem:[#allocation2 + $0x8] sm:$0xff]  ;;  %v32847_v6 = vld [vmem:[#allocation4 + $0x18] sm:$0xff] }
  0xb3   : > { %529 = vst.msk [vmem:[#allocation2 + $0x48] sm:$0xff] %vm348_vm0, %v496_v7  ;;  %530 = vst.msk [vmem:[#allocation2 + $0x50] sm:$0xff] %vm348_vm0, %v497_v8 }
  0xb4   : > { %531 = vst.msk [vmem:[#allocation2 + $0x68] sm:$0xff] %vm348_vm0, %v498_v9  ;;  %532 = vst.msk [vmem:[#allocation2 + $0x70] sm:$0xff] %vm348_vm0, %v499_v10 }
  0xb5   : > { %533 = vst.msk [vmem:[#allocation2 + $0x88] sm:$0xff] %vm348_vm0, %v500_v11  ;;  %534 = vst.msk [vmem:[#allocation2 + $0x90] sm:$0xff] %vm348_vm0, %v501_v12 }
  0xb6   : > { %535 = vst.msk [vmem:[#allocation2 + $0xa8] sm:$0xff] %vm348_vm0, %v502_v13  ;;  %536 = vst.msk [vmem:[#allocation2 + $0xb0] sm:$0xff] %vm348_vm0, %v503_v14 }
  0xb7   : > { %537 = vst.msk [vmem:[#allocation2 + $0xc8] sm:$0xff] %vm348_vm0, %v504_v15  ;;  %538 = vst.msk [vmem:[#allocation2 + $0xd0] sm:$0xff] %vm348_vm0, %v505_v16 }
  0xb8   : > { %539 = vst.msk [vmem:[#allocation2 + $0xe8] sm:$0xff] %vm348_vm0, %v506_v17  ;;  %540 = vst.msk [vmem:[#allocation2 + $0xf0] sm:$0xff] %vm348_vm0, %v507_v18 }
  0xb9   : > { %541 = vst.msk [vmem:[#allocation2 + $0x108] sm:$0xff] %vm348_vm0, %v508_v19  ;;  %542 = vst.msk [vmem:[#allocation2 + $0x110] sm:$0xff] %vm348_vm0, %v509_v20  ;;  %v32701_v25 = vld [vmem:[#allocation2 + $0x27] sm:$0xff]  ;;  %v32710_v28 = vld [vmem:[#allocation2 + $0x2f] sm:$0xff] }
  0xba   : > { %543 = vst.msk [vmem:[#allocation2 + $0x128] sm:$0xff] %vm348_vm0, %v510_v21  ;;  %544 = vst.msk [vmem:[#allocation2 + $0x130] sm:$0xff] %vm348_vm0, %v511_v22  ;;  %26230 = vmatprep.mubr.msk.f32.mxu0 %vm348_vm0, %v32701_v25  ;;  %v32718_v31 = vld [vmem:[#allocation2 + $0x47] sm:$0xff]  ;;  %v32724_v32 = vld [vmem:[#allocation2 + $0x4f] sm:$0xff] }
  0xbb   : > { %545 = vst.msk [vmem:[#allocation2 + $0x148] sm:$0xff] %vm348_vm0, %v512_v23  ;;  %546 = vst.msk [vmem:[#allocation2 + $0x150] sm:$0xff] %vm348_vm0, %v513_v24  ;;  %26231 = vmatmul.mubr.msk.f32.gmra.mrb[2].mxu0 %vm348_vm0, %v32710_v28  ;;  %v32726_v33 = vld [vmem:[#allocation2 + $0x67] sm:$0xff]  ;;  %v32732_v34 = vld [vmem:[#allocation2 + $0x6f] sm:$0xff] }
  0xbc   : > { %547 = vst.msk [vmem:[#allocation2 + $0x168] sm:$0xff] %vm348_vm0, %v514_v26  ;;  %548 = vst.msk [vmem:[#allocation2 + $0x170] sm:$0xff] %vm348_vm0, %v515_v27  ;;  %26233 = vmatprep.mubr.msk.f32.mxu0 %vm348_vm0, %v32718_v31  ;;  %v32734_v35 = vld [vmem:[#allocation2 + $0x87] sm:$0xff]  ;;  %v32747_v41 = vld [vmem:[#allocation2 + $0x8f] sm:$0xff] }
  0xbd   : > { %549 = vst.msk [vmem:[#allocation2 + $0x188] sm:$0xff] %vm348_vm0, %v516_v29  ;;  %550 = vst.msk [vmem:[#allocation2 + $0x190] sm:$0xff] %vm348_vm0, %v517_v30  ;;  %v32753_v44 = vld [vmem:[#allocation2 + $0xa7] sm:$0xff]  ;;  %v32760_v45 = vld [vmem:[#allocation2 + $0xaf] sm:$0xff] }
  0xbe   : > { %551 = vst.msk [vmem:[#allocation2 + $0x1a8] sm:$0xff] %vm348_vm0, %v518_v36  ;;  %552 = vst.msk [vmem:[#allocation2 + $0x1b0] sm:$0xff] %vm348_vm0, %v519_v37  ;;  %v32762_v46 = vld [vmem:[#allocation2 + $0xc7] sm:$0xff]  ;;  %v32768_v47 = vld [vmem:[#allocation2 + $0xcf] sm:$0xff] }
  0xbf   : > { %26234 = vmatmul.mubr.msk.f32.gmra.mrb[4].mxu0 %vm348_vm0, %v32724_v32  ;;  %553 = vst.msk [vmem:[#allocation2 + $0x1c8] sm:$0xff] %vm348_vm0, %v520_v38  ;;  %554 = vst.msk [vmem:[#allocation2 + $0x1d0] sm:$0xff] %vm348_vm0, %v521_v39  ;;  %v32770_v48 = vld [vmem:[#allocation2 + $0xe7] sm:$0xff]  ;;  %v32776_v49 = vld [vmem:[#allocation2 + $0xef] sm:$0xff] }
  0xc0   : > { %26236 = vmatprep.mubr.msk.f32.mxu0 %vm348_vm0, %v32726_v33  ;;  %555 = vst.msk [vmem:[#allocation2 + $0x1e8] sm:$0xff] %vm348_vm0, %v522_v40  ;;  %556 = vst.msk [vmem:[#allocation2 + $0x1f0] sm:$0xff] %vm348_vm0, %v523_v42  ;;  %v32778_v50 = vld [vmem:[#allocation2 + $0x107] sm:$0xff]  ;;  %v32784_v51 = vld [vmem:[#allocation2 + $0x10f] sm:$0xff] }
  0xc1   : > { %v32786_v52 = vld [vmem:[#allocation2 + $0x127] sm:$0xff]  ;;  %v32792_v53 = vld [vmem:[#allocation2 + $0x12f] sm:$0xff]  ;;  %v525_v42 = vld [vmem:[%s32660_s17 + $0xf8] sm:$0xff] }
  0xc2   : > { %v32794_v54 = vld [vmem:[#allocation2 + $0x147] sm:$0xff]  ;;  %v32800_v55 = vld [vmem:[#allocation2 + $0x14f] sm:$0xff]  ;;  %558 = vst.msk [vmem:[#allocation2 + $0x210] sm:$0xff] %vm348_vm0, %v525_v42 }
  0xc3   : > { %26237 = vmatmul.mubr.msk.f32.gmra.mrb[6].mxu0 %vm348_vm0, %v32732_v34  ;;  %v32802_v56 = vld [vmem:[#allocation2 + $0x167] sm:$0xff]  ;;  %v32808_v57 = vld [vmem:[#allocation2 + $0x16f] sm:$0xff] }
  0xc4   : > { %26239 = vmatprep.mubr.msk.f32.mxu0 %vm348_vm0, %v32734_v35  ;;  %v32810_v58 = vld [vmem:[#allocation2 + $0x187] sm:$0xff]  ;;  %v32816_v59 = vld [vmem:[#allocation2 + $0x18f] sm:$0xff] }
  0xc5   : > { %v32818_v60 = vld [vmem:[#allocation2 + $0x1a7] sm:$0xff]  ;;  %v32824_v61 = vld [vmem:[#allocation2 + $0x1af] sm:$0xff] }
  0xc6   : > { %v32826_v62 = vld [vmem:[#allocation2 + $0x1c7] sm:$0xff]  ;;  %v32832_v63 = vld [vmem:[#allocation2 + $0x1cf] sm:$0xff] }
  0xc7   : > { %26240 = vmatmul.mubr.msk.f32.gmra.mrb[8].mxu0 %vm348_vm0, %v32747_v41  ;;  %v32834_v1 = vld [vmem:[#allocation2 + $0x1e7] sm:$0xff]  ;;  %v32840_v2 = vld [vmem:[#allocation2 + $0x1ef] sm:$0xff] }
  0xc8   : > { %26242 = vmatprep.mubr.msk.f32.mxu0 %vm348_vm0, %v32753_v44  ;;  %v32845_v5 = vld [vmem:[#allocation2 + $0x28] sm:$0xff]  ;;  %v32852_v7 = vld [vmem:[#allocation2 + $0x30] sm:$0xff] }
  0xc9   : > { %v32854_v8 = vld [vmem:[#allocation2 + $0x48] sm:$0xff]  ;;  %v32861_v9 = vld [vmem:[#allocation2 + $0x50] sm:$0xff] }
  0xca   : > { %v32863_v10 = vld [vmem:[#allocation2 + $0x68] sm:$0xff]  ;;  %v32869_v11 = vld [vmem:[#allocation2 + $0x70] sm:$0xff] }
  0xcb   : > { %26243 = vmatmul.mubr.msk.f32.gmra.mrb[10].mxu0 %vm348_vm0, %v32760_v45  ;;  %v32871_v12 = vld [vmem:[#allocation2 + $0x88] sm:$0xff]  ;;  %v32877_v13 = vld [vmem:[#allocation2 + $0x90] sm:$0xff] }
  0xcc   : > { %26245 = vmatprep.mubr.msk.f32.mxu0 %vm348_vm0, %v32762_v46  ;;  %v32879_v14 = vld [vmem:[#allocation2 + $0xa8] sm:$0xff]  ;;  %v32885_v15 = vld [vmem:[#allocation2 + $0xb0] sm:$0xff] }
  0xcd   : > { %v32887_v16 = vld [vmem:[#allocation2 + $0xc8] sm:$0xff]  ;;  %v32893_v17 = vld [vmem:[#allocation2 + $0xd0] sm:$0xff] }
  0xce   : > { %v32895_v18 = vld [vmem:[#allocation2 + $0xe8] sm:$0xff]  ;;  %v32901_v19 = vld [vmem:[#allocation2 + $0xf0] sm:$0xff] }
  0xcf   : > { %26246 = vmatmul.mubr.msk.f32.gmra.mrb[12].mxu0 %vm348_vm0, %v32768_v47  ;;  %v32903_v20 = vld [vmem:[#allocation2 + $0x108] sm:$0xff]  ;;  %v32909_v21 = vld [vmem:[#allocation2 + $0x110] sm:$0xff] }
  0xd0   : > { %26248 = vmatprep.mubr.msk.f32.mxu0 %vm348_vm0, %v32770_v48  ;;  %v32911_v22 = vld [vmem:[#allocation2 + $0x128] sm:$0xff]  ;;  %v32917_v23 = vld [vmem:[#allocation2 + $0x130] sm:$0xff] }
  0xd1   : > { %v32919_v24 = vld [vmem:[#allocation2 + $0x148] sm:$0xff]  ;;  %v32925_v26 = vld [vmem:[#allocation2 + $0x150] sm:$0xff] }
  0xd2   : > { %v32927_v27 = vld [vmem:[#allocation2 + $0x168] sm:$0xff]  ;;  %v32933_v29 = vld [vmem:[#allocation2 + $0x170] sm:$0xff] }
  0xd3   : > { %26249 = vmatmul.mubr.msk.f32.gmra.mrb[14].mxu0 %vm348_vm0, %v32776_v49  ;;  %38910 = vst [vmem:[#allocation15_spill] sm:$0xff] %v32933_v29  ;;  %v32935_v30 = vld [vmem:[#allocation2 + $0x188] sm:$0xff]  ;;  %v32941_v36 = vld [vmem:[#allocation2 + $0x190] sm:$0xff] }
  0xd4   : > { %26251 = vmatprep.mubr.msk.f32.mxu0 %vm348_vm0, %v32778_v50  ;;  %38911 = vst [vmem:[#allocation16_spill] sm:$0xff] %v32941_v36  ;;  %v32943_v37 = vld [vmem:[#allocation2 + $0x1a8] sm:$0xff]  ;;  %v32949_v38 = vld [vmem:[#allocation2 + $0x1b0] sm:$0xff] }
  0xd5   : > { %38912 = vst [vmem:[#allocation17_spill] sm:$0xff] %v32943_v37  ;;  %38913 = vst [vmem:[#allocation18_spill] sm:$0xff] %v32949_v38  ;;  %v32951_v39 = vld [vmem:[#allocation2 + $0x1c8] sm:$0xff]  ;;  %v524_v40 = vld [vmem:[%s32660_s17 + $0xf0] sm:$0xff] }
  0xd6   : > { %38914 = vst [vmem:[#allocation19_spill] sm:$0xff] %v32951_v39  ;;  %557 = vst.msk [vmem:[#allocation2 + $0x208] sm:$0xff] %vm348_vm0, %v524_v40  ;;  %v1339_v40 = vld [vmem:[#allocation2 + $0x9] sm:$0xff]  ;;  %v1340_v42 = vld [vmem:[#allocation2 + $0x11] sm:$0xff] }
  0xd7   : > { %26252 = vmatmul.mubr.msk.f32.gmra.mrb[16].mxu0 %vm348_vm0, %v32784_v51  ;;  %v32974_v0 = vld [vmem:[#allocation2 + $0x29] sm:$0xff] }
  0xd8   : > { %26254 = vmatprep.mubr.msk.f32.mxu0 %vm348_vm0, %v32786_v52  ;;  %38918 = vst [vmem:[#allocation23_spill] sm:$0xff] %v32974_v0 }
  0xdb   : > { %26255 = vmatmul.mubr.msk.f32.gmra.mrb[18].mxu0 %vm348_vm0, %v32792_v53 }
  0xdc   : > { %26257 = vmatprep.mubr.msk.f32.mxu0 %vm348_vm0, %v32794_v54 }
  0xdf   : > { %26258 = vmatmul.mubr.msk.f32.gmra.mrb[20].mxu0 %vm348_vm0, %v32800_v55 }
  0xe0   : > { %26260 = vmatprep.mubr.msk.f32.mxu0 %vm348_vm0, %v32802_v56 }
  0xe3   : > { %26261 = vmatmul.mubr.msk.f32.gmra.mrb[22].mxu0 %vm348_vm0, %v32808_v57 }
  0xe4   : > { %26263 = vmatprep.mubr.msk.f32.mxu0 %vm348_vm0, %v32810_v58 }
  0xe7   : > { %26264 = vmatmul.mubr.msk.f32.gmra.mrb[24].mxu0 %vm348_vm0, %v32816_v59 }
  0xe8   : > { %26266 = vmatprep.mubr.msk.f32.mxu0 %vm348_vm0, %v32818_v60 }
  0xeb   : > { %26267 = vmatmul.mubr.msk.f32.gmra.mrb[26].mxu0 %vm348_vm0, %v32824_v61 }
  0xec   : > { %26269 = vmatprep.mubr.msk.f32.mxu0 %vm348_vm0, %v32826_v62 }
  0xef   : > { %26270 = vmatmul.mubr.msk.f32.gmra.mrb[28].mxu0 %vm348_vm0, %v32832_v63 }
  0xf0   : > { %26272 = vmatprep.mubr.msk.f32.mxu0 %vm348_vm0, %v32834_v1 }
  0xf3   : > { %26273 = vmatmul.mubr.msk.f32.gmra.mrb[30].mxu0 %vm348_vm0, %v32840_v2 }
  0xf4   : > { %26277 = vmatprep.mubr.msk.f32.mxu0 %vm348_vm0, %v952_v3  ;;  %v32963_v3 = vld [vmem:[#allocation2 + $0x1e8] sm:$0xff] }
  0xf5   : > { %38916 = vst [vmem:[#allocation21_spill] sm:$0xff] %v32963_v3 }
  0xf7   : > { %26278 = vmatmul.mubr.msk.f32.vlgmr.msra.gmra.mrb[0].mxu0 %vm348_vm0, %v953_v4  ;;  %v32969_v4 = vld [vmem:[#allocation2 + $0x1f0] sm:$0xff] }
  0xf8   : > { %26326 = vmatpush3.msra.mxu0 %v1372_v43  ;;  %26280 = vmatprep.mubr.msk.f32.mxu0 %vm348_vm0, %v32845_v5  ;;  %v32961_v43 = vld [vmem:[#allocation2 + $0x1d0] sm:$0xff]  ;;  %38917 = vst [vmem:[#allocation22_spill] sm:$0xff] %v32969_v4 }
  0xf9   : > { %26375 = vmatprep.subr.mxu0 %v32847_v6  ;;  %38915 = vst [vmem:[#allocation20_spill] sm:$0xff] %v32961_v43 }
  0xfb   : > { %26281 = vmatmul.mubr.msk.f32.gmra.mrb[2].mxu0 %vm348_vm0, %v32852_v7 }
  0xfc   : > { %26283 = vmatprep.mubr.msk.f32.mxu0 %vm348_vm0, %v32854_v8 }
  0xff   : > { %26284 = vmatmul.mubr.msk.f32.gmra.mrb[4].mxu0 %vm348_vm0, %v32861_v9 }
 0x100   : > { %26286 = vmatprep.mubr.msk.f32.mxu0 %vm348_vm0, %v32863_v10 }
 0x103   : > { %26287 = vmatmul.mubr.msk.f32.gmra.mrb[6].mxu0 %vm348_vm0, %v32869_v11 }
 0x104   : > { %26289 = vmatprep.mubr.msk.f32.mxu0 %vm348_vm0, %v32871_v12 }
 0x107   : > { %26290 = vmatmul.mubr.msk.f32.gmra.mrb[8].mxu0 %vm348_vm0, %v32877_v13 }
 0x108   : > { %26292 = vmatprep.mubr.msk.f32.mxu0 %vm348_vm0, %v32879_v14 }
 0x10b   : > { %26293 = vmatmul.mubr.msk.f32.gmra.mrb[10].mxu0 %vm348_vm0, %v32885_v15 }
 0x10c   : > { %26295 = vmatprep.mubr.msk.f32.mxu0 %vm348_vm0, %v32887_v16 }
 0x10f   : > { %26296 = vmatmul.mubr.msk.f32.gmra.mrb[12].mxu0 %vm348_vm0, %v32893_v17 }
 0x110   : > { %26298 = vmatprep.mubr.msk.f32.mxu0 %vm348_vm0, %v32895_v18 }
 0x113   : > { %26299 = vmatmul.mubr.msk.f32.gmra.mrb[14].mxu0 %vm348_vm0, %v32901_v19 }
 0x114   : > { %26301 = vmatprep.mubr.msk.f32.mxu0 %vm348_vm0, %v32903_v20 }
 0x117   : > { %26302 = vmatmul.mubr.msk.f32.gmra.mrb[16].mxu0 %vm348_vm0, %v32909_v21 }
 0x118   : > { %26304 = vmatprep.mubr.msk.f32.mxu0 %vm348_vm0, %v32911_v22 }
 0x11b   : > { %26305 = vmatmul.mubr.msk.f32.gmra.mrb[18].mxu0 %vm348_vm0, %v32917_v23 }
 0x11c   : > { %26307 = vmatprep.mubr.msk.f32.mxu0 %vm348_vm0, %v32919_v24 }
 0x11f   : > { %26308 = vmatmul.mubr.msk.f32.gmra.mrb[20].mxu0 %vm348_vm0, %v32925_v26 }
 0x120   : > { %26310 = vmatprep.mubr.msk.f32.mxu0 %vm348_vm0, %v32927_v27 }
 0x123   : > { %26311 = vmatmul.mubr.msk.f32.gmra.mrb[22].mxu0 %vm348_vm0, %v32933_v29 }
 0x124   : > { %26313 = vmatprep.mubr.msk.f32.mxu0 %vm348_vm0, %v32935_v30 }
 0x127   : > { %26314 = vmatmul.mubr.msk.f32.gmra.mrb[24].mxu0 %vm348_vm0, %v32941_v36 }
 0x128   : > { %26316 = vmatprep.mubr.msk.f32.mxu0 %vm348_vm0, %v32943_v37 }
 0x12b   : > { %26317 = vmatmul.mubr.msk.f32.gmra.mrb[26].mxu0 %vm348_vm0, %v32949_v38 }
 0x12c   : > { %26319 = vmatprep.mubr.msk.f32.mxu0 %vm348_vm0, %v32951_v39  ;;  %v32976_v39 = vld [vmem:[#allocation4 + $0x20] sm:$0xff] }
 0x12f   : > { %26320 = vmatmul.mubr.msk.f32.gmra.mrb[28].mxu0 %vm348_vm0, %v32961_v43  ;;  %v32984_v43 = vld [vmem:[#allocation2 + $0x49] sm:$0xff] }
 0x130   : > { %26322 = vmatprep.mubr.msk.f32.mxu0 %vm348_vm0, %v32963_v3  ;;  %v32982_v3 = vld [vmem:[#allocation2 + $0x31] sm:$0xff]  ;;  %38920 = vst [vmem:[#allocation25_spill] sm:$0xff] %v32984_v43 }
 0x131   : > { %38919 = vst [vmem:[#allocation24_spill] sm:$0xff] %v32982_v3 }
 0x133   : > { %26323 = vmatmul.mubr.msk.f32.gmra.mrb[30].mxu0 %vm348_vm0, %v32969_v4 }
 0x134   : > { %26327 = vmatprep.mubr.msk.f32.mxu0 %vm348_vm0, %v1339_v40  ;;  %v32991_v40 = vld [vmem:[#allocation2 + $0x51] sm:$0xff] }
 0x135   : > { %38921 = vst [vmem:[#allocation26_spill] sm:$0xff] %v32991_v40 }
 0x137   : > { %26328 = vmatmul.mubr.msk.f32.vlgmr.msra.gmra.mrb[0].mxu0 %vm348_vm0, %v1340_v42  ;;  %v32993_v42 = vld [vmem:[#allocation2 + $0x69] sm:$0xff] }
 0x138   : > { %26376 = vmatpush3.msra.mxu0 %v32847_v6  ;;  %26330 = vmatprep.mubr.msk.f32.mxu0 %vm348_vm0, %v32974_v0  ;;  %38922 = vst [vmem:[#allocation27_spill] sm:$0xff] %v32993_v42  ;;  %v32999_v6 = vld [vmem:[#allocation2 + $0x71] sm:$0xff]  ;;  %v33001_v0 = vld [vmem:[#allocation2 + $0x89] sm:$0xff] }
 0x139   : > { %26425 = vmatprep.subr.mxu0 %v32976_v39  ;;  %38923 = vst [vmem:[#allocation28_spill] sm:$0xff] %v32999_v6  ;;  %38924 = vst [vmem:[#allocation29_spill] sm:$0xff] %v33001_v0 }
 0x13b   : > { %26331 = vmatmul.mubr.msk.f32.gmra.mrb[2].mxu0 %vm348_vm0, %v32982_v3  ;;  %v33009_v3 = vld [vmem:[#allocation2 + $0xa9] sm:$0xff] }
 0x13c   : > { %26333 = vmatprep.mubr.msk.f32.mxu0 %vm348_vm0, %v32984_v43  ;;  %v33007_v43 = vld [vmem:[#allocation2 + $0x91] sm:$0xff]  ;;  %38926 = vst [vmem:[#allocation31_spill] sm:$0xff] %v33009_v3 }
 0x13d   : > { %38925 = vst [vmem:[#allocation30_spill] sm:$0xff] %v33007_v43 }
 0x13f   : > { %26334 = vmatmul.mubr.msk.f32.gmra.mrb[4].mxu0 %vm348_vm0, %v32991_v40  ;;  %v33017_v40 = vld [vmem:[#allocation2 + $0xc9] sm:$0xff] }
 0x140   : > { %26336 = vmatprep.mubr.msk.f32.mxu0 %vm348_vm0, %v32993_v42  ;;  %v33015_v42 = vld [vmem:[#allocation2 + $0xb1] sm:$0xff]  ;;  %38928 = vst [vmem:[#allocation33_spill] sm:$0xff] %v33017_v40 }
 0x141   : > { %38927 = vst [vmem:[#allocation32_spill] sm:$0xff] %v33015_v42 }
 0x143   : > { %26337 = vmatmul.mubr.msk.f32.gmra.mrb[6].mxu0 %vm348_vm0, %v32999_v6  ;;  %v33025_v6 = vld [vmem:[#allocation2 + $0xe9] sm:$0xff] }
 0x144   : > { %26339 = vmatprep.mubr.msk.f32.mxu0 %vm348_vm0, %v33001_v0  ;;  %v33023_v0 = vld [vmem:[#allocation2 + $0xd1] sm:$0xff]  ;;  %38930 = vst [vmem:[#allocation35_spill] sm:$0xff] %v33025_v6 }
 0x145   : > { %38929 = vst [vmem:[#allocation34_spill] sm:$0xff] %v33023_v0 }
 0x147   : > { %26340 = vmatmul.mubr.msk.f32.gmra.mrb[8].mxu0 %vm348_vm0, %v33007_v43  ;;  %v33033_v43 = vld [vmem:[#allocation2 + $0x109] sm:$0xff] }
 0x148   : > { %26342 = vmatprep.mubr.msk.f32.mxu0 %vm348_vm0, %v33009_v3  ;;  %v33031_v3 = vld [vmem:[#allocation2 + $0xf1] sm:$0xff]  ;;  %38932 = vst [vmem:[#allocation37_spill] sm:$0xff] %v33033_v43 }
 0x149   : > { %38931 = vst [vmem:[#allocation36_spill] sm:$0xff] %v33031_v3 }
 0x14b   : > { %26343 = vmatmul.mubr.msk.f32.gmra.mrb[10].mxu0 %vm348_vm0, %v33015_v42  ;;  %v33041_v42 = vld [vmem:[#allocation2 + $0x129] sm:$0xff] }
 0x14c   : > { %26345 = vmatprep.mubr.msk.f32.mxu0 %vm348_vm0, %v33017_v40  ;;  %v33039_v40 = vld [vmem:[#allocation2 + $0x111] sm:$0xff]  ;;  %38934 = vst [vmem:[#allocation39_spill] sm:$0xff] %v33041_v42 }
 0x14d   : > { %38933 = vst [vmem:[#allocation38_spill] sm:$0xff] %v33039_v40 }
 0x14f   : > { %26346 = vmatmul.mubr.msk.f32.gmra.mrb[12].mxu0 %vm348_vm0, %v33023_v0  ;;  %v33049_v0 = vld [vmem:[#allocation2 + $0x149] sm:$0xff] }
 0x150   : > { %26348 = vmatprep.mubr.msk.f32.mxu0 %vm348_vm0, %v33025_v6  ;;  %v33047_v6 = vld [vmem:[#allocation2 + $0x131] sm:$0xff]  ;;  %38936 = vst [vmem:[#allocation41_spill] sm:$0xff] %v33049_v0 }
 0x151   : > { %38935 = vst [vmem:[#allocation40_spill] sm:$0xff] %v33047_v6 }
 0x153   : > { %26349 = vmatmul.mubr.msk.f32.gmra.mrb[14].mxu0 %vm348_vm0, %v33031_v3  ;;  %v33057_v3 = vld [vmem:[#allocation2 + $0x169] sm:$0xff] }
 0x154   : > { %26351 = vmatprep.mubr.msk.f32.mxu0 %vm348_vm0, %v33033_v43  ;;  %v33055_v43 = vld [vmem:[#allocation2 + $0x151] sm:$0xff]  ;;  %38938 = vst [vmem:[#allocation43_spill] sm:$0xff] %v33057_v3 }
 0x155   : > { %38937 = vst [vmem:[#allocation42_spill] sm:$0xff] %v33055_v43 }
 0x157   : > { %26352 = vmatmul.mubr.msk.f32.gmra.mrb[16].mxu0 %vm348_vm0, %v33039_v40  ;;  %v33065_v40 = vld [vmem:[#allocation2 + $0x189] sm:$0xff] }
 0x158   : > { %26354 = vmatprep.mubr.msk.f32.mxu0 %vm348_vm0, %v33041_v42  ;;  %v33063_v42 = vld [vmem:[#allocation2 + $0x171] sm:$0xff]  ;;  %38940 = vst [vmem:[#allocation45_spill] sm:$0xff] %v33065_v40 }
 0x159   : > { %38939 = vst [vmem:[#allocation44_spill] sm:$0xff] %v33063_v42 }
 0x15b   : > { %26355 = vmatmul.mubr.msk.f32.gmra.mrb[18].mxu0 %vm348_vm0, %v33047_v6  ;;  %v33073_v6 = vld [vmem:[#allocation2 + $0x1a9] sm:$0xff] }
 0x15c   : > { %26357 = vmatprep.mubr.msk.f32.mxu0 %vm348_vm0, %v33049_v0  ;;  %v33071_v0 = vld [vmem:[#allocation2 + $0x191] sm:$0xff]  ;;  %38941 = vst [vmem:[#allocation46_spill] sm:$0xff] %v33073_v6 }
 0x15f   : > { %26358 = vmatmul.mubr.msk.f32.gmra.mrb[20].mxu0 %vm348_vm0, %v33055_v43  ;;  %v33081_v43 = vld [vmem:[#allocation2 + $0x1c9] sm:$0xff] }
 0x160   : > { %26360 = vmatprep.mubr.msk.f32.mxu0 %vm348_vm0, %v33057_v3  ;;  %v33079_v3 = vld [vmem:[#allocation2 + $0x1b1] sm:$0xff] }
 0x161   : > { %38942 = vst [vmem:[#allocation47_spill] sm:$0xff] %v33079_v3 }
 0x163   : > { %26361 = vmatmul.mubr.msk.f32.gmra.mrb[22].mxu0 %vm348_vm0, %v33063_v42  ;;  %v33089_v42 = vld [vmem:[#allocation2 + $0x1e9] sm:$0xff] }
 0x164   : > { %26363 = vmatprep.mubr.msk.f32.mxu0 %vm348_vm0, %v33065_v40  ;;  %v33087_v40 = vld [vmem:[#allocation2 + $0x1d1] sm:$0xff] }
 0x165   : > { %38943 = vst [vmem:[#allocation48_spill] sm:$0xff] %v33087_v40 }
 0x167   : > { %26364 = vmatmul.mubr.msk.f32.gmra.mrb[24].mxu0 %vm348_vm0, %v33071_v0 }
 0x168   : > { %26366 = vmatprep.mubr.msk.f32.mxu0 %vm348_vm0, %v33073_v6  ;;  %v33095_v6 = vld [vmem:[#allocation2 + $0x1f1] sm:$0xff] }
 0x16b   : > { %26367 = vmatmul.mubr.msk.f32.gmra.mrb[26].mxu0 %vm348_vm0, %v33079_v3  ;;  %v2533_v3 = vld [vmem:[#allocation4 + $0x28] sm:$0xff] }
 0x16c   : > { %26369 = vmatprep.mubr.msk.f32.mxu0 %vm348_vm0, %v33081_v43 }
 0x16f   : > { %26370 = vmatmul.mubr.msk.f32.gmra.mrb[28].mxu0 %vm348_vm0, %v33087_v40 }
 0x170   : > { %26372 = vmatprep.mubr.msk.f32.mxu0 %vm348_vm0, %v33089_v42 }
 0x173   : > { %26373 = vmatmul.mubr.msk.f32.gmra.mrb[30].mxu0 %vm348_vm0, %v33095_v6 }
 0x174   : > { %26377 = vmatprep.mubr.msk.f32.mxu0 %vm348_vm0, %v32701_v25  ;;  %v33158_v25 = vld [vmem:[#allocation2 + $0x207] sm:$0xff] }
 0x177   : > { %26378 = vmatmul.mubr.msk.f32.vlgmr.msra.gmra.mrb[0].mxu0 %vm348_vm0, %v32710_v28  ;;  %v33164_v28 = vld [vmem:[#allocation2 + $0x20f] sm:$0xff] }
 0x178   : > { %26426 = vmatpush3.msra.mxu0 %v32976_v39  ;;  %26380 = vmatprep.mubr.msk.f32.mxu0 %vm348_vm0, %v32718_v31  ;;  %v2921_v39 = vld [vmem:[#allocation4 + $0x30] sm:$0xff] }
 0x179   : > { %26475 = vmatprep.subr.mxu0 %v2533_v3 }
 0x17b   : > { %26381 = vmatmul.mubr.msk.f32.gmra.mrb[2].mxu0 %vm348_vm0, %v32724_v32 }
 0x17c   : > { %26383 = vmatprep.mubr.msk.f32.mxu0 %vm348_vm0, %v32726_v33 }
 0x17f   : > { %26384 = vmatmul.mubr.msk.f32.gmra.mrb[4].mxu0 %vm348_vm0, %v32732_v34 }
 0x180   : > { %26386 = vmatprep.mubr.msk.f32.mxu0 %vm348_vm0, %v32734_v35 }
 0x183   : > { %26387 = vmatmul.mubr.msk.f32.gmra.mrb[6].mxu0 %vm348_vm0, %v32747_v41 }
 0x184   : > { %26389 = vmatprep.mubr.msk.f32.mxu0 %vm348_vm0, %v32753_v44 }
 0x187   : > { %26390 = vmatmul.mubr.msk.f32.gmra.mrb[8].mxu0 %vm348_vm0, %v32760_v45 }
 0x188   : > { %26392 = vmatprep.mubr.msk.f32.mxu0 %vm348_vm0, %v32762_v46 }
 0x18b   : > { %26393 = vmatmul.mubr.msk.f32.gmra.mrb[10].mxu0 %vm348_vm0, %v32768_v47 }
 0x18c   : > { %26395 = vmatprep.mubr.msk.f32.mxu0 %vm348_vm0, %v32770_v48 }
 0x18f   : > { %26396 = vmatmul.mubr.msk.f32.gmra.mrb[12].mxu0 %vm348_vm0, %v32776_v49 }
 0x190   : > { %26398 = vmatprep.mubr.msk.f32.mxu0 %vm348_vm0, %v32778_v50 }
 0x193   : > { %26399 = vmatmul.mubr.msk.f32.gmra.mrb[14].mxu0 %vm348_vm0, %v32784_v51 }
 0x194   : > { %26401 = vmatprep.mubr.msk.f32.mxu0 %vm348_vm0, %v32786_v52 }
 0x197   : > { %26402 = vmatmul.mubr.msk.f32.gmra.mrb[16].mxu0 %vm348_vm0, %v32792_v53 }
 0x198   : > { %26404 = vmatprep.mubr.msk.f32.mxu0 %vm348_vm0, %v32794_v54 }
 0x19b   : > { %26405 = vmatmul.mubr.msk.f32.gmra.mrb[18].mxu0 %vm348_vm0, %v32800_v55 }
 0x19c   : > { %26407 = vmatprep.mubr.msk.f32.mxu0 %vm348_vm0, %v32802_v56 }
 0x19f   : > { %26408 = vmatmul.mubr.msk.f32.gmra.mrb[20].mxu0 %vm348_vm0, %v32808_v57 }
 0x1a0   : > { %26410 = vmatprep.mubr.msk.f32.mxu0 %vm348_vm0, %v32810_v58 }
 0x1a3   : > { %26411 = vmatmul.mubr.msk.f32.gmra.mrb[22].mxu0 %vm348_vm0, %v32816_v59 }
 0x1a4   : > { %26413 = vmatprep.mubr.msk.f32.mxu0 %vm348_vm0, %v32818_v60 }
 0x1a7   : > { %26414 = vmatmul.mubr.msk.f32.gmra.mrb[24].mxu0 %vm348_vm0, %v32824_v61 }
 0x1a8   : > { %26416 = vmatprep.mubr.msk.f32.mxu0 %vm348_vm0, %v32826_v62 }
 0x1ab   : > { %26417 = vmatmul.mubr.msk.f32.gmra.mrb[26].mxu0 %vm348_vm0, %v32832_v63 }
 0x1ac   : > { %26419 = vmatprep.mubr.msk.f32.mxu0 %vm348_vm0, %v32834_v1 }
 0x1af   : > { %26420 = vmatmul.mubr.msk.f32.gmra.mrb[28].mxu0 %vm348_vm0, %v32840_v2 }
 0x1b0   : > { %26422 = vmatprep.mubr.msk.f32.mxu0 %vm348_vm0, %v33158_v25 }
 0x1b3   : > { %26423 = vmatmul.mubr.msk.f32.gmra.mrb[30].mxu0 %vm348_vm0, %v33164_v28 }
 0x1b4   : > { %26427 = vmatprep.mubr.msk.f32.mxu0 %vm348_vm0, %v32845_v5  ;;  %v38944_v5 = vld [vmem:[#allocation19_spill] sm:$0xff] }
 0x1b7   : > { %26428 = vmatmul.mubr.msk.f32.vlgmr.msra.gmra.mrb[0].mxu0 %vm348_vm0, %v32852_v7  ;;  %v38945_v7 = vld [vmem:[#allocation20_spill] sm:$0xff] }
 0x1b8   : > { %26476 = vmatpush3.msra.mxu0 %v2533_v3  ;;  %26430 = vmatprep.mubr.msk.f32.mxu0 %vm348_vm0, %v32854_v8  ;;  %v38946_v3 = vld [vmem:[#allocation21_spill] sm:$0xff] }
 0x1b9   : > { %26525 = vmatprep.subr.mxu0 %v2921_v39 }
 0x1bb   : > { %26431 = vmatmul.mubr.msk.f32.gmra.mrb[2].mxu0 %vm348_vm0, %v32861_v9 }
 0x1bc   : > { %26433 = vmatprep.mubr.msk.f32.mxu0 %vm348_vm0, %v32863_v10 }
 0x1bf   : > { %26434 = vmatmul.mubr.msk.f32.gmra.mrb[4].mxu0 %vm348_vm0, %v32869_v11 }
 0x1c0   : > { %26436 = vmatprep.mubr.msk.f32.mxu0 %vm348_vm0, %v32871_v12 }
 0x1c3   : > { %26437 = vmatmul.mubr.msk.f32.gmra.mrb[6].mxu0 %vm348_vm0, %v32877_v13 }
 0x1c4   : > { %26439 = vmatprep.mubr.msk.f32.mxu0 %vm348_vm0, %v32879_v14 }
 0x1c7   : > { %26440 = vmatmul.mubr.msk.f32.gmra.mrb[8].mxu0 %vm348_vm0, %v32885_v15 }
 0x1c8   : > { %26442 = vmatprep.mubr.msk.f32.mxu0 %vm348_vm0, %v32887_v16 }
 0x1cb   : > { %26443 = vmatmul.mubr.msk.f32.gmra.mrb[10].mxu0 %vm348_vm0, %v32893_v17 }
 0x1cc   : > { %26445 = vmatprep.mubr.msk.f32.mxu0 %vm348_vm0, %v32895_v18 }
 0x1cf   : > { %26446 = vmatmul.mubr.msk.f32.gmra.mrb[12].mxu0 %vm348_vm0, %v32901_v19 }
 0x1d0   : > { %26448 = vmatprep.mubr.msk.f32.mxu0 %vm348_vm0, %v32903_v20 }
 0x1d3   : > { %26449 = vmatmul.mubr.msk.f32.gmra.mrb[14].mxu0 %vm348_vm0, %v32909_v21 }
 0x1d4   : > { %26451 = vmatprep.mubr.msk.f32.mxu0 %vm348_vm0, %v32911_v22 }
 0x1d7   : > { %26452 = vmatmul.mubr.msk.f32.gmra.mrb[16].mxu0 %vm348_vm0, %v32917_v23 }
 0x1d8   : > { %26454 = vmatprep.mubr.msk.f32.mxu0 %vm348_vm0, %v32919_v24 }
 0x1db   : > { %26455 = vmatmul.mubr.msk.f32.gmra.mrb[18].mxu0 %vm348_vm0, %v32925_v26 }
 0x1dc   : > { %26457 = vmatprep.mubr.msk.f32.mxu0 %vm348_vm0, %v32927_v27 }
 0x1df   : > { %26458 = vmatmul.mubr.msk.f32.gmra.mrb[20].mxu0 %vm348_vm0, %v32933_v29  ;;  %v33226_v29 = vld [vmem:[#allocation2 + $0x208] sm:$0xff] }
 0x1e0   : > { %26460 = vmatprep.mubr.msk.f32.mxu0 %vm348_vm0, %v32935_v30  ;;  %38947 = vst [vmem:[#allocation49_spill] sm:$0xff] %v33226_v29 }
 0x1e3   : > { %26461 = vmatmul.mubr.msk.f32.gmra.mrb[22].mxu0 %vm348_vm0, %v32941_v36  ;;  %v38954_v36 = vld [vmem:[#allocation28_spill] sm:$0xff] }
 0x1e4   : > { %26463 = vmatprep.mubr.msk.f32.mxu0 %vm348_vm0, %v32943_v37  ;;  %v33232_v37 = vld [vmem:[#allocation2 + $0x210] sm:$0xff] }
 0x1e5   : > { %38948 = vst [vmem:[#allocation50_spill] sm:$0xff] %v33232_v37 }
 0x1e7   : > { %26464 = vmatmul.mubr.msk.f32.gmra.mrb[24].mxu0 %vm348_vm0, %v32949_v38  ;;  %v38950_v38 = vld [vmem:[#allocation24_spill] sm:$0xff] }
 0x1e8   : > { %26466 = vmatprep.mubr.msk.f32.mxu0 %vm348_vm0, %v38944_v5  ;;  %v38949_v5 = vld [vmem:[#allocation23_spill] sm:$0xff] }
 0x1eb   : > { %26467 = vmatmul.mubr.msk.f32.gmra.mrb[26].mxu0 %vm348_vm0, %v38945_v7  ;;  %v3308_v7 = vld [vmem:[#allocation4 + $0x38] sm:$0xff] }
 0x1ec   : > { %26469 = vmatprep.mubr.msk.f32.mxu0 %vm348_vm0, %v38946_v3  ;;  %v38951_v3 = vld [vmem:[#allocation25_spill] sm:$0xff] }
 0x1ef   : > { %26470 = vmatmul.mubr.msk.f32.gmra.mrb[28].mxu0 %vm348_vm0, %v32969_v4  ;;  %v38952_v4 = vld [vmem:[#allocation26_spill] sm:$0xff] }
 0x1f0   : > { %26472 = vmatprep.mubr.msk.f32.mxu0 %vm348_vm0, %v33226_v29  ;;  %v38953_v29 = vld [vmem:[#allocation27_spill] sm:$0xff] }
 0x1f3   : > { %26473 = vmatmul.mubr.msk.f32.gmra.mrb[30].mxu0 %vm348_vm0, %v33232_v37  ;;  %v38955_v37 = vld [vmem:[#allocation29_spill] sm:$0xff] }
 0x1f4   : > { %26477 = vmatprep.mubr.msk.f32.mxu0 %vm348_vm0, %v38949_v5  ;;  %v38956_v5 = vld [vmem:[#allocation30_spill] sm:$0xff] }
 0x1f7   : > { %26478 = vmatmul.mubr.msk.f32.vlgmr.msra.gmra.mrb[0].mxu0 %vm348_vm0, %v38950_v38  ;;  %v38957_v38 = vld [vmem:[#allocation31_spill] sm:$0xff] }
 0x1f8   : > { %26526 = vmatpush3.msra.mxu0 %v2921_v39  ;;  %26480 = vmatprep.mubr.msk.f32.mxu0 %vm348_vm0, %v38951_v3  ;;  %v38958_v39 = vld [vmem:[#allocation32_spill] sm:$0xff]  ;;  %v38959_v3 = vld [vmem:[#allocation33_spill] sm:$0xff] }
 0x1f9   : > { %26575 = vmatprep.subr.mxu0 %v3308_v7 }
 0x1fb   : > { %26481 = vmatmul.mubr.msk.f32.gmra.mrb[2].mxu0 %vm348_vm0, %v38952_v4  ;;  %v38960_v4 = vld [vmem:[#allocation34_spill] sm:$0xff] }
 0x1fc   : > { %26483 = vmatprep.mubr.msk.f32.mxu0 %vm348_vm0, %v38953_v29  ;;  %v38961_v29 = vld [vmem:[#allocation35_spill] sm:$0xff] }
 0x1ff   : > { %26484 = vmatmul.mubr.msk.f32.gmra.mrb[4].mxu0 %vm348_vm0, %v38954_v36  ;;  %v38962_v36 = vld [vmem:[#allocation36_spill] sm:$0xff] }
 0x200   : > { %26486 = vmatprep.mubr.msk.f32.mxu0 %vm348_vm0, %v38955_v37  ;;  %v38963_v37 = vld [vmem:[#allocation37_spill] sm:$0xff] }
 0x203   : > { %26487 = vmatmul.mubr.msk.f32.gmra.mrb[6].mxu0 %vm348_vm0, %v38956_v5  ;;  %v38964_v5 = vld [vmem:[#allocation38_spill] sm:$0xff] }
 0x204   : > { %26489 = vmatprep.mubr.msk.f32.mxu0 %vm348_vm0, %v38957_v38  ;;  %v38965_v38 = vld [vmem:[#allocation39_spill] sm:$0xff] }
 0x207   : > { %26490 = vmatmul.mubr.msk.f32.gmra.mrb[8].mxu0 %vm348_vm0, %v38958_v39  ;;  %v38966_v39 = vld [vmem:[#allocation40_spill] sm:$0xff] }
 0x208   : > { %26492 = vmatprep.mubr.msk.f32.mxu0 %vm348_vm0, %v38959_v3  ;;  %v38967_v3 = vld [vmem:[#allocation41_spill] sm:$0xff] }
 0x20b   : > { %26493 = vmatmul.mubr.msk.f32.gmra.mrb[10].mxu0 %vm348_vm0, %v38960_v4  ;;  %v38968_v4 = vld [vmem:[#allocation42_spill] sm:$0xff] }
 0x20c   : > { %26495 = vmatprep.mubr.msk.f32.mxu0 %vm348_vm0, %v38961_v29  ;;  %v38969_v29 = vld [vmem:[#allocation43_spill] sm:$0xff] }
 0x20f   : > { %26496 = vmatmul.mubr.msk.f32.gmra.mrb[12].mxu0 %vm348_vm0, %v38962_v36  ;;  %v38970_v36 = vld [vmem:[#allocation44_spill] sm:$0xff] }
 0x210   : > { %26498 = vmatprep.mubr.msk.f32.mxu0 %vm348_vm0, %v38963_v37  ;;  %v38971_v37 = vld [vmem:[#allocation45_spill] sm:$0xff] }
 0x213   : > { %26499 = vmatmul.mubr.msk.f32.gmra.mrb[14].mxu0 %vm348_vm0, %v38964_v5 }
 0x214   : > { %26501 = vmatprep.mubr.msk.f32.mxu0 %vm348_vm0, %v38965_v38  ;;  %v38972_v38 = vld [vmem:[#allocation46_spill] sm:$0xff] }
 0x217   : > { %26502 = vmatmul.mubr.msk.f32.gmra.mrb[16].mxu0 %vm348_vm0, %v38966_v39  ;;  %v38973_v39 = vld [vmem:[#allocation47_spill] sm:$0xff] }
 0x218   : > { %26504 = vmatprep.mubr.msk.f32.mxu0 %vm348_vm0, %v38967_v3 }
 0x21b   : > { %26505 = vmatmul.mubr.msk.f32.gmra.mrb[18].mxu0 %vm348_vm0, %v38968_v4 }
 0x21c   : > { %26507 = vmatprep.mubr.msk.f32.mxu0 %vm348_vm0, %v38969_v29 }
 0x21f   : > { %26508 = vmatmul.mubr.msk.f32.gmra.mrb[20].mxu0 %vm348_vm0, %v38970_v36  ;;  %v33294_v36 = vld [vmem:[#allocation2 + $0x209] sm:$0xff] }
 0x220   : > { %26510 = vmatprep.mubr.msk.f32.mxu0 %vm348_vm0, %v38971_v37 }
 0x223   : > { %26511 = vmatmul.mubr.msk.f32.gmra.mrb[22].mxu0 %vm348_vm0, %v33071_v0 }
 0x224   : > { %26513 = vmatprep.mubr.msk.f32.mxu0 %vm348_vm0, %v38972_v38  ;;  %v33300_v38 = vld [vmem:[#allocation2 + $0x211] sm:$0xff] }
 0x227   : > { %26514 = vmatmul.mubr.msk.f32.gmra.mrb[24].mxu0 %vm348_vm0, %v38973_v39 }
 0x228   : > { %26516 = vmatprep.mubr.msk.f32.mxu0 %vm348_vm0, %v33081_v43 }
 0x22b   : > { %26517 = vmatmul.mubr.msk.f32.gmra.mrb[26].mxu0 %vm348_vm0, %v33087_v40  ;;  %v33306_v40 = vld [vmem:[#allocation4 + $0x40] sm:$0xff] }
 0x22c   : > { %26519 = vmatprep.mubr.msk.f32.mxu0 %vm348_vm0, %v33089_v42 }
 0x22f   : > { %26520 = vmatmul.mubr.msk.f32.gmra.mrb[28].mxu0 %vm348_vm0, %v33095_v6 }
 0x230   : > { %26522 = vmatprep.mubr.msk.f32.mxu0 %vm348_vm0, %v33294_v36 }
 0x233   : > { %26523 = vmatmul.mubr.msk.f32.gmra.mrb[30].mxu0 %vm348_vm0, %v33300_v38 }
 0x234   : > { %26527 = vmatprep.mubr.msk.f32.mxu0 %vm348_vm0, %v32718_v31  ;;  %v2918_v31 = vld [vmem:[#allocation2 + $0x227] sm:$0xff] }
 0x237   : > { %26528 = vmatmul.mubr.msk.f32.vlgmr.msra.gmra.mrb[0].mxu0 %vm348_vm0, %v32724_v32  ;;  %v2919_v32 = vld [vmem:[#allocation2 + $0x22f] sm:$0xff] }
 0x238   : > { %26576 = vmatpush3.msra.mxu0 %v3308_v7  ;;  %26530 = vmatprep.mubr.msk.f32.mxu0 %vm348_vm0, %v32726_v33  ;;  %v4153_v33 = vld [vmem:[#allocation8] sm:$0xff]  ;;  %v4554_v7 = vld [vmem:[#allocation8 + $0x78] sm:$0xff] }
 0x239   : > { %26625 = vmatprep.subr.mxu0 %v33306_v40 }
 0x23b   : > { %26531 = vmatmul.mubr.msk.f32.gmra.mrb[2].mxu0 %vm348_vm0, %v32732_v34  ;;  %v4154_v34 = vld [vmem:[#allocation8 + $0x8] sm:$0xff] }
 0x23c   : > { %26533 = vmatprep.mubr.msk.f32.mxu0 %vm348_vm0, %v32734_v35  ;;  %v33369_v35 = vld [vmem:[#allocation8 + $0x10] sm:$0xff] }
 0x23f   : > { %26534 = vmatmul.mubr.msk.f32.gmra.mrb[4].mxu0 %vm348_vm0, %v32747_v41  ;;  %v33373_v41 = vpack.c.bf16 %v4154_v34, %v4153_v33 }
 0x240   : > { %26536 = vmatprep.mubr.msk.f32.mxu0 %vm348_vm0, %v32753_v44  ;;  %v33375_v44 = vld [vmem:[#allocation8 + $0x18] sm:$0xff] }
 0x241   : > { %29556 = vmatprep.subr.bf16.mxu1 %v33373_v41 }
 0x242   : > { %29558 = vmatpush3.bf16.msra.mxu1 %v33373_v41 }
 0x243   : > { %26537 = vmatmul.mubr.msk.f32.gmra.mrb[6].mxu0 %vm348_vm0, %v32760_v45  ;;  %v38974_v45 = vmov 0.0  }
 0x244   : > { %26539 = vmatprep.mubr.msk.f32.mxu0 %vm348_vm0, %v32762_v46  ;;  %428 = vst.msk [vmem:[#allocation3 + $0x30] sm:$0xff] %vm421_vm1, %v38974_v45  ;;  %422 = vst.msk [vmem:[#allocation3] sm:$0xff] %vm421_vm1, %v38974_v45  ;;  %v29559_v46 = vpack.c.bf16 %v33375_v44, %v33369_v35 }
 0x245   : > { %423 = vst.msk [vmem:[#allocation3 + $0x8] sm:$0xff] %vm421_vm1, %v38974_v45  ;;  %424 = vst.msk [vmem:[#allocation3 + $0x10] sm:$0xff] %vm421_vm1, %v38974_v45 }
 0x246   : > { %425 = vst.msk [vmem:[#allocation3 + $0x18] sm:$0xff] %vm421_vm1, %v38974_v45  ;;  %426 = vst.msk [vmem:[#allocation3 + $0x20] sm:$0xff] %vm421_vm1, %v38974_v45  ;;  %29560 = vmatprep.subr.bf16.mxu1 %v29559_v46 }
 0x247   : > { %26540 = vmatmul.mubr.msk.f32.gmra.mrb[8].mxu0 %vm348_vm0, %v32768_v47  ;;  %427 = vst.msk [vmem:[#allocation3 + $0x28] sm:$0xff] %vm421_vm1, %v38974_v45  ;;  %429 = vst.msk [vmem:[#allocation3 + $0x38] sm:$0xff] %vm421_vm1, %v38974_v45  ;;  %29562 = vmatpush3.bf16.msra.mxu1 %v29559_v46  ;;  %v38975_v47 = vld [vmem:[#allocation15_spill] sm:$0xff] }
 0x248   : > { %26542 = vmatprep.mubr.msk.f32.mxu0 %vm348_vm0, %v32770_v48  ;;  %430 = vst.msk [vmem:[#allocation3 + $0x40] sm:$0xff] %vm421_vm1, %v38974_v45  ;;  %431 = vst.msk [vmem:[#allocation3 + $0x48] sm:$0xff] %vm421_vm1, %v38974_v45  ;;  %v38976_v48 = vld [vmem:[#allocation16_spill] sm:$0xff] }
 0x249   : > { %432 = vst.msk [vmem:[#allocation3 + $0x50] sm:$0xff] %vm421_vm1, %v38974_v45  ;;  %433 = vst.msk [vmem:[#allocation3 + $0x58] sm:$0xff] %vm421_vm1, %v38974_v45 }
 0x24a   : > { %434 = vst.msk [vmem:[#allocation3 + $0x60] sm:$0xff] %vm421_vm1, %v38974_v45  ;;  %435 = vst.msk [vmem:[#allocation3 + $0x68] sm:$0xff] %vm421_vm1, %v38974_v45 }
 0x24b   : > { %26543 = vmatmul.mubr.msk.f32.gmra.mrb[10].mxu0 %vm348_vm0, %v32776_v49  ;;  %436 = vst.msk [vmem:[#allocation3 + $0x70] sm:$0xff] %vm421_vm1, %v38974_v45  ;;  %437 = vst.msk [vmem:[#allocation3 + $0x78] sm:$0xff] %vm421_vm1, %v38974_v45  ;;  %v38977_v49 = vld [vmem:[#allocation17_spill] sm:$0xff] }
 0x24c   : > { %26545 = vmatprep.mubr.msk.f32.mxu0 %vm348_vm0, %v32778_v50  ;;  %438 = vst.msk [vmem:[#allocation3 + $0x80] sm:$0xff] %vm421_vm1, %v38974_v45  ;;  %439 = vst.msk [vmem:[#allocation3 + $0x88] sm:$0xff] %vm421_vm1, %v38974_v45  ;;  %v38978_v50 = vld [vmem:[#allocation18_spill] sm:$0xff] }
 0x24d   : > { %440 = vst.msk [vmem:[#allocation3 + $0x90] sm:$0xff] %vm421_vm1, %v38974_v45  ;;  %441 = vst.msk [vmem:[#allocation3 + $0x98] sm:$0xff] %vm421_vm1, %v38974_v45 }
 0x24e   : > { %442 = vst.msk [vmem:[#allocation3 + $0xa0] sm:$0xff] %vm421_vm1, %v38974_v45  ;;  %443 = vst.msk [vmem:[#allocation3 + $0xa8] sm:$0xff] %vm421_vm1, %v38974_v45 }
 0x24f   : > { %26546 = vmatmul.mubr.msk.f32.gmra.mrb[12].mxu0 %vm348_vm0, %v32784_v51  ;;  %444 = vst.msk [vmem:[#allocation3 + $0xb0] sm:$0xff] %vm421_vm1, %v38974_v45  ;;  %445 = vst.msk [vmem:[#allocation3 + $0xb8] sm:$0xff] %vm421_vm1, %v38974_v45  ;;  %v38979_v51 = vld [vmem:[#allocation19_spill] sm:$0xff] }
 0x250   : > { %26548 = vmatprep.mubr.msk.f32.mxu0 %vm348_vm0, %v32786_v52  ;;  %446 = vst.msk [vmem:[#allocation3 + $0xc0] sm:$0xff] %vm421_vm1, %v38974_v45  ;;  %447 = vst.msk [vmem:[#allocation3 + $0xc8] sm:$0xff] %vm421_vm1, %v38974_v45  ;;  %v38980_v52 = vld [vmem:[#allocation20_spill] sm:$0xff] }
 0x251   : > { %448 = vst.msk [vmem:[#allocation3 + $0xd0] sm:$0xff] %vm421_vm1, %v38974_v45  ;;  %449 = vst.msk [vmem:[#allocation3 + $0xd8] sm:$0xff] %vm421_vm1, %v38974_v45 }
 0x252   : > { %450 = vst.msk [vmem:[#allocation3 + $0xe0] sm:$0xff] %vm421_vm1, %v38974_v45  ;;  %451 = vst.msk [vmem:[#allocation3 + $0xe8] sm:$0xff] %vm421_vm1, %v38974_v45 }
 0x253   : > { %26549 = vmatmul.mubr.msk.f32.gmra.mrb[14].mxu0 %vm348_vm0, %v32792_v53  ;;  %452 = vst.msk [vmem:[#allocation3 + $0xf0] sm:$0xff] %vm421_vm1, %v38974_v45  ;;  %453 = vst.msk [vmem:[#allocation3 + $0xf8] sm:$0xff] %vm421_vm1, %v38974_v45  ;;  %v38981_v53 = vld [vmem:[#allocation21_spill] sm:$0xff] }
 0x254   : > { %26551 = vmatprep.mubr.msk.f32.mxu0 %vm348_vm0, %v32794_v54  ;;  %454 = vst.msk [vmem:[#allocation3 + $0x100] sm:$0xff] %vm421_vm1, %v38974_v45  ;;  %455 = vst.msk [vmem:[#allocation3 + $0x108] sm:$0xff] %vm421_vm1, %v38974_v45  ;;  %v38982_v54 = vld [vmem:[#allocation22_spill] sm:$0xff] }
 0x255   : > { %456 = vst.msk [vmem:[#allocation3 + $0x110] sm:$0xff] %vm421_vm1, %v38974_v45  ;;  %457 = vst.msk [vmem:[#allocation3 + $0x118] sm:$0xff] %vm421_vm1, %v38974_v45 }
 0x256   : > { %458 = vst.msk [vmem:[#allocation3 + $0x120] sm:$0xff] %vm421_vm1, %v38974_v45  ;;  %459 = vst.msk [vmem:[#allocation3 + $0x128] sm:$0xff] %vm421_vm1, %v38974_v45 }
 0x257   : > { %26552 = vmatmul.mubr.msk.f32.gmra.mrb[16].mxu0 %vm348_vm0, %v32800_v55  ;;  %460 = vst.msk [vmem:[#allocation3 + $0x130] sm:$0xff] %vm421_vm1, %v38974_v45  ;;  %461 = vst.msk [vmem:[#allocation3 + $0x138] sm:$0xff] %vm421_vm1, %v38974_v45  ;;  %v38983_v55 = vld [vmem:[#allocation49_spill] sm:$0xff] }
 0x258   : > { %26554 = vmatprep.mubr.msk.f32.mxu0 %vm348_vm0, %v32802_v56  ;;  %462 = vst.msk [vmem:[#allocation3 + $0x140] sm:$0xff] %vm421_vm1, %v38974_v45  ;;  %463 = vst.msk [vmem:[#allocation3 + $0x148] sm:$0xff] %vm421_vm1, %v38974_v45  ;;  %v3305_v56 = vld [vmem:[#allocation2 + $0x228] sm:$0xff] }
 0x259   : > { %464 = vst.msk [vmem:[#allocation3 + $0x150] sm:$0xff] %vm421_vm1, %v38974_v45  ;;  %465 = vst.msk [vmem:[#allocation3 + $0x158] sm:$0xff] %vm421_vm1, %v38974_v45 }
 0x25a   : > { %466 = vst.msk [vmem:[#allocation3 + $0x160] sm:$0xff] %vm421_vm1, %v38974_v45  ;;  %467 = vst.msk [vmem:[#allocation3 + $0x168] sm:$0xff] %vm421_vm1, %v38974_v45 }
 0x25b   : > { %26555 = vmatmul.mubr.msk.f32.gmra.mrb[18].mxu0 %vm348_vm0, %v32808_v57  ;;  %468 = vst.msk [vmem:[#allocation3 + $0x170] sm:$0xff] %vm421_vm1, %v38974_v45  ;;  %469 = vst.msk [vmem:[#allocation3 + $0x178] sm:$0xff] %vm421_vm1, %v38974_v45  ;;  %v38984_v57 = vld [vmem:[#allocation50_spill] sm:$0xff] }
 0x25c   : > { %26557 = vmatprep.mubr.msk.f32.mxu0 %vm348_vm0, %v32810_v58  ;;  %470 = vst.msk [vmem:[#allocation3 + $0x180] sm:$0xff] %vm421_vm1, %v38974_v45  ;;  %471 = vst.msk [vmem:[#allocation3 + $0x188] sm:$0xff] %vm421_vm1, %v38974_v45  ;;  %v3306_v58 = vld [vmem:[#allocation2 + $0x230] sm:$0xff] }
 0x25d   : > { %472 = vst.msk [vmem:[#allocation3 + $0x190] sm:$0xff] %vm421_vm1, %v38974_v45  ;;  %473 = vst.msk [vmem:[#allocation3 + $0x198] sm:$0xff] %vm421_vm1, %v38974_v45 }
 0x25e   : > { %474 = vst.msk [vmem:[#allocation3 + $0x1a0] sm:$0xff] %vm421_vm1, %v38974_v45  ;;  %475 = vst.msk [vmem:[#allocation3 + $0x1a8] sm:$0xff] %vm421_vm1, %v38974_v45 }
 0x25f   : > { %26558 = vmatmul.mubr.msk.f32.gmra.mrb[20].mxu0 %vm348_vm0, %v32816_v59  ;;  %476 = vst.msk [vmem:[#allocation3 + $0x1b0] sm:$0xff] %vm421_vm1, %v38974_v45  ;;  %477 = vst.msk [vmem:[#allocation3 + $0x1b8] sm:$0xff] %vm421_vm1, %v38974_v45  ;;  %v38985_v59 = vld [vmem:[#allocation25_spill] sm:$0xff] }
 0x260   : > { %26560 = vmatprep.mubr.msk.f32.mxu0 %vm348_vm0, %v32818_v60  ;;  %478 = vst.msk [vmem:[#allocation3 + $0x1c0] sm:$0xff] %vm421_vm1, %v38974_v45  ;;  %479 = vst.msk [vmem:[#allocation3 + $0x1c8] sm:$0xff] %vm421_vm1, %v38974_v45  ;;  %v38986_v60 = vld [vmem:[#allocation26_spill] sm:$0xff] }
 0x261   : > { %480 = vst.msk [vmem:[#allocation3 + $0x1d0] sm:$0xff] %vm421_vm1, %v38974_v45  ;;  %481 = vst.msk [vmem:[#allocation3 + $0x1d8] sm:$0xff] %vm421_vm1, %v38974_v45 }
 0x262   : > { %482 = vst.msk [vmem:[#allocation3 + $0x1e0] sm:$0xff] %vm421_vm1, %v38974_v45  ;;  %483 = vst.msk [vmem:[#allocation3 + $0x1e8] sm:$0xff] %vm421_vm1, %v38974_v45 }
 0x263   : > { %26561 = vmatmul.mubr.msk.f32.gmra.mrb[22].mxu0 %vm348_vm0, %v32824_v61  ;;  %484 = vst.msk [vmem:[#allocation3 + $0x1f0] sm:$0xff] %vm421_vm1, %v38974_v45  ;;  %485 = vst.msk [vmem:[#allocation3 + $0x1f8] sm:$0xff] %vm421_vm1, %v38974_v45  ;;  %v38987_v61 = vld [vmem:[#allocation27_spill] sm:$0xff] }
 0x264   : > { %26563 = vmatprep.mubr.msk.f32.mxu0 %vm348_vm0, %v32826_v62  ;;  %486 = vst.msk [vmem:[#allocation3 + $0x200] sm:$0xff] %vm421_vm1, %v38974_v45  ;;  %487 = vst.msk [vmem:[#allocation3 + $0x208] sm:$0xff] %vm421_vm1, %v38974_v45  ;;  %v38988_v62 = vld [vmem:[#allocation28_spill] sm:$0xff] }
 0x265   : > { %488 = vst.msk [vmem:[#allocation3 + $0x210] sm:$0xff] %vm421_vm1, %v38974_v45  ;;  %489 = vst.msk [vmem:[#allocation3 + $0x218] sm:$0xff] %vm421_vm1, %v38974_v45 }
 0x266   : > { %490 = vst.msk [vmem:[#allocation3 + $0x220] sm:$0xff] %vm421_vm1, %v38974_v45  ;;  %491 = vst.msk [vmem:[#allocation3 + $0x228] sm:$0xff] %vm421_vm1, %v38974_v45 }
 0x267   : > { %26564 = vmatmul.mubr.msk.f32.gmra.mrb[24].mxu0 %vm348_vm0, %v32832_v63  ;;  %492 = vst.msk [vmem:[#allocation3 + $0x230] sm:$0xff] %vm421_vm1, %v38974_v45  ;;  %493 = vst.msk [vmem:[#allocation3 + $0x238] sm:$0xff] %vm421_vm1, %v38974_v45  ;;  %v38989_v63 = vld [vmem:[#allocation29_spill] sm:$0xff] }
 0x268   : > { %26566 = vmatprep.mubr.msk.f32.mxu0 %vm348_vm0, %v32834_v1  ;;  %v38990_v1 = vld [vmem:[#allocation30_spill] sm:$0xff] }
 0x26b   : > { %26567 = vmatmul.mubr.msk.f32.gmra.mrb[26].mxu0 %vm348_vm0, %v32840_v2  ;;  %v38991_v2 = vld [vmem:[#allocation31_spill] sm:$0xff] }
 0x26c   : > { %26569 = vmatprep.mubr.msk.f32.mxu0 %vm348_vm0, %v33158_v25 }
 0x26f   : > { %26570 = vmatmul.mubr.msk.f32.gmra.mrb[28].mxu0 %vm348_vm0, %v33164_v28  ;;  %v4553_v28 = vld [vmem:[#allocation8 + $0x70] sm:$0xff] }
 0x270   : > { %26572 = vmatprep.mubr.msk.f32.mxu0 %vm348_vm0, %v2918_v31  ;;  %v33653_v31 = vld [vmem:[#allocation6] ss:$0 sm:$0xff] }
 0x273   : > { %26573 = vmatmul.mubr.msk.f32.gmra.mrb[30].mxu0 %vm348_vm0, %v2919_v32 }
 0x274   : > { %26577 = vmatprep.mubr.msk.f32.mxu0 %vm348_vm0, %v32854_v8  ;;  %v38992_v8 = vld [vmem:[#allocation32_spill] sm:$0xff] }
 0x277   : > { %26578 = vmatmul.mubr.msk.f32.vlgmr.msra.gmra.mrb[0].mxu0 %vm348_vm0, %v32861_v9  ;;  %v38993_v9 = vld [vmem:[#allocation33_spill] sm:$0xff] }
 0x278   : > { %26626 = vmatpush3.msra.mxu0 %v33306_v40  ;;  %26580 = vmatprep.mubr.msk.f32.mxu0 %vm348_vm0, %v32863_v10  ;;  %v38994_v10 = vld [vmem:[#allocation34_spill] sm:$0xff] }
 0x27b   : > { %26581 = vmatmul.mubr.msk.f32.gmra.mrb[2].mxu0 %vm348_vm0, %v32869_v11  ;;  %v38995_v11 = vld [vmem:[#allocation35_spill] sm:$0xff] }
 0x27c   : > { %26583 = vmatprep.mubr.msk.f32.mxu0 %vm348_vm0, %v32871_v12  ;;  %v38996_v12 = vld [vmem:[#allocation36_spill] sm:$0xff] }
 0x27f   : > { %26584 = vmatmul.mubr.msk.f32.gmra.mrb[4].mxu0 %vm348_vm0, %v32877_v13  ;;  %v38997_v13 = vld [vmem:[#allocation37_spill] sm:$0xff] }
 0x280   : > { %26586 = vmatprep.mubr.msk.f32.mxu0 %vm348_vm0, %v32879_v14  ;;  %v38998_v14 = vld [vmem:[#allocation39_spill] sm:$0xff] }
 0x283   : > { %26587 = vmatmul.mubr.msk.f32.gmra.mrb[6].mxu0 %vm348_vm0, %v32885_v15  ;;  %v38999_v15 = vld [vmem:[#allocation40_spill] sm:$0xff] }
 0x284   : > { %26589 = vmatprep.mubr.msk.f32.mxu0 %vm348_vm0, %v32887_v16  ;;  %v39000_v16 = vld [vmem:[#allocation44_spill] sm:$0xff] }
 0x287   : > { %26590 = vmatmul.mubr.msk.f32.gmra.mrb[8].mxu0 %vm348_vm0, %v32893_v17  ;;  %v39001_v17 = vld [vmem:[#allocation46_spill] sm:$0xff] }
 0x288   : > { %26592 = vmatprep.mubr.msk.f32.mxu0 %vm348_vm0, %v32895_v18  ;;  %v39002_v18 = vld [vmem:[#allocation48_spill] sm:$0xff] }
 0x28b   : > { %26593 = vmatmul.mubr.msk.f32.gmra.mrb[10].mxu0 %vm348_vm0, %v32901_v19  ;;  %v3693_v19 = vld [vmem:[#allocation2 + $0x231] sm:$0xff] }
 0x28c   : > { %26595 = vmatprep.mubr.msk.f32.mxu0 %vm348_vm0, %v32903_v20  ;;  %v4157_v20 = vld [vmem:[#allocation8 + $0x20] sm:$0xff] }
 0x28f   : > { %26596 = vmatmul.mubr.msk.f32.gmra.mrb[12].mxu0 %vm348_vm0, %v32909_v21  ;;  %v4158_v21 = vld [vmem:[#allocation8 + $0x28] sm:$0xff] }
 0x290   : > { %26598 = vmatprep.mubr.msk.f32.mxu0 %vm348_vm0, %v32911_v22  ;;  %v29563_v22 = vpack.c.bf16 %v4158_v21, %v4157_v20 }
 0x292   : > { %29564 = vmatprep.subr.bf16.mxu1 %v29563_v22 }
 0x293   : > { %26599 = vmatmul.mubr.msk.f32.gmra.mrb[14].mxu0 %vm348_vm0, %v32917_v23  ;;  %29566 = vmatpush3.bf16.msra.mxu1 %v29563_v22  ;;  %v4159_v23 = vld [vmem:[#allocation8 + $0x30] sm:$0xff] }
 0x294   : > { %26601 = vmatprep.mubr.msk.f32.mxu0 %vm348_vm0, %v32919_v24  ;;  %v4160_v24 = vld [vmem:[#allocation8 + $0x38] sm:$0xff] }
 0x297   : > { %26602 = vmatmul.mubr.msk.f32.gmra.mrb[16].mxu0 %vm348_vm0, %v32925_v26  ;;  %v29567_v26 = vpack.c.bf16 %v4160_v24, %v4159_v23 }
 0x298   : > { %26604 = vmatprep.mubr.msk.f32.mxu0 %vm348_vm0, %v32927_v27  ;;  %v4121_v27 = vld [vmem:[#allocation3 + $0x7] sm:$0xff] }
 0x299   : > { %29568 = vmatprep.subr.bf16.mxu1 %v29567_v26  ;;  %26691 = vmatprep.mubr.msk.f32.mxu1 %vm421_vm1, %v4121_v27 }
 0x29a   : > { %29570 = vmatpush3.bf16.msra.mxu1 %v29567_v26 }
 0x29b   : > { %26605 = vmatmul.mubr.msk.f32.gmra.mrb[18].mxu0 %vm348_vm0, %v38975_v47 }
 0x29c   : > { %26607 = vmatprep.mubr.msk.f32.mxu0 %vm348_vm0, %v32935_v30  ;;  %v4547_v30 = vld [vmem:[#allocation8 + $0x40] sm:$0xff] }
 0x29f   : > { %26608 = vmatmul.mubr.msk.f32.gmra.mrb[20].mxu0 %vm348_vm0, %v38976_v48 }
 0x2a0   : > { %26610 = vmatprep.mubr.msk.f32.mxu0 %vm348_vm0, %v38977_v49 }
 0x2a3   : > { %26611 = vmatmul.mubr.msk.f32.gmra.mrb[22].mxu0 %vm348_vm0, %v38978_v50 }
 0x2a4   : > { %26613 = vmatprep.mubr.msk.f32.mxu0 %vm348_vm0, %v38979_v51 }
 0x2a7   : > { %26614 = vmatmul.mubr.msk.f32.gmra.mrb[24].mxu0 %vm348_vm0, %v38980_v52 }
 0x2a8   : > { %26616 = vmatprep.mubr.msk.f32.mxu0 %vm348_vm0, %v38981_v53 }
 0x2ab   : > { %26617 = vmatmul.mubr.msk.f32.gmra.mrb[26].mxu0 %vm348_vm0, %v38982_v54 }
 0x2ac   : > { %26619 = vmatprep.mubr.msk.f32.mxu0 %vm348_vm0, %v38983_v55 }
 0x2af   : > { %26620 = vmatmul.mubr.msk.f32.gmra.mrb[28].mxu0 %vm348_vm0, %v38984_v57 }
 0x2b0   : > { %26622 = vmatprep.mubr.msk.f32.mxu0 %vm348_vm0, %v3305_v56 }
 0x2b3   : > { %26623 = vmatmul.mubr.msk.f32.gmra.mrb[30].mxu0 %vm348_vm0, %v3306_v58 }
 0x2b4   : > { %26627 = vmatprep.mubr.msk.f32.mxu0 %vm348_vm0, %v38985_v59 }
 0x2b7   : > { %26628 = vmatmul.mubr.msk.f32.vlgmr.msra.gmra.mrb[0].mxu0 %vm348_vm0, %v38986_v60 }
 0x2b8   : > { %26630 = vmatprep.mubr.msk.f32.mxu0 %vm348_vm0, %v38987_v61 }
 0x2bb   : > { %26631 = vmatmul.mubr.msk.f32.gmra.mrb[2].mxu0 %vm348_vm0, %v38988_v62 }
 0x2bc   : > { %26633 = vmatprep.mubr.msk.f32.mxu0 %vm348_vm0, %v38989_v63 }
 0x2bf   : > { %26634 = vmatmul.mubr.msk.f32.gmra.mrb[4].mxu0 %vm348_vm0, %v38990_v1 }
 0x2c0   : > { %26636 = vmatprep.mubr.msk.f32.mxu0 %vm348_vm0, %v38991_v2 }
 0x2c3   : > { %26637 = vmatmul.mubr.msk.f32.gmra.mrb[6].mxu0 %vm348_vm0, %v38992_v8 }
 0x2c4   : > { %26639 = vmatprep.mubr.msk.f32.mxu0 %vm348_vm0, %v38993_v9 }
 0x2c7   : > { %26640 = vmatmul.mubr.msk.f32.gmra.mrb[8].mxu0 %vm348_vm0, %v38994_v10 }
 0x2c8   : > { %26642 = vmatprep.mubr.msk.f32.mxu0 %vm348_vm0, %v38995_v11 }
 0x2cb   : > { %26643 = vmatmul.mubr.msk.f32.gmra.mrb[10].mxu0 %vm348_vm0, %v38996_v12 }
 0x2cc   : > { %26645 = vmatprep.mubr.msk.f32.mxu0 %vm348_vm0, %v38997_v13 }
 0x2cf   : > { %26646 = vmatmul.mubr.msk.f32.gmra.mrb[12].mxu0 %vm348_vm0, %v38964_v5  ;;  %v4941_v5 = vld [vmem:[#allocation8 + $0x80] sm:$0xff] }
 0x2d0   : > { %26648 = vmatprep.mubr.msk.f32.mxu0 %vm348_vm0, %v38998_v14 }
 0x2d3   : > { %26649 = vmatmul.mubr.msk.f32.gmra.mrb[14].mxu0 %vm348_vm0, %v38999_v15 }
 0x2d4   : > { %26651 = vmatprep.mubr.msk.f32.mxu0 %vm348_vm0, %v38967_v3  ;;  %v29583_v3 = vpack.c.bf16 %v4554_v7, %v4553_v28 }
 0x2d7   : > { %26652 = vmatmul.mubr.msk.f32.gmra.mrb[16].mxu0 %vm348_vm0, %v38968_v4  ;;  %v4550_v4 = vld [vmem:[#allocation8 + $0x58] sm:$0xff] }
 0x2d8   : > { %26654 = vmatprep.mubr.msk.f32.mxu0 %vm348_vm0, %v38969_v29  ;;  %v4122_v29 = vld [vmem:[#allocation3 + $0xf] sm:$0xff] }
 0x2d9   : > { %26692 = vmatmul.mubr.msk.f32.vlgmr.msra.gmra.mrb[0].mxu1 %vm421_vm1, %v4122_v29 }
 0x2db   : > { %26655 = vmatmul.mubr.msk.f32.gmra.mrb[18].mxu0 %vm348_vm0, %v39000_v16 }
 0x2dc   : > { %26657 = vmatprep.mubr.msk.f32.mxu0 %vm348_vm0, %v38971_v37 }
 0x2df   : > { %26658 = vmatmul.mubr.msk.f32.gmra.mrb[20].mxu0 %vm348_vm0, %v33071_v0  ;;  %v3692_v0 = vld [vmem:[#allocation2 + $0x229] sm:$0xff] }
 0x2e0   : > { %26660 = vmatprep.mubr.msk.f32.mxu0 %vm348_vm0, %v39001_v17 }
 0x2e3   : > { %26661 = vmatmul.mubr.msk.f32.gmra.mrb[22].mxu0 %vm348_vm0, %v38973_v39 }
 0x2e4   : > { %26663 = vmatprep.mubr.msk.f32.mxu0 %vm348_vm0, %v33081_v43  ;;  %v4549_v43 = vld [vmem:[#allocation8 + $0x50] sm:$0xff] }
 0x2e5   : > { %v29575_v40 = vpack.c.bf16 %v4550_v4, %v4549_v43 }
 0x2e7   : > { %26664 = vmatmul.mubr.msk.f32.gmra.mrb[24].mxu0 %vm348_vm0, %v39002_v18 }
 0x2e8   : > { %26666 = vmatprep.mubr.msk.f32.mxu0 %vm348_vm0, %v33089_v42  ;;  %v4551_v42 = vld [vmem:[#allocation8 + $0x60] sm:$0xff] }
 0x2eb   : > { %26667 = vmatmul.mubr.msk.f32.gmra.mrb[26].mxu0 %vm348_vm0, %v33095_v6  ;;  %v4552_v6 = vld [vmem:[#allocation8 + $0x68] sm:$0xff] }
 0x2ec   : > { %26669 = vmatprep.mubr.msk.f32.mxu0 %vm348_vm0, %v33294_v36  ;;  %v4548_v36 = vld [vmem:[#allocation8 + $0x48] sm:$0xff]  ;;  %v29579_v25 = vpack.c.bf16 %v4552_v6, %v4551_v42 }
 0x2ed   : > { %v29571_v37 = vpack.c.bf16 %v4548_v36, %v4547_v30 }
 0x2ef   : > { %26670 = vmatmul.mubr.msk.f32.gmra.mrb[28].mxu0 %vm348_vm0, %v33300_v38  ;;  %29572 = vmatprep.subr.bf16.mxu1 %v29571_v37  ;;  %v4942_v38 = vld [vmem:[#allocation8 + $0x88] sm:$0xff] }
 0x2f0   : > { %26672 = vmatprep.mubr.msk.f32.mxu0 %vm348_vm0, %v3692_v0  ;;  %29574 = vmatpush3.bf16.msra.mxu1 %v29571_v37  ;;  %v33650_v39 = vpack.c.bf16 %v4942_v38, %v4941_v5 }
 0x2f1   : > { %29576 = vmatprep.subr.bf16.mxu1 %v29575_v40 }
 0x2f3   : > { %26673 = vmatmul.mubr.msk.f32.gmra.mrb[30].mxu0 %vm348_vm0, %v3693_v19 }
 0x2f4   : > { %29578 = vmatpush3.bf16.msra.mxu1 %v29575_v40 }
 0x2f5   : > { %29580 = vmatprep.subr.bf16.mxu1 %v29579_v25 }
 0x2f8   : > { %29582 = vmatpush3.bf16.msra.mxu1 %v29579_v25 }
 0x2f9   : > { %29584 = vmatprep.subr.bf16.mxu1 %v29583_v3 }
 0x2fc   : > { %29586 = vmatpush3.bf16.msra.mxu1 %v29583_v3 }
 0x2fd   : > { %29588 = vmatprep.subr.bf16.mxu1 %v33650_v39 }
 0x38a   : > { %v26629_v32 = vpop.f32.mrb[0].mxu0 }
 0x38b   : > { %v33656_v33 = vadd.f32 %v26629_v32, %v33653_v31  ;;  %v3858_v34 = vpop.f32.mrb[1].mxu0 }
 0x38c   : > { %v33659_v35 = vadd.f32 %v33653_v31, %v3858_v34 }
 0x38d   : > { %39003 = vst [vmem:[#allocation23_spill] sm:$0xff] %v33656_v33  ;;  %v38477_v41 = vmax.f32 %v33656_v33, 0.0  ;;  %v5338_v33 = vld [vmem:[#allocation8 + $0xd8] sm:$0xff] }
 0x38e   : > { %39004 = vst [vmem:[#allocation24_spill] sm:$0xff] %v33659_v35  ;;  %v38476_v44 = vmax.f32 %v33659_v35, 0.0  ;;  %v26632_v45 = vpop.f32.mrb[2].mxu0  ;;  %v5337_v35 = vld [vmem:[#allocation8 + $0xd0] sm:$0xff] }
 0x38f   : > { %4083 = vst.msk [vmem:[#allocation3 + $0x30] sm:$0xff] %vm421_vm1, %v38477_v41  ;;  %v33667_v46 = vadd.f32 %v26632_v45, %v33653_v31  ;;  %v3868_v47 = vpop.f32.mrb[3].mxu0 }
 0x390   : > { %4082 = vst.msk [vmem:[#allocation3 + $0x28] sm:$0xff] %vm421_vm1, %v38476_v44  ;;  %v33673_v48 = vadd.f32 %v33653_v31, %v3868_v47 }
 0x391   : > { %39005 = vst [vmem:[#allocation38_spill] sm:$0xff] %v33667_v46  ;;  %v38475_v49 = vmax.f32 %v33667_v46, 0.0 }
 0x392   : > { %39006 = vst [vmem:[#allocation41_spill] sm:$0xff] %v33673_v48  ;;  %v38473_v50 = vmax.f32 %v33673_v48, 0.0  ;;  %v26635_v51 = vpop.f32.mrb[4].mxu0  ;;  %v4908_v48 = vld [vmem:[#allocation3 + $0x9] sm:$0xff] }
 0x393   : > { %4085 = vst.msk [vmem:[#allocation3 + $0x50] sm:$0xff] %vm421_vm1, %v38475_v49  ;;  %v33681_v52 = vadd.f32 %v26635_v51, %v33653_v31  ;;  %v3878_v53 = vpop.f32.mrb[5].mxu0 }
 0x394   : > { %4084 = vst.msk [vmem:[#allocation3 + $0x48] sm:$0xff] %vm421_vm1, %v38473_v50  ;;  %v33687_v54 = vadd.f32 %v33653_v31, %v3878_v53 }
 0x395   : > { %39007 = vst [vmem:[#allocation42_spill] sm:$0xff] %v33681_v52  ;;  %v38471_v55 = vmax.f32 %v33681_v52, 0.0 }
 0x396   : > { %39008 = vst [vmem:[#allocation43_spill] sm:$0xff] %v33687_v54  ;;  %v38470_v56 = vmax.f32 %v33687_v54, 0.0  ;;  %v26638_v57 = vpop.f32.mrb[6].mxu0 }
 0x397   : > { %4087 = vst.msk [vmem:[#allocation3 + $0x70] sm:$0xff] %vm421_vm1, %v38471_v55  ;;  %v33695_v58 = vadd.f32 %v26638_v57, %v33653_v31  ;;  %v3888_v59 = vpop.f32.mrb[7].mxu0  ;;  %v33697_v60 = vld [vmem:[#allocation3 + $0x27] sm:$0xff]  ;;  %v33699_v61 = vld [vmem:[#allocation3 + $0x2f] sm:$0xff] }
 0x398   : > { %4086 = vst.msk [vmem:[#allocation3 + $0x68] sm:$0xff] %vm421_vm1, %v38470_v56  ;;  %v33705_v62 = vadd.f32 %v33653_v31, %v3888_v59  ;;  %26694 = vmatprep.mubr.msk.f32.mxu1 %vm421_vm1, %v33697_v60 }
 0x399   : > { %39009 = vst [vmem:[#allocation45_spill] sm:$0xff] %v33695_v58  ;;  %v38469_v63 = vmax.f32 %v33695_v58, 0.0  ;;  %26695 = vmatmul.mubr.msk.f32.gmra.mrb[2].mxu1 %vm421_vm1, %v33699_v61 }
 0x39a   : > { %39010 = vst [vmem:[#allocation47_spill] sm:$0xff] %v33705_v62  ;;  %v38467_v1 = vmax.f32 %v33705_v62, 0.0  ;;  %v26641_v2 = vpop.f32.mrb[8].mxu0 }
 0x39b   : > { %4089 = vst.msk [vmem:[#allocation3 + $0x90] sm:$0xff] %vm421_vm1, %v38469_v63  ;;  %v33717_v8 = vadd.f32 %v26641_v2, %v33653_v31  ;;  %v3898_v9 = vpop.f32.mrb[9].mxu0  ;;  %v33719_v10 = vld [vmem:[#allocation3 + $0x47] sm:$0xff]  ;;  %v33721_v11 = vld [vmem:[#allocation3 + $0x4f] sm:$0xff] }
 0x39c   : > { %4088 = vst.msk [vmem:[#allocation3 + $0x88] sm:$0xff] %vm421_vm1, %v38467_v1  ;;  %v33727_v12 = vadd.f32 %v33653_v31, %v3898_v9  ;;  %26697 = vmatprep.mubr.msk.f32.mxu1 %vm421_vm1, %v33719_v10 }
 0x39d   : > { %39011 = vst [vmem:[#allocation15_spill] sm:$0xff] %v33717_v8  ;;  %v38465_v13 = vmax.f32 %v33717_v8, 0.0  ;;  %26698 = vmatmul.mubr.msk.f32.gmra.mrb[4].mxu1 %vm421_vm1, %v33721_v11 }
 0x39e   : > { %39012 = vst [vmem:[#allocation16_spill] sm:$0xff] %v33727_v12  ;;  %v38464_v14 = vmax.f32 %v33727_v12, 0.0  ;;  %v26644_v15 = vpop.f32.mrb[10].mxu0 }
 0x39f   : > { %4091 = vst.msk [vmem:[#allocation3 + $0xb0] sm:$0xff] %vm421_vm1, %v38465_v13  ;;  %v33739_v16 = vadd.f32 %v26644_v15, %v33653_v31  ;;  %v3908_v17 = vpop.f32.mrb[11].mxu0  ;;  %v33741_v18 = vld [vmem:[#allocation3 + $0x67] sm:$0xff]  ;;  %v33743_v0 = vld [vmem:[#allocation3 + $0x6f] sm:$0xff] }
 0x3a0   : > { %4090 = vst.msk [vmem:[#allocation3 + $0xa8] sm:$0xff] %vm421_vm1, %v38464_v14  ;;  %v33749_v19 = vadd.f32 %v33653_v31, %v3908_v17  ;;  %26700 = vmatprep.mubr.msk.f32.mxu1 %vm421_vm1, %v33741_v18 }
 0x3a1   : > { %39013 = vst [vmem:[#allocation17_spill] sm:$0xff] %v33739_v16  ;;  %v38463_v20 = vmax.f32 %v33739_v16, 0.0  ;;  %26701 = vmatmul.mubr.msk.f32.gmra.mrb[6].mxu1 %vm421_vm1, %v33743_v0 }
 0x3a2   : > { %39014 = vst [vmem:[#allocation18_spill] sm:$0xff] %v33749_v19  ;;  %v38461_v21 = vmax.f32 %v33749_v19, 0.0  ;;  %v26647_v22 = vpop.f32.mrb[12].mxu0 }
 0x3a3   : > { %4093 = vst.msk [vmem:[#allocation3 + $0xd0] sm:$0xff] %vm421_vm1, %v38463_v20  ;;  %v33761_v23 = vadd.f32 %v26647_v22, %v33653_v31  ;;  %v3918_v24 = vpop.f32.mrb[13].mxu0  ;;  %v33763_v26 = vld [vmem:[#allocation3 + $0x87] sm:$0xff]  ;;  %v33765_v27 = vld [vmem:[#allocation3 + $0x8f] sm:$0xff] }
 0x3a4   : > { %4092 = vst.msk [vmem:[#allocation3 + $0xc8] sm:$0xff] %vm421_vm1, %v38461_v21  ;;  %v33771_v29 = vadd.f32 %v33653_v31, %v3918_v24  ;;  %26703 = vmatprep.mubr.msk.f32.mxu1 %vm421_vm1, %v33763_v26 }
 0x3a5   : > { %39015 = vst [vmem:[#allocation19_spill] sm:$0xff] %v33761_v23  ;;  %v38459_v30 = vmax.f32 %v33761_v23, 0.0  ;;  %26704 = vmatmul.mubr.msk.f32.gmra.mrb[8].mxu1 %vm421_vm1, %v33765_v27 }
 0x3a6   : > { %39016 = vst [vmem:[#allocation20_spill] sm:$0xff] %v33771_v29  ;;  %v38458_v36 = vmax.f32 %v33771_v29, 0.0  ;;  %v26650_v37 = vpop.f32.mrb[14].mxu0 }
 0x3a7   : > { %4095 = vst.msk [vmem:[#allocation3 + $0xf0] sm:$0xff] %vm421_vm1, %v38459_v30  ;;  %v33783_v43 = vadd.f32 %v26650_v37, %v33653_v31  ;;  %v3928_v4 = vpop.f32.mrb[15].mxu0  ;;  %v33785_v40 = vld [vmem:[#allocation3 + $0xa7] sm:$0xff]  ;;  %v33787_v42 = vld [vmem:[#allocation3 + $0xaf] sm:$0xff] }
 0x3a8   : > { %4094 = vst.msk [vmem:[#allocation3 + $0xe8] sm:$0xff] %vm421_vm1, %v38458_v36  ;;  %v33793_v6 = vadd.f32 %v33653_v31, %v3928_v4  ;;  %26706 = vmatprep.mubr.msk.f32.mxu1 %vm421_vm1, %v33785_v40 }
 0x3a9   : > { %39017 = vst [vmem:[#allocation21_spill] sm:$0xff] %v33783_v43  ;;  %v38457_v25 = vmax.f32 %v33783_v43, 0.0  ;;  %26707 = vmatmul.mubr.msk.f32.gmra.mrb[10].mxu1 %vm421_vm1, %v33787_v42 }
 0x3aa   : > { %39018 = vst [vmem:[#allocation22_spill] sm:$0xff] %v33793_v6  ;;  %v38455_v28 = vmax.f32 %v33793_v6, 0.0  ;;  %v26653_v7 = vpop.f32.mrb[16].mxu0 }
 0x3ab   : > { %4097 = vst.msk [vmem:[#allocation3 + $0x110] sm:$0xff] %vm421_vm1, %v38457_v25  ;;  %v33805_v3 = vadd.f32 %v26653_v7, %v33653_v31  ;;  %v3938_v5 = vpop.f32.mrb[17].mxu0  ;;  %v33807_v38 = vld [vmem:[#allocation3 + $0xc7] sm:$0xff]  ;;  %v33809_v32 = vld [vmem:[#allocation3 + $0xcf] sm:$0xff] }
 0x3ac   : > { %4096 = vst.msk [vmem:[#allocation3 + $0x108] sm:$0xff] %vm421_vm1, %v38455_v28  ;;  %v33815_v34 = vadd.f32 %v33653_v31, %v3938_v5  ;;  %26709 = vmatprep.mubr.msk.f32.mxu1 %vm421_vm1, %v33807_v38 }
 0x3ad   : > { %39019 = vst [vmem:[#allocation49_spill] sm:$0xff] %v33805_v3  ;;  %v38453_v45 = vmax.f32 %v33805_v3, 0.0  ;;  %26710 = vmatmul.mubr.msk.f32.gmra.mrb[12].mxu1 %vm421_vm1, %v33809_v32 }
 0x3ae   : > { %39020 = vst [vmem:[#allocation50_spill] sm:$0xff] %v33815_v34  ;;  %v38452_v47 = vmax.f32 %v33815_v34, 0.0  ;;  %v26656_v51 = vpop.f32.mrb[18].mxu0 }
 0x3af   : > { %4099 = vst.msk [vmem:[#allocation3 + $0x130] sm:$0xff] %vm421_vm1, %v38453_v45  ;;  %v33827_v53 = vadd.f32 %v26656_v51, %v33653_v31  ;;  %v3948_v57 = vpop.f32.mrb[19].mxu0  ;;  %v33829_v59 = vld [vmem:[#allocation3 + $0xe7] sm:$0xff]  ;;  %v33831_v2 = vld [vmem:[#allocation3 + $0xef] sm:$0xff] }
 0x3b0   : > { %4098 = vst.msk [vmem:[#allocation3 + $0x128] sm:$0xff] %vm421_vm1, %v38452_v47  ;;  %v33837_v9 = vadd.f32 %v33653_v31, %v3948_v57  ;;  %26712 = vmatprep.mubr.msk.f32.mxu1 %vm421_vm1, %v33829_v59 }
 0x3b1   : > { %39021 = vst [vmem:[#allocation25_spill] sm:$0xff] %v33827_v53  ;;  %v38451_v15 = vmax.f32 %v33827_v53, 0.0  ;;  %26713 = vmatmul.mubr.msk.f32.gmra.mrb[14].mxu1 %vm421_vm1, %v33831_v2 }
 0x3b2   : > { %39022 = vst [vmem:[#allocation26_spill] sm:$0xff] %v33837_v9  ;;  %v38450_v17 = vmax.f32 %v33837_v9, 0.0  ;;  %v26659_v22 = vpop.f32.mrb[20].mxu0  ;;  %v34054_v9 = vld [vmem:[#allocation3 + $0xf0] sm:$0xff] }
 0x3b3   : > { %4101 = vst.msk [vmem:[#allocation3 + $0x150] sm:$0xff] %vm421_vm1, %v38451_v15  ;;  %v33849_v24 = vadd.f32 %v26659_v22, %v33653_v31  ;;  %v3958_v37 = vpop.f32.mrb[21].mxu0  ;;  %v33851_v4 = vld [vmem:[#allocation3 + $0x107] sm:$0xff]  ;;  %v33853_v7 = vld [vmem:[#allocation3 + $0x10f] sm:$0xff] }
 0x3b4   : > { %4100 = vst.msk [vmem:[#allocation3 + $0x148] sm:$0xff] %vm421_vm1, %v38450_v17  ;;  %v33859_v5 = vadd.f32 %v33653_v31, %v3958_v37  ;;  %26715 = vmatprep.mubr.msk.f32.mxu1 %vm421_vm1, %v33851_v4  ;;  %v34058_v53 = vld [vmem:[#allocation3 + $0x108] sm:$0xff]  ;;  %v34062_v34 = vld [vmem:[#allocation3 + $0x110] sm:$0xff] }
 0x3b5   : > { %39023 = vst [vmem:[#allocation27_spill] sm:$0xff] %v33849_v24  ;;  %v38454_v51 = vmax.f32 %v33849_v24, 0.0  ;;  %26716 = vmatmul.mubr.msk.f32.gmra.mrb[16].mxu1 %vm421_vm1, %v33853_v7  ;;  %v34022_v24 = vld [vmem:[#allocation3 + $0x70] sm:$0xff] }
 0x3b6   : > { %39024 = vst [vmem:[#allocation28_spill] sm:$0xff] %v33859_v5  ;;  %v38456_v57 = vmax.f32 %v33859_v5, 0.0  ;;  %v26662_v22 = vpop.f32.mrb[22].mxu0  ;;  %v4948_v5 = vld [vmem:[#allocation8 + $0xb8] sm:$0xff]  ;;  %v34070_v6 = vld [vmem:[#allocation3 + $0x130] sm:$0xff] }
 0x3b7   : > { %4103 = vst.msk [vmem:[#allocation3 + $0x170] sm:$0xff] %vm421_vm1, %v38454_v51  ;;  %v33871_v17 = vadd.f32 %v26662_v22, %v33653_v31  ;;  %v3968_v37 = vpop.f32.mrb[23].mxu0  ;;  %v33873_v15 = vld [vmem:[#allocation3 + $0x127] sm:$0xff]  ;;  %v33875_v47 = vld [vmem:[#allocation3 + $0x12f] sm:$0xff] }
 0x3b8   : > { %4102 = vst.msk [vmem:[#allocation3 + $0x168] sm:$0xff] %vm421_vm1, %v38456_v57  ;;  %v33881_v45 = vadd.f32 %v33653_v31, %v3968_v37  ;;  %26718 = vmatprep.mubr.msk.f32.mxu1 %vm421_vm1, %v33873_v15  ;;  %v34066_v3 = vld [vmem:[#allocation3 + $0x128] sm:$0xff] }
 0x3b9   : > { %39025 = vst [vmem:[#allocation29_spill] sm:$0xff] %v33871_v17  ;;  %v38460_v51 = vmax.f32 %v33871_v17, 0.0  ;;  %26719 = vmatmul.mubr.msk.f32.gmra.mrb[18].mxu1 %vm421_vm1, %v33875_v47  ;;  %v4947_v17 = vld [vmem:[#allocation8 + $0xb0] sm:$0xff] }
 0x3ba   : > { %39026 = vst [vmem:[#allocation30_spill] sm:$0xff] %v33881_v45  ;;  %v38462_v22 = vmax.f32 %v33881_v45, 0.0  ;;  %v26665_v28 = vpop.f32.mrb[24].mxu0  ;;  %v34006_v45 = vld [vmem:[#allocation3 + $0x30] sm:$0xff] }
 0x3bb   : > { %4105 = vst.msk [vmem:[#allocation3 + $0x190] sm:$0xff] %vm421_vm1, %v38460_v51  ;;  %v33893_v57 = vadd.f32 %v26665_v28, %v33653_v31  ;;  %v3978_v37 = vpop.f32.mrb[25].mxu0  ;;  %v33895_v25 = vld [vmem:[#allocation3 + $0x147] sm:$0xff]  ;;  %v33897_v36 = vld [vmem:[#allocation3 + $0x14f] sm:$0xff] }
 0x3bc   : > { %4104 = vst.msk [vmem:[#allocation3 + $0x188] sm:$0xff] %vm421_vm1, %v38462_v22  ;;  %v33903_v30 = vadd.f32 %v33653_v31, %v3978_v37  ;;  %26721 = vmatprep.mubr.msk.f32.mxu1 %vm421_vm1, %v33895_v25  ;;  %v34074_v43 = vld [vmem:[#allocation3 + $0x148] sm:$0xff]  ;;  %v34078_v29 = vld [vmem:[#allocation3 + $0x150] sm:$0xff] }
 0x3bd   : > { %39027 = vst [vmem:[#allocation31_spill] sm:$0xff] %v33893_v57  ;;  %v38466_v51 = vmax.f32 %v33893_v57, 0.0  ;;  %26722 = vmatmul.mubr.msk.f32.gmra.mrb[20].mxu1 %vm421_vm1, %v33897_v36 }
 0x3be   : > { %39028 = vst [vmem:[#allocation32_spill] sm:$0xff] %v33903_v30  ;;  %v38468_v28 = vmax.f32 %v33903_v30, 0.0  ;;  %v26668_v21 = vpop.f32.mrb[26].mxu0  ;;  %v34001_v30 = vld [vmem:[#allocation3 + $0x28] sm:$0xff]  ;;  %v34086_v19 = vld [vmem:[#allocation3 + $0x170] sm:$0xff] }
 0x3bf   : > { %4107 = vst.msk [vmem:[#allocation3 + $0x1b0] sm:$0xff] %vm421_vm1, %v38466_v51  ;;  %v33915_v22 = vadd.f32 %v26668_v21, %v33653_v31  ;;  %v3988_v37 = vpop.f32.mrb[27].mxu0  ;;  %v33917_v20 = vld [vmem:[#allocation3 + $0x167] sm:$0xff]  ;;  %v33919_v14 = vld [vmem:[#allocation3 + $0x16f] sm:$0xff]  ;;  %39035 = vst [vmem:[#allocation40_spill] sm:$0xff] %v34086_v19 }
 0x3c0   : > { %4106 = vst.msk [vmem:[#allocation3 + $0x1a8] sm:$0xff] %vm421_vm1, %v38468_v28  ;;  %v33925_v13 = vadd.f32 %v33653_v31, %v3988_v37  ;;  %26724 = vmatprep.mubr.msk.f32.mxu1 %vm421_vm1, %v33917_v20  ;;  %v34082_v23 = vld [vmem:[#allocation3 + $0x168] sm:$0xff] }
 0x3c1   : > { %39029 = vst [vmem:[#allocation33_spill] sm:$0xff] %v33915_v22  ;;  %v38472_v51 = vmax.f32 %v33915_v22, 0.0  ;;  %26725 = vmatmul.mubr.msk.f32.gmra.mrb[22].mxu1 %vm421_vm1, %v33919_v14  ;;  %v4946_v22 = vld [vmem:[#allocation8 + $0xa8] sm:$0xff] }
 0x3c2   : > { %39030 = vst [vmem:[#allocation34_spill] sm:$0xff] %v33925_v13  ;;  %v38474_v21 = vmax.f32 %v33925_v13, 0.0  ;;  %v26671_v1 = vpop.f32.mrb[28].mxu0  ;;  %v4945_v13 = vld [vmem:[#allocation8 + $0xa0] sm:$0xff] }
 0x3c3   : > { %4109 = vst.msk [vmem:[#allocation3 + $0x1d0] sm:$0xff] %vm421_vm1, %v38472_v51  ;;  %v33937_v28 = vadd.f32 %v26671_v1, %v33653_v31  ;;  %v3998_v37 = vpop.f32.mrb[29].mxu0  ;;  %v33939_v63 = vld [vmem:[#allocation3 + $0x187] sm:$0xff]  ;;  %v33941_v56 = vld [vmem:[#allocation3 + $0x18f] sm:$0xff]  ;;  %v29595_v57 = vpack.c.bf16 %v4946_v22, %v4945_v13 }
 0x3c4   : > { %4108 = vst.msk [vmem:[#allocation3 + $0x1c8] sm:$0xff] %vm421_vm1, %v38474_v21  ;;  %v33947_v55 = vadd.f32 %v33653_v31, %v3998_v37  ;;  %26727 = vmatprep.mubr.msk.f32.mxu1 %vm421_vm1, %v33939_v63  ;;  %v34018_v13 = vld [vmem:[#allocation3 + $0x68] sm:$0xff]  ;;  %v34094_v12 = vld [vmem:[#allocation3 + $0x190] sm:$0xff] }
 0x3c5   : > { %39031 = vst [vmem:[#allocation35_spill] sm:$0xff] %v33937_v28  ;;  %v38478_v51 = vmax.f32 %v33937_v28, 0.0  ;;  %26728 = vmatmul.mubr.msk.f32.gmra.mrb[24].mxu1 %vm421_vm1, %v33941_v56  ;;  %v4944_v28 = vld [vmem:[#allocation8 + $0x98] sm:$0xff]  ;;  %39037 = vst [vmem:[#allocation46_spill] sm:$0xff] %v34094_v12 }
 0x3c6   : > { %39032 = vst [vmem:[#allocation36_spill] sm:$0xff] %v33947_v55  ;;  %v38480_v1 = vmax.f32 %v33947_v55, 0.0  ;;  %v26674_v50 = vpop.f32.mrb[30].mxu0  ;;  %v34090_v16 = vld [vmem:[#allocation3 + $0x188] sm:$0xff]  ;;  %v34102_v62 = vld [vmem:[#allocation3 + $0x1b0] sm:$0xff] }
 0x3c7   : > { %4111 = vst.msk [vmem:[#allocation3 + $0x1f0] sm:$0xff] %vm421_vm1, %v38478_v51  ;;  %v33959_v21 = vadd.f32 %v26674_v50, %v33653_v31  ;;  %v4008_v37 = vpop.f32.mrb[31].mxu0  ;;  %v33961_v49 = vld [vmem:[#allocation3 + $0x1a7] sm:$0xff]  ;;  %v33963_v44 = vld [vmem:[#allocation3 + $0x1af] sm:$0xff]  ;;  %39036 = vst [vmem:[#allocation44_spill] sm:$0xff] %v34090_v16 }
 0x3c8   : > { %4110 = vst.msk [vmem:[#allocation3 + $0x1e8] sm:$0xff] %vm421_vm1, %v38480_v1  ;;  %v33969_v41 = vadd.f32 %v33653_v31, %v4008_v37  ;;  %26730 = vmatprep.mubr.msk.f32.mxu1 %vm421_vm1, %v33961_v49  ;;  %v34098_v8 = vld [vmem:[#allocation3 + $0x1a8] sm:$0xff]  ;;  %39039 = vst [vmem:[#allocation51_spill] sm:$0xff] %v34102_v62 }
 0x3c9   : > { %39033 = vst [vmem:[#allocation37_spill] sm:$0xff] %v33959_v21  ;;  %v38482_v51 = vmax.f32 %v33959_v21, 0.0  ;;  %26731 = vmatmul.mubr.msk.f32.gmra.mrb[26].mxu1 %vm421_vm1, %v33963_v44  ;;  %v4514_v21 = vld [vmem:[#allocation3 + $0x8] sm:$0xff]  ;;  %39038 = vst [vmem:[#allocation48_spill] sm:$0xff] %v34098_v8 }
 0x3ca   : > { %39034 = vst [vmem:[#allocation39_spill] sm:$0xff] %v33969_v41  ;;  %v38484_v50 = vmax.f32 %v33969_v41, 0.0  ;;  %v34110_v54 = vld [vmem:[#allocation3 + $0x1d0] sm:$0xff] }
 0x3cb   : > { %4113 = vst.msk [vmem:[#allocation3 + $0x210] sm:$0xff] %vm421_vm1, %v38482_v51  ;;  %v33980_v55 = vld [vmem:[#allocation3 + $0x1c7] sm:$0xff]  ;;  %v33982_v1 = vld [vmem:[#allocation3 + $0x1cf] sm:$0xff]  ;;  %v4943_v51 = vld [vmem:[#allocation8 + $0x90] sm:$0xff] }
 0x3cc   : > { %4112 = vst.msk [vmem:[#allocation3 + $0x208] sm:$0xff] %vm421_vm1, %v38484_v50  ;;  %26733 = vmatprep.mubr.msk.f32.mxu1 %vm421_vm1, %v33980_v55  ;;  %v4515_v50 = vld [vmem:[#allocation3 + $0x10] sm:$0xff]  ;;  %v29591_v41 = vpack.c.bf16 %v4944_v28, %v4943_v51  ;;  %v34010_v51 = vld [vmem:[#allocation3 + $0x48] sm:$0xff]  ;;  %39041 = vst [vmem:[#allocation53_spill] sm:$0xff] %v34110_v54 }
 0x3cd   : > { %26734 = vmatmul.mubr.msk.f32.gmra.mrb[28].mxu1 %vm421_vm1, %v33982_v1  ;;  %v34014_v28 = vld [vmem:[#allocation3 + $0x50] sm:$0xff]  ;;  %v34106_v58 = vld [vmem:[#allocation3 + $0x1c8] sm:$0xff] }
 0x3ce   : > { %39040 = vst [vmem:[#allocation52_spill] sm:$0xff] %v34106_v58  ;;  %v34118_v46 = vld [vmem:[#allocation3 + $0x1f0] sm:$0xff] }
 0x3cf   : > { %v33991_v31 = vld [vmem:[#allocation3 + $0x1e7] sm:$0xff]  ;;  %v33993_v37 = vld [vmem:[#allocation3 + $0x1ef] sm:$0xff]  ;;  %39043 = vst [vmem:[#allocation55_spill] sm:$0xff] %v34118_v46 }
 0x3d0   : > { %26736 = vmatprep.mubr.msk.f32.mxu1 %vm421_vm1, %v33991_v31  ;;  %v34114_v52 = vld [vmem:[#allocation3 + $0x1e8] sm:$0xff] }
 0x3d1   : > { %26737 = vmatmul.mubr.msk.f32.gmra.mrb[30].mxu1 %vm421_vm1, %v33993_v37  ;;  %39042 = vst [vmem:[#allocation54_spill] sm:$0xff] %v34114_v52 }
 0x3d2   : > { %26755 = vmatprep.mubr.msk.f32.mxu1 %vm421_vm1, %v4514_v21  ;;  %v5335_v21 = vld [vmem:[#allocation8 + $0xc0] sm:$0xff] }
 0x3d5   : > { %26756 = vmatmul.mubr.msk.f32.vlgmr.msra.gmra.mrb[0].mxu1 %vm421_vm1, %v4515_v50  ;;  %v5336_v50 = vld [vmem:[#allocation8 + $0xc8] sm:$0xff] }
 0x3d6   : > { %29590 = vmatpush3.bf16.msra.mxu1 %v33650_v39  ;;  %26758 = vmatprep.mubr.msk.f32.mxu1 %vm421_vm1, %v34001_v30  ;;  %v29599_v39 = vpack.c.bf16 %v4948_v5, %v4947_v17  ;;  %v29603_v22 = vpack.c.bf16 %v5336_v50, %v5335_v21  ;;  %v34030_v17 = vld [vmem:[#allocation3 + $0x90] sm:$0xff]  ;;  %v34034_v5 = vld [vmem:[#allocation3 + $0xa8] sm:$0xff] }
 0x3d7   : > { %29592 = vmatprep.subr.bf16.mxu1 %v29591_v41  ;;  %v34042_v21 = vld [vmem:[#allocation3 + $0xc8] sm:$0xff] }
 0x3d8   : > { %v34050_v50 = vld [vmem:[#allocation3 + $0xe8] sm:$0xff] }
 0x3d9   : > { %26759 = vmatmul.mubr.msk.f32.gmra.mrb[2].mxu1 %vm421_vm1, %v34006_v45 }
 0x3da   : > { %26761 = vmatprep.mubr.msk.f32.mxu1 %vm421_vm1, %v34010_v51  ;;  %29594 = vmatpush3.bf16.msra.mxu1 %v29591_v41  ;;  %v34026_v41 = vld [vmem:[#allocation3 + $0x88] sm:$0xff] }
 0x3db   : > { %29596 = vmatprep.subr.bf16.mxu1 %v29595_v57 }
 0x3dd   : > { %26762 = vmatmul.mubr.msk.f32.gmra.mrb[4].mxu1 %vm421_vm1, %v34014_v28 }
 0x3de   : > { %26764 = vmatprep.mubr.msk.f32.mxu1 %vm421_vm1, %v34018_v13  ;;  %29598 = vmatpush3.bf16.msra.mxu1 %v29595_v57  ;;  %v34038_v57 = vld [vmem:[#allocation3 + $0xb0] sm:$0xff] }
 0x3df   : > { %29600 = vmatprep.subr.bf16.mxu1 %v29599_v39 }
 0x3e1   : > { %26765 = vmatmul.mubr.msk.f32.gmra.mrb[6].mxu1 %vm421_vm1, %v34022_v24 }
 0x3e2   : > { %26767 = vmatprep.mubr.msk.f32.mxu1 %vm421_vm1, %v34026_v41  ;;  %29602 = vmatpush3.bf16.msra.mxu1 %v29599_v39  ;;  %v34046_v39 = vld [vmem:[#allocation3 + $0xd0] sm:$0xff] }
 0x3e3   : > { %29604 = vmatprep.subr.bf16.mxu1 %v29603_v22 }
 0x3e5   : > { %26768 = vmatmul.mubr.msk.f32.gmra.mrb[8].mxu1 %vm421_vm1, %v34030_v17 }
 0x3e6   : > { %26770 = vmatprep.mubr.msk.f32.mxu1 %vm421_vm1, %v34034_v5 }
 0x3e9   : > { %26771 = vmatmul.mubr.msk.f32.gmra.mrb[10].mxu1 %vm421_vm1, %v34038_v57 }
 0x3ea   : > { %26773 = vmatprep.mubr.msk.f32.mxu1 %vm421_vm1, %v34042_v21 }
 0x3ed   : > { %26774 = vmatmul.mubr.msk.f32.gmra.mrb[12].mxu1 %vm421_vm1, %v34046_v39 }
 0x3ee   : > { %26776 = vmatprep.mubr.msk.f32.mxu1 %vm421_vm1, %v34050_v50 }
 0x3f1   : > { %26777 = vmatmul.mubr.msk.f32.gmra.mrb[14].mxu1 %vm421_vm1, %v34054_v9 }
 0x3f2   : > { %26779 = vmatprep.mubr.msk.f32.mxu1 %vm421_vm1, %v34058_v53 }
 0x3f5   : > { %26780 = vmatmul.mubr.msk.f32.gmra.mrb[16].mxu1 %vm421_vm1, %v34062_v34 }
 0x3f6   : > { %26782 = vmatprep.mubr.msk.f32.mxu1 %vm421_vm1, %v34066_v3 }
 0x3f9   : > { %26783 = vmatmul.mubr.msk.f32.gmra.mrb[18].mxu1 %vm421_vm1, %v34070_v6 }
 0x3fa   : > { %26785 = vmatprep.mubr.msk.f32.mxu1 %vm421_vm1, %v34074_v43 }
 0x3fd   : > { %26786 = vmatmul.mubr.msk.f32.gmra.mrb[20].mxu1 %vm421_vm1, %v34078_v29 }
 0x3fe   : > { %26788 = vmatprep.mubr.msk.f32.mxu1 %vm421_vm1, %v34082_v23 }
 0x401   : > { %26789 = vmatmul.mubr.msk.f32.gmra.mrb[22].mxu1 %vm421_vm1, %v34086_v19  ;;  %v5341_v19 = vld [vmem:[#allocation8 + $0xf0] sm:$0xff] }
 0x402   : > { %26791 = vmatprep.mubr.msk.f32.mxu1 %vm421_vm1, %v34090_v16  ;;  %v34128_v16 = vld [vmem:[#allocation3 + $0x31] sm:$0xff] }
 0x403   : > { %39044 = vst [vmem:[#allocation56_spill] sm:$0xff] %v34128_v16 }
 0x405   : > { %26792 = vmatmul.mubr.msk.f32.gmra.mrb[24].mxu1 %vm421_vm1, %v34094_v12  ;;  %v5340_v12 = vld [vmem:[#allocation8 + $0xe8] sm:$0xff] }
 0x406   : > { %26794 = vmatprep.mubr.msk.f32.mxu1 %vm421_vm1, %v34098_v8  ;;  %v5339_v8 = vld [vmem:[#allocation8 + $0xe0] sm:$0xff] }
 0x409   : > { %26795 = vmatmul.mubr.msk.f32.gmra.mrb[26].mxu1 %vm421_vm1, %v34102_v62  ;;  %v29607_v62 = vpack.c.bf16 %v5338_v33, %v5337_v35  ;;  %v34132_v33 = vld [vmem:[#allocation3 + $0x49] sm:$0xff] }
 0x40a   : > { %26797 = vmatprep.mubr.msk.f32.mxu1 %vm421_vm1, %v34106_v58  ;;  %v4909_v58 = vld [vmem:[#allocation3 + $0x11] sm:$0xff] }
 0x40d   : > { %26798 = vmatmul.mubr.msk.f32.gmra.mrb[28].mxu1 %vm421_vm1, %v34110_v54  ;;  %v34124_v54 = vld [vmem:[#allocation3 + $0x29] sm:$0xff] }
 0x40e   : > { %26800 = vmatprep.mubr.msk.f32.mxu1 %vm421_vm1, %v34114_v52  ;;  %v29611_v52 = vpack.c.bf16 %v5340_v12, %v5339_v8  ;;  %v34140_v8 = vld [vmem:[#allocation3 + $0x69] sm:$0xff] }
 0x40f   : > { %39045 = vst [vmem:[#allocation57_spill] sm:$0xff] %v34140_v8 }
 0x411   : > { %26801 = vmatmul.mubr.msk.f32.gmra.mrb[30].mxu1 %vm421_vm1, %v34118_v46  ;;  %v5342_v46 = vld [vmem:[#allocation8 + $0xf8] sm:$0xff] }
 0x412   : > { %26819 = vmatprep.mubr.msk.f32.mxu1 %vm421_vm1, %v4908_v48  ;;  %v29615_v35 = vpack.c.bf16 %v5342_v46, %v5341_v19  ;;  %v34136_v48 = vld [vmem:[#allocation3 + $0x51] sm:$0xff]  ;;  %v34148_v46 = vld [vmem:[#allocation3 + $0x89] sm:$0xff] }
 0x413   : > { %39047 = vst [vmem:[#allocation59_spill] sm:$0xff] %v34148_v46  ;;  %v34160_v19 = vld [vmem:[#allocation3 + $0xb1] sm:$0xff] }
 0x414   : > { %39050 = vst [vmem:[#allocation62_spill] sm:$0xff] %v34160_v19 }
 0x415   : > { %26820 = vmatmul.mubr.msk.f32.vlgmr.msra.gmra.mrb[0].mxu1 %vm421_vm1, %v4909_v58  ;;  %v5729_v58 = vld [vmem:[#allocation8 + $0x100] sm:$0xff] }
 0x416   : > { %29606 = vmatpush3.bf16.msra.mxu1 %v29603_v22  ;;  %26822 = vmatprep.mubr.msk.f32.mxu1 %vm421_vm1, %v34124_v54  ;;  %v5730_v22 = vld [vmem:[#allocation8 + $0x108] sm:$0xff] }
 0x417   : > { %29608 = vmatprep.subr.bf16.mxu1 %v29607_v62  ;;  %v29619_v12 = vpack.c.bf16 %v5730_v22, %v5729_v58  ;;  %v34164_v58 = vld [vmem:[#allocation3 + $0xc9] sm:$0xff] }
 0x418   : > { %39051 = vst [vmem:[#allocation63_spill] sm:$0xff] %v34164_v58  ;;  %v34172_v22 = vld [vmem:[#allocation3 + $0xe9] sm:$0xff] }
 0x419   : > { %26823 = vmatmul.mubr.msk.f32.gmra.mrb[2].mxu1 %vm421_vm1, %v34128_v16  ;;  %v34144_v16 = vld [vmem:[#allocation3 + $0x71] sm:$0xff]  ;;  %39053 = vst [vmem:[#allocation65_spill] sm:$0xff] %v34172_v22 }
 0x41a   : > { %26825 = vmatprep.mubr.msk.f32.mxu1 %vm421_vm1, %v34132_v33  ;;  %29610 = vmatpush3.bf16.msra.mxu1 %v29607_v62  ;;  %39046 = vst [vmem:[#allocation58_spill] sm:$0xff] %v34144_v16  ;;  %v34152_v62 = vld [vmem:[#allocation3 + $0x91] sm:$0xff] }
 0x41b   : > { %29612 = vmatprep.subr.bf16.mxu1 %v29611_v52  ;;  %39048 = vst [vmem:[#allocation60_spill] sm:$0xff] %v34152_v62 }
 0x41d   : > { %26826 = vmatmul.mubr.msk.f32.gmra.mrb[4].mxu1 %vm421_vm1, %v34136_v48 }
 0x41e   : > { %26828 = vmatprep.mubr.msk.f32.mxu1 %vm421_vm1, %v34140_v8  ;;  %29614 = vmatpush3.bf16.msra.mxu1 %v29611_v52  ;;  %v34156_v52 = vld [vmem:[#allocation3 + $0xa9] sm:$0xff] }
 0x41f   : > { %29616 = vmatprep.subr.bf16.mxu1 %v29615_v35  ;;  %39049 = vst [vmem:[#allocation61_spill] sm:$0xff] %v34156_v52  ;;  %v5736_v8 = vld [vmem:[#allocation8 + $0x138] sm:$0xff] }
 0x421   : > { %26829 = vmatmul.mubr.msk.f32.gmra.mrb[6].mxu1 %vm421_vm1, %v34144_v16  ;;  %v5734_v16 = vld [vmem:[#allocation8 + $0x128] sm:$0xff] }
 0x422   : > { %26831 = vmatprep.mubr.msk.f32.mxu1 %vm421_vm1, %v34148_v46  ;;  %29618 = vmatpush3.bf16.msra.mxu1 %v29615_v35  ;;  %v34168_v35 = vld [vmem:[#allocation3 + $0xd1] sm:$0xff]  ;;  %v5732_v46 = vld [vmem:[#allocation8 + $0x118] sm:$0xff] }
 0x423   : > { %29620 = vmatprep.subr.bf16.mxu1 %v29619_v12  ;;  %39052 = vst [vmem:[#allocation64_spill] sm:$0xff] %v34168_v35 }
 0x425   : > { %26832 = vmatmul.mubr.msk.f32.gmra.mrb[8].mxu1 %vm421_vm1, %v34152_v62  ;;  %v5731_v62 = vld [vmem:[#allocation8 + $0x110] sm:$0xff] }
 0x426   : > { %26834 = vmatprep.mubr.msk.f32.mxu1 %vm421_vm1, %v34156_v52  ;;  %v34176_v52 = vld [vmem:[#allocation3 + $0xf1] sm:$0xff] }
 0x427   : > { %39054 = vst [vmem:[#allocation66_spill] sm:$0xff] %v34176_v52 }
 0x429   : > { %26835 = vmatmul.mubr.msk.f32.gmra.mrb[10].mxu1 %vm421_vm1, %v34160_v19  ;;  %v34180_v19 = vld [vmem:[#allocation3 + $0x109] sm:$0xff] }
 0x42a   : > { %26837 = vmatprep.mubr.msk.f32.mxu1 %vm421_vm1, %v34164_v58  ;;  %39055 = vst [vmem:[#allocation67_spill] sm:$0xff] %v34180_v19  ;;  %v34184_v58 = vld [vmem:[#allocation3 + $0x111] sm:$0xff] }
 0x42b   : > { %39056 = vst [vmem:[#allocation68_spill] sm:$0xff] %v34184_v58 }
 0x42d   : > { %26838 = vmatmul.mubr.msk.f32.gmra.mrb[12].mxu1 %vm421_vm1, %v34168_v35  ;;  %v34188_v35 = vld [vmem:[#allocation3 + $0x129] sm:$0xff] }
 0x42e   : > { %26840 = vmatprep.mubr.msk.f32.mxu1 %vm421_vm1, %v34172_v22  ;;  %39057 = vst [vmem:[#allocation69_spill] sm:$0xff] %v34188_v35  ;;  %v34192_v22 = vld [vmem:[#allocation3 + $0x131] sm:$0xff] }
 0x42f   : > { %39058 = vst [vmem:[#allocation70_spill] sm:$0xff] %v34192_v22 }
 0x431   : > { %26841 = vmatmul.mubr.msk.f32.gmra.mrb[14].mxu1 %vm421_vm1, %v34176_v52  ;;  %v34196_v52 = vld [vmem:[#allocation3 + $0x149] sm:$0xff] }
 0x432   : > { %26843 = vmatprep.mubr.msk.f32.mxu1 %vm421_vm1, %v34180_v19  ;;  %39059 = vst [vmem:[#allocation71_spill] sm:$0xff] %v34196_v52  ;;  %v34200_v19 = vld [vmem:[#allocation3 + $0x151] sm:$0xff] }
 0x433   : > { %39060 = vst [vmem:[#allocation72_spill] sm:$0xff] %v34200_v19 }
 0x435   : > { %26844 = vmatmul.mubr.msk.f32.gmra.mrb[16].mxu1 %vm421_vm1, %v34184_v58  ;;  %v34204_v58 = vld [vmem:[#allocation3 + $0x169] sm:$0xff] }
 0x436   : > { %26846 = vmatprep.mubr.msk.f32.mxu1 %vm421_vm1, %v34188_v35  ;;  %39061 = vst [vmem:[#allocation73_spill] sm:$0xff] %v34204_v58  ;;  %v34208_v35 = vld [vmem:[#allocation3 + $0x171] sm:$0xff] }
 0x437   : > { %39062 = vst [vmem:[#allocation74_spill] sm:$0xff] %v34208_v35 }
 0x439   : > { %26847 = vmatmul.mubr.msk.f32.gmra.mrb[18].mxu1 %vm421_vm1, %v34192_v22  ;;  %v34212_v22 = vld [vmem:[#allocation3 + $0x189] sm:$0xff] }
 0x43a   : > { %26849 = vmatprep.mubr.msk.f32.mxu1 %vm421_vm1, %v34196_v52  ;;  %39063 = vst [vmem:[#allocation75_spill] sm:$0xff] %v34212_v22  ;;  %v34216_v52 = vld [vmem:[#allocation3 + $0x191] sm:$0xff] }
 0x43b   : > { %39064 = vst [vmem:[#allocation76_spill] sm:$0xff] %v34216_v52 }
 0x43d   : > { %26850 = vmatmul.mubr.msk.f32.gmra.mrb[20].mxu1 %vm421_vm1, %v34200_v19  ;;  %v34220_v19 = vld [vmem:[#allocation3 + $0x1a9] sm:$0xff] }
 0x43e   : > { %26852 = vmatprep.mubr.msk.f32.mxu1 %vm421_vm1, %v34204_v58  ;;  %39065 = vst [vmem:[#allocation77_spill] sm:$0xff] %v34220_v19  ;;  %v34224_v58 = vld [vmem:[#allocation3 + $0x1b1] sm:$0xff] }
 0x43f   : > { %39066 = vst [vmem:[#allocation78_spill] sm:$0xff] %v34224_v58 }
 0x441   : > { %26853 = vmatmul.mubr.msk.f32.gmra.mrb[22].mxu1 %vm421_vm1, %v34208_v35  ;;  %v34228_v35 = vld [vmem:[#allocation3 + $0x1c9] sm:$0xff] }
 0x442   : > { %26855 = vmatprep.mubr.msk.f32.mxu1 %vm421_vm1, %v34212_v22  ;;  %39067 = vst [vmem:[#allocation79_spill] sm:$0xff] %v34228_v35  ;;  %v34232_v22 = vld [vmem:[#allocation3 + $0x1d1] sm:$0xff] }
 0x443   : > { %39068 = vst [vmem:[#allocation80_spill] sm:$0xff] %v34232_v22 }
 0x445   : > { %26856 = vmatmul.mubr.msk.f32.gmra.mrb[24].mxu1 %vm421_vm1, %v34216_v52  ;;  %v34236_v52 = vld [vmem:[#allocation3 + $0x1e9] sm:$0xff] }
 0x446   : > { %26858 = vmatprep.mubr.msk.f32.mxu1 %vm421_vm1, %v34220_v19  ;;  %39069 = vst [vmem:[#allocation81_spill] sm:$0xff] %v34236_v52  ;;  %v34240_v19 = vld [vmem:[#allocation3 + $0x1f1] sm:$0xff] }
 0x447   : > { %39070 = vst [vmem:[#allocation82_spill] sm:$0xff] %v34240_v19 }
 0x449   : > { %26859 = vmatmul.mubr.msk.f32.gmra.mrb[26].mxu1 %vm421_vm1, %v34224_v58  ;;  %v5733_v58 = vld [vmem:[#allocation8 + $0x120] sm:$0xff] }
 0x44a   : > { %26861 = vmatprep.mubr.msk.f32.mxu1 %vm421_vm1, %v34228_v35  ;;  %v29623_v35 = vpack.c.bf16 %v5732_v46, %v5731_v62  ;;  %v6123_v46 = vld [vmem:[#allocation8 + $0x140] sm:$0xff]  ;;  %v6124_v62 = vld [vmem:[#allocation8 + $0x148] sm:$0xff] }
 0x44d   : > { %26862 = vmatmul.mubr.msk.f32.gmra.mrb[28].mxu1 %vm421_vm1, %v34232_v22  ;;  %v5735_v22 = vld [vmem:[#allocation8 + $0x130] sm:$0xff] }
 0x44e   : > { %26864 = vmatprep.mubr.msk.f32.mxu1 %vm421_vm1, %v34236_v52  ;;  %v29627_v52 = vpack.c.bf16 %v5734_v16, %v5733_v58  ;;  %v6125_v16 = vld [vmem:[#allocation8 + $0x150] sm:$0xff]  ;;  %v34376_v58 = vld [vmem:[#allocation3 + $0x210] sm:$0xff] }
 0x451   : > { %26865 = vmatmul.mubr.msk.f32.gmra.mrb[30].mxu1 %vm421_vm1, %v34240_v19 }
 0x452   : > { %26883 = vmatprep.mubr.msk.f32.mxu1 %vm421_vm1, %v33697_v60  ;;  %v29631_v60 = vpack.c.bf16 %v5736_v8, %v5735_v22  ;;  %v39078_v8 = vld [vmem:[#allocation54_spill] sm:$0xff] }
 0x453   : > { %v6521_v22 = vld [vmem:[#allocation8 + $0x198] sm:$0xff] }
 0x455   : > { %26884 = vmatmul.mubr.msk.f32.vlgmr.msra.gmra.mrb[0].mxu1 %vm421_vm1, %v33699_v61  ;;  %v29635_v61 = vpack.c.bf16 %v6124_v62, %v6123_v46  ;;  %v6522_v46 = vld [vmem:[#allocation8 + $0x1a0] sm:$0xff]  ;;  %v6523_v62 = vld [vmem:[#allocation8 + $0x1a8] sm:$0xff] }
 0x456   : > { %29622 = vmatpush3.bf16.msra.mxu1 %v29619_v12  ;;  %26886 = vmatprep.mubr.msk.f32.mxu1 %vm421_vm1, %v33719_v10  ;;  %v34304_v10 = vld [vmem:[#allocation3 + $0x207] sm:$0xff]  ;;  %v39079_v12 = vld [vmem:[#allocation55_spill] sm:$0xff] }
 0x457   : > { %29624 = vmatprep.subr.bf16.mxu1 %v29623_v35 }
 0x459   : > { %26887 = vmatmul.mubr.msk.f32.gmra.mrb[2].mxu1 %vm421_vm1, %v33721_v11  ;;  %v34308_v11 = vld [vmem:[#allocation3 + $0x20f] sm:$0xff] }
 0x45a   : > { %26889 = vmatprep.mubr.msk.f32.mxu1 %vm421_vm1, %v33741_v18  ;;  %29626 = vmatpush3.bf16.msra.mxu1 %v29623_v35  ;;  %v6126_v18 = vld [vmem:[#allocation8 + $0x158] sm:$0xff]  ;;  %v6520_v35 = vld [vmem:[#allocation8 + $0x190] sm:$0xff] }
 0x45b   : > { %29628 = vmatprep.subr.bf16.mxu1 %v29627_v52 }
 0x45d   : > { %26890 = vmatmul.mubr.msk.f32.gmra.mrb[4].mxu1 %vm421_vm1, %v33743_v0  ;;  %v29639_v0 = vpack.c.bf16 %v6126_v18, %v6125_v16  ;;  %v29659_v16 = vpack.c.bf16 %v6523_v62, %v6522_v46  ;;  %v6524_v18 = vld [vmem:[#allocation8 + $0x1b0] sm:$0xff]  ;;  %v39090_v46 = vld [vmem:[#allocation66_spill] sm:$0xff]  ;;  %v39091_v62 = vld [vmem:[#allocation67_spill] sm:$0xff] }
 0x45e   : > { %26892 = vmatprep.mubr.msk.f32.mxu1 %vm421_vm1, %v33763_v26  ;;  %29630 = vmatpush3.bf16.msra.mxu1 %v29627_v52  ;;  %v6127_v26 = vld [vmem:[#allocation8 + $0x160] sm:$0xff] }
 0x45f   : > { %29632 = vmatprep.subr.bf16.mxu1 %v29631_v60  ;;  %v34372_v52 = vld [vmem:[#allocation3 + $0x208] sm:$0xff] }
 0x461   : > { %26893 = vmatmul.mubr.msk.f32.gmra.mrb[6].mxu1 %vm421_vm1, %v33765_v27  ;;  %v6128_v27 = vld [vmem:[#allocation8 + $0x168] sm:$0xff] }
 0x462   : > { %26895 = vmatprep.mubr.msk.f32.mxu1 %vm421_vm1, %v33785_v40  ;;  %29634 = vmatpush3.bf16.msra.mxu1 %v29631_v60  ;;  %v6129_v40 = vld [vmem:[#allocation8 + $0x170] sm:$0xff]  ;;  %v29655_v60 = vpack.c.bf16 %v6521_v22, %v6520_v35  ;;  %v39087_v35 = vld [vmem:[#allocation63_spill] sm:$0xff] }
 0x463   : > { %29636 = vmatprep.subr.bf16.mxu1 %v29635_v61  ;;  %v39088_v22 = vld [vmem:[#allocation64_spill] sm:$0xff] }
 0x465   : > { %26896 = vmatmul.mubr.msk.f32.gmra.mrb[8].mxu1 %vm421_vm1, %v33787_v42  ;;  %v6130_v42 = vld [vmem:[#allocation8 + $0x178] sm:$0xff] }
 0x466   : > { %26898 = vmatprep.mubr.msk.f32.mxu1 %vm421_vm1, %v33807_v38  ;;  %v6519_v38 = vld [vmem:[#allocation8 + $0x188] sm:$0xff] }
 0x469   : > { %26899 = vmatmul.mubr.msk.f32.gmra.mrb[10].mxu1 %vm421_vm1, %v33809_v32 }
 0x46a   : > { %26901 = vmatprep.mubr.msk.f32.mxu1 %vm421_vm1, %v33829_v59  ;;  %v39073_v59 = vld [vmem:[#allocation46_spill] sm:$0xff] }
 0x46d   : > { %26902 = vmatmul.mubr.msk.f32.gmra.mrb[12].mxu1 %vm421_vm1, %v33831_v2  ;;  %v39074_v2 = vld [vmem:[#allocation48_spill] sm:$0xff] }
 0x46e   : > { %26904 = vmatprep.mubr.msk.f32.mxu1 %vm421_vm1, %v33851_v4  ;;  %v39076_v4 = vld [vmem:[#allocation52_spill] sm:$0xff] }
 0x471   : > { %26905 = vmatmul.mubr.msk.f32.gmra.mrb[14].mxu1 %vm421_vm1, %v33853_v7  ;;  %v39077_v7 = vld [vmem:[#allocation53_spill] sm:$0xff] }
 0x472   : > { %26907 = vmatprep.mubr.msk.f32.mxu1 %vm421_vm1, %v33873_v15  ;;  %v39075_v15 = vld [vmem:[#allocation51_spill] sm:$0xff] }
 0x475   : > { %26908 = vmatmul.mubr.msk.f32.gmra.mrb[16].mxu1 %vm421_vm1, %v33875_v47  ;;  %v39072_v47 = vld [vmem:[#allocation44_spill] sm:$0xff] }
 0x476   : > { %26910 = vmatprep.mubr.msk.f32.mxu1 %vm421_vm1, %v33895_v25  ;;  %v6518_v25 = vld [vmem:[#allocation8 + $0x180] sm:$0xff] }
 0x477   : > { %v29651_v32 = vpack.c.bf16 %v6519_v38, %v6518_v25  ;;  %v39084_v25 = vld [vmem:[#allocation60_spill] sm:$0xff]  ;;  %v39085_v38 = vld [vmem:[#allocation61_spill] sm:$0xff] }
 0x479   : > { %26911 = vmatmul.mubr.msk.f32.gmra.mrb[18].mxu1 %vm421_vm1, %v33897_v36  ;;  %v29643_v36 = vpack.c.bf16 %v6128_v27, %v6127_v26  ;;  %v39081_v26 = vld [vmem:[#allocation57_spill] sm:$0xff]  ;;  %v6912_v27 = vld [vmem:[#allocation8 + $0x1c0] sm:$0xff] }
 0x47a   : > { %26913 = vmatprep.mubr.msk.f32.mxu1 %vm421_vm1, %v33917_v20 }
 0x47d   : > { %26914 = vmatmul.mubr.msk.f32.gmra.mrb[20].mxu1 %vm421_vm1, %v33919_v14 }
 0x47e   : > { %26916 = vmatprep.mubr.msk.f32.mxu1 %vm421_vm1, %v33939_v63 }
 0x481   : > { %26917 = vmatmul.mubr.msk.f32.gmra.mrb[22].mxu1 %vm421_vm1, %v33941_v56 }
 0x482   : > { %26919 = vmatprep.mubr.msk.f32.mxu1 %vm421_vm1, %v33961_v49 }
 0x485   : > { %26920 = vmatmul.mubr.msk.f32.gmra.mrb[24].mxu1 %vm421_vm1, %v33963_v44 }
 0x486   : > { %26922 = vmatprep.mubr.msk.f32.mxu1 %vm421_vm1, %v33980_v55 }
 0x489   : > { %26923 = vmatmul.mubr.msk.f32.gmra.mrb[26].mxu1 %vm421_vm1, %v33982_v1 }
 0x48a   : > { %26925 = vmatprep.mubr.msk.f32.mxu1 %vm421_vm1, %v33991_v31 }
 0x48d   : > { %26926 = vmatmul.mubr.msk.f32.gmra.mrb[28].mxu1 %vm421_vm1, %v33993_v37 }
 0x48e   : > { %26928 = vmatprep.mubr.msk.f32.mxu1 %vm421_vm1, %v34304_v10 }
 0x491   : > { %26929 = vmatmul.mubr.msk.f32.gmra.mrb[30].mxu1 %vm421_vm1, %v34308_v11 }
 0x492   : > { %26947 = vmatprep.mubr.msk.f32.mxu1 %vm421_vm1, %v34001_v30  ;;  %v29647_v30 = vpack.c.bf16 %v6130_v42, %v6129_v40  ;;  %v39082_v40 = vld [vmem:[#allocation58_spill] sm:$0xff]  ;;  %v39083_v42 = vld [vmem:[#allocation59_spill] sm:$0xff] }
 0x495   : > { %26948 = vmatmul.mubr.msk.f32.vlgmr.msra.gmra.mrb[0].mxu1 %vm421_vm1, %v34006_v45  ;;  %v39071_v45 = vld [vmem:[#allocation40_spill] sm:$0xff] }
 0x496   : > { %29638 = vmatpush3.bf16.msra.mxu1 %v29635_v61  ;;  %26950 = vmatprep.mubr.msk.f32.mxu1 %vm421_vm1, %v34010_v51  ;;  %v39080_v61 = vld [vmem:[#allocation56_spill] sm:$0xff] }
 0x497   : > { %29640 = vmatprep.subr.bf16.mxu1 %v29639_v0 }
 0x499   : > { %26951 = vmatmul.mubr.msk.f32.gmra.mrb[2].mxu1 %vm421_vm1, %v34014_v28 }
 0x49a   : > { %26953 = vmatprep.mubr.msk.f32.mxu1 %vm421_vm1, %v34018_v13  ;;  %29642 = vmatpush3.bf16.msra.mxu1 %v29639_v0  ;;  %v6525_v0 = vld [vmem:[#allocation8 + $0x1b8] sm:$0xff] }
 0x49b   : > { %29644 = vmatprep.subr.bf16.mxu1 %v29643_v36 }
 0x49d   : > { %26954 = vmatmul.mubr.msk.f32.gmra.mrb[4].mxu1 %vm421_vm1, %v34022_v24 }
 0x49e   : > { %26956 = vmatprep.mubr.msk.f32.mxu1 %vm421_vm1, %v34026_v41  ;;  %29646 = vmatpush3.bf16.msra.mxu1 %v29643_v36  ;;  %v6913_v36 = vld [vmem:[#allocation8 + $0x1c8] sm:$0xff] }
 0x49f   : > { %29648 = vmatprep.subr.bf16.mxu1 %v29647_v30 }
 0x4a1   : > { %26957 = vmatmul.mubr.msk.f32.gmra.mrb[6].mxu1 %vm421_vm1, %v34030_v17 }
 0x4a2   : > { %26959 = vmatprep.mubr.msk.f32.mxu1 %vm421_vm1, %v34034_v5  ;;  %29650 = vmatpush3.bf16.msra.mxu1 %v29647_v30  ;;  %v29667_v30 = vpack.c.bf16 %v6913_v36, %v6912_v27  ;;  %v39097_v27 = vld [vmem:[#allocation73_spill] sm:$0xff]  ;;  %v39098_v36 = vld [vmem:[#allocation74_spill] sm:$0xff] }
 0x4a3   : > { %29652 = vmatprep.subr.bf16.mxu1 %v29651_v32 }
 0x4a5   : > { %26960 = vmatmul.mubr.msk.f32.gmra.mrb[8].mxu1 %vm421_vm1, %v34038_v57 }
 0x4a6   : > { %26962 = vmatprep.mubr.msk.f32.mxu1 %vm421_vm1, %v34042_v21 }
 0x4a9   : > { %26963 = vmatmul.mubr.msk.f32.gmra.mrb[10].mxu1 %vm421_vm1, %v34046_v39 }
 0x4aa   : > { %26965 = vmatprep.mubr.msk.f32.mxu1 %vm421_vm1, %v34050_v50 }
 0x4ad   : > { %26966 = vmatmul.mubr.msk.f32.gmra.mrb[12].mxu1 %vm421_vm1, %v34054_v9 }
 0x4ae   : > { %26968 = vmatprep.mubr.msk.f32.mxu1 %vm421_vm1, %v34058_v53 }
 0x4b1   : > { %26969 = vmatmul.mubr.msk.f32.gmra.mrb[14].mxu1 %vm421_vm1, %v34062_v34 }
 0x4b2   : > { %26971 = vmatprep.mubr.msk.f32.mxu1 %vm421_vm1, %v34066_v3 }
 0x4b5   : > { %26972 = vmatmul.mubr.msk.f32.gmra.mrb[16].mxu1 %vm421_vm1, %v34070_v6 }
 0x4b6   : > { %26974 = vmatprep.mubr.msk.f32.mxu1 %vm421_vm1, %v34074_v43 }
 0x4b9   : > { %26975 = vmatmul.mubr.msk.f32.gmra.mrb[18].mxu1 %vm421_vm1, %v34078_v29 }
 0x4ba   : > { %26977 = vmatprep.mubr.msk.f32.mxu1 %vm421_vm1, %v34082_v23 }
 0x4bd   : > { %26978 = vmatmul.mubr.msk.f32.gmra.mrb[20].mxu1 %vm421_vm1, %v39071_v45 }
 0x4be   : > { %26980 = vmatprep.mubr.msk.f32.mxu1 %vm421_vm1, %v39072_v47 }
 0x4c1   : > { %26981 = vmatmul.mubr.msk.f32.gmra.mrb[22].mxu1 %vm421_vm1, %v39073_v59 }
 0x4c2   : > { %26983 = vmatprep.mubr.msk.f32.mxu1 %vm421_vm1, %v39074_v2 }
 0x4c5   : > { %26984 = vmatmul.mubr.msk.f32.gmra.mrb[24].mxu1 %vm421_vm1, %v39075_v15 }
 0x4c6   : > { %26986 = vmatprep.mubr.msk.f32.mxu1 %vm421_vm1, %v39076_v4 }
 0x4c9   : > { %26987 = vmatmul.mubr.msk.f32.gmra.mrb[26].mxu1 %vm421_vm1, %v39077_v7 }
 0x4ca   : > { %26989 = vmatprep.mubr.msk.f32.mxu1 %vm421_vm1, %v39078_v8 }
 0x4cd   : > { %26990 = vmatmul.mubr.msk.f32.gmra.mrb[28].mxu1 %vm421_vm1, %v39079_v12 }
 0x4ce   : > { %26992 = vmatprep.mubr.msk.f32.mxu1 %vm421_vm1, %v34372_v52 }
 0x4d1   : > { %26993 = vmatmul.mubr.msk.f32.gmra.mrb[30].mxu1 %vm421_vm1, %v34376_v58 }
 0x4d2   : > { %27011 = vmatprep.mubr.msk.f32.mxu1 %vm421_vm1, %v34124_v54  ;;  %v29663_v54 = vpack.c.bf16 %v6525_v0, %v6524_v18  ;;  %v39094_v18 = vld [vmem:[#allocation70_spill] sm:$0xff]  ;;  %v39095_v0 = vld [vmem:[#allocation71_spill] sm:$0xff] }
 0x4d5   : > { %27012 = vmatmul.mubr.msk.f32.vlgmr.msra.gmra.mrb[0].mxu1 %vm421_vm1, %v39080_v61  ;;  %v39092_v61 = vld [vmem:[#allocation68_spill] sm:$0xff] }
 0x4d6   : > { %29654 = vmatpush3.bf16.msra.mxu1 %v29651_v32  ;;  %27014 = vmatprep.mubr.msk.f32.mxu1 %vm421_vm1, %v34132_v33  ;;  %v39086_v32 = vld [vmem:[#allocation62_spill] sm:$0xff] }
 0x4d7   : > { %29656 = vmatprep.subr.bf16.mxu1 %v29655_v60 }
 0x4d9   : > { %27015 = vmatmul.mubr.msk.f32.gmra.mrb[2].mxu1 %vm421_vm1, %v34136_v48 }
 0x4da   : > { %27017 = vmatprep.mubr.msk.f32.mxu1 %vm421_vm1, %v39081_v26  ;;  %29658 = vmatpush3.bf16.msra.mxu1 %v29655_v60  ;;  %v39089_v60 = vld [vmem:[#allocation65_spill] sm:$0xff] }
 0x4db   : > { %29660 = vmatprep.subr.bf16.mxu1 %v29659_v16 }
 0x4dd   : > { %27018 = vmatmul.mubr.msk.f32.gmra.mrb[4].mxu1 %vm421_vm1, %v39082_v40 }
 0x4de   : > { %27020 = vmatprep.mubr.msk.f32.mxu1 %vm421_vm1, %v39083_v42  ;;  %29662 = vmatpush3.bf16.msra.mxu1 %v29659_v16  ;;  %v39093_v16 = vld [vmem:[#allocation69_spill] sm:$0xff] }
 0x4df   : > { %29664 = vmatprep.subr.bf16.mxu1 %v29663_v54 }
 0x4e1   : > { %27021 = vmatmul.mubr.msk.f32.gmra.mrb[6].mxu1 %vm421_vm1, %v39084_v25 }
 0x4e2   : > { %27023 = vmatprep.mubr.msk.f32.mxu1 %vm421_vm1, %v39085_v38  ;;  %29666 = vmatpush3.bf16.msra.mxu1 %v29663_v54  ;;  %v39096_v54 = vld [vmem:[#allocation72_spill] sm:$0xff] }
 0x4e3   : > { %29668 = vmatprep.subr.bf16.mxu1 %v29667_v30 }
 0x4e5   : > { %27024 = vmatmul.mubr.msk.f32.gmra.mrb[8].mxu1 %vm421_vm1, %v39086_v32 }
 0x4e6   : > { %27026 = vmatprep.mubr.msk.f32.mxu1 %vm421_vm1, %v39087_v35  ;;  %v6919_v35 = vld [vmem:[#allocation8 + $0x1f8] sm:$0xff] }
 0x4e9   : > { %27027 = vmatmul.mubr.msk.f32.gmra.mrb[10].mxu1 %vm421_vm1, %v39088_v22  ;;  %v6918_v22 = vld [vmem:[#allocation8 + $0x1f0] sm:$0xff] }
 0x4ea   : > { %27029 = vmatprep.mubr.msk.f32.mxu1 %vm421_vm1, %v39089_v60  ;;  %v6488_v60 = vld [vmem:[#allocation3 + $0x6f] sm:$0xff] }
 0x4ed   : > { %27030 = vmatmul.mubr.msk.f32.gmra.mrb[12].mxu1 %vm421_vm1, %v39090_v46  ;;  %v6917_v46 = vld [vmem:[#allocation8 + $0x1e8] sm:$0xff] }
 0x4ee   : > { %27032 = vmatprep.mubr.msk.f32.mxu1 %vm421_vm1, %v39091_v62  ;;  %v39099_v62 = vld [vmem:[#allocation75_spill] sm:$0xff] }
 0x4f1   : > { %27033 = vmatmul.mubr.msk.f32.gmra.mrb[14].mxu1 %vm421_vm1, %v39092_v61  ;;  %v39100_v61 = vld [vmem:[#allocation76_spill] sm:$0xff] }
 0x4f2   : > { %27035 = vmatprep.mubr.msk.f32.mxu1 %vm421_vm1, %v39093_v16  ;;  %v39101_v16 = vld [vmem:[#allocation77_spill] sm:$0xff] }
 0x4f5   : > { %27036 = vmatmul.mubr.msk.f32.gmra.mrb[16].mxu1 %vm421_vm1, %v39094_v18  ;;  %v39102_v18 = vld [vmem:[#allocation78_spill] sm:$0xff] }
 0x4f6   : > { %27038 = vmatprep.mubr.msk.f32.mxu1 %vm421_vm1, %v39095_v0  ;;  %v39103_v0 = vld [vmem:[#allocation79_spill] sm:$0xff] }
 0x4f9   : > { %27039 = vmatmul.mubr.msk.f32.gmra.mrb[18].mxu1 %vm421_vm1, %v39096_v54  ;;  %v39104_v54 = vld [vmem:[#allocation80_spill] sm:$0xff] }
 0x4fa   : > { %27041 = vmatprep.mubr.msk.f32.mxu1 %vm421_vm1, %v39097_v27  ;;  %v39105_v27 = vld [vmem:[#allocation81_spill] sm:$0xff] }
 0x4fd   : > { %27042 = vmatmul.mubr.msk.f32.gmra.mrb[20].mxu1 %vm421_vm1, %v39098_v36  ;;  %v6916_v36 = vld [vmem:[#allocation8 + $0x1e0] sm:$0xff] }
 0x4fe   : > { %27044 = vmatprep.mubr.msk.f32.mxu1 %vm421_vm1, %v39099_v62  ;;  %v34440_v62 = vld [vmem:[#allocation3 + $0x209] sm:$0xff] }
 0x4ff   : > { %39106 = vst [vmem:[#allocation40_spill] sm:$0xff] %v34440_v62 }
 0x501   : > { %27045 = vmatmul.mubr.msk.f32.gmra.mrb[22].mxu1 %vm421_vm1, %v39100_v61  ;;  %v6915_v61 = vld [vmem:[#allocation8 + $0x1d8] sm:$0xff] }
 0x502   : > { %27047 = vmatprep.mubr.msk.f32.mxu1 %vm421_vm1, %v39101_v16  ;;  %v34444_v16 = vld [vmem:[#allocation3 + $0x211] sm:$0xff] }
 0x503   : > { %39107 = vst [vmem:[#allocation44_spill] sm:$0xff] %v34444_v16 }
 0x505   : > { %27048 = vmatmul.mubr.msk.f32.gmra.mrb[24].mxu1 %vm421_vm1, %v39102_v18  ;;  %v6914_v18 = vld [vmem:[#allocation8 + $0x1d0] sm:$0xff] }
 0x506   : > { %27050 = vmatprep.mubr.msk.f32.mxu1 %vm421_vm1, %v39103_v0  ;;  %v6485_v0 = vld [vmem:[#allocation3 + $0x47] sm:$0xff] }
 0x509   : > { %27051 = vmatmul.mubr.msk.f32.gmra.mrb[26].mxu1 %vm421_vm1, %v39104_v54  ;;  %v29671_v54 = vpack.c.bf16 %v6915_v61, %v6914_v18  ;;  %v29679_v61 = vpack.c.bf16 %v6919_v35, %v6918_v22  ;;  %v6490_v18 = vld [vmem:[#allocation3 + $0x8f] sm:$0xff]  ;;  %v6495_v22 = vld [vmem:[#allocation3 + $0xe7] sm:$0xff] }
 0x50a   : > { %27053 = vmatprep.mubr.msk.f32.mxu1 %vm421_vm1, %v39105_v27  ;;  %v6486_v27 = vld [vmem:[#allocation3 + $0x4f] sm:$0xff] }
 0x50b   : > { %v6494_v35 = vld [vmem:[#allocation3 + $0xcf] sm:$0xff] }
 0x50d   : > { %27054 = vmatmul.mubr.msk.f32.gmra.mrb[28].mxu1 %vm421_vm1, %v34240_v19  ;;  %v6487_v19 = vld [vmem:[#allocation3 + $0x67] sm:$0xff] }
 0x50e   : > { %27056 = vmatprep.mubr.msk.f32.mxu1 %vm421_vm1, %v34440_v62  ;;  %v29675_v62 = vpack.c.bf16 %v6917_v46, %v6916_v36  ;;  %v6492_v46 = vld [vmem:[#allocation3 + $0xaf] sm:$0xff]  ;;  %v6499_v36 = vld [vmem:[#allocation3 + $0x127] sm:$0xff] }
 0x511   : > { %27057 = vmatmul.mubr.msk.f32.gmra.mrb[30].mxu1 %vm421_vm1, %v34444_v16  ;;  %v6489_v16 = vld [vmem:[#allocation3 + $0x87] sm:$0xff] }
 0x512   : > { %27075 = vmatprep.mubr.msk.f32.mxu1 %vm421_vm1, %v6485_v0  ;;  %v7306_v0 = vld [vmem:[#allocation8 + $0x200] sm:$0xff] }
 0x515   : > { %27076 = vmatmul.mubr.msk.f32.vlgmr.msra.gmra.mrb[0].mxu1 %vm421_vm1, %v6486_v27  ;;  %v7307_v27 = vld [vmem:[#allocation8 + $0x208] sm:$0xff] }
 0x516   : > { %29670 = vmatpush3.bf16.msra.mxu1 %v29667_v30  ;;  %27078 = vmatprep.mubr.msk.f32.mxu1 %vm421_vm1, %v6487_v19  ;;  %v6491_v30 = vld [vmem:[#allocation3 + $0xa7] sm:$0xff]  ;;  %v29683_v19 = vpack.c.bf16 %v7307_v27, %v7306_v0  ;;  %v6502_v0 = vld [vmem:[#allocation3 + $0x14f] sm:$0xff] }
 0x517   : > { %29672 = vmatprep.subr.bf16.mxu1 %v29671_v54 }
 0x519   : > { %27079 = vmatmul.mubr.msk.f32.gmra.mrb[2].mxu1 %vm421_vm1, %v6488_v60  ;;  %v6493_v60 = vld [vmem:[#allocation3 + $0xc7] sm:$0xff] }
 0x51a   : > { %27081 = vmatprep.mubr.msk.f32.mxu1 %vm421_vm1, %v6489_v16  ;;  %29674 = vmatpush3.bf16.msra.mxu1 %v29671_v54  ;;  %v6496_v16 = vld [vmem:[#allocation3 + $0xef] sm:$0xff] }
 0x51b   : > { %29676 = vmatprep.subr.bf16.mxu1 %v29675_v62  ;;  %v6498_v54 = vld [vmem:[#allocation3 + $0x10f] sm:$0xff] }
 0x51d   : > { %27082 = vmatmul.mubr.msk.f32.gmra.mrb[4].mxu1 %vm421_vm1, %v6490_v18  ;;  %v6501_v18 = vld [vmem:[#allocation3 + $0x147] sm:$0xff] }
 0x51e   : > { %27084 = vmatprep.mubr.msk.f32.mxu1 %vm421_vm1, %v6491_v30  ;;  %29678 = vmatpush3.bf16.msra.mxu1 %v29675_v62  ;;  %v6497_v62 = vld [vmem:[#allocation3 + $0x107] sm:$0xff]  ;;  %v7311_v30 = vld [vmem:[#allocation8 + $0x228] sm:$0xff] }
 0x51f   : > { %29680 = vmatprep.subr.bf16.mxu1 %v29679_v61 }
 0x521   : > { %27085 = vmatmul.mubr.msk.f32.gmra.mrb[6].mxu1 %vm421_vm1, %v6492_v46  ;;  %v7777_v46 = vld [vmem:[#allocation8 + $0x268] sm:$0xff] }
 0x522   : > { %27087 = vmatprep.mubr.msk.f32.mxu1 %vm421_vm1, %v6493_v60  ;;  %29682 = vmatpush3.bf16.msra.mxu1 %v29679_v61  ;;  %v6500_v61 = vld [vmem:[#allocation3 + $0x12f] sm:$0xff] }
 0x523   : > { %29684 = vmatprep.subr.bf16.mxu1 %v29683_v19 }
 0x525   : > { %27088 = vmatmul.mubr.msk.f32.gmra.mrb[8].mxu1 %vm421_vm1, %v6494_v35 }
 0x526   : > { %27090 = vmatprep.mubr.msk.f32.mxu1 %vm421_vm1, %v6495_v22  ;;  %v7313_v22 = vld [vmem:[#allocation8 + $0x238] sm:$0xff] }
 0x529   : > { %27091 = vmatmul.mubr.msk.f32.gmra.mrb[10].mxu1 %vm421_vm1, %v6496_v16  ;;  %v7778_v16 = vld [vmem:[#allocation8 + $0x270] sm:$0xff] }
 0x52a   : > { %27093 = vmatprep.mubr.msk.f32.mxu1 %vm421_vm1, %v6497_v62  ;;  %v7779_v62 = vld [vmem:[#allocation8 + $0x278] sm:$0xff] }
 0x52d   : > { %27094 = vmatmul.mubr.msk.f32.gmra.mrb[12].mxu1 %vm421_vm1, %v6498_v54 }
 0x52e   : > { %27096 = vmatprep.mubr.msk.f32.mxu1 %vm421_vm1, %v6499_v36  ;;  %v8172_v36 = vld [vmem:[#allocation8 + $0x2b0] sm:$0xff] }
 0x531   : > { %27097 = vmatmul.mubr.msk.f32.gmra.mrb[14].mxu1 %vm421_vm1, %v6500_v61  ;;  %v8173_v61 = vld [vmem:[#allocation8 + $0x2b8] sm:$0xff] }
 0x532   : > { %27099 = vmatprep.mubr.msk.f32.mxu1 %vm421_vm1, %v6501_v18  ;;  %v29727_v18 = vpack.c.bf16 %v8173_v61, %v8172_v36 }
 0x535   : > { %27100 = vmatmul.mubr.msk.f32.gmra.mrb[16].mxu1 %vm421_vm1, %v6502_v0  ;;  %v8560_v0 = vld [vmem:[#allocation8 + $0x2c0] sm:$0xff] }
 0x536   : > { %27102 = vmatprep.mubr.msk.f32.mxu1 %vm421_vm1, %v33917_v20  ;;  %v7774_v20 = vld [vmem:[#allocation8 + $0x250] sm:$0xff] }
 0x539   : > { %27103 = vmatmul.mubr.msk.f32.gmra.mrb[18].mxu1 %vm421_vm1, %v33919_v14  ;;  %v7773_v14 = vld [vmem:[#allocation8 + $0x248] sm:$0xff] }
 0x53a   : > { %27105 = vmatprep.mubr.msk.f32.mxu1 %vm421_vm1, %v33939_v63  ;;  %v7772_v63 = vld [vmem:[#allocation8 + $0x240] sm:$0xff] }
 0x53d   : > { %27106 = vmatmul.mubr.msk.f32.gmra.mrb[20].mxu1 %vm421_vm1, %v33941_v56  ;;  %v6515_v56 = vld [vmem:[#allocation3 + $0x227] sm:$0xff] }
 0x53e   : > { %27108 = vmatprep.mubr.msk.f32.mxu1 %vm421_vm1, %v33961_v49  ;;  %v7308_v49 = vld [vmem:[#allocation8 + $0x210] sm:$0xff] }
 0x541   : > { %27109 = vmatmul.mubr.msk.f32.gmra.mrb[22].mxu1 %vm421_vm1, %v33963_v44  ;;  %v6516_v44 = vld [vmem:[#allocation3 + $0x22f] sm:$0xff] }
 0x542   : > { %27111 = vmatprep.mubr.msk.f32.mxu1 %vm421_vm1, %v33980_v55  ;;  %v7309_v55 = vld [vmem:[#allocation8 + $0x218] sm:$0xff] }
 0x545   : > { %27112 = vmatmul.mubr.msk.f32.gmra.mrb[24].mxu1 %vm421_vm1, %v33982_v1  ;;  %v29699_v1 = vpack.c.bf16 %v7773_v14, %v7772_v63 }
 0x546   : > { %27114 = vmatprep.mubr.msk.f32.mxu1 %vm421_vm1, %v33991_v31  ;;  %v7775_v31 = vld [vmem:[#allocation8 + $0x258] sm:$0xff] }
 0x547   : > { %v29703_v27 = vpack.c.bf16 %v7775_v31, %v7774_v20  ;;  %29700 = vmatprep.subr.bf16.mxu0 %v29699_v1 }
 0x548   : > { %29702 = vmatpush3.bf16.msra.mxu0 %v29699_v1 }
 0x549   : > { %27115 = vmatmul.mubr.msk.f32.gmra.mrb[26].mxu1 %vm421_vm1, %v33993_v37  ;;  %v29687_v37 = vpack.c.bf16 %v7309_v55, %v7308_v49  ;;  %29704 = vmatprep.subr.bf16.mxu0 %v29703_v27  ;;  %v34621_v49 = vld [vmem:[#allocation9] ss:$0 sm:$0xff] }
 0x54a   : > { %27117 = vmatprep.mubr.msk.f32.mxu1 %vm421_vm1, %v34304_v10  ;;  %v7310_v10 = vld [vmem:[#allocation8 + $0x220] sm:$0xff] }
 0x54b   : > { %v29691_v60 = vpack.c.bf16 %v7311_v30, %v7310_v10 }
 0x54c   : > { %29706 = vmatpush3.bf16.msra.mxu0 %v29703_v27 }
 0x54d   : > { %27118 = vmatmul.mubr.msk.f32.gmra.mrb[28].mxu1 %vm421_vm1, %v34308_v11  ;;  %v7776_v11 = vld [vmem:[#allocation8 + $0x260] sm:$0xff] }
 0x54e   : > { %27120 = vmatprep.mubr.msk.f32.mxu1 %vm421_vm1, %v6515_v56  ;;  %v29707_v35 = vpack.c.bf16 %v7777_v46, %v7776_v11  ;;  %v8561_v56 = vld [vmem:[#allocation8 + $0x2c8] sm:$0xff] }
 0x550   : > { %29708 = vmatprep.subr.bf16.mxu0 %v29707_v35 }
 0x551   : > { %27121 = vmatmul.mubr.msk.f32.gmra.mrb[30].mxu1 %vm421_vm1, %v6516_v44  ;;  %29710 = vmatpush3.bf16.msra.mxu0 %v29707_v35  ;;  %v34618_v44 = vpack.c.bf16 %v8561_v56, %v8560_v0 }
 0x552   : > { %27139 = vmatprep.mubr.msk.f32.mxu1 %vm421_vm1, %v34010_v51  ;;  %v7312_v51 = vld [vmem:[#allocation8 + $0x230] sm:$0xff] }
 0x555   : > { %27140 = vmatmul.mubr.msk.f32.vlgmr.msra.gmra.mrb[0].mxu1 %vm421_vm1, %v34014_v28  ;;  %v29695_v28 = vpack.c.bf16 %v7313_v22, %v7312_v51 }
 0x556   : > { %29686 = vmatpush3.bf16.msra.mxu1 %v29683_v19  ;;  %27142 = vmatprep.mubr.msk.f32.mxu1 %vm421_vm1, %v34018_v13  ;;  %v29711_v13 = vpack.c.bf16 %v7779_v62, %v7778_v16  ;;  %v8171_v19 = vld [vmem:[#allocation8 + $0x2a8] sm:$0xff] }
 0x557   : > { %29688 = vmatprep.subr.bf16.mxu1 %v29687_v37 }
 0x558   : > { %29712 = vmatprep.subr.bf16.mxu0 %v29711_v13 }
 0x559   : > { %27143 = vmatmul.mubr.msk.f32.gmra.mrb[2].mxu1 %vm421_vm1, %v34022_v24  ;;  %29714 = vmatpush3.bf16.msra.mxu0 %v29711_v13  ;;  %v39114_v24 = vld [vmem:[#allocation69_spill] sm:$0xff] }
 0x55a   : > { %27145 = vmatprep.mubr.msk.f32.mxu1 %vm421_vm1, %v34026_v41  ;;  %29690 = vmatpush3.bf16.msra.mxu1 %v29687_v37  ;;  %v39115_v41 = vld [vmem:[#allocation70_spill] sm:$0xff] }
 0x55b   : > { %29692 = vmatprep.subr.bf16.mxu1 %v29691_v60 }
 0x55d   : > { %27146 = vmatmul.mubr.msk.f32.gmra.mrb[4].mxu1 %vm421_vm1, %v34030_v17  ;;  %v39116_v17 = vld [vmem:[#allocation71_spill] sm:$0xff] }
 0x55e   : > { %27148 = vmatprep.mubr.msk.f32.mxu1 %vm421_vm1, %v34034_v5  ;;  %29694 = vmatpush3.bf16.msra.mxu1 %v29691_v60  ;;  %v39117_v5 = vld [vmem:[#allocation72_spill] sm:$0xff] }
 0x55f   : > { %29696 = vmatprep.subr.bf16.mxu1 %v29695_v28 }
 0x561   : > { %27149 = vmatmul.mubr.msk.f32.gmra.mrb[6].mxu1 %vm421_vm1, %v34038_v57  ;;  %v39118_v57 = vld [vmem:[#allocation73_spill] sm:$0xff] }
 0x562   : > { %27151 = vmatprep.mubr.msk.f32.mxu1 %vm421_vm1, %v34042_v21  ;;  %29698 = vmatpush3.bf16.msra.mxu1 %v29695_v28  ;;  %v39119_v21 = vld [vmem:[#allocation74_spill] sm:$0xff] }
 0x565   : > { %27152 = vmatmul.mubr.msk.f32.gmra.mrb[8].mxu1 %vm421_vm1, %v34046_v39  ;;  %v39120_v39 = vld [vmem:[#allocation75_spill] sm:$0xff] }
 0x566   : > { %27154 = vmatprep.mubr.msk.f32.mxu1 %vm421_vm1, %v34050_v50  ;;  %v39121_v50 = vld [vmem:[#allocation76_spill] sm:$0xff] }
 0x569   : > { %27155 = vmatmul.mubr.msk.f32.gmra.mrb[10].mxu1 %vm421_vm1, %v34054_v9  ;;  %v39113_v9 = vld [vmem:[#allocation68_spill] sm:$0xff] }
 0x56a   : > { %27157 = vmatprep.mubr.msk.f32.mxu1 %vm421_vm1, %v34058_v53  ;;  %v39112_v53 = vld [vmem:[#allocation67_spill] sm:$0xff] }
 0x56d   : > { %27158 = vmatmul.mubr.msk.f32.gmra.mrb[12].mxu1 %vm421_vm1, %v34062_v34  ;;  %v39111_v34 = vld [vmem:[#allocation66_spill] sm:$0xff] }
 0x56e   : > { %27160 = vmatprep.mubr.msk.f32.mxu1 %vm421_vm1, %v34066_v3  ;;  %v39110_v3 = vld [vmem:[#allocation65_spill] sm:$0xff] }
 0x571   : > { %27161 = vmatmul.mubr.msk.f32.gmra.mrb[14].mxu1 %vm421_vm1, %v34070_v6  ;;  %v39109_v6 = vld [vmem:[#allocation64_spill] sm:$0xff] }
 0x572   : > { %27163 = vmatprep.mubr.msk.f32.mxu1 %vm421_vm1, %v34074_v43  ;;  %v39108_v43 = vld [vmem:[#allocation63_spill] sm:$0xff] }
 0x575   : > { %27164 = vmatmul.mubr.msk.f32.gmra.mrb[16].mxu1 %vm421_vm1, %v34078_v29  ;;  %v6910_v29 = vld [vmem:[#allocation3 + $0x230] sm:$0xff] }
 0x576   : > { %27166 = vmatprep.mubr.msk.f32.mxu1 %vm421_vm1, %v34082_v23  ;;  %v6909_v23 = vld [vmem:[#allocation3 + $0x228] sm:$0xff] }
 0x579   : > { %27167 = vmatmul.mubr.msk.f32.gmra.mrb[18].mxu1 %vm421_vm1, %v39071_v45  ;;  %v39124_v45 = vld [vmem:[#allocation79_spill] sm:$0xff] }
 0x57a   : > { %27169 = vmatprep.mubr.msk.f32.mxu1 %vm421_vm1, %v39072_v47  ;;  %v39125_v47 = vld [vmem:[#allocation80_spill] sm:$0xff] }
 0x57d   : > { %27170 = vmatmul.mubr.msk.f32.gmra.mrb[20].mxu1 %vm421_vm1, %v39073_v59  ;;  %v39126_v59 = vld [vmem:[#allocation81_spill] sm:$0xff] }
 0x57e   : > { %27172 = vmatprep.mubr.msk.f32.mxu1 %vm421_vm1, %v39074_v2  ;;  %v39127_v2 = vld [vmem:[#allocation82_spill] sm:$0xff] }
 0x581   : > { %27173 = vmatmul.mubr.msk.f32.gmra.mrb[22].mxu1 %vm421_vm1, %v39075_v15  ;;  %v39128_v15 = vld [vmem:[#allocation40_spill] sm:$0xff] }
 0x582   : > { %27175 = vmatprep.mubr.msk.f32.mxu1 %vm421_vm1, %v39076_v4  ;;  %v7303_v4 = vld [vmem:[#allocation3 + $0x229] sm:$0xff] }
 0x585   : > { %27176 = vmatmul.mubr.msk.f32.gmra.mrb[24].mxu1 %vm421_vm1, %v39077_v7  ;;  %v39129_v7 = vld [vmem:[#allocation44_spill] sm:$0xff] }
 0x586   : > { %27178 = vmatprep.mubr.msk.f32.mxu1 %vm421_vm1, %v39078_v8  ;;  %v7304_v8 = vld [vmem:[#allocation3 + $0x231] sm:$0xff] }
 0x589   : > { %27179 = vmatmul.mubr.msk.f32.gmra.mrb[26].mxu1 %vm421_vm1, %v39079_v12  ;;  %v7739_v12 = vld [vmem:[#allocation3 + $0x7] sm:$0xff] }
 0x58a   : > { %27181 = vmatprep.mubr.msk.f32.mxu1 %vm421_vm1, %v34372_v52  ;;  %27267 = vmatprep.mubr.msk.f32.mxu0 %vm421_vm1, %v7739_v12  ;;  %v7740_v52 = vld [vmem:[#allocation3 + $0xf] sm:$0xff] }
 0x58b   : > { %27268 = vmatmul.mubr.msk.f32.vlgmr.msra.gmra.mrb[32].mxu0 %vm421_vm1, %v7740_v52 }
 0x58d   : > { %27182 = vmatmul.mubr.msk.f32.gmra.mrb[28].mxu1 %vm421_vm1, %v34376_v58  ;;  %v8166_v58 = vld [vmem:[#allocation8 + $0x280] sm:$0xff] }
 0x58e   : > { %27184 = vmatprep.mubr.msk.f32.mxu1 %vm421_vm1, %v6909_v23 }
 0x591   : > { %27185 = vmatmul.mubr.msk.f32.gmra.mrb[30].mxu1 %vm421_vm1, %v6910_v29 }
 0x592   : > { %27203 = vmatprep.mubr.msk.f32.mxu1 %vm421_vm1, %v34132_v33  ;;  %v39122_v33 = vld [vmem:[#allocation77_spill] sm:$0xff] }
 0x595   : > { %27204 = vmatmul.mubr.msk.f32.vlgmr.msra.gmra.mrb[0].mxu1 %vm421_vm1, %v34136_v48  ;;  %v39123_v48 = vld [vmem:[#allocation78_spill] sm:$0xff] }
 0x596   : > { %27206 = vmatprep.mubr.msk.f32.mxu1 %vm421_vm1, %v39081_v26  ;;  %v8167_v26 = vld [vmem:[#allocation8 + $0x288] sm:$0xff] }
 0x599   : > { %27207 = vmatmul.mubr.msk.f32.gmra.mrb[2].mxu1 %vm421_vm1, %v39082_v40  ;;  %v29715_v40 = vpack.c.bf16 %v8167_v26, %v8166_v58 }
 0x59a   : > { %27209 = vmatprep.mubr.msk.f32.mxu1 %vm421_vm1, %v39083_v42  ;;  %v8168_v42 = vld [vmem:[#allocation8 + $0x290] sm:$0xff] }
 0x59b   : > { %29716 = vmatprep.subr.bf16.mxu0 %v29715_v40 }
 0x59c   : > { %29718 = vmatpush3.bf16.msra.mxu0 %v29715_v40 }
 0x59d   : > { %27210 = vmatmul.mubr.msk.f32.gmra.mrb[4].mxu1 %vm421_vm1, %v39084_v25  ;;  %v8169_v25 = vld [vmem:[#allocation8 + $0x298] sm:$0xff] }
 0x59e   : > { %27212 = vmatprep.mubr.msk.f32.mxu1 %vm421_vm1, %v39085_v38  ;;  %v29719_v38 = vpack.c.bf16 %v8169_v25, %v8168_v42 }
 0x5a0   : > { %29720 = vmatprep.subr.bf16.mxu0 %v29719_v38 }
 0x5a1   : > { %27213 = vmatmul.mubr.msk.f32.gmra.mrb[6].mxu1 %vm421_vm1, %v39086_v32  ;;  %29722 = vmatpush3.bf16.msra.mxu0 %v29719_v38  ;;  %v8170_v32 = vld [vmem:[#allocation8 + $0x2a0] sm:$0xff] }
 0x5a2   : > { %27215 = vmatprep.mubr.msk.f32.mxu1 %vm421_vm1, %v39108_v43  ;;  %v29723_v54 = vpack.c.bf16 %v8171_v19, %v8170_v32 }
 0x5a4   : > { %29724 = vmatprep.subr.bf16.mxu0 %v29723_v54 }
 0x5a5   : > { %27216 = vmatmul.mubr.msk.f32.gmra.mrb[8].mxu1 %vm421_vm1, %v39109_v6  ;;  %29726 = vmatpush3.bf16.msra.mxu0 %v29723_v54 }
 0x5a6   : > { %27218 = vmatprep.mubr.msk.f32.mxu1 %vm421_vm1, %v39110_v3  ;;  %29728 = vmatprep.subr.bf16.mxu0 %v29727_v18 }
 0x5a9   : > { %27219 = vmatmul.mubr.msk.f32.gmra.mrb[10].mxu1 %vm421_vm1, %v39111_v34  ;;  %29730 = vmatpush3.bf16.msra.mxu0 %v29727_v18 }
 0x5aa   : > { %27221 = vmatprep.mubr.msk.f32.mxu1 %vm421_vm1, %v39112_v53  ;;  %29732 = vmatprep.subr.bf16.mxu0 %v34618_v44 }
 0x5ad   : > { %27222 = vmatmul.mubr.msk.f32.gmra.mrb[12].mxu1 %vm421_vm1, %v39113_v9 }
 0x5ae   : > { %27224 = vmatprep.mubr.msk.f32.mxu1 %vm421_vm1, %v39114_v24 }
 0x5b1   : > { %27225 = vmatmul.mubr.msk.f32.gmra.mrb[14].mxu1 %vm421_vm1, %v39115_v41 }
 0x5b2   : > { %27227 = vmatprep.mubr.msk.f32.mxu1 %vm421_vm1, %v39116_v17 }
 0x5b5   : > { %27228 = vmatmul.mubr.msk.f32.gmra.mrb[16].mxu1 %vm421_vm1, %v39117_v5 }
 0x5b6   : > { %27230 = vmatprep.mubr.msk.f32.mxu1 %vm421_vm1, %v39118_v57 }
 0x5b9   : > { %27231 = vmatmul.mubr.msk.f32.gmra.mrb[18].mxu1 %vm421_vm1, %v39119_v21 }
 0x5ba   : > { %27233 = vmatprep.mubr.msk.f32.mxu1 %vm421_vm1, %v39120_v39 }
 0x5bd   : > { %27234 = vmatmul.mubr.msk.f32.gmra.mrb[20].mxu1 %vm421_vm1, %v39121_v50 }
 0x5be   : > { %27236 = vmatprep.mubr.msk.f32.mxu1 %vm421_vm1, %v39122_v33 }
 0x5c1   : > { %27237 = vmatmul.mubr.msk.f32.gmra.mrb[22].mxu1 %vm421_vm1, %v39123_v48 }
 0x5c2   : > { %27239 = vmatprep.mubr.msk.f32.mxu1 %vm421_vm1, %v39124_v45 }
 0x5c5   : > { %27240 = vmatmul.mubr.msk.f32.gmra.mrb[24].mxu1 %vm421_vm1, %v39125_v47 }
 0x5c6   : > { %27242 = vmatprep.mubr.msk.f32.mxu1 %vm421_vm1, %v39126_v59 }
 0x5c9   : > { %27243 = vmatmul.mubr.msk.f32.gmra.mrb[26].mxu1 %vm421_vm1, %v39127_v2 }
 0x5ca   : > { %27245 = vmatprep.mubr.msk.f32.mxu1 %vm421_vm1, %v39128_v15 }
 0x5cd   : > { %27246 = vmatmul.mubr.msk.f32.gmra.mrb[28].mxu1 %vm421_vm1, %v39129_v7 }
 0x5ce   : > { %27248 = vmatprep.mubr.msk.f32.mxu1 %vm421_vm1, %v7303_v4 }
 0x5d1   : > { %27249 = vmatmul.mubr.msk.f32.gmra.mrb[30].mxu1 %vm421_vm1, %v7304_v8 }
 0x668   : > { %v27205_v55 = vpop.f32.mrb[0].mxu1 }
 0x669   : > { %v30315_v63 = vadd.f32 %v27205_v55, %v34621_v49  ;;  %v7476_v14 = vpop.f32.mrb[1].mxu1 }
 0x66a   : > { %v30316_v20 = vadd.f32 %v34621_v49, %v7476_v14 }
 0x66b   : > { %v7668_v1 = vmax.f32 %v30315_v63, 0.0 }
 0x66c   : > { %v7667_v31 = vmax.f32 %v30316_v20, 0.0  ;;  %v27208_v37 = vpop.f32.mrb[2].mxu1 }
 0x66d   : > { %7700 = vst.msk [vmem:[#allocation3 + $0x30] sm:$0xff] %vm421_vm1, %v7668_v1  ;;  %v30317_v10 = vadd.f32 %v27208_v37, %v34621_v49  ;;  %v7486_v27 = vpop.f32.mrb[3].mxu1 }
 0x66e   : > { %7699 = vst.msk [vmem:[#allocation3 + $0x28] sm:$0xff] %vm421_vm1, %v7667_v31  ;;  %v30318_v30 = vadd.f32 %v34621_v49, %v7486_v27 }
 0x66f   : > { %v7670_v11 = vmax.f32 %v30317_v10, 0.0 }
 0x670   : > { %v7669_v46 = vmax.f32 %v30318_v30, 0.0  ;;  %v27211_v60 = vpop.f32.mrb[4].mxu1 }
 0x671   : > { %7702 = vst.msk [vmem:[#allocation3 + $0x50] sm:$0xff] %vm421_vm1, %v7670_v11  ;;  %v30319_v51 = vadd.f32 %v27211_v60, %v34621_v49  ;;  %v7496_v35 = vpop.f32.mrb[5].mxu1 }
 0x672   : > { %7701 = vst.msk [vmem:[#allocation3 + $0x48] sm:$0xff] %vm421_vm1, %v7669_v46  ;;  %v30320_v22 = vadd.f32 %v34621_v49, %v7496_v35 }
 0x673   : > { %v7672_v16 = vmax.f32 %v30319_v51, 0.0 }
 0x674   : > { %v7671_v62 = vmax.f32 %v30320_v22, 0.0  ;;  %v27214_v28 = vpop.f32.mrb[6].mxu1 }
 0x675   : > { %7704 = vst.msk [vmem:[#allocation3 + $0x70] sm:$0xff] %vm421_vm1, %v7672_v16  ;;  %v30321_v13 = vadd.f32 %v27214_v28, %v34621_v49  ;;  %v7506_v23 = vpop.f32.mrb[7].mxu1  ;;  %v34635_v29 = vld [vmem:[#allocation3 + $0x27] sm:$0xff]  ;;  %v34637_v43 = vld [vmem:[#allocation3 + $0x2f] sm:$0xff] }
 0x676   : > { %7703 = vst.msk [vmem:[#allocation3 + $0x68] sm:$0xff] %vm421_vm1, %v7671_v62  ;;  %v30322_v6 = vadd.f32 %v34621_v49, %v7506_v23  ;;  %27270 = vmatprep.mubr.msk.f32.mxu0 %vm421_vm1, %v34635_v29 }
 0x677   : > { %v7674_v3 = vmax.f32 %v30321_v13, 0.0  ;;  %27271 = vmatmul.mubr.msk.f32.gmra.mrb[34].mxu0 %vm421_vm1, %v34637_v43 }
 0x678   : > { %v7673_v34 = vmax.f32 %v30322_v6, 0.0  ;;  %v27217_v53 = vpop.f32.mrb[8].mxu1 }
 0x679   : > { %7706 = vst.msk [vmem:[#allocation3 + $0x90] sm:$0xff] %vm421_vm1, %v7674_v3  ;;  %v30323_v9 = vadd.f32 %v27217_v53, %v34621_v49  ;;  %v7516_v24 = vpop.f32.mrb[9].mxu1  ;;  %v34647_v41 = vld [vmem:[#allocation3 + $0x47] sm:$0xff]  ;;  %v34649_v17 = vld [vmem:[#allocation3 + $0x4f] sm:$0xff] }
 0x67a   : > { %7705 = vst.msk [vmem:[#allocation3 + $0x88] sm:$0xff] %vm421_vm1, %v7673_v34  ;;  %v30324_v5 = vadd.f32 %v34621_v49, %v7516_v24  ;;  %27273 = vmatprep.mubr.msk.f32.mxu0 %vm421_vm1, %v34647_v41 }
 0x67b   : > { %v7676_v57 = vmax.f32 %v30323_v9, 0.0  ;;  %27274 = vmatmul.mubr.msk.f32.gmra.mrb[36].mxu0 %vm421_vm1, %v34649_v17 }
 0x67c   : > { %v7675_v21 = vmax.f32 %v30324_v5, 0.0  ;;  %v27220_v39 = vpop.f32.mrb[10].mxu1 }
 0x67d   : > { %7708 = vst.msk [vmem:[#allocation3 + $0xb0] sm:$0xff] %vm421_vm1, %v7676_v57  ;;  %v30325_v50 = vadd.f32 %v27220_v39, %v34621_v49  ;;  %v7526_v33 = vpop.f32.mrb[11].mxu1  ;;  %v34659_v48 = vld [vmem:[#allocation3 + $0x67] sm:$0xff]  ;;  %v34661_v45 = vld [vmem:[#allocation3 + $0x6f] sm:$0xff] }
 0x67e   : > { %7707 = vst.msk [vmem:[#allocation3 + $0xa8] sm:$0xff] %vm421_vm1, %v7675_v21  ;;  %v30326_v47 = vadd.f32 %v34621_v49, %v7526_v33  ;;  %27276 = vmatprep.mubr.msk.f32.mxu0 %vm421_vm1, %v34659_v48 }
 0x67f   : > { %v7678_v59 = vmax.f32 %v30325_v50, 0.0  ;;  %27277 = vmatmul.mubr.msk.f32.gmra.mrb[38].mxu0 %vm421_vm1, %v34661_v45 }
 0x680   : > { %v7677_v2 = vmax.f32 %v30326_v47, 0.0  ;;  %v27223_v15 = vpop.f32.mrb[12].mxu1 }
 0x681   : > { %7710 = vst.msk [vmem:[#allocation3 + $0xd0] sm:$0xff] %vm421_vm1, %v7678_v59  ;;  %v30327_v4 = vadd.f32 %v27223_v15, %v34621_v49  ;;  %v7536_v7 = vpop.f32.mrb[13].mxu1  ;;  %v34671_v8 = vld [vmem:[#allocation3 + $0x87] sm:$0xff]  ;;  %v34673_v12 = vld [vmem:[#allocation3 + $0x8f] sm:$0xff] }
 0x682   : > { %7709 = vst.msk [vmem:[#allocation3 + $0xc8] sm:$0xff] %vm421_vm1, %v7677_v2  ;;  %v30328_v52 = vadd.f32 %v34621_v49, %v7536_v7  ;;  %27279 = vmatprep.mubr.msk.f32.mxu0 %vm421_vm1, %v34671_v8 }
 0x683   : > { %v7680_v58 = vmax.f32 %v30327_v4, 0.0  ;;  %27280 = vmatmul.mubr.msk.f32.gmra.mrb[40].mxu0 %vm421_vm1, %v34673_v12 }
 0x684   : > { %v7679_v26 = vmax.f32 %v30328_v52, 0.0  ;;  %v27226_v40 = vpop.f32.mrb[14].mxu1 }
 0x685   : > { %7712 = vst.msk [vmem:[#allocation3 + $0xf0] sm:$0xff] %vm421_vm1, %v7680_v58  ;;  %v30329_v42 = vadd.f32 %v27226_v40, %v34621_v49  ;;  %v7546_v25 = vpop.f32.mrb[15].mxu1  ;;  %v34683_v38 = vld [vmem:[#allocation3 + $0xa7] sm:$0xff]  ;;  %v34685_v32 = vld [vmem:[#allocation3 + $0xaf] sm:$0xff] }
 0x686   : > { %7711 = vst.msk [vmem:[#allocation3 + $0xe8] sm:$0xff] %vm421_vm1, %v7679_v26  ;;  %v30330_v19 = vadd.f32 %v34621_v49, %v7546_v25  ;;  %27282 = vmatprep.mubr.msk.f32.mxu0 %vm421_vm1, %v34683_v38 }
 0x687   : > { %v7682_v54 = vmax.f32 %v30329_v42, 0.0  ;;  %27283 = vmatmul.mubr.msk.f32.gmra.mrb[42].mxu0 %vm421_vm1, %v34685_v32 }
 0x688   : > { %v7681_v36 = vmax.f32 %v30330_v19, 0.0  ;;  %v27229_v61 = vpop.f32.mrb[16].mxu1 }
 0x689   : > { %7714 = vst.msk [vmem:[#allocation3 + $0x110] sm:$0xff] %vm421_vm1, %v7682_v54  ;;  %v30331_v18 = vadd.f32 %v27229_v61, %v34621_v49  ;;  %v7556_v0 = vpop.f32.mrb[17].mxu1  ;;  %v34695_v56 = vld [vmem:[#allocation3 + $0xc7] sm:$0xff]  ;;  %v34697_v55 = vld [vmem:[#allocation3 + $0xcf] sm:$0xff] }
 0x68a   : > { %7713 = vst.msk [vmem:[#allocation3 + $0x108] sm:$0xff] %vm421_vm1, %v7681_v36  ;;  %v30332_v63 = vadd.f32 %v34621_v49, %v7556_v0  ;;  %27285 = vmatprep.mubr.msk.f32.mxu0 %vm421_vm1, %v34695_v56 }
 0x68b   : > { %v7684_v14 = vmax.f32 %v30331_v18, 0.0  ;;  %27286 = vmatmul.mubr.msk.f32.gmra.mrb[44].mxu0 %vm421_vm1, %v34697_v55 }
 0x68c   : > { %v7683_v20 = vmax.f32 %v30332_v63, 0.0  ;;  %v27232_v1 = vpop.f32.mrb[18].mxu1 }
 0x68d   : > { %7716 = vst.msk [vmem:[#allocation3 + $0x130] sm:$0xff] %vm421_vm1, %v7684_v14  ;;  %v30333_v31 = vadd.f32 %v27232_v1, %v34621_v49  ;;  %v7566_v37 = vpop.f32.mrb[19].mxu1  ;;  %v34707_v10 = vld [vmem:[#allocation3 + $0xe7] sm:$0xff]  ;;  %v34709_v27 = vld [vmem:[#allocation3 + $0xef] sm:$0xff] }
 0x68e   : > { %7715 = vst.msk [vmem:[#allocation3 + $0x128] sm:$0xff] %vm421_vm1, %v7683_v20  ;;  %v30334_v30 = vadd.f32 %v34621_v49, %v7566_v37  ;;  %27288 = vmatprep.mubr.msk.f32.mxu0 %vm421_vm1, %v34707_v10 }
 0x68f   : > { %v7686_v11 = vmax.f32 %v30333_v31, 0.0  ;;  %27289 = vmatmul.mubr.msk.f32.gmra.mrb[46].mxu0 %vm421_vm1, %v34709_v27 }
 0x690   : > { %v7685_v46 = vmax.f32 %v30334_v30, 0.0  ;;  %v27235_v60 = vpop.f32.mrb[20].mxu1 }
 0x691   : > { %7718 = vst.msk [vmem:[#allocation3 + $0x150] sm:$0xff] %vm421_vm1, %v7686_v11  ;;  %v30335_v51 = vadd.f32 %v27235_v60, %v34621_v49  ;;  %v7576_v35 = vpop.f32.mrb[21].mxu1  ;;  %v34719_v22 = vld [vmem:[#allocation3 + $0x107] sm:$0xff]  ;;  %v34721_v16 = vld [vmem:[#allocation3 + $0x10f] sm:$0xff] }
 0x692   : > { %7717 = vst.msk [vmem:[#allocation3 + $0x148] sm:$0xff] %vm421_vm1, %v7685_v46  ;;  %v30336_v62 = vadd.f32 %v34621_v49, %v7576_v35  ;;  %27291 = vmatprep.mubr.msk.f32.mxu0 %vm421_vm1, %v34719_v22 }
 0x693   : > { %v7688_v28 = vmax.f32 %v30335_v51, 0.0  ;;  %27292 = vmatmul.mubr.msk.f32.gmra.mrb[48].mxu0 %vm421_vm1, %v34721_v16 }
 0x694   : > { %v7687_v13 = vmax.f32 %v30336_v62, 0.0  ;;  %v27238_v23 = vpop.f32.mrb[22].mxu1  ;;  %v8133_v62 = vld [vmem:[#allocation3 + $0x8] sm:$0xff] }
 0x695   : > { %7720 = vst.msk [vmem:[#allocation3 + $0x170] sm:$0xff] %vm421_vm1, %v7688_v28  ;;  %v30337_v6 = vadd.f32 %v27238_v23, %v34621_v49  ;;  %v7586_v3 = vpop.f32.mrb[23].mxu1  ;;  %v34731_v34 = vld [vmem:[#allocation3 + $0x127] sm:$0xff]  ;;  %v34733_v53 = vld [vmem:[#allocation3 + $0x12f] sm:$0xff]  ;;  %v8562_v28 = vld [vmem:[#allocation8 + $0x2d0] sm:$0xff] }
 0x696   : > { %7719 = vst.msk [vmem:[#allocation3 + $0x168] sm:$0xff] %vm421_vm1, %v7687_v13  ;;  %v30338_v9 = vadd.f32 %v34621_v49, %v7586_v3  ;;  %27294 = vmatprep.mubr.msk.f32.mxu0 %vm421_vm1, %v34731_v34  ;;  %v8563_v13 = vld [vmem:[#allocation8 + $0x2d8] sm:$0xff]  ;;  %v8134_v23 = vld [vmem:[#allocation3 + $0x10] sm:$0xff] }
 0x697   : > { %v7690_v24 = vmax.f32 %v30337_v6, 0.0  ;;  %27295 = vmatmul.mubr.msk.f32.gmra.mrb[50].mxu0 %vm421_vm1, %v34733_v53  ;;  %v29735_v6 = vpack.c.bf16 %v8563_v13, %v8562_v28  ;;  %v8564_v3 = vld [vmem:[#allocation8 + $0x2e0] sm:$0xff] }
 0x698   : > { %v7689_v5 = vmax.f32 %v30338_v9, 0.0  ;;  %v27241_v57 = vpop.f32.mrb[24].mxu1  ;;  %v8565_v9 = vld [vmem:[#allocation8 + $0x2e8] sm:$0xff] }
 0x699   : > { %7722 = vst.msk [vmem:[#allocation3 + $0x190] sm:$0xff] %vm421_vm1, %v7690_v24  ;;  %v30339_v21 = vadd.f32 %v27241_v57, %v34621_v49  ;;  %v7596_v39 = vpop.f32.mrb[25].mxu1  ;;  %v34743_v50 = vld [vmem:[#allocation3 + $0x147] sm:$0xff]  ;;  %v34745_v33 = vld [vmem:[#allocation3 + $0x14f] sm:$0xff] }
 0x69a   : > { %7721 = vst.msk [vmem:[#allocation3 + $0x188] sm:$0xff] %vm421_vm1, %v7689_v5  ;;  %v30340_v47 = vadd.f32 %v34621_v49, %v7596_v39  ;;  %27297 = vmatprep.mubr.msk.f32.mxu0 %vm421_vm1, %v34743_v50  ;;  %v34809_v24 = vld [vmem:[#allocation3 + $0x28] sm:$0xff]  ;;  %v29739_v5 = vpack.c.bf16 %v8565_v9, %v8564_v3  ;;  %v34814_v57 = vld [vmem:[#allocation3 + $0x30] sm:$0xff] }
 0x69b   : > { %v7692_v59 = vmax.f32 %v30339_v21, 0.0  ;;  %27298 = vmatmul.mubr.msk.f32.gmra.mrb[52].mxu0 %vm421_vm1, %v34745_v33  ;;  %v8566_v21 = vld [vmem:[#allocation8 + $0x2f0] sm:$0xff]  ;;  %v8567_v39 = vld [vmem:[#allocation8 + $0x2f8] sm:$0xff] }
 0x69c   : > { %v7691_v2 = vmax.f32 %v30340_v47, 0.0  ;;  %v27244_v15 = vpop.f32.mrb[26].mxu1  ;;  %v34818_v47 = vld [vmem:[#allocation3 + $0x48] sm:$0xff]  ;;  %v34894_v28 = vld [vmem:[#allocation3 + $0x170] sm:$0xff] }
 0x69d   : > { %7724 = vst.msk [vmem:[#allocation3 + $0x1b0] sm:$0xff] %vm421_vm1, %v7692_v59  ;;  %v30341_v4 = vadd.f32 %v27244_v15, %v34621_v49  ;;  %v7606_v7 = vpop.f32.mrb[27].mxu1  ;;  %v34755_v52 = vld [vmem:[#allocation3 + $0x167] sm:$0xff]  ;;  %v34757_v58 = vld [vmem:[#allocation3 + $0x16f] sm:$0xff]  ;;  %39130 = vst [vmem:[#allocation46_spill] sm:$0xff] %v34894_v28 }
 0x69e   : > { %7723 = vst.msk [vmem:[#allocation3 + $0x1a8] sm:$0xff] %vm421_vm1, %v7691_v2  ;;  %v30342_v26 = vadd.f32 %v34621_v49, %v7606_v7  ;;  %27300 = vmatprep.mubr.msk.f32.mxu0 %vm421_vm1, %v34755_v52  ;;  %v34822_v59 = vld [vmem:[#allocation3 + $0x50] sm:$0xff] }
 0x69f   : > { %v7694_v40 = vmax.f32 %v30341_v4, 0.0  ;;  %27301 = vmatmul.mubr.msk.f32.gmra.mrb[54].mxu0 %vm421_vm1, %v34757_v58  ;;  %v8954_v2 = vld [vmem:[#allocation8 + $0x300] sm:$0xff]  ;;  %v8955_v15 = vld [vmem:[#allocation8 + $0x308] sm:$0xff] }
 0x6a0   : > { %v7693_v42 = vmax.f32 %v30342_v26, 0.0  ;;  %v27247_v25 = vpop.f32.mrb[28].mxu1  ;;  %v34826_v4 = vld [vmem:[#allocation3 + $0x68] sm:$0xff]  ;;  %v29747_v7 = vpack.c.bf16 %v8955_v15, %v8954_v2  ;;  %v34830_v26 = vld [vmem:[#allocation3 + $0x70] sm:$0xff]  ;;  %v8956_v2 = vld [vmem:[#allocation8 + $0x310] sm:$0xff] }
 0x6a1   : > { %7726 = vst.msk [vmem:[#allocation3 + $0x1d0] sm:$0xff] %vm421_vm1, %v7694_v40  ;;  %v30343_v19 = vadd.f32 %v27247_v25, %v34621_v49  ;;  %v7616_v54 = vpop.f32.mrb[29].mxu1  ;;  %v34767_v36 = vld [vmem:[#allocation3 + $0x187] sm:$0xff]  ;;  %v34769_v61 = vld [vmem:[#allocation3 + $0x18f] sm:$0xff] }
 0x6a2   : > { %7725 = vst.msk [vmem:[#allocation3 + $0x1c8] sm:$0xff] %vm421_vm1, %v7693_v42  ;;  %v30344_v18 = vadd.f32 %v34621_v49, %v7616_v54  ;;  %27303 = vmatprep.mubr.msk.f32.mxu0 %vm421_vm1, %v34767_v36  ;;  %v34834_v40 = vld [vmem:[#allocation3 + $0x88] sm:$0xff]  ;;  %v34838_v42 = vld [vmem:[#allocation3 + $0x90] sm:$0xff] }
 0x6a3   : > { %v7696_v0 = vmax.f32 %v30343_v19, 0.0  ;;  %27304 = vmatmul.mubr.msk.f32.gmra.mrb[56].mxu0 %vm421_vm1, %v34769_v61  ;;  %v34842_v25 = vld [vmem:[#allocation3 + $0xa8] sm:$0xff]  ;;  %v34846_v19 = vld [vmem:[#allocation3 + $0xb0] sm:$0xff] }
 0x6a4   : > { %v7695_v63 = vmax.f32 %v30344_v18, 0.0  ;;  %v27250_v14 = vpop.f32.mrb[30].mxu1  ;;  %v34850_v54 = vld [vmem:[#allocation3 + $0xc8] sm:$0xff]  ;;  %v34854_v18 = vld [vmem:[#allocation3 + $0xd0] sm:$0xff] }
 0x6a5   : > { %7728 = vst.msk [vmem:[#allocation3 + $0x1f0] sm:$0xff] %vm421_vm1, %v7696_v0  ;;  %v30345_v20 = vadd.f32 %v27250_v14, %v34621_v49  ;;  %v7626_v1 = vpop.f32.mrb[31].mxu1  ;;  %v34779_v31 = vld [vmem:[#allocation3 + $0x1a7] sm:$0xff]  ;;  %v34781_v37 = vld [vmem:[#allocation3 + $0x1af] sm:$0xff] }
 0x6a6   : > { %7727 = vst.msk [vmem:[#allocation3 + $0x1e8] sm:$0xff] %vm421_vm1, %v7695_v63  ;;  %v30346_v30 = vadd.f32 %v34621_v49, %v7626_v1  ;;  %27306 = vmatprep.mubr.msk.f32.mxu0 %vm421_vm1, %v34779_v31  ;;  %v34858_v0 = vld [vmem:[#allocation3 + $0xe8] sm:$0xff]  ;;  %v34862_v63 = vld [vmem:[#allocation3 + $0xf0] sm:$0xff] }
 0x6a7   : > { %v7698_v11 = vmax.f32 %v30345_v20, 0.0  ;;  %27307 = vmatmul.mubr.msk.f32.gmra.mrb[58].mxu0 %vm421_vm1, %v34781_v37  ;;  %v34866_v14 = vld [vmem:[#allocation3 + $0x108] sm:$0xff]  ;;  %v34870_v20 = vld [vmem:[#allocation3 + $0x110] sm:$0xff] }
 0x6a8   : > { %v7697_v46 = vmax.f32 %v30346_v30, 0.0  ;;  %v34874_v1 = vld [vmem:[#allocation3 + $0x128] sm:$0xff]  ;;  %v34878_v30 = vld [vmem:[#allocation3 + $0x130] sm:$0xff] }
 0x6a9   : > { %7730 = vst.msk [vmem:[#allocation3 + $0x210] sm:$0xff] %vm421_vm1, %v7698_v11  ;;  %v34790_v60 = vld [vmem:[#allocation3 + $0x1c7] sm:$0xff]  ;;  %v34792_v51 = vld [vmem:[#allocation3 + $0x1cf] sm:$0xff] }
 0x6aa   : > { %7729 = vst.msk [vmem:[#allocation3 + $0x208] sm:$0xff] %vm421_vm1, %v7697_v46  ;;  %27309 = vmatprep.mubr.msk.f32.mxu0 %vm421_vm1, %v34790_v60  ;;  %v34882_v11 = vld [vmem:[#allocation3 + $0x148] sm:$0xff]  ;;  %v34886_v46 = vld [vmem:[#allocation3 + $0x150] sm:$0xff] }
 0x6ab   : > { %27310 = vmatmul.mubr.msk.f32.gmra.mrb[60].mxu0 %vm421_vm1, %v34792_v51  ;;  %v34898_v13 = vld [vmem:[#allocation3 + $0x188] sm:$0xff]  ;;  %v34910_v3 = vld [vmem:[#allocation3 + $0x1b0] sm:$0xff] }
 0x6ac   : > { %39131 = vst [vmem:[#allocation48_spill] sm:$0xff] %v34898_v13  ;;  %39134 = vst [vmem:[#allocation53_spill] sm:$0xff] %v34910_v3  ;;  %v34914_v9 = vld [vmem:[#allocation3 + $0x1c8] sm:$0xff] }
 0x6ad   : > { %v34799_v49 = vld [vmem:[#allocation3 + $0x1e7] sm:$0xff]  ;;  %v34801_v35 = vld [vmem:[#allocation3 + $0x1ef] sm:$0xff]  ;;  %39135 = vst [vmem:[#allocation54_spill] sm:$0xff] %v34914_v9 }
 0x6ae   : > { %27312 = vmatprep.mubr.msk.f32.mxu0 %vm421_vm1, %v34799_v49  ;;  %v8957_v15 = vld [vmem:[#allocation8 + $0x318] sm:$0xff] }
 0x6af   : > { %27313 = vmatmul.mubr.msk.f32.gmra.mrb[62].mxu0 %vm421_vm1, %v34801_v35 }
 0x6b0   : > { %27331 = vmatprep.mubr.msk.f32.mxu0 %vm421_vm1, %v8133_v62  ;;  %v34890_v62 = vld [vmem:[#allocation3 + $0x168] sm:$0xff] }
 0x6b3   : > { %27332 = vmatmul.mubr.msk.f32.vlgmr.msra.gmra.mrb[32].mxu0 %vm421_vm1, %v8134_v23  ;;  %v34902_v23 = vld [vmem:[#allocation3 + $0x190] sm:$0xff] }
 0x6b4   : > { %29734 = vmatpush3.bf16.msra.mxu0 %v34618_v44  ;;  %27334 = vmatprep.mubr.msk.f32.mxu0 %vm421_vm1, %v34809_v24  ;;  %v29743_v44 = vpack.c.bf16 %v8567_v39, %v8566_v21  ;;  %39132 = vst [vmem:[#allocation51_spill] sm:$0xff] %v34902_v23  ;;  %v34922_v21 = vld [vmem:[#allocation3 + $0x1e8] sm:$0xff] }
 0x6b5   : > { %29736 = vmatprep.subr.bf16.mxu0 %v29735_v6  ;;  %39137 = vst [vmem:[#allocation56_spill] sm:$0xff] %v34922_v21  ;;  %v8527_v39 = vld [vmem:[#allocation3 + $0x9] sm:$0xff] }
 0x6b7   : > { %27335 = vmatmul.mubr.msk.f32.gmra.mrb[34].mxu0 %vm421_vm1, %v34814_v57 }
 0x6b8   : > { %27337 = vmatprep.mubr.msk.f32.mxu0 %vm421_vm1, %v34818_v47  ;;  %29738 = vmatpush3.bf16.msra.mxu0 %v29735_v6  ;;  %v34906_v6 = vld [vmem:[#allocation3 + $0x1a8] sm:$0xff] }
 0x6b9   : > { %29740 = vmatprep.subr.bf16.mxu0 %v29739_v5  ;;  %39133 = vst [vmem:[#allocation52_spill] sm:$0xff] %v34906_v6 }
 0x6bb   : > { %27338 = vmatmul.mubr.msk.f32.gmra.mrb[36].mxu0 %vm421_vm1, %v34822_v59 }
 0x6bc   : > { %27340 = vmatprep.mubr.msk.f32.mxu0 %vm421_vm1, %v34826_v4  ;;  %29742 = vmatpush3.bf16.msra.mxu0 %v29739_v5  ;;  %v34918_v5 = vld [vmem:[#allocation3 + $0x1d0] sm:$0xff] }
 0x6bd   : > { %29744 = vmatprep.subr.bf16.mxu0 %v29743_v44  ;;  %39136 = vst [vmem:[#allocation55_spill] sm:$0xff] %v34918_v5 }
 0x6bf   : > { %27341 = vmatmul.mubr.msk.f32.gmra.mrb[38].mxu0 %vm421_vm1, %v34830_v26 }
 0x6c0   : > { %27343 = vmatprep.mubr.msk.f32.mxu0 %vm421_vm1, %v34834_v40  ;;  %29746 = vmatpush3.bf16.msra.mxu0 %v29743_v44  ;;  %v34926_v44 = vld [vmem:[#allocation3 + $0x1f0] sm:$0xff] }
 0x6c1   : > { %29748 = vmatprep.subr.bf16.mxu0 %v29747_v7  ;;  %39138 = vst [vmem:[#allocation57_spill] sm:$0xff] %v34926_v44 }
 0x6c3   : > { %27344 = vmatmul.mubr.msk.f32.gmra.mrb[40].mxu0 %vm421_vm1, %v34838_v42 }
 0x6c4   : > { %27346 = vmatprep.mubr.msk.f32.mxu0 %vm421_vm1, %v34842_v25 }
 0x6c7   : > { %27347 = vmatmul.mubr.msk.f32.gmra.mrb[42].mxu0 %vm421_vm1, %v34846_v19 }
 0x6c8   : > { %27349 = vmatprep.mubr.msk.f32.mxu0 %vm421_vm1, %v34850_v54 }
 0x6cb   : > { %27350 = vmatmul.mubr.msk.f32.gmra.mrb[44].mxu0 %vm421_vm1, %v34854_v18 }
 0x6cc   : > { %27352 = vmatprep.mubr.msk.f32.mxu0 %vm421_vm1, %v34858_v0 }
 0x6cf   : > { %27353 = vmatmul.mubr.msk.f32.gmra.mrb[46].mxu0 %vm421_vm1, %v34862_v63 }
 0x6d0   : > { %27355 = vmatprep.mubr.msk.f32.mxu0 %vm421_vm1, %v34866_v14 }
 0x6d3   : > { %27356 = vmatmul.mubr.msk.f32.gmra.mrb[48].mxu0 %vm421_vm1, %v34870_v20 }
 0x6d4   : > { %27358 = vmatprep.mubr.msk.f32.mxu0 %vm421_vm1, %v34874_v1 }
 0x6d7   : > { %27359 = vmatmul.mubr.msk.f32.gmra.mrb[50].mxu0 %vm421_vm1, %v34878_v30 }
 0x6d8   : > { %27361 = vmatprep.mubr.msk.f32.mxu0 %vm421_vm1, %v34882_v11 }
 0x6db   : > { %27362 = vmatmul.mubr.msk.f32.gmra.mrb[52].mxu0 %vm421_vm1, %v34886_v46 }
 0x6dc   : > { %27364 = vmatprep.mubr.msk.f32.mxu0 %vm421_vm1, %v34890_v62 }
 0x6df   : > { %27365 = vmatmul.mubr.msk.f32.gmra.mrb[54].mxu0 %vm421_vm1, %v34894_v28  ;;  %v8960_v28 = vld [vmem:[#allocation8 + $0x330] sm:$0xff] }
 0x6e0   : > { %27367 = vmatprep.mubr.msk.f32.mxu0 %vm421_vm1, %v34898_v13  ;;  %v34936_v13 = vld [vmem:[#allocation3 + $0x31] sm:$0xff] }
 0x6e1   : > { %39139 = vst [vmem:[#allocation58_spill] sm:$0xff] %v34936_v13 }
 0x6e3   : > { %27368 = vmatmul.mubr.msk.f32.gmra.mrb[56].mxu0 %vm421_vm1, %v34902_v23  ;;  %v8959_v23 = vld [vmem:[#allocation8 + $0x328] sm:$0xff] }
 0x6e4   : > { %27370 = vmatprep.mubr.msk.f32.mxu0 %vm421_vm1, %v34906_v6  ;;  %v8958_v6 = vld [vmem:[#allocation8 + $0x320] sm:$0xff] }
 0x6e7   : > { %27371 = vmatmul.mubr.msk.f32.gmra.mrb[58].mxu0 %vm421_vm1, %v34910_v3  ;;  %v29751_v3 = vpack.c.bf16 %v8957_v15, %v8956_v2  ;;  %v9348_v2 = vld [vmem:[#allocation8 + $0x340] sm:$0xff]  ;;  %v9349_v15 = vld [vmem:[#allocation8 + $0x348] sm:$0xff] }
 0x6e8   : > { %27373 = vmatprep.mubr.msk.f32.mxu0 %vm421_vm1, %v34914_v9  ;;  %v8528_v9 = vld [vmem:[#allocation3 + $0x11] sm:$0xff] }
 0x6eb   : > { %27374 = vmatmul.mubr.msk.f32.gmra.mrb[60].mxu0 %vm421_vm1, %v34918_v5  ;;  %v34932_v5 = vld [vmem:[#allocation3 + $0x29] sm:$0xff] }
 0x6ec   : > { %27376 = vmatprep.mubr.msk.f32.mxu0 %vm421_vm1, %v34922_v21  ;;  %v29755_v21 = vpack.c.bf16 %v8959_v23, %v8958_v6  ;;  %v34948_v23 = vld [vmem:[#allocation3 + $0x69] sm:$0xff]  ;;  %v29763_v6 = vpack.c.bf16 %v9349_v15, %v9348_v2 }
 0x6ed   : > { %39140 = vst [vmem:[#allocation59_spill] sm:$0xff] %v34948_v23  ;;  %v34972_v2 = vld [vmem:[#allocation3 + $0xc9] sm:$0xff] }
 0x6ee   : > { %39146 = vst [vmem:[#allocation65_spill] sm:$0xff] %v34972_v2  ;;  %v34980_v15 = vld [vmem:[#allocation3 + $0xe9] sm:$0xff] }
 0x6ef   : > { %27377 = vmatmul.mubr.msk.f32.gmra.mrb[62].mxu0 %vm421_vm1, %v34926_v44  ;;  %v8961_v44 = vld [vmem:[#allocation8 + $0x338] sm:$0xff]  ;;  %39148 = vst [vmem:[#allocation67_spill] sm:$0xff] %v34980_v15 }
 0x6f0   : > { %27395 = vmatprep.mubr.msk.f32.mxu0 %vm421_vm1, %v8527_v39  ;;  %v34940_v39 = vld [vmem:[#allocation3 + $0x49] sm:$0xff] }
 0x6f3   : > { %27396 = vmatmul.mubr.msk.f32.vlgmr.msra.gmra.mrb[32].mxu0 %vm421_vm1, %v8528_v9  ;;  %v34944_v9 = vld [vmem:[#allocation3 + $0x51] sm:$0xff] }
 0x6f4   : > { %29750 = vmatpush3.bf16.msra.mxu0 %v29747_v7  ;;  %27398 = vmatprep.mubr.msk.f32.mxu0 %vm421_vm1, %v34932_v5  ;;  %v29759_v7 = vpack.c.bf16 %v8961_v44, %v8960_v28  ;;  %v34956_v28 = vld [vmem:[#allocation3 + $0x89] sm:$0xff]  ;;  %v34968_v44 = vld [vmem:[#allocation3 + $0xb1] sm:$0xff] }
 0x6f5   : > { %29752 = vmatprep.subr.bf16.mxu0 %v29751_v3  ;;  %39142 = vst [vmem:[#allocation61_spill] sm:$0xff] %v34956_v28  ;;  %39145 = vst [vmem:[#allocation64_spill] sm:$0xff] %v34968_v44 }
 0x6f7   : > { %27399 = vmatmul.mubr.msk.f32.gmra.mrb[34].mxu0 %vm421_vm1, %v34936_v13  ;;  %v34952_v13 = vld [vmem:[#allocation3 + $0x71] sm:$0xff] }
 0x6f8   : > { %27401 = vmatprep.mubr.msk.f32.mxu0 %vm421_vm1, %v34940_v39  ;;  %29754 = vmatpush3.bf16.msra.mxu0 %v29751_v3  ;;  %39141 = vst [vmem:[#allocation60_spill] sm:$0xff] %v34952_v13  ;;  %v34960_v3 = vld [vmem:[#allocation3 + $0x91] sm:$0xff] }
 0x6f9   : > { %29756 = vmatprep.subr.bf16.mxu0 %v29755_v21  ;;  %39143 = vst [vmem:[#allocation62_spill] sm:$0xff] %v34960_v3 }
 0x6fb   : > { %27402 = vmatmul.mubr.msk.f32.gmra.mrb[36].mxu0 %vm421_vm1, %v34944_v9 }
 0x6fc   : > { %27404 = vmatprep.mubr.msk.f32.mxu0 %vm421_vm1, %v34948_v23  ;;  %29758 = vmatpush3.bf16.msra.mxu0 %v29755_v21  ;;  %v34964_v21 = vld [vmem:[#allocation3 + $0xa9] sm:$0xff] }
 0x6fd   : > { %29760 = vmatprep.subr.bf16.mxu0 %v29759_v7  ;;  %39144 = vst [vmem:[#allocation63_spill] sm:$0xff] %v34964_v21  ;;  %v9355_v23 = vld [vmem:[#allocation8 + $0x378] sm:$0xff] }
 0x6ff   : > { %27405 = vmatmul.mubr.msk.f32.gmra.mrb[38].mxu0 %vm421_vm1, %v34952_v13  ;;  %v9353_v13 = vld [vmem:[#allocation8 + $0x368] sm:$0xff] }
 0x700   : > { %27407 = vmatprep.mubr.msk.f32.mxu0 %vm421_vm1, %v34956_v28  ;;  %29762 = vmatpush3.bf16.msra.mxu0 %v29759_v7  ;;  %v34976_v7 = vld [vmem:[#allocation3 + $0xd1] sm:$0xff]  ;;  %v9351_v28 = vld [vmem:[#allocation8 + $0x358] sm:$0xff] }
 0x701   : > { %29764 = vmatprep.subr.bf16.mxu0 %v29763_v6  ;;  %39147 = vst [vmem:[#allocation66_spill] sm:$0xff] %v34976_v7 }
 0x703   : > { %27408 = vmatmul.mubr.msk.f32.gmra.mrb[40].mxu0 %vm421_vm1, %v34960_v3  ;;  %v9350_v3 = vld [vmem:[#allocation8 + $0x350] sm:$0xff] }
 0x704   : > { %27410 = vmatprep.mubr.msk.f32.mxu0 %vm421_vm1, %v34964_v21  ;;  %v34984_v21 = vld [vmem:[#allocation3 + $0xf1] sm:$0xff] }
 0x705   : > { %39149 = vst [vmem:[#allocation68_spill] sm:$0xff] %v34984_v21 }
 0x707   : > { %27411 = vmatmul.mubr.msk.f32.gmra.mrb[42].mxu0 %vm421_vm1, %v34968_v44  ;;  %v34988_v44 = vld [vmem:[#allocation3 + $0x109] sm:$0xff] }
 0x708   : > { %27413 = vmatprep.mubr.msk.f32.mxu0 %vm421_vm1, %v34972_v2  ;;  %39150 = vst [vmem:[#allocation69_spill] sm:$0xff] %v34988_v44  ;;  %v34992_v2 = vld [vmem:[#allocation3 + $0x111] sm:$0xff] }
 0x709   : > { %39151 = vst [vmem:[#allocation70_spill] sm:$0xff] %v34992_v2 }
 0x70b   : > { %27414 = vmatmul.mubr.msk.f32.gmra.mrb[44].mxu0 %vm421_vm1, %v34976_v7  ;;  %v34996_v7 = vld [vmem:[#allocation3 + $0x129] sm:$0xff] }
 0x70c   : > { %27416 = vmatprep.mubr.msk.f32.mxu0 %vm421_vm1, %v34980_v15  ;;  %39152 = vst [vmem:[#allocation71_spill] sm:$0xff] %v34996_v7  ;;  %v35000_v15 = vld [vmem:[#allocation3 + $0x131] sm:$0xff] }
 0x70d   : > { %39153 = vst [vmem:[#allocation72_spill] sm:$0xff] %v35000_v15 }
 0x70f   : > { %27417 = vmatmul.mubr.msk.f32.gmra.mrb[46].mxu0 %vm421_vm1, %v34984_v21  ;;  %v35004_v21 = vld [vmem:[#allocation3 + $0x149] sm:$0xff] }
 0x710   : > { %27419 = vmatprep.mubr.msk.f32.mxu0 %vm421_vm1, %v34988_v44  ;;  %39154 = vst [vmem:[#allocation73_spill] sm:$0xff] %v35004_v21  ;;  %v35008_v44 = vld [vmem:[#allocation3 + $0x151] sm:$0xff] }
 0x711   : > { %39155 = vst [vmem:[#allocation74_spill] sm:$0xff] %v35008_v44 }
 0x713   : > { %27420 = vmatmul.mubr.msk.f32.gmra.mrb[48].mxu0 %vm421_vm1, %v34992_v2  ;;  %v35012_v2 = vld [vmem:[#allocation3 + $0x169] sm:$0xff] }
 0x714   : > { %27422 = vmatprep.mubr.msk.f32.mxu0 %vm421_vm1, %v34996_v7  ;;  %39156 = vst [vmem:[#allocation75_spill] sm:$0xff] %v35012_v2  ;;  %v35016_v7 = vld [vmem:[#allocation3 + $0x171] sm:$0xff] }
 0x715   : > { %39157 = vst [vmem:[#allocation76_spill] sm:$0xff] %v35016_v7 }
 0x717   : > { %27423 = vmatmul.mubr.msk.f32.gmra.mrb[50].mxu0 %vm421_vm1, %v35000_v15  ;;  %v35020_v15 = vld [vmem:[#allocation3 + $0x189] sm:$0xff] }
 0x718   : > { %27425 = vmatprep.mubr.msk.f32.mxu0 %vm421_vm1, %v35004_v21  ;;  %39158 = vst [vmem:[#allocation77_spill] sm:$0xff] %v35020_v15  ;;  %v35024_v21 = vld [vmem:[#allocation3 + $0x191] sm:$0xff] }
 0x719   : > { %39159 = vst [vmem:[#allocation78_spill] sm:$0xff] %v35024_v21 }
 0x71b   : > { %27426 = vmatmul.mubr.msk.f32.gmra.mrb[52].mxu0 %vm421_vm1, %v35008_v44  ;;  %v35028_v44 = vld [vmem:[#allocation3 + $0x1a9] sm:$0xff] }
 0x71c   : > { %27428 = vmatprep.mubr.msk.f32.mxu0 %vm421_vm1, %v35012_v2  ;;  %39160 = vst [vmem:[#allocation79_spill] sm:$0xff] %v35028_v44  ;;  %v35032_v2 = vld [vmem:[#allocation3 + $0x1b1] sm:$0xff] }
 0x71d   : > { %39161 = vst [vmem:[#allocation80_spill] sm:$0xff] %v35032_v2 }
 0x71f   : > { %27429 = vmatmul.mubr.msk.f32.gmra.mrb[54].mxu0 %vm421_vm1, %v35016_v7  ;;  %v35036_v7 = vld [vmem:[#allocation3 + $0x1c9] sm:$0xff] }
 0x720   : > { %27431 = vmatprep.mubr.msk.f32.mxu0 %vm421_vm1, %v35020_v15  ;;  %39162 = vst [vmem:[#allocation81_spill] sm:$0xff] %v35036_v7  ;;  %v35040_v15 = vld [vmem:[#allocation3 + $0x1d1] sm:$0xff] }
 0x721   : > { %39163 = vst [vmem:[#allocation82_spill] sm:$0xff] %v35040_v15 }
 0x723   : > { %27432 = vmatmul.mubr.msk.f32.gmra.mrb[56].mxu0 %vm421_vm1, %v35024_v21  ;;  %v35044_v21 = vld [vmem:[#allocation3 + $0x1e9] sm:$0xff] }
 0x724   : > { %27434 = vmatprep.mubr.msk.f32.mxu0 %vm421_vm1, %v35028_v44  ;;  %39164 = vst [vmem:[#allocation40_spill] sm:$0xff] %v35044_v21  ;;  %v35048_v44 = vld [vmem:[#allocation3 + $0x1f1] sm:$0xff] }
 0x725   : > { %39165 = vst [vmem:[#allocation44_spill] sm:$0xff] %v35048_v44 }
 0x727   : > { %27435 = vmatmul.mubr.msk.f32.gmra.mrb[58].mxu0 %vm421_vm1, %v35032_v2  ;;  %v9352_v2 = vld [vmem:[#allocation8 + $0x360] sm:$0xff] }
 0x728   : > { %27437 = vmatprep.mubr.msk.f32.mxu0 %vm421_vm1, %v35036_v7  ;;  %v29767_v7 = vpack.c.bf16 %v9351_v28, %v9350_v3  ;;  %v9742_v28 = vld [vmem:[#allocation8 + $0x380] sm:$0xff]  ;;  %v9743_v3 = vld [vmem:[#allocation8 + $0x388] sm:$0xff] }
 0x72b   : > { %27438 = vmatmul.mubr.msk.f32.gmra.mrb[60].mxu0 %vm421_vm1, %v35040_v15  ;;  %v9354_v15 = vld [vmem:[#allocation8 + $0x370] sm:$0xff] }
 0x72c   : > { %27440 = vmatprep.mubr.msk.f32.mxu0 %vm421_vm1, %v35044_v21  ;;  %v29771_v21 = vpack.c.bf16 %v9353_v13, %v9352_v2  ;;  %v39172_v13 = vld [vmem:[#allocation55_spill] sm:$0xff] }
 0x72d   : > { %v35184_v2 = vld [vmem:[#allocation3 + $0x210] sm:$0xff] }
 0x72f   : > { %27441 = vmatmul.mubr.msk.f32.gmra.mrb[62].mxu0 %vm421_vm1, %v35048_v44 }
 0x730   : > { %27459 = vmatprep.mubr.msk.f32.mxu0 %vm421_vm1, %v34635_v29  ;;  %v29775_v29 = vpack.c.bf16 %v9355_v23, %v9354_v15  ;;  %v39173_v23 = vld [vmem:[#allocation56_spill] sm:$0xff]  ;;  %v10139_v15 = vld [vmem:[#allocation8 + $0x3d8] sm:$0xff] }
 0x733   : > { %27460 = vmatmul.mubr.msk.f32.vlgmr.msra.gmra.mrb[32].mxu0 %vm421_vm1, %v34637_v43  ;;  %v29779_v43 = vpack.c.bf16 %v9743_v3, %v9742_v28  ;;  %v10140_v28 = vld [vmem:[#allocation8 + $0x3e0] sm:$0xff]  ;;  %v10141_v3 = vld [vmem:[#allocation8 + $0x3e8] sm:$0xff] }
 0x734   : > { %29766 = vmatpush3.bf16.msra.mxu0 %v29763_v6  ;;  %27462 = vmatprep.mubr.msk.f32.mxu0 %vm421_vm1, %v34647_v41  ;;  %v35112_v41 = vld [vmem:[#allocation3 + $0x207] sm:$0xff] }
 0x735   : > { %29768 = vmatprep.subr.bf16.mxu0 %v29767_v7  ;;  %v39174_v6 = vld [vmem:[#allocation57_spill] sm:$0xff] }
 0x737   : > { %27463 = vmatmul.mubr.msk.f32.gmra.mrb[34].mxu0 %vm421_vm1, %v34649_v17  ;;  %v35116_v17 = vld [vmem:[#allocation3 + $0x20f] sm:$0xff] }
 0x738   : > { %27465 = vmatprep.mubr.msk.f32.mxu0 %vm421_vm1, %v34659_v48  ;;  %29770 = vmatpush3.bf16.msra.mxu0 %v29767_v7  ;;  %v9744_v48 = vld [vmem:[#allocation8 + $0x390] sm:$0xff] }
 0x739   : > { %29772 = vmatprep.subr.bf16.mxu0 %v29771_v21  ;;  %v10138_v7 = vld [vmem:[#allocation8 + $0x3d0] sm:$0xff] }
 0x73b   : > { %27466 = vmatmul.mubr.msk.f32.gmra.mrb[36].mxu0 %vm421_vm1, %v34661_v45  ;;  %v9745_v45 = vld [vmem:[#allocation8 + $0x398] sm:$0xff] }
 0x73c   : > { %27468 = vmatprep.mubr.msk.f32.mxu0 %vm421_vm1, %v34671_v8  ;;  %29774 = vmatpush3.bf16.msra.mxu0 %v29771_v21  ;;  %v29783_v8 = vpack.c.bf16 %v9745_v45, %v9744_v48  ;;  %v35180_v21 = vld [vmem:[#allocation3 + $0x208] sm:$0xff]  ;;  %v29803_v48 = vpack.c.bf16 %v10141_v3, %v10140_v28  ;;  %v10142_v45 = vld [vmem:[#allocation8 + $0x3f0] sm:$0xff] }
 0x73d   : > { %29776 = vmatprep.subr.bf16.mxu0 %v29775_v29  ;;  %v39185_v28 = vld [vmem:[#allocation68_spill] sm:$0xff]  ;;  %v39186_v3 = vld [vmem:[#allocation69_spill] sm:$0xff] }
 0x73f   : > { %27469 = vmatmul.mubr.msk.f32.gmra.mrb[38].mxu0 %vm421_vm1, %v34673_v12  ;;  %v9746_v12 = vld [vmem:[#allocation8 + $0x3a0] sm:$0xff] }
 0x740   : > { %27471 = vmatprep.mubr.msk.f32.mxu0 %vm421_vm1, %v34683_v38  ;;  %29778 = vmatpush3.bf16.msra.mxu0 %v29775_v29  ;;  %v9747_v38 = vld [vmem:[#allocation8 + $0x3a8] sm:$0xff]  ;;  %v29799_v29 = vpack.c.bf16 %v10139_v15, %v10138_v7  ;;  %v39182_v7 = vld [vmem:[#allocation65_spill] sm:$0xff]  ;;  %v39183_v15 = vld [vmem:[#allocation66_spill] sm:$0xff] }
 0x741   : > { %29780 = vmatprep.subr.bf16.mxu0 %v29779_v43 }
 0x743   : > { %27472 = vmatmul.mubr.msk.f32.gmra.mrb[40].mxu0 %vm421_vm1, %v34685_v32  ;;  %v29787_v32 = vpack.c.bf16 %v9747_v38, %v9746_v12  ;;  %v39176_v12 = vld [vmem:[#allocation59_spill] sm:$0xff] }
 0x744   : > { %27474 = vmatprep.mubr.msk.f32.mxu0 %vm421_vm1, %v34695_v56  ;;  %v9748_v56 = vld [vmem:[#allocation8 + $0x3b0] sm:$0xff]  ;;  %v10530_v38 = vld [vmem:[#allocation8 + $0x400] sm:$0xff] }
 0x747   : > { %27475 = vmatmul.mubr.msk.f32.gmra.mrb[42].mxu0 %vm421_vm1, %v34697_v55  ;;  %v9749_v55 = vld [vmem:[#allocation8 + $0x3b8] sm:$0xff] }
 0x748   : > { %27477 = vmatprep.mubr.msk.f32.mxu0 %vm421_vm1, %v34707_v10  ;;  %v29791_v10 = vpack.c.bf16 %v9749_v55, %v9748_v56  ;;  %v39177_v56 = vld [vmem:[#allocation60_spill] sm:$0xff]  ;;  %v39178_v55 = vld [vmem:[#allocation61_spill] sm:$0xff] }
 0x74b   : > { %27478 = vmatmul.mubr.msk.f32.gmra.mrb[44].mxu0 %vm421_vm1, %v34709_v27  ;;  %v10136_v27 = vld [vmem:[#allocation8 + $0x3c0] sm:$0xff] }
 0x74c   : > { %27480 = vmatprep.mubr.msk.f32.mxu0 %vm421_vm1, %v34719_v22  ;;  %v10137_v22 = vld [vmem:[#allocation8 + $0x3c8] sm:$0xff] }
 0x74f   : > { %27481 = vmatmul.mubr.msk.f32.gmra.mrb[46].mxu0 %vm421_vm1, %v34721_v16  ;;  %v29795_v16 = vpack.c.bf16 %v10137_v22, %v10136_v27  ;;  %v39179_v27 = vld [vmem:[#allocation62_spill] sm:$0xff]  ;;  %v39180_v22 = vld [vmem:[#allocation63_spill] sm:$0xff] }
 0x750   : > { %27483 = vmatprep.mubr.msk.f32.mxu0 %vm421_vm1, %v34731_v34  ;;  %v39166_v34 = vld [vmem:[#allocation46_spill] sm:$0xff] }
 0x753   : > { %27484 = vmatmul.mubr.msk.f32.gmra.mrb[48].mxu0 %vm421_vm1, %v34733_v53  ;;  %v39167_v53 = vld [vmem:[#allocation48_spill] sm:$0xff] }
 0x754   : > { %27486 = vmatprep.mubr.msk.f32.mxu0 %vm421_vm1, %v34743_v50  ;;  %v39168_v50 = vld [vmem:[#allocation51_spill] sm:$0xff] }
 0x757   : > { %27487 = vmatmul.mubr.msk.f32.gmra.mrb[50].mxu0 %vm421_vm1, %v34745_v33  ;;  %v39169_v33 = vld [vmem:[#allocation52_spill] sm:$0xff] }
 0x758   : > { %27489 = vmatprep.mubr.msk.f32.mxu0 %vm421_vm1, %v34755_v52 }
 0x75b   : > { %27490 = vmatmul.mubr.msk.f32.gmra.mrb[52].mxu0 %vm421_vm1, %v34757_v58 }
 0x75c   : > { %27492 = vmatprep.mubr.msk.f32.mxu0 %vm421_vm1, %v34767_v36 }
 0x75f   : > { %27493 = vmatmul.mubr.msk.f32.gmra.mrb[54].mxu0 %vm421_vm1, %v34769_v61 }
 0x760   : > { %27495 = vmatprep.mubr.msk.f32.mxu0 %vm421_vm1, %v34779_v31 }
 0x763   : > { %27496 = vmatmul.mubr.msk.f32.gmra.mrb[56].mxu0 %vm421_vm1, %v34781_v37 }
 0x764   : > { %27498 = vmatprep.mubr.msk.f32.mxu0 %vm421_vm1, %v34790_v60 }
 0x767   : > { %27499 = vmatmul.mubr.msk.f32.gmra.mrb[58].mxu0 %vm421_vm1, %v34792_v51 }
 0x768   : > { %27501 = vmatprep.mubr.msk.f32.mxu0 %vm421_vm1, %v34799_v49 }
 0x76b   : > { %27502 = vmatmul.mubr.msk.f32.gmra.mrb[60].mxu0 %vm421_vm1, %v34801_v35 }
 0x76c   : > { %27504 = vmatprep.mubr.msk.f32.mxu0 %vm421_vm1, %v35112_v41 }
 0x76f   : > { %27505 = vmatmul.mubr.msk.f32.gmra.mrb[62].mxu0 %vm421_vm1, %v35116_v17 }
 0x770   : > { %27523 = vmatprep.mubr.msk.f32.mxu0 %vm421_vm1, %v34809_v24  ;;  %v39170_v24 = vld [vmem:[#allocation53_spill] sm:$0xff] }
 0x773   : > { %27524 = vmatmul.mubr.msk.f32.vlgmr.msra.gmra.mrb[32].mxu0 %vm421_vm1, %v34814_v57  ;;  %v39171_v57 = vld [vmem:[#allocation54_spill] sm:$0xff] }
 0x774   : > { %29782 = vmatpush3.bf16.msra.mxu0 %v29779_v43  ;;  %27526 = vmatprep.mubr.msk.f32.mxu0 %vm421_vm1, %v34818_v47  ;;  %v39175_v43 = vld [vmem:[#allocation58_spill] sm:$0xff] }
 0x775   : > { %29784 = vmatprep.subr.bf16.mxu0 %v29783_v8 }
 0x777   : > { %27527 = vmatmul.mubr.msk.f32.gmra.mrb[34].mxu0 %vm421_vm1, %v34822_v59 }
 0x778   : > { %27529 = vmatprep.mubr.msk.f32.mxu0 %vm421_vm1, %v34826_v4  ;;  %29786 = vmatpush3.bf16.msra.mxu0 %v29783_v8  ;;  %v10143_v8 = vld [vmem:[#allocation8 + $0x3f8] sm:$0xff] }
 0x779   : > { %29788 = vmatprep.subr.bf16.mxu0 %v29787_v32 }
 0x77b   : > { %27530 = vmatmul.mubr.msk.f32.gmra.mrb[36].mxu0 %vm421_vm1, %v34830_v26 }
 0x77c   : > { %27532 = vmatprep.mubr.msk.f32.mxu0 %vm421_vm1, %v34834_v40  ;;  %29790 = vmatpush3.bf16.msra.mxu0 %v29787_v32  ;;  %v10531_v32 = vld [vmem:[#allocation8 + $0x408] sm:$0xff] }
 0x77d   : > { %29792 = vmatprep.subr.bf16.mxu0 %v29791_v10 }
 0x77f   : > { %27533 = vmatmul.mubr.msk.f32.gmra.mrb[38].mxu0 %vm421_vm1, %v34838_v42 }
 0x780   : > { %27535 = vmatprep.mubr.msk.f32.mxu0 %vm421_vm1, %v34842_v25  ;;  %29794 = vmatpush3.bf16.msra.mxu0 %v29791_v10  ;;  %v29811_v10 = vpack.c.bf16 %v10531_v32, %v10530_v38  ;;  %v39192_v38 = vld [vmem:[#allocation75_spill] sm:$0xff]  ;;  %v39193_v32 = vld [vmem:[#allocation76_spill] sm:$0xff] }
 0x781   : > { %29796 = vmatprep.subr.bf16.mxu0 %v29795_v16 }
 0x783   : > { %27536 = vmatmul.mubr.msk.f32.gmra.mrb[40].mxu0 %vm421_vm1, %v34846_v19 }
 0x784   : > { %27538 = vmatprep.mubr.msk.f32.mxu0 %vm421_vm1, %v34850_v54 }
 0x787   : > { %27539 = vmatmul.mubr.msk.f32.gmra.mrb[42].mxu0 %vm421_vm1, %v34854_v18 }
 0x788   : > { %27541 = vmatprep.mubr.msk.f32.mxu0 %vm421_vm1, %v34858_v0 }
 0x78b   : > { %27542 = vmatmul.mubr.msk.f32.gmra.mrb[44].mxu0 %vm421_vm1, %v34862_v63 }
 0x78c   : > { %27544 = vmatprep.mubr.msk.f32.mxu0 %vm421_vm1, %v34866_v14 }
 0x78f   : > { %27545 = vmatmul.mubr.msk.f32.gmra.mrb[46].mxu0 %vm421_vm1, %v34870_v20 }
 0x790   : > { %27547 = vmatprep.mubr.msk.f32.mxu0 %vm421_vm1, %v34874_v1 }
 0x793   : > { %27548 = vmatmul.mubr.msk.f32.gmra.mrb[48].mxu0 %vm421_vm1, %v34878_v30 }
 0x794   : > { %27550 = vmatprep.mubr.msk.f32.mxu0 %vm421_vm1, %v34882_v11 }
 0x797   : > { %27551 = vmatmul.mubr.msk.f32.gmra.mrb[50].mxu0 %vm421_vm1, %v34886_v46 }
 0x798   : > { %27553 = vmatprep.mubr.msk.f32.mxu0 %vm421_vm1, %v34890_v62 }
 0x79b   : > { %27554 = vmatmul.mubr.msk.f32.gmra.mrb[52].mxu0 %vm421_vm1, %v39166_v34 }
 0x79c   : > { %27556 = vmatprep.mubr.msk.f32.mxu0 %vm421_vm1, %v39167_v53 }
 0x79f   : > { %27557 = vmatmul.mubr.msk.f32.gmra.mrb[54].mxu0 %vm421_vm1, %v39168_v50 }
 0x7a0   : > { %27559 = vmatprep.mubr.msk.f32.mxu0 %vm421_vm1, %v39169_v33 }
 0x7a3   : > { %27560 = vmatmul.mubr.msk.f32.gmra.mrb[56].mxu0 %vm421_vm1, %v39170_v24 }
 0x7a4   : > { %27562 = vmatprep.mubr.msk.f32.mxu0 %vm421_vm1, %v39171_v57 }
 0x7a7   : > { %27563 = vmatmul.mubr.msk.f32.gmra.mrb[58].mxu0 %vm421_vm1, %v39172_v13 }
 0x7a8   : > { %27565 = vmatprep.mubr.msk.f32.mxu0 %vm421_vm1, %v39173_v23 }
 0x7ab   : > { %27566 = vmatmul.mubr.msk.f32.gmra.mrb[60].mxu0 %vm421_vm1, %v39174_v6 }
 0x7ac   : > { %27568 = vmatprep.mubr.msk.f32.mxu0 %vm421_vm1, %v35180_v21 }
 0x7af   : > { %27569 = vmatmul.mubr.msk.f32.gmra.mrb[62].mxu0 %vm421_vm1, %v35184_v2 }
 0x7b0   : > { %27587 = vmatprep.mubr.msk.f32.mxu0 %vm421_vm1, %v34932_v5  ;;  %v29807_v5 = vpack.c.bf16 %v10143_v8, %v10142_v45  ;;  %v39189_v45 = vld [vmem:[#allocation72_spill] sm:$0xff]  ;;  %v39190_v8 = vld [vmem:[#allocation73_spill] sm:$0xff] }
 0x7b3   : > { %27588 = vmatmul.mubr.msk.f32.vlgmr.msra.gmra.mrb[32].mxu0 %vm421_vm1, %v39175_v43  ;;  %v39187_v43 = vld [vmem:[#allocation70_spill] sm:$0xff] }
 0x7b4   : > { %29798 = vmatpush3.bf16.msra.mxu0 %v29795_v16  ;;  %27590 = vmatprep.mubr.msk.f32.mxu0 %vm421_vm1, %v34940_v39  ;;  %v39181_v16 = vld [vmem:[#allocation64_spill] sm:$0xff] }
 0x7b5   : > { %29800 = vmatprep.subr.bf16.mxu0 %v29799_v29 }
 0x7b7   : > { %27591 = vmatmul.mubr.msk.f32.gmra.mrb[34].mxu0 %vm421_vm1, %v34944_v9 }
 0x7b8   : > { %27593 = vmatprep.mubr.msk.f32.mxu0 %vm421_vm1, %v39176_v12  ;;  %29802 = vmatpush3.bf16.msra.mxu0 %v29799_v29  ;;  %v39184_v29 = vld [vmem:[#allocation67_spill] sm:$0xff] }
 0x7b9   : > { %29804 = vmatprep.subr.bf16.mxu0 %v29803_v48 }
 0x7bb   : > { %27594 = vmatmul.mubr.msk.f32.gmra.mrb[36].mxu0 %vm421_vm1, %v39177_v56 }
 0x7bc   : > { %27596 = vmatprep.mubr.msk.f32.mxu0 %vm421_vm1, %v39178_v55  ;;  %29806 = vmatpush3.bf16.msra.mxu0 %v29803_v48  ;;  %v39188_v48 = vld [vmem:[#allocation71_spill] sm:$0xff] }
 0x7bd   : > { %29808 = vmatprep.subr.bf16.mxu0 %v29807_v5 }
 0x7bf   : > { %27597 = vmatmul.mubr.msk.f32.gmra.mrb[38].mxu0 %vm421_vm1, %v39179_v27 }
 0x7c0   : > { %27599 = vmatprep.mubr.msk.f32.mxu0 %vm421_vm1, %v39180_v22  ;;  %29810 = vmatpush3.bf16.msra.mxu0 %v29807_v5  ;;  %v39191_v5 = vld [vmem:[#allocation74_spill] sm:$0xff] }
 0x7c1   : > { %29812 = vmatprep.subr.bf16.mxu0 %v29811_v10 }
 0x7c3   : > { %27600 = vmatmul.mubr.msk.f32.gmra.mrb[40].mxu0 %vm421_vm1, %v39181_v16 }
 0x7c4   : > { %27602 = vmatprep.mubr.msk.f32.mxu0 %vm421_vm1, %v39182_v7  ;;  %v10537_v7 = vld [vmem:[#allocation8 + $0x438] sm:$0xff] }
 0x7c7   : > { %27603 = vmatmul.mubr.msk.f32.gmra.mrb[42].mxu0 %vm421_vm1, %v39183_v15  ;;  %v10536_v15 = vld [vmem:[#allocation8 + $0x430] sm:$0xff] }
 0x7c8   : > { %27605 = vmatprep.mubr.msk.f32.mxu0 %vm421_vm1, %v39184_v29  ;;  %v10106_v29 = vld [vmem:[#allocation3 + $0x6f] sm:$0xff] }
 0x7cb   : > { %27606 = vmatmul.mubr.msk.f32.gmra.mrb[44].mxu0 %vm421_vm1, %v39185_v28  ;;  %v10535_v28 = vld [vmem:[#allocation8 + $0x428] sm:$0xff] }
 0x7cc   : > { %27608 = vmatprep.mubr.msk.f32.mxu0 %vm421_vm1, %v39186_v3  ;;  %v39194_v3 = vld [vmem:[#allocation77_spill] sm:$0xff] }
 0x7cf   : > { %27609 = vmatmul.mubr.msk.f32.gmra.mrb[46].mxu0 %vm421_vm1, %v39187_v43  ;;  %v39195_v43 = vld [vmem:[#allocation78_spill] sm:$0xff] }
 0x7d0   : > { %27611 = vmatprep.mubr.msk.f32.mxu0 %vm421_vm1, %v39188_v48  ;;  %v39196_v48 = vld [vmem:[#allocation79_spill] sm:$0xff] }
 0x7d3   : > { %27612 = vmatmul.mubr.msk.f32.gmra.mrb[48].mxu0 %vm421_vm1, %v39189_v45  ;;  %v39197_v45 = vld [vmem:[#allocation80_spill] sm:$0xff] }
 0x7d4   : > { %27614 = vmatprep.mubr.msk.f32.mxu0 %vm421_vm1, %v39190_v8  ;;  %v39198_v8 = vld [vmem:[#allocation81_spill] sm:$0xff] }
 0x7d7   : > { %27615 = vmatmul.mubr.msk.f32.gmra.mrb[50].mxu0 %vm421_vm1, %v39191_v5  ;;  %v39199_v5 = vld [vmem:[#allocation82_spill] sm:$0xff] }
 0x7d8   : > { %27617 = vmatprep.mubr.msk.f32.mxu0 %vm421_vm1, %v39192_v38  ;;  %v39200_v38 = vld [vmem:[#allocation40_spill] sm:$0xff] }
 0x7db   : > { %27618 = vmatmul.mubr.msk.f32.gmra.mrb[52].mxu0 %vm421_vm1, %v39193_v32  ;;  %v10534_v32 = vld [vmem:[#allocation8 + $0x420] sm:$0xff] }
 0x7dc   : > { %27620 = vmatprep.mubr.msk.f32.mxu0 %vm421_vm1, %v39194_v3  ;;  %v35248_v3 = vld [vmem:[#allocation3 + $0x209] sm:$0xff] }
 0x7dd   : > { %39201 = vst [vmem:[#allocation46_spill] sm:$0xff] %v35248_v3 }
 0x7df   : > { %27621 = vmatmul.mubr.msk.f32.gmra.mrb[54].mxu0 %vm421_vm1, %v39195_v43  ;;  %v10533_v43 = vld [vmem:[#allocation8 + $0x418] sm:$0xff] }
 0x7e0   : > { %27623 = vmatprep.mubr.msk.f32.mxu0 %vm421_vm1, %v39196_v48  ;;  %v35252_v48 = vld [vmem:[#allocation3 + $0x211] sm:$0xff] }
 0x7e1   : > { %39202 = vst [vmem:[#allocation48_spill] sm:$0xff] %v35252_v48 }
 0x7e3   : > { %27624 = vmatmul.mubr.msk.f32.gmra.mrb[56].mxu0 %vm421_vm1, %v39197_v45  ;;  %v10532_v45 = vld [vmem:[#allocation8 + $0x410] sm:$0xff] }
 0x7e4   : > { %27626 = vmatprep.mubr.msk.f32.mxu0 %vm421_vm1, %v39198_v8  ;;  %v10103_v8 = vld [vmem:[#allocation3 + $0x47] sm:$0xff] }
 0x7e7   : > { %27627 = vmatmul.mubr.msk.f32.gmra.mrb[58].mxu0 %vm421_vm1, %v39199_v5  ;;  %v29815_v5 = vpack.c.bf16 %v10533_v43, %v10532_v45  ;;  %v29823_v43 = vpack.c.bf16 %v10537_v7, %v10536_v15  ;;  %v10108_v45 = vld [vmem:[#allocation3 + $0x8f] sm:$0xff]  ;;  %v10113_v15 = vld [vmem:[#allocation3 + $0xe7] sm:$0xff] }
 0x7e8   : > { %27629 = vmatprep.mubr.msk.f32.mxu0 %vm421_vm1, %v39200_v38  ;;  %v10104_v38 = vld [vmem:[#allocation3 + $0x4f] sm:$0xff] }
 0x7e9   : > { %v10112_v7 = vld [vmem:[#allocation3 + $0xcf] sm:$0xff] }
 0x7eb   : > { %27630 = vmatmul.mubr.msk.f32.gmra.mrb[60].mxu0 %vm421_vm1, %v35048_v44  ;;  %v10105_v44 = vld [vmem:[#allocation3 + $0x67] sm:$0xff] }
 0x7ec   : > { %27632 = vmatprep.mubr.msk.f32.mxu0 %vm421_vm1, %v35248_v3  ;;  %v29819_v3 = vpack.c.bf16 %v10535_v28, %v10534_v32  ;;  %v10110_v28 = vld [vmem:[#allocation3 + $0xaf] sm:$0xff]  ;;  %v10117_v32 = vld [vmem:[#allocation3 + $0x127] sm:$0xff] }
 0x7ef   : > { %27633 = vmatmul.mubr.msk.f32.gmra.mrb[62].mxu0 %vm421_vm1, %v35252_v48  ;;  %v10107_v48 = vld [vmem:[#allocation3 + $0x87] sm:$0xff] }
 0x7f0   : > { %27651 = vmatprep.mubr.msk.f32.mxu0 %vm421_vm1, %v10103_v8  ;;  %v10924_v8 = vld [vmem:[#allocation8 + $0x440] sm:$0xff] }
 0x7f3   : > { %27652 = vmatmul.mubr.msk.f32.vlgmr.msra.gmra.mrb[32].mxu0 %vm421_vm1, %v10104_v38  ;;  %v10925_v38 = vld [vmem:[#allocation8 + $0x448] sm:$0xff] }
 0x7f4   : > { %29814 = vmatpush3.bf16.msra.mxu0 %v29811_v10  ;;  %27654 = vmatprep.mubr.msk.f32.mxu0 %vm421_vm1, %v10105_v44  ;;  %v10109_v10 = vld [vmem:[#allocation3 + $0xa7] sm:$0xff]  ;;  %v29827_v44 = vpack.c.bf16 %v10925_v38, %v10924_v8  ;;  %v10120_v8 = vld [vmem:[#allocation3 + $0x14f] sm:$0xff] }
 0x7f5   : > { %29816 = vmatprep.subr.bf16.mxu0 %v29815_v5 }
 0x7f7   : > { %27655 = vmatmul.mubr.msk.f32.gmra.mrb[34].mxu0 %vm421_vm1, %v10106_v29  ;;  %v10111_v29 = vld [vmem:[#allocation3 + $0xc7] sm:$0xff] }
 0x7f8   : > { %27657 = vmatprep.mubr.msk.f32.mxu0 %vm421_vm1, %v10107_v48  ;;  %29818 = vmatpush3.bf16.msra.mxu0 %v29815_v5  ;;  %v10114_v48 = vld [vmem:[#allocation3 + $0xef] sm:$0xff] }
 0x7f9   : > { %29820 = vmatprep.subr.bf16.mxu0 %v29819_v3  ;;  %v10116_v5 = vld [vmem:[#allocation3 + $0x10f] sm:$0xff] }
 0x7fb   : > { %27658 = vmatmul.mubr.msk.f32.gmra.mrb[36].mxu0 %vm421_vm1, %v10108_v45  ;;  %v10119_v45 = vld [vmem:[#allocation3 + $0x147] sm:$0xff] }
 0x7fc   : > { %27660 = vmatprep.mubr.msk.f32.mxu0 %vm421_vm1, %v10109_v10  ;;  %29822 = vmatpush3.bf16.msra.mxu0 %v29819_v3  ;;  %v10115_v3 = vld [vmem:[#allocation3 + $0x107] sm:$0xff]  ;;  %v10929_v10 = vld [vmem:[#allocation8 + $0x468] sm:$0xff] }
 0x7fd   : > { %29824 = vmatprep.subr.bf16.mxu0 %v29823_v43 }
 0x7ff   : > { %27661 = vmatmul.mubr.msk.f32.gmra.mrb[38].mxu0 %vm421_vm1, %v10110_v28  ;;  %v11395_v28 = vld [vmem:[#allocation8 + $0x4a8] sm:$0xff] }
 0x800   : > { %27663 = vmatprep.mubr.msk.f32.mxu0 %vm421_vm1, %v10111_v29  ;;  %29826 = vmatpush3.bf16.msra.mxu0 %v29823_v43  ;;  %v10118_v43 = vld [vmem:[#allocation3 + $0x12f] sm:$0xff] }
 0x801   : > { %29828 = vmatprep.subr.bf16.mxu0 %v29827_v44 }
 0x803   : > { %27664 = vmatmul.mubr.msk.f32.gmra.mrb[40].mxu0 %vm421_vm1, %v10112_v7 }
 0x804   : > { %27666 = vmatprep.mubr.msk.f32.mxu0 %vm421_vm1, %v10113_v15  ;;  %v10931_v15 = vld [vmem:[#allocation8 + $0x478] sm:$0xff] }
 0x807   : > { %27667 = vmatmul.mubr.msk.f32.gmra.mrb[42].mxu0 %vm421_vm1, %v10114_v48  ;;  %v11396_v48 = vld [vmem:[#allocation8 + $0x4b0] sm:$0xff] }
 0x808   : > { %27669 = vmatprep.mubr.msk.f32.mxu0 %vm421_vm1, %v10115_v3  ;;  %v11397_v3 = vld [vmem:[#allocation8 + $0x4b8] sm:$0xff] }
 0x80b   : > { %27670 = vmatmul.mubr.msk.f32.gmra.mrb[44].mxu0 %vm421_vm1, %v10116_v5 }
 0x80c   : > { %27672 = vmatprep.mubr.msk.f32.mxu0 %vm421_vm1, %v10117_v32  ;;  %v11790_v32 = vld [vmem:[#allocation8 + $0x4f0] sm:$0xff] }
 0x80f   : > { %27673 = vmatmul.mubr.msk.f32.gmra.mrb[46].mxu0 %vm421_vm1, %v10118_v43  ;;  %v11791_v43 = vld [vmem:[#allocation8 + $0x4f8] sm:$0xff] }
 0x810   : > { %27675 = vmatprep.mubr.msk.f32.mxu0 %vm421_vm1, %v10119_v45  ;;  %v29871_v45 = vpack.c.bf16 %v11791_v43, %v11790_v32 }
 0x813   : > { %27676 = vmatmul.mubr.msk.f32.gmra.mrb[48].mxu0 %vm421_vm1, %v10120_v8  ;;  %v12178_v8 = vld [vmem:[#allocation8 + $0x500] sm:$0xff] }
 0x814   : > { %27678 = vmatprep.mubr.msk.f32.mxu0 %vm421_vm1, %v34755_v52  ;;  %v10133_v52 = vld [vmem:[#allocation3 + $0x227] sm:$0xff] }
 0x817   : > { %27679 = vmatmul.mubr.msk.f32.gmra.mrb[50].mxu0 %vm421_vm1, %v34757_v58  ;;  %v10134_v58 = vld [vmem:[#allocation3 + $0x22f] sm:$0xff] }
 0x818   : > { %27681 = vmatprep.mubr.msk.f32.mxu0 %vm421_vm1, %v34767_v36  ;;  %v10926_v36 = vld [vmem:[#allocation8 + $0x450] sm:$0xff] }
 0x81b   : > { %27682 = vmatmul.mubr.msk.f32.gmra.mrb[52].mxu0 %vm421_vm1, %v34769_v61  ;;  %v10927_v61 = vld [vmem:[#allocation8 + $0x458] sm:$0xff] }
 0x81c   : > { %27684 = vmatprep.mubr.msk.f32.mxu0 %vm421_vm1, %v34779_v31  ;;  %v11390_v31 = vld [vmem:[#allocation8 + $0x480] sm:$0xff] }
 0x81f   : > { %27685 = vmatmul.mubr.msk.f32.gmra.mrb[54].mxu0 %vm421_vm1, %v34781_v37  ;;  %v11391_v37 = vld [vmem:[#allocation8 + $0x488] sm:$0xff] }
 0x820   : > { %27687 = vmatprep.mubr.msk.f32.mxu0 %vm421_vm1, %v34790_v60  ;;  %v11392_v60 = vld [vmem:[#allocation8 + $0x490] sm:$0xff] }
 0x823   : > { %27688 = vmatmul.mubr.msk.f32.gmra.mrb[56].mxu0 %vm421_vm1, %v34792_v51  ;;  %v29843_v51 = vpack.c.bf16 %v11391_v37, %v11390_v31 }
 0x824   : > { %27690 = vmatprep.mubr.msk.f32.mxu0 %vm421_vm1, %v34799_v49  ;;  %v11393_v49 = vld [vmem:[#allocation8 + $0x498] sm:$0xff] }
 0x825   : > { %v29847_v38 = vpack.c.bf16 %v11393_v49, %v11392_v60  ;;  %29844 = vmatprep.subr.bf16.mxu1 %v29843_v51 }
 0x826   : > { %29846 = vmatpush3.bf16.msra.mxu1 %v29843_v51  ;;  %v39225_v51 = vld [vmem:[#allocation23_spill] sm:$0xff] }
 0x827   : > { %27691 = vmatmul.mubr.msk.f32.gmra.mrb[58].mxu0 %vm421_vm1, %v34801_v35  ;;  %v29831_v35 = vpack.c.bf16 %v10927_v61, %v10926_v36  ;;  %29848 = vmatprep.subr.bf16.mxu1 %v29847_v38  ;;  %v35429_v36 = vld [vmem:[#allocation9 + $0x1] ss:$0 sm:$0xff]  ;;  %v39226_v49 = vmax.f32 %v39225_v51, 0.0 }
 0x828   : > { %27693 = vmatprep.mubr.msk.f32.mxu0 %vm421_vm1, %v35112_v41  ;;  %v10928_v41 = vld [vmem:[#allocation8 + $0x460] sm:$0xff] }
 0x829   : > { %v29835_v29 = vpack.c.bf16 %v10929_v10, %v10928_v41  ;;  %v39228_v41 = vld [vmem:[#allocation24_spill] sm:$0xff] }
 0x82a   : > { %29850 = vmatpush3.bf16.msra.mxu1 %v29847_v38  ;;  %v39229_v38 = vmax.f32 %v39228_v41, 0.0 }
 0x82b   : > { %27694 = vmatmul.mubr.msk.f32.gmra.mrb[60].mxu0 %vm421_vm1, %v35116_v17  ;;  %v11394_v17 = vld [vmem:[#allocation8 + $0x4a0] sm:$0xff] }
 0x82c   : > { %27696 = vmatprep.mubr.msk.f32.mxu0 %vm421_vm1, %v10133_v52  ;;  %v29851_v7 = vpack.c.bf16 %v11395_v28, %v11394_v17  ;;  %v12179_v52 = vld [vmem:[#allocation8 + $0x508] sm:$0xff] }
 0x82e   : > { %29852 = vmatprep.subr.bf16.mxu1 %v29851_v7 }
 0x82f   : > { %27697 = vmatmul.mubr.msk.f32.gmra.mrb[62].mxu0 %vm421_vm1, %v10134_v58  ;;  %29854 = vmatpush3.bf16.msra.mxu1 %v29851_v7  ;;  %v35426_v58 = vpack.c.bf16 %v12179_v52, %v12178_v8  ;;  %v39231_v7 = vld [vmem:[#allocation38_spill] sm:$0xff]  ;;  %v39255_v8 = vld [vmem:[#allocation17_spill] sm:$0xff] }
 0x830   : > { %27715 = vmatprep.mubr.msk.f32.mxu0 %vm421_vm1, %v34818_v47  ;;  %v10930_v47 = vld [vmem:[#allocation8 + $0x470] sm:$0xff]  ;;  %v39256_v52 = vmax.f32 %v39255_v8, 0.0 }
 0x833   : > { %27716 = vmatmul.mubr.msk.f32.vlgmr.msra.gmra.mrb[32].mxu0 %vm421_vm1, %v34822_v59  ;;  %v29839_v59 = vpack.c.bf16 %v10931_v15, %v10930_v47  ;;  %v39232_v15 = vmax.f32 %v39231_v7, 0.0 }
 0x834   : > { %29830 = vmatpush3.bf16.msra.mxu0 %v29827_v44  ;;  %27718 = vmatprep.mubr.msk.f32.mxu0 %vm421_vm1, %v34826_v4  ;;  %v29855_v4 = vpack.c.bf16 %v11397_v3, %v11396_v48  ;;  %v11789_v44 = vld [vmem:[#allocation8 + $0x4e8] sm:$0xff]  ;;  %v39234_v3 = vld [vmem:[#allocation41_spill] sm:$0xff] }
 0x835   : > { %29832 = vmatprep.subr.bf16.mxu0 %v29831_v35 }
 0x836   : > { %29856 = vmatprep.subr.bf16.mxu1 %v29855_v4 }
 0x837   : > { %27719 = vmatmul.mubr.msk.f32.gmra.mrb[34].mxu0 %vm421_vm1, %v34830_v26  ;;  %29858 = vmatpush3.bf16.msra.mxu1 %v29855_v4  ;;  %v10527_v26 = vld [vmem:[#allocation3 + $0x228] sm:$0xff] }
 0x838   : > { %27721 = vmatprep.mubr.msk.f32.mxu0 %vm421_vm1, %v34834_v40  ;;  %29834 = vmatpush3.bf16.msra.mxu0 %v29831_v35  ;;  %v10528_v40 = vld [vmem:[#allocation3 + $0x230] sm:$0xff] }
 0x839   : > { %29836 = vmatprep.subr.bf16.mxu0 %v29835_v29 }
 0x83b   : > { %27722 = vmatmul.mubr.msk.f32.gmra.mrb[36].mxu0 %vm421_vm1, %v34838_v42  ;;  %v39203_v42 = vld [vmem:[#allocation65_spill] sm:$0xff] }
 0x83c   : > { %27724 = vmatprep.mubr.msk.f32.mxu0 %vm421_vm1, %v34842_v25  ;;  %29838 = vmatpush3.bf16.msra.mxu0 %v29835_v29  ;;  %v39204_v25 = vld [vmem:[#allocation66_spill] sm:$0xff] }
 0x83d   : > { %29840 = vmatprep.subr.bf16.mxu0 %v29839_v59 }
 0x83f   : > { %27725 = vmatmul.mubr.msk.f32.gmra.mrb[38].mxu0 %vm421_vm1, %v34846_v19  ;;  %v39205_v19 = vld [vmem:[#allocation67_spill] sm:$0xff] }
 0x840   : > { %27727 = vmatprep.mubr.msk.f32.mxu0 %vm421_vm1, %v34850_v54  ;;  %29842 = vmatpush3.bf16.msra.mxu0 %v29839_v59  ;;  %v39206_v54 = vld [vmem:[#allocation68_spill] sm:$0xff]  ;;  %v39235_v59 = vmax.f32 %v39234_v3, 0.0 }
 0x843   : > { %27728 = vmatmul.mubr.msk.f32.gmra.mrb[40].mxu0 %vm421_vm1, %v34854_v18  ;;  %v39207_v18 = vld [vmem:[#allocation69_spill] sm:$0xff] }
 0x844   : > { %27730 = vmatprep.mubr.msk.f32.mxu0 %vm421_vm1, %v34858_v0  ;;  %v39208_v0 = vld [vmem:[#allocation70_spill] sm:$0xff] }
 0x847   : > { %27731 = vmatmul.mubr.msk.f32.gmra.mrb[42].mxu0 %vm421_vm1, %v34862_v63  ;;  %v39209_v63 = vld [vmem:[#allocation71_spill] sm:$0xff] }
 0x848   : > { %27733 = vmatprep.mubr.msk.f32.mxu0 %vm421_vm1, %v34866_v14  ;;  %v39210_v14 = vld [vmem:[#allocation72_spill] sm:$0xff] }
 0x84b   : > { %27734 = vmatmul.mubr.msk.f32.gmra.mrb[44].mxu0 %vm421_vm1, %v34870_v20  ;;  %v39211_v20 = vld [vmem:[#allocation73_spill] sm:$0xff] }
 0x84c   : > { %27736 = vmatprep.mubr.msk.f32.mxu0 %vm421_vm1, %v34874_v1  ;;  %v39212_v1 = vld [vmem:[#allocation74_spill] sm:$0xff] }
 0x84f   : > { %27737 = vmatmul.mubr.msk.f32.gmra.mrb[46].mxu0 %vm421_vm1, %v34878_v30  ;;  %v39213_v30 = vld [vmem:[#allocation75_spill] sm:$0xff] }
 0x850   : > { %27739 = vmatprep.mubr.msk.f32.mxu0 %vm421_vm1, %v34882_v11  ;;  %v39214_v11 = vld [vmem:[#allocation76_spill] sm:$0xff] }
 0x853   : > { %27740 = vmatmul.mubr.msk.f32.gmra.mrb[48].mxu0 %vm421_vm1, %v34886_v46  ;;  %v39215_v46 = vld [vmem:[#allocation77_spill] sm:$0xff] }
 0x854   : > { %27742 = vmatprep.mubr.msk.f32.mxu0 %vm421_vm1, %v34890_v62  ;;  %v39216_v62 = vld [vmem:[#allocation78_spill] sm:$0xff] }
 0x857   : > { %27743 = vmatmul.mubr.msk.f32.gmra.mrb[50].mxu0 %vm421_vm1, %v39166_v34  ;;  %v39219_v34 = vld [vmem:[#allocation81_spill] sm:$0xff] }
 0x858   : > { %27745 = vmatprep.mubr.msk.f32.mxu0 %vm421_vm1, %v39167_v53  ;;  %v39220_v53 = vld [vmem:[#allocation82_spill] sm:$0xff] }
 0x85b   : > { %27746 = vmatmul.mubr.msk.f32.gmra.mrb[52].mxu0 %vm421_vm1, %v39168_v50  ;;  %v39221_v50 = vld [vmem:[#allocation40_spill] sm:$0xff] }
 0x85c   : > { %27748 = vmatprep.mubr.msk.f32.mxu0 %vm421_vm1, %v39169_v33  ;;  %v39222_v33 = vld [vmem:[#allocation44_spill] sm:$0xff] }
 0x85f   : > { %27749 = vmatmul.mubr.msk.f32.gmra.mrb[54].mxu0 %vm421_vm1, %v39170_v24  ;;  %v39223_v24 = vld [vmem:[#allocation46_spill] sm:$0xff] }
 0x860   : > { %27751 = vmatprep.mubr.msk.f32.mxu0 %vm421_vm1, %v39171_v57  ;;  %v10921_v57 = vld [vmem:[#allocation3 + $0x229] sm:$0xff] }
 0x863   : > { %27752 = vmatmul.mubr.msk.f32.gmra.mrb[56].mxu0 %vm421_vm1, %v39172_v13  ;;  %v39224_v13 = vld [vmem:[#allocation48_spill] sm:$0xff] }
 0x864   : > { %27754 = vmatprep.mubr.msk.f32.mxu0 %vm421_vm1, %v39173_v23  ;;  %v10922_v23 = vld [vmem:[#allocation3 + $0x231] sm:$0xff] }
 0x867   : > { %27755 = vmatmul.mubr.msk.f32.gmra.mrb[58].mxu0 %vm421_vm1, %v39174_v6  ;;  %v11357_v6 = vld [vmem:[#allocation3 + $0x7] sm:$0xff] }
 0x868   : > { %27757 = vmatprep.mubr.msk.f32.mxu0 %vm421_vm1, %v35180_v21  ;;  %27843 = vmatprep.mubr.msk.f32.mxu1 %vm421_vm1, %v11357_v6  ;;  %v11358_v21 = vld [vmem:[#allocation3 + $0xf] sm:$0xff] }
 0x869   : > { %27844 = vmatmul.mubr.msk.f32.vlgmr.msra.gmra.mrb[32].mxu1 %vm421_vm1, %v11358_v21 }
 0x86b   : > { %27758 = vmatmul.mubr.msk.f32.gmra.mrb[60].mxu0 %vm421_vm1, %v35184_v2  ;;  %v11784_v2 = vld [vmem:[#allocation8 + $0x4c0] sm:$0xff] }
 0x86c   : > { %27760 = vmatprep.mubr.msk.f32.mxu0 %vm421_vm1, %v10527_v26 }
 0x86f   : > { %27761 = vmatmul.mubr.msk.f32.gmra.mrb[62].mxu0 %vm421_vm1, %v10528_v40 }
 0x870   : > { %27779 = vmatprep.mubr.msk.f32.mxu0 %vm421_vm1, %v34940_v39  ;;  %v39217_v39 = vld [vmem:[#allocation79_spill] sm:$0xff] }
 0x873   : > { %27780 = vmatmul.mubr.msk.f32.vlgmr.msra.gmra.mrb[32].mxu0 %vm421_vm1, %v34944_v9  ;;  %v39218_v9 = vld [vmem:[#allocation80_spill] sm:$0xff] }
 0x874   : > { %27782 = vmatprep.mubr.msk.f32.mxu0 %vm421_vm1, %v39176_v12  ;;  %v11785_v12 = vld [vmem:[#allocation8 + $0x4c8] sm:$0xff] }
 0x877   : > { %27783 = vmatmul.mubr.msk.f32.gmra.mrb[34].mxu0 %vm421_vm1, %v39177_v56  ;;  %v29859_v56 = vpack.c.bf16 %v11785_v12, %v11784_v2  ;;  %v39249_v2 = vld [vmem:[#allocation15_spill] sm:$0xff] }
 0x878   : > { %27785 = vmatprep.mubr.msk.f32.mxu0 %vm421_vm1, %v39178_v55  ;;  %v11786_v55 = vld [vmem:[#allocation8 + $0x4d0] sm:$0xff]  ;;  %v39250_v12 = vmax.f32 %v39249_v2, 0.0 }
 0x879   : > { %29860 = vmatprep.subr.bf16.mxu1 %v29859_v56 }
 0x87a   : > { %29862 = vmatpush3.bf16.msra.mxu1 %v29859_v56 }
 0x87b   : > { %27786 = vmatmul.mubr.msk.f32.gmra.mrb[36].mxu0 %vm421_vm1, %v39179_v27  ;;  %v11787_v27 = vld [vmem:[#allocation8 + $0x4d8] sm:$0xff] }
 0x87c   : > { %27788 = vmatprep.mubr.msk.f32.mxu0 %vm421_vm1, %v39180_v22  ;;  %v29863_v22 = vpack.c.bf16 %v11787_v27, %v11786_v55  ;;  %v39252_v55 = vld [vmem:[#allocation16_spill] sm:$0xff] }
 0x87d   : > { %v39253_v27 = vmax.f32 %v39252_v55, 0.0 }
 0x87e   : > { %29864 = vmatprep.subr.bf16.mxu1 %v29863_v22 }
 0x87f   : > { %27789 = vmatmul.mubr.msk.f32.gmra.mrb[38].mxu0 %vm421_vm1, %v39181_v16  ;;  %29866 = vmatpush3.bf16.msra.mxu1 %v29863_v22  ;;  %v11788_v16 = vld [vmem:[#allocation8 + $0x4e0] sm:$0xff] }
 0x880   : > { %27791 = vmatprep.mubr.msk.f32.mxu0 %vm421_vm1, %v39203_v42  ;;  %v29867_v5 = vpack.c.bf16 %v11789_v44, %v11788_v16 }
 0x882   : > { %29868 = vmatprep.subr.bf16.mxu1 %v29867_v5 }
 0x883   : > { %27792 = vmatmul.mubr.msk.f32.gmra.mrb[40].mxu0 %vm421_vm1, %v39204_v25  ;;  %29870 = vmatpush3.bf16.msra.mxu1 %v29867_v5 }
 0x884   : > { %27794 = vmatprep.mubr.msk.f32.mxu0 %vm421_vm1, %v39205_v19  ;;  %29872 = vmatprep.subr.bf16.mxu1 %v29871_v45  ;;  %v39237_v19 = vld [vmem:[#allocation42_spill] sm:$0xff] }
 0x887   : > { %27795 = vmatmul.mubr.msk.f32.gmra.mrb[42].mxu0 %vm421_vm1, %v39206_v54  ;;  %29874 = vmatpush3.bf16.msra.mxu1 %v29871_v45  ;;  %v39238_v54 = vmax.f32 %v39237_v19, 0.0 }
 0x888   : > { %27797 = vmatprep.mubr.msk.f32.mxu0 %vm421_vm1, %v39207_v18  ;;  %29876 = vmatprep.subr.bf16.mxu1 %v35426_v58 }
 0x88b   : > { %27798 = vmatmul.mubr.msk.f32.gmra.mrb[44].mxu0 %vm421_vm1, %v39208_v0  ;;  %v39240_v0 = vld [vmem:[#allocation43_spill] sm:$0xff] }
 0x88c   : > { %27800 = vmatprep.mubr.msk.f32.mxu0 %vm421_vm1, %v39209_v63  ;;  %v39241_v63 = vmax.f32 %v39240_v0, 0.0  ;;  %v39267_v0 = vld [vmem:[#allocation21_spill] sm:$0xff] }
 0x88f   : > { %27801 = vmatmul.mubr.msk.f32.gmra.mrb[46].mxu0 %vm421_vm1, %v39210_v14 }
 0x890   : > { %27803 = vmatprep.mubr.msk.f32.mxu0 %vm421_vm1, %v39211_v20 }
 0x893   : > { %27804 = vmatmul.mubr.msk.f32.gmra.mrb[48].mxu0 %vm421_vm1, %v39212_v1 }
 0x894   : > { %27806 = vmatprep.mubr.msk.f32.mxu0 %vm421_vm1, %v39213_v30 }
 0x897   : > { %27807 = vmatmul.mubr.msk.f32.gmra.mrb[50].mxu0 %vm421_vm1, %v39214_v11 }
 0x898   : > { %27809 = vmatprep.mubr.msk.f32.mxu0 %vm421_vm1, %v39215_v46 }
 0x89b   : > { %27810 = vmatmul.mubr.msk.f32.gmra.mrb[52].mxu0 %vm421_vm1, %v39216_v62 }
 0x89c   : > { %27812 = vmatprep.mubr.msk.f32.mxu0 %vm421_vm1, %v39217_v39  ;;  %v39243_v39 = vld [vmem:[#allocation45_spill] sm:$0xff] }
 0x89f   : > { %27813 = vmatmul.mubr.msk.f32.gmra.mrb[54].mxu0 %vm421_vm1, %v39218_v9  ;;  %v39244_v9 = vmax.f32 %v39243_v39, 0.0 }
 0x8a0   : > { %27815 = vmatprep.mubr.msk.f32.mxu0 %vm421_vm1, %v39219_v34 }
 0x8a3   : > { %27816 = vmatmul.mubr.msk.f32.gmra.mrb[56].mxu0 %vm421_vm1, %v39220_v53  ;;  %v39246_v53 = vld [vmem:[#allocation47_spill] sm:$0xff] }
 0x8a4   : > { %27818 = vmatprep.mubr.msk.f32.mxu0 %vm421_vm1, %v39221_v50  ;;  %v39247_v50 = vmax.f32 %v39246_v53, 0.0 }
 0x8a7   : > { %27819 = vmatmul.mubr.msk.f32.gmra.mrb[58].mxu0 %vm421_vm1, %v39222_v33 }
 0x8a8   : > { %27821 = vmatprep.mubr.msk.f32.mxu0 %vm421_vm1, %v39223_v24 }
 0x8ab   : > { %27822 = vmatmul.mubr.msk.f32.gmra.mrb[60].mxu0 %vm421_vm1, %v39224_v13 }
 0x8ac   : > { %27824 = vmatprep.mubr.msk.f32.mxu0 %vm421_vm1, %v10921_v57 }
 0x8af   : > { %27825 = vmatmul.mubr.msk.f32.gmra.mrb[62].mxu0 %vm421_vm1, %v10922_v23 }
 0x946   : > { %v27781_v61 = vpop.f32.mrb[32].mxu0 }
 0x947   : > { %v30347_v31 = vadd.f32 %v27781_v61, %v35429_v36  ;;  %v11094_v37 = vpop.f32.mrb[33].mxu0 }
 0x948   : > { %v30348_v60 = vadd.f32 %v35429_v36, %v11094_v37 }
 0x949   : > { %v35435_v35 = vadd.f32 %v30347_v31, %v39226_v49  ;;  %v39258_v31 = vld [vmem:[#allocation18_spill] sm:$0xff] }
 0x94a   : > { %v35439_v10 = vadd.f32 %v30348_v60, %v39229_v38  ;;  %v27784_v17 = vpop.f32.mrb[34].mxu0  ;;  %v39259_v37 = vmax.f32 %v39258_v31, 0.0  ;;  %v39279_v31 = vld [vmem:[#allocation25_spill] sm:$0xff] }
 0x94b   : > { %39227 = vst [vmem:[#allocation51_spill] sm:$0xff] %v35435_v35  ;;  %11318 = vst.msk [vmem:[#allocation3 + $0x30] sm:$0xff] %vm421_vm1, %v35435_v35  ;;  %v30349_v28 = vadd.f32 %v27784_v17, %v35429_v36  ;;  %v11104_v29 = vpop.f32.mrb[35].mxu0  ;;  %v12575_v35 = vld [vmem:[#allocation8 + $0x558] sm:$0xff] }
 0x94c   : > { %39230 = vst [vmem:[#allocation52_spill] sm:$0xff] %v35439_v10  ;;  %11317 = vst.msk [vmem:[#allocation3 + $0x28] sm:$0xff] %vm421_vm1, %v35439_v10  ;;  %v30350_v47 = vadd.f32 %v35429_v36, %v11104_v29  ;;  %v39261_v29 = vld [vmem:[#allocation19_spill] sm:$0xff]  ;;  %v12574_v10 = vld [vmem:[#allocation8 + $0x550] sm:$0xff] }
 0x94d   : > { %v35449_v48 = vadd.f32 %v30349_v28, %v39232_v15  ;;  %v39264_v15 = vld [vmem:[#allocation20_spill] sm:$0xff] }
 0x94e   : > { %v35453_v4 = vadd.f32 %v30350_v47, %v39235_v59  ;;  %v27787_v26 = vpop.f32.mrb[36].mxu0  ;;  %v39262_v47 = vmax.f32 %v39261_v29, 0.0  ;;  %v39265_v3 = vmax.f32 %v39264_v15, 0.0 }
 0x94f   : > { %39233 = vst [vmem:[#allocation53_spill] sm:$0xff] %v35449_v48  ;;  %11320 = vst.msk [vmem:[#allocation3 + $0x50] sm:$0xff] %vm421_vm1, %v35449_v48  ;;  %v30351_v40 = vadd.f32 %v27787_v26, %v35429_v36  ;;  %v11114_v42 = vpop.f32.mrb[37].mxu0 }
 0x950   : > { %39236 = vst [vmem:[#allocation54_spill] sm:$0xff] %v35453_v4  ;;  %11319 = vst.msk [vmem:[#allocation3 + $0x48] sm:$0xff] %vm421_vm1, %v35453_v4  ;;  %v30352_v25 = vadd.f32 %v35429_v36, %v11114_v42  ;;  %v12145_v4 = vld [vmem:[#allocation3 + $0x9] sm:$0xff] }
 0x951   : > { %v35463_v18 = vadd.f32 %v30351_v40, %v39238_v54 }
 0x952   : > { %v35467_v14 = vadd.f32 %v30352_v25, %v39241_v63  ;;  %v27790_v20 = vpop.f32.mrb[38].mxu0  ;;  %v39268_v63 = vmax.f32 %v39267_v0, 0.0 }
 0x953   : > { %39239 = vst [vmem:[#allocation55_spill] sm:$0xff] %v35463_v18  ;;  %11322 = vst.msk [vmem:[#allocation3 + $0x70] sm:$0xff] %vm421_vm1, %v35463_v18  ;;  %v30353_v1 = vadd.f32 %v27790_v20, %v35429_v36  ;;  %v11124_v30 = vpop.f32.mrb[39].mxu0  ;;  %v35472_v11 = vld [vmem:[#allocation3 + $0x27] sm:$0xff]  ;;  %v35474_v46 = vld [vmem:[#allocation3 + $0x2f] sm:$0xff] }
 0x954   : > { %39242 = vst [vmem:[#allocation56_spill] sm:$0xff] %v35467_v14  ;;  %11321 = vst.msk [vmem:[#allocation3 + $0x68] sm:$0xff] %vm421_vm1, %v35467_v14  ;;  %v30354_v62 = vadd.f32 %v35429_v36, %v11124_v30  ;;  %27846 = vmatprep.mubr.msk.f32.mxu1 %vm421_vm1, %v35472_v11 }
 0x955   : > { %v35483_v34 = vadd.f32 %v30353_v1, %v39244_v9  ;;  %27847 = vmatmul.mubr.msk.f32.gmra.mrb[34].mxu1 %vm421_vm1, %v35474_v46  ;;  %v39270_v1 = vld [vmem:[#allocation22_spill] sm:$0xff] }
 0x956   : > { %v35489_v33 = vadd.f32 %v30354_v62, %v39247_v50  ;;  %v27793_v24 = vpop.f32.mrb[40].mxu0  ;;  %v39271_v30 = vmax.f32 %v39270_v1, 0.0 }
 0x957   : > { %39245 = vst [vmem:[#allocation57_spill] sm:$0xff] %v35483_v34  ;;  %11324 = vst.msk [vmem:[#allocation3 + $0x90] sm:$0xff] %vm421_vm1, %v35483_v34  ;;  %v30355_v57 = vadd.f32 %v27793_v24, %v35429_v36  ;;  %v11134_v13 = vpop.f32.mrb[41].mxu0  ;;  %v35494_v23 = vld [vmem:[#allocation3 + $0x47] sm:$0xff]  ;;  %v35496_v6 = vld [vmem:[#allocation3 + $0x4f] sm:$0xff] }
 0x958   : > { %39248 = vst [vmem:[#allocation58_spill] sm:$0xff] %v35489_v33  ;;  %11323 = vst.msk [vmem:[#allocation3 + $0x88] sm:$0xff] %vm421_vm1, %v35489_v33  ;;  %v30356_v21 = vadd.f32 %v35429_v36, %v11134_v13  ;;  %27849 = vmatprep.mubr.msk.f32.mxu1 %vm421_vm1, %v35494_v23  ;;  %v39273_v13 = vld [vmem:[#allocation49_spill] sm:$0xff] }
 0x959   : > { %v35505_v56 = vadd.f32 %v30355_v57, %v39250_v12  ;;  %27850 = vmatmul.mubr.msk.f32.gmra.mrb[36].mxu1 %vm421_vm1, %v35496_v6  ;;  %v39276_v12 = vld [vmem:[#allocation50_spill] sm:$0xff] }
 0x95a   : > { %v35511_v22 = vadd.f32 %v30356_v21, %v39253_v27  ;;  %v27796_v16 = vpop.f32.mrb[42].mxu0  ;;  %v39274_v21 = vmax.f32 %v39273_v13, 0.0  ;;  %v39277_v55 = vmax.f32 %v39276_v12, 0.0  ;;  %v39291_v12 = vld [vmem:[#allocation29_spill] sm:$0xff] }
 0x95b   : > { %39251 = vst [vmem:[#allocation59_spill] sm:$0xff] %v35505_v56  ;;  %11326 = vst.msk [vmem:[#allocation3 + $0xb0] sm:$0xff] %vm421_vm1, %v35505_v56  ;;  %v30357_v44 = vadd.f32 %v27796_v16, %v35429_v36  ;;  %v11144_v5 = vpop.f32.mrb[43].mxu0  ;;  %v35516_v32 = vld [vmem:[#allocation3 + $0x67] sm:$0xff]  ;;  %v35518_v43 = vld [vmem:[#allocation3 + $0x6f] sm:$0xff] }
 0x95c   : > { %39254 = vst [vmem:[#allocation60_spill] sm:$0xff] %v35511_v22  ;;  %11325 = vst.msk [vmem:[#allocation3 + $0xa8] sm:$0xff] %vm421_vm1, %v35511_v22  ;;  %v30358_v45 = vadd.f32 %v35429_v36, %v11144_v5  ;;  %27852 = vmatprep.mubr.msk.f32.mxu1 %vm421_vm1, %v35516_v32 }
 0x95d   : > { %v35527_v61 = vadd.f32 %v30357_v44, %v39256_v52  ;;  %27853 = vmatmul.mubr.msk.f32.gmra.mrb[38].mxu1 %vm421_vm1, %v35518_v43 }
 0x95e   : > { %v35533_v60 = vadd.f32 %v30358_v45, %v39259_v37  ;;  %v27799_v51 = vpop.f32.mrb[44].mxu0  ;;  %v39280_v37 = vmax.f32 %v39279_v31, 0.0 }
 0x95f   : > { %39257 = vst [vmem:[#allocation61_spill] sm:$0xff] %v35527_v61  ;;  %11328 = vst.msk [vmem:[#allocation3 + $0xd0] sm:$0xff] %vm421_vm1, %v35527_v61  ;;  %v30359_v49 = vadd.f32 %v27799_v51, %v35429_v36  ;;  %v11154_v41 = vpop.f32.mrb[45].mxu0  ;;  %v35538_v38 = vld [vmem:[#allocation3 + $0x87] sm:$0xff]  ;;  %v35540_v17 = vld [vmem:[#allocation3 + $0x8f] sm:$0xff] }
 0x960   : > { %39260 = vst [vmem:[#allocation62_spill] sm:$0xff] %v35533_v60  ;;  %11327 = vst.msk [vmem:[#allocation3 + $0xc8] sm:$0xff] %vm421_vm1, %v35533_v60  ;;  %v30360_v28 = vadd.f32 %v35429_v36, %v11154_v41  ;;  %27855 = vmatprep.mubr.msk.f32.mxu1 %vm421_vm1, %v35538_v38 }
 0x961   : > { %v35549_v7 = vadd.f32 %v30359_v49, %v39262_v47  ;;  %27856 = vmatmul.mubr.msk.f32.gmra.mrb[40].mxu1 %vm421_vm1, %v35540_v17  ;;  %v39282_v49 = vld [vmem:[#allocation26_spill] sm:$0xff] }
 0x962   : > { %v35555_v59 = vadd.f32 %v30360_v28, %v39265_v3  ;;  %v27802_v26 = vpop.f32.mrb[46].mxu0  ;;  %v39283_v41 = vmax.f32 %v39282_v49, 0.0 }
 0x963   : > { %39263 = vst [vmem:[#allocation63_spill] sm:$0xff] %v35549_v7  ;;  %11330 = vst.msk [vmem:[#allocation3 + $0xf0] sm:$0xff] %vm421_vm1, %v35549_v7  ;;  %v30361_v40 = vadd.f32 %v27802_v26, %v35429_v36  ;;  %v11164_v42 = vpop.f32.mrb[47].mxu0  ;;  %v35560_v25 = vld [vmem:[#allocation3 + $0xa7] sm:$0xff]  ;;  %v35562_v19 = vld [vmem:[#allocation3 + $0xaf] sm:$0xff] }
 0x964   : > { %39266 = vst [vmem:[#allocation64_spill] sm:$0xff] %v35555_v59  ;;  %11329 = vst.msk [vmem:[#allocation3 + $0xe8] sm:$0xff] %vm421_vm1, %v35555_v59  ;;  %v30362_v54 = vadd.f32 %v35429_v36, %v11164_v42  ;;  %27858 = vmatprep.mubr.msk.f32.mxu1 %vm421_vm1, %v35560_v25  ;;  %v39285_v42 = vld [vmem:[#allocation27_spill] sm:$0xff] }
 0x965   : > { %v35571_v20 = vadd.f32 %v30361_v40, %v39268_v63  ;;  %27859 = vmatmul.mubr.msk.f32.gmra.mrb[42].mxu1 %vm421_vm1, %v35562_v19  ;;  %v39288_v63 = vld [vmem:[#allocation28_spill] sm:$0xff] }
 0x966   : > { %v35577_v62 = vadd.f32 %v30362_v54, %v39271_v30  ;;  %v27805_v39 = vpop.f32.mrb[48].mxu0  ;;  %v39286_v54 = vmax.f32 %v39285_v42, 0.0  ;;  %v39289_v1 = vmax.f32 %v39288_v63, 0.0 }
 0x967   : > { %39269 = vst [vmem:[#allocation65_spill] sm:$0xff] %v35571_v20  ;;  %11332 = vst.msk [vmem:[#allocation3 + $0x110] sm:$0xff] %vm421_vm1, %v35571_v20  ;;  %v30363_v9 = vadd.f32 %v27805_v39, %v35429_v36  ;;  %v11174_v53 = vpop.f32.mrb[49].mxu0  ;;  %v35582_v50 = vld [vmem:[#allocation3 + $0xc7] sm:$0xff]  ;;  %v35584_v24 = vld [vmem:[#allocation3 + $0xcf] sm:$0xff] }
 0x968   : > { %39272 = vst [vmem:[#allocation66_spill] sm:$0xff] %v35577_v62  ;;  %11331 = vst.msk [vmem:[#allocation3 + $0x108] sm:$0xff] %vm421_vm1, %v35577_v62  ;;  %v30364_v57 = vadd.f32 %v35429_v36, %v11174_v53  ;;  %27861 = vmatprep.mubr.msk.f32.mxu1 %vm421_vm1, %v35582_v50 }
 0x969   : > { %v35593_v2 = vadd.f32 %v30363_v9, %v39274_v21  ;;  %27862 = vmatmul.mubr.msk.f32.gmra.mrb[44].mxu1 %vm421_vm1, %v35584_v24 }
 0x96a   : > { %v35599_v27 = vadd.f32 %v30364_v57, %v39277_v55  ;;  %v27808_v16 = vpop.f32.mrb[50].mxu0  ;;  %v39292_v55 = vmax.f32 %v39291_v12, 0.0 }
 0x96b   : > { %39275 = vst [vmem:[#allocation67_spill] sm:$0xff] %v35593_v2  ;;  %11334 = vst.msk [vmem:[#allocation3 + $0x130] sm:$0xff] %vm421_vm1, %v35593_v2  ;;  %v30365_v44 = vadd.f32 %v27808_v16, %v35429_v36  ;;  %v11184_v5 = vpop.f32.mrb[51].mxu0  ;;  %v35604_v45 = vld [vmem:[#allocation3 + $0xe7] sm:$0xff]  ;;  %v35606_v8 = vld [vmem:[#allocation3 + $0xef] sm:$0xff] }
 0x96c   : > { %39278 = vst [vmem:[#allocation68_spill] sm:$0xff] %v35599_v27  ;;  %11333 = vst.msk [vmem:[#allocation3 + $0x128] sm:$0xff] %vm421_vm1, %v35599_v27  ;;  %v30366_v52 = vadd.f32 %v35429_v36, %v11184_v5  ;;  %27864 = vmatprep.mubr.msk.f32.mxu1 %vm421_vm1, %v35604_v45 }
 0x96d   : > { %v35615_v51 = vadd.f32 %v30365_v44, %v39280_v37  ;;  %27865 = vmatmul.mubr.msk.f32.gmra.mrb[46].mxu1 %vm421_vm1, %v35606_v8  ;;  %v39294_v44 = vld [vmem:[#allocation30_spill] sm:$0xff] }
 0x96e   : > { %v35621_v28 = vadd.f32 %v30366_v52, %v39283_v41  ;;  %v27811_v29 = vpop.f32.mrb[52].mxu0  ;;  %v39295_v5 = vmax.f32 %v39294_v44, 0.0  ;;  %v39303_v44 = vld [vmem:[#allocation33_spill] sm:$0xff]  ;;  %v35838_v27 = vld [vmem:[#allocation3 + $0x110] sm:$0xff] }
 0x96f   : > { %39281 = vst [vmem:[#allocation69_spill] sm:$0xff] %v35615_v51  ;;  %11336 = vst.msk [vmem:[#allocation3 + $0x150] sm:$0xff] %vm421_vm1, %v35615_v51  ;;  %v30367_v47 = vadd.f32 %v27811_v29, %v35429_v36  ;;  %v11194_v15 = vpop.f32.mrb[53].mxu0  ;;  %v35626_v3 = vld [vmem:[#allocation3 + $0x107] sm:$0xff]  ;;  %v35628_v26 = vld [vmem:[#allocation3 + $0x10f] sm:$0xff] }
 0x970   : > { %39284 = vst [vmem:[#allocation70_spill] sm:$0xff] %v35621_v28  ;;  %11335 = vst.msk [vmem:[#allocation3 + $0x148] sm:$0xff] %vm421_vm1, %v35621_v28  ;;  %v30368_v40 = vadd.f32 %v35429_v36, %v11194_v15  ;;  %27867 = vmatprep.mubr.msk.f32.mxu1 %vm421_vm1, %v35626_v3  ;;  %v39297_v15 = vld [vmem:[#allocation31_spill] sm:$0xff]  ;;  %v35834_v51 = vld [vmem:[#allocation3 + $0x108] sm:$0xff] }
 0x971   : > { %v35637_v0 = vadd.f32 %v30367_v47, %v39286_v54  ;;  %27868 = vmatmul.mubr.msk.f32.gmra.mrb[48].mxu1 %vm421_vm1, %v35628_v26  ;;  %v39300_v54 = vld [vmem:[#allocation32_spill] sm:$0xff]  ;;  %v35830_v28 = vld [vmem:[#allocation3 + $0xf0] sm:$0xff] }
 0x972   : > { %v35643_v30 = vadd.f32 %v30368_v40, %v39289_v1  ;;  %v27814_v39 = vpop.f32.mrb[54].mxu0  ;;  %v39298_v40 = vmax.f32 %v39297_v15, 0.0  ;;  %v39301_v63 = vmax.f32 %v39300_v54, 0.0  ;;  %v35846_v62 = vld [vmem:[#allocation3 + $0x130] sm:$0xff] }
 0x973   : > { %39287 = vst [vmem:[#allocation71_spill] sm:$0xff] %v35637_v0  ;;  %11338 = vst.msk [vmem:[#allocation3 + $0x170] sm:$0xff] %vm421_vm1, %v35637_v0  ;;  %v30369_v9 = vadd.f32 %v27814_v39, %v35429_v36  ;;  %v11204_v53 = vpop.f32.mrb[55].mxu0  ;;  %v35648_v57 = vld [vmem:[#allocation3 + $0x127] sm:$0xff]  ;;  %v35650_v13 = vld [vmem:[#allocation3 + $0x12f] sm:$0xff] }
 0x974   : > { %39290 = vst [vmem:[#allocation72_spill] sm:$0xff] %v35643_v30  ;;  %11337 = vst.msk [vmem:[#allocation3 + $0x168] sm:$0xff] %vm421_vm1, %v35643_v30  ;;  %v30370_v21 = vadd.f32 %v35429_v36, %v11204_v53  ;;  %27870 = vmatprep.mubr.msk.f32.mxu1 %vm421_vm1, %v35648_v57  ;;  %v12185_v30 = vld [vmem:[#allocation8 + $0x538] sm:$0xff]  ;;  %v35798_v0 = vld [vmem:[#allocation3 + $0x70] sm:$0xff] }
 0x975   : > { %v35659_v16 = vadd.f32 %v30369_v9, %v39292_v55  ;;  %27871 = vmatmul.mubr.msk.f32.gmra.mrb[50].mxu1 %vm421_vm1, %v35650_v13  ;;  %v35842_v2 = vld [vmem:[#allocation3 + $0x128] sm:$0xff] }
 0x976   : > { %v35665_v52 = vadd.f32 %v30370_v21, %v39295_v5  ;;  %v27817_v31 = vpop.f32.mrb[56].mxu0  ;;  %v39304_v5 = vmax.f32 %v39303_v44, 0.0  ;;  %v35854_v59 = vld [vmem:[#allocation3 + $0x150] sm:$0xff] }
 0x977   : > { %39293 = vst [vmem:[#allocation73_spill] sm:$0xff] %v35659_v16  ;;  %11340 = vst.msk [vmem:[#allocation3 + $0x190] sm:$0xff] %vm421_vm1, %v35659_v16  ;;  %v30371_v37 = vadd.f32 %v27817_v31, %v35429_v36  ;;  %v11214_v49 = vpop.f32.mrb[57].mxu0  ;;  %v35670_v41 = vld [vmem:[#allocation3 + $0x147] sm:$0xff]  ;;  %v35672_v29 = vld [vmem:[#allocation3 + $0x14f] sm:$0xff] }
 0x978   : > { %39296 = vst [vmem:[#allocation74_spill] sm:$0xff] %v35665_v52  ;;  %11339 = vst.msk [vmem:[#allocation3 + $0x188] sm:$0xff] %vm421_vm1, %v35665_v52  ;;  %v30372_v47 = vadd.f32 %v35429_v36, %v11214_v49  ;;  %27873 = vmatprep.mubr.msk.f32.mxu1 %vm421_vm1, %v35670_v41  ;;  %v35782_v52 = vld [vmem:[#allocation3 + $0x30] sm:$0xff]  ;;  %v12184_v16 = vld [vmem:[#allocation8 + $0x530] sm:$0xff] }
 0x979   : > { %v35681_v42 = vadd.f32 %v30371_v37, %v39298_v40  ;;  %27874 = vmatmul.mubr.msk.f32.gmra.mrb[52].mxu1 %vm421_vm1, %v35672_v29  ;;  %v39306_v37 = vld [vmem:[#allocation34_spill] sm:$0xff] }
 0x97a   : > { %v35687_v1 = vadd.f32 %v30372_v47, %v39301_v63  ;;  %v27820_v39 = vpop.f32.mrb[58].mxu0  ;;  %v39307_v49 = vmax.f32 %v39306_v37, 0.0  ;;  %v35850_v20 = vld [vmem:[#allocation3 + $0x148] sm:$0xff]  ;;  %v35862_v60 = vld [vmem:[#allocation3 + $0x170] sm:$0xff] }
 0x97b   : > { %39299 = vst [vmem:[#allocation75_spill] sm:$0xff] %v35681_v42  ;;  %11342 = vst.msk [vmem:[#allocation3 + $0x1b0] sm:$0xff] %vm421_vm1, %v35681_v42  ;;  %v30373_v9 = vadd.f32 %v27820_v39, %v35429_v36  ;;  %v11224_v53 = vpop.f32.mrb[59].mxu0  ;;  %v35692_v21 = vld [vmem:[#allocation3 + $0x167] sm:$0xff]  ;;  %v35694_v12 = vld [vmem:[#allocation3 + $0x16f] sm:$0xff] }
 0x97c   : > { %39302 = vst [vmem:[#allocation76_spill] sm:$0xff] %v35687_v1  ;;  %11341 = vst.msk [vmem:[#allocation3 + $0x1a8] sm:$0xff] %vm421_vm1, %v35687_v1  ;;  %v30374_v55 = vadd.f32 %v35429_v36, %v11224_v53  ;;  %27876 = vmatprep.mubr.msk.f32.mxu1 %vm421_vm1, %v35692_v21  ;;  %v39309_v53 = vld [vmem:[#allocation35_spill] sm:$0xff]  ;;  %v35858_v7 = vld [vmem:[#allocation3 + $0x168] sm:$0xff] }
 0x97d   : > { %v35703_v31 = vadd.f32 %v30373_v9, %v39304_v5  ;;  %27877 = vmatmul.mubr.msk.f32.gmra.mrb[54].mxu1 %vm421_vm1, %v35694_v12  ;;  %v39312_v5 = vld [vmem:[#allocation36_spill] sm:$0xff]  ;;  %39321 = vst [vmem:[#allocation40_spill] sm:$0xff] %v35862_v60 }
 0x97e   : > { %v35709_v47 = vadd.f32 %v30374_v55, %v39307_v49  ;;  %v27823_v15 = vpop.f32.mrb[60].mxu0  ;;  %v39310_v55 = vmax.f32 %v39309_v53, 0.0  ;;  %v39313_v37 = vmax.f32 %v39312_v5, 0.0  ;;  %v39318_v5 = vld [vmem:[#allocation39_spill] sm:$0xff] }
 0x97f   : > { %39305 = vst [vmem:[#allocation77_spill] sm:$0xff] %v35703_v31  ;;  %11344 = vst.msk [vmem:[#allocation3 + $0x1d0] sm:$0xff] %vm421_vm1, %v35703_v31  ;;  %v30375_v40 = vadd.f32 %v27823_v15, %v35429_v36  ;;  %v11234_v54 = vpop.f32.mrb[61].mxu0  ;;  %v35714_v63 = vld [vmem:[#allocation3 + $0x187] sm:$0xff]  ;;  %v35716_v39 = vld [vmem:[#allocation3 + $0x18f] sm:$0xff] }
 0x980   : > { %39308 = vst [vmem:[#allocation78_spill] sm:$0xff] %v35709_v47  ;;  %11343 = vst.msk [vmem:[#allocation3 + $0x1c8] sm:$0xff] %vm421_vm1, %v35709_v47  ;;  %v30376_v9 = vadd.f32 %v35429_v36, %v11234_v54  ;;  %27879 = vmatprep.mubr.msk.f32.mxu1 %vm421_vm1, %v35714_v63  ;;  %v35866_v61 = vld [vmem:[#allocation3 + $0x188] sm:$0xff]  ;;  %v35870_v22 = vld [vmem:[#allocation3 + $0x190] sm:$0xff] }
 0x981   : > { %v35725_v44 = vadd.f32 %v30375_v40, %v39310_v55  ;;  %27880 = vmatmul.mubr.msk.f32.gmra.mrb[56].mxu1 %vm421_vm1, %v35716_v39  ;;  %39322 = vst [vmem:[#allocation44_spill] sm:$0xff] %v35866_v61  ;;  %39323 = vst [vmem:[#allocation46_spill] sm:$0xff] %v35870_v22 }
 0x982   : > { %v35731_v49 = vadd.f32 %v30376_v9, %v39313_v37  ;;  %v27826_v15 = vpop.f32.mrb[62].mxu0  ;;  %v39315_v9 = vld [vmem:[#allocation37_spill] sm:$0xff]  ;;  %v39319_v37 = vmax.f32 %v39318_v5, 0.0  ;;  %v11752_v5 = vld [vmem:[#allocation3 + $0x10] sm:$0xff] }
 0x983   : > { %39311 = vst [vmem:[#allocation79_spill] sm:$0xff] %v35725_v44  ;;  %11346 = vst.msk [vmem:[#allocation3 + $0x1f0] sm:$0xff] %vm421_vm1, %v35725_v44  ;;  %v30377_v54 = vadd.f32 %v27826_v15, %v35429_v36  ;;  %v11244_v47 = vpop.f32.mrb[63].mxu0  ;;  %v35736_v31 = vld [vmem:[#allocation3 + $0x1a7] sm:$0xff]  ;;  %v35738_v1 = vld [vmem:[#allocation3 + $0x1af] sm:$0xff]  ;;  %v39316_v53 = vmax.f32 %v39315_v9, 0.0 }
 0x984   : > { %39314 = vst [vmem:[#allocation80_spill] sm:$0xff] %v35731_v49  ;;  %11345 = vst.msk [vmem:[#allocation3 + $0x1e8] sm:$0xff] %vm421_vm1, %v35731_v49  ;;  %v30378_v40 = vadd.f32 %v35429_v36, %v11244_v47  ;;  %27882 = vmatprep.mubr.msk.f32.mxu1 %vm421_vm1, %v35736_v31  ;;  %v12180_v9 = vld [vmem:[#allocation8 + $0x510] sm:$0xff]  ;;  %v35777_v44 = vld [vmem:[#allocation3 + $0x28] sm:$0xff] }
 0x985   : > { %v35747_v55 = vadd.f32 %v30377_v54, %v39316_v53  ;;  %27883 = vmatmul.mubr.msk.f32.gmra.mrb[58].mxu1 %vm421_vm1, %v35738_v1  ;;  %v12181_v53 = vld [vmem:[#allocation8 + $0x518] sm:$0xff]  ;;  %v35878_v33 = vld [vmem:[#allocation3 + $0x1b0] sm:$0xff] }
 0x986   : > { %v35753_v15 = vadd.f32 %v30378_v40, %v39319_v37  ;;  %v11751_v40 = vld [vmem:[#allocation3 + $0x8] sm:$0xff]  ;;  %v29879_v37 = vpack.c.bf16 %v12181_v53, %v12180_v9  ;;  %v35790_v9 = vld [vmem:[#allocation3 + $0x50] sm:$0xff]  ;;  %39325 = vst [vmem:[#allocation23_spill] sm:$0xff] %v35878_v33 }
 0x987   : > { %39317 = vst [vmem:[#allocation81_spill] sm:$0xff] %v35747_v55  ;;  %11348 = vst.msk [vmem:[#allocation3 + $0x210] sm:$0xff] %vm421_vm1, %v35747_v55  ;;  %v35757_v49 = vld [vmem:[#allocation3 + $0x1c7] sm:$0xff]  ;;  %v35759_v36 = vld [vmem:[#allocation3 + $0x1cf] sm:$0xff] }
 0x988   : > { %39320 = vst [vmem:[#allocation82_spill] sm:$0xff] %v35753_v15  ;;  %11347 = vst.msk [vmem:[#allocation3 + $0x208] sm:$0xff] %vm421_vm1, %v35753_v15  ;;  %27885 = vmatprep.mubr.msk.f32.mxu1 %vm421_vm1, %v35757_v49  ;;  %v12182_v15 = vld [vmem:[#allocation8 + $0x520] sm:$0xff]  ;;  %v12183_v55 = vld [vmem:[#allocation8 + $0x528] sm:$0xff] }
 0x989   : > { %27886 = vmatmul.mubr.msk.f32.gmra.mrb[60].mxu1 %vm421_vm1, %v35759_v36  ;;  %v29883_v42 = vpack.c.bf16 %v12183_v55, %v12182_v15  ;;  %v12572_v53 = vld [vmem:[#allocation8 + $0x540] sm:$0xff] }
 0x98a   : > { %v35794_v55 = vld [vmem:[#allocation3 + $0x68] sm:$0xff]  ;;  %v35886_v14 = vld [vmem:[#allocation3 + $0x1d0] sm:$0xff] }
 0x98b   : > { %v35767_v47 = vld [vmem:[#allocation3 + $0x1e7] sm:$0xff]  ;;  %v35769_v54 = vld [vmem:[#allocation3 + $0x1ef] sm:$0xff]  ;;  %39327 = vst [vmem:[#allocation38_spill] sm:$0xff] %v35886_v14 }
 0x98c   : > { %27888 = vmatprep.mubr.msk.f32.mxu1 %vm421_vm1, %v35767_v47  ;;  %v35874_v56 = vld [vmem:[#allocation3 + $0x1a8] sm:$0xff]  ;;  %v35894_v48 = vld [vmem:[#allocation3 + $0x1f0] sm:$0xff] }
 0x98d   : > { %27889 = vmatmul.mubr.msk.f32.gmra.mrb[62].mxu1 %vm421_vm1, %v35769_v54  ;;  %39324 = vst [vmem:[#allocation48_spill] sm:$0xff] %v35874_v56  ;;  %v35882_v34 = vld [vmem:[#allocation3 + $0x1c8] sm:$0xff]  ;;  %39329 = vst [vmem:[#allocation42_spill] sm:$0xff] %v35894_v48 }
 0x98e   : > { %27907 = vmatprep.mubr.msk.f32.mxu1 %vm421_vm1, %v11751_v40  ;;  %v35786_v40 = vld [vmem:[#allocation3 + $0x48] sm:$0xff]  ;;  %39326 = vst [vmem:[#allocation24_spill] sm:$0xff] %v35882_v34 }
 0x98f   : > { %v35890_v18 = vld [vmem:[#allocation3 + $0x1e8] sm:$0xff] }
 0x990   : > { %39328 = vst [vmem:[#allocation41_spill] sm:$0xff] %v35890_v18 }
 0x991   : > { %27908 = vmatmul.mubr.msk.f32.vlgmr.msra.gmra.mrb[32].mxu1 %vm421_vm1, %v11752_v5  ;;  %v12573_v5 = vld [vmem:[#allocation8 + $0x548] sm:$0xff] }
 0x992   : > { %29878 = vmatpush3.bf16.msra.mxu1 %v35426_v58  ;;  %27910 = vmatprep.mubr.msk.f32.mxu1 %vm421_vm1, %v35777_v44  ;;  %v29887_v58 = vpack.c.bf16 %v12185_v30, %v12184_v16  ;;  %v29891_v15 = vpack.c.bf16 %v12573_v5, %v12572_v53  ;;  %v35802_v30 = vld [vmem:[#allocation3 + $0x88] sm:$0xff]  ;;  %v35806_v16 = vld [vmem:[#allocation3 + $0x90] sm:$0xff] }
 0x993   : > { %29880 = vmatprep.subr.bf16.mxu1 %v29879_v37  ;;  %v35818_v53 = vld [vmem:[#allocation3 + $0xc8] sm:$0xff] }
 0x994   : > { %v35826_v5 = vld [vmem:[#allocation3 + $0xe8] sm:$0xff] }
 0x995   : > { %27911 = vmatmul.mubr.msk.f32.gmra.mrb[34].mxu1 %vm421_vm1, %v35782_v52 }
 0x996   : > { %27913 = vmatprep.mubr.msk.f32.mxu1 %vm421_vm1, %v35786_v40  ;;  %29882 = vmatpush3.bf16.msra.mxu1 %v29879_v37  ;;  %v35814_v37 = vld [vmem:[#allocation3 + $0xb0] sm:$0xff] }
 0x997   : > { %29884 = vmatprep.subr.bf16.mxu1 %v29883_v42 }
 0x999   : > { %27914 = vmatmul.mubr.msk.f32.gmra.mrb[36].mxu1 %vm421_vm1, %v35790_v9 }
 0x99a   : > { %27916 = vmatprep.mubr.msk.f32.mxu1 %vm421_vm1, %v35794_v55  ;;  %29886 = vmatpush3.bf16.msra.mxu1 %v29883_v42  ;;  %v35810_v42 = vld [vmem:[#allocation3 + $0xa8] sm:$0xff] }
 0x99b   : > { %29888 = vmatprep.subr.bf16.mxu1 %v29887_v58 }
 0x99d   : > { %27917 = vmatmul.mubr.msk.f32.gmra.mrb[38].mxu1 %vm421_vm1, %v35798_v0 }
 0x99e   : > { %27919 = vmatprep.mubr.msk.f32.mxu1 %vm421_vm1, %v35802_v30  ;;  %29890 = vmatpush3.bf16.msra.mxu1 %v29887_v58  ;;  %v35822_v58 = vld [vmem:[#allocation3 + $0xd0] sm:$0xff] }
 0x99f   : > { %29892 = vmatprep.subr.bf16.mxu1 %v29891_v15 }
 0x9a1   : > { %27920 = vmatmul.mubr.msk.f32.gmra.mrb[40].mxu1 %vm421_vm1, %v35806_v16 }
 0x9a2   : > { %27922 = vmatprep.mubr.msk.f32.mxu1 %vm421_vm1, %v35810_v42 }
 0x9a5   : > { %27923 = vmatmul.mubr.msk.f32.gmra.mrb[42].mxu1 %vm421_vm1, %v35814_v37 }
 0x9a6   : > { %27925 = vmatprep.mubr.msk.f32.mxu1 %vm421_vm1, %v35818_v53 }
 0x9a9   : > { %27926 = vmatmul.mubr.msk.f32.gmra.mrb[44].mxu1 %vm421_vm1, %v35822_v58 }
 0x9aa   : > { %27928 = vmatprep.mubr.msk.f32.mxu1 %vm421_vm1, %v35826_v5 }
 0x9ad   : > { %27929 = vmatmul.mubr.msk.f32.gmra.mrb[46].mxu1 %vm421_vm1, %v35830_v28 }
 0x9ae   : > { %27931 = vmatprep.mubr.msk.f32.mxu1 %vm421_vm1, %v35834_v51 }
 0x9b1   : > { %27932 = vmatmul.mubr.msk.f32.gmra.mrb[48].mxu1 %vm421_vm1, %v35838_v27 }
 0x9b2   : > { %27934 = vmatprep.mubr.msk.f32.mxu1 %vm421_vm1, %v35842_v2 }
 0x9b5   : > { %27935 = vmatmul.mubr.msk.f32.gmra.mrb[50].mxu1 %vm421_vm1, %v35846_v62 }
 0x9b6   : > { %27937 = vmatprep.mubr.msk.f32.mxu1 %vm421_vm1, %v35850_v20 }
 0x9b9   : > { %27938 = vmatmul.mubr.msk.f32.gmra.mrb[52].mxu1 %vm421_vm1, %v35854_v59 }
 0x9ba   : > { %27940 = vmatprep.mubr.msk.f32.mxu1 %vm421_vm1, %v35858_v7 }
 0x9bd   : > { %27941 = vmatmul.mubr.msk.f32.gmra.mrb[54].mxu1 %vm421_vm1, %v35862_v60  ;;  %v12578_v60 = vld [vmem:[#allocation8 + $0x570] sm:$0xff] }
 0x9be   : > { %27943 = vmatprep.mubr.msk.f32.mxu1 %vm421_vm1, %v35866_v61  ;;  %v35904_v61 = vld [vmem:[#allocation3 + $0x31] sm:$0xff] }
 0x9bf   : > { %39330 = vst [vmem:[#allocation43_spill] sm:$0xff] %v35904_v61 }
 0x9c1   : > { %27944 = vmatmul.mubr.msk.f32.gmra.mrb[56].mxu1 %vm421_vm1, %v35870_v22  ;;  %v12577_v22 = vld [vmem:[#allocation8 + $0x568] sm:$0xff] }
 0x9c2   : > { %27946 = vmatprep.mubr.msk.f32.mxu1 %vm421_vm1, %v35874_v56  ;;  %v12576_v56 = vld [vmem:[#allocation8 + $0x560] sm:$0xff] }
 0x9c5   : > { %27947 = vmatmul.mubr.msk.f32.gmra.mrb[58].mxu1 %vm421_vm1, %v35878_v33  ;;  %v29895_v33 = vpack.c.bf16 %v12575_v35, %v12574_v10  ;;  %v35908_v35 = vld [vmem:[#allocation3 + $0x49] sm:$0xff] }
 0x9c6   : > { %27949 = vmatprep.mubr.msk.f32.mxu1 %vm421_vm1, %v35882_v34  ;;  %v12146_v34 = vld [vmem:[#allocation3 + $0x11] sm:$0xff] }
 0x9c9   : > { %27950 = vmatmul.mubr.msk.f32.gmra.mrb[60].mxu1 %vm421_vm1, %v35886_v14  ;;  %v35900_v14 = vld [vmem:[#allocation3 + $0x29] sm:$0xff] }
 0x9ca   : > { %27952 = vmatprep.mubr.msk.f32.mxu1 %vm421_vm1, %v35890_v18  ;;  %v29899_v18 = vpack.c.bf16 %v12577_v22, %v12576_v56  ;;  %v35916_v56 = vld [vmem:[#allocation3 + $0x69] sm:$0xff] }
 0x9cb   : > { %39331 = vst [vmem:[#allocation45_spill] sm:$0xff] %v35916_v56 }
 0x9cd   : > { %27953 = vmatmul.mubr.msk.f32.gmra.mrb[62].mxu1 %vm421_vm1, %v35894_v48  ;;  %v12579_v48 = vld [vmem:[#allocation8 + $0x578] sm:$0xff] }
 0x9ce   : > { %27971 = vmatprep.mubr.msk.f32.mxu1 %vm421_vm1, %v12145_v4  ;;  %v29903_v10 = vpack.c.bf16 %v12579_v48, %v12578_v60  ;;  %v35912_v4 = vld [vmem:[#allocation3 + $0x51] sm:$0xff]  ;;  %v35924_v48 = vld [vmem:[#allocation3 + $0x89] sm:$0xff] }
 0x9cf   : > { %39333 = vst [vmem:[#allocation15_spill] sm:$0xff] %v35924_v48  ;;  %v35936_v60 = vld [vmem:[#allocation3 + $0xb1] sm:$0xff] }
 0x9d0   : > { %39336 = vst [vmem:[#allocation18_spill] sm:$0xff] %v35936_v60 }
 0x9d1   : > { %27972 = vmatmul.mubr.msk.f32.vlgmr.msra.gmra.mrb[32].mxu1 %vm421_vm1, %v12146_v34  ;;  %v12966_v34 = vld [vmem:[#allocation8 + $0x580] sm:$0xff] }
 0x9d2   : > { %29894 = vmatpush3.bf16.msra.mxu1 %v29891_v15  ;;  %27974 = vmatprep.mubr.msk.f32.mxu1 %vm421_vm1, %v35900_v14  ;;  %v12967_v15 = vld [vmem:[#allocation8 + $0x588] sm:$0xff] }
 0x9d3   : > { %29896 = vmatprep.subr.bf16.mxu1 %v29895_v33  ;;  %v29907_v22 = vpack.c.bf16 %v12967_v15, %v12966_v34  ;;  %v35940_v34 = vld [vmem:[#allocation3 + $0xc9] sm:$0xff] }
 0x9d4   : > { %39337 = vst [vmem:[#allocation19_spill] sm:$0xff] %v35940_v34  ;;  %v35948_v15 = vld [vmem:[#allocation3 + $0xe9] sm:$0xff] }
 0x9d5   : > { %27975 = vmatmul.mubr.msk.f32.gmra.mrb[34].mxu1 %vm421_vm1, %v35904_v61  ;;  %v35920_v61 = vld [vmem:[#allocation3 + $0x71] sm:$0xff]  ;;  %39339 = vst [vmem:[#allocation21_spill] sm:$0xff] %v35948_v15 }
 0x9d6   : > { %27977 = vmatprep.mubr.msk.f32.mxu1 %vm421_vm1, %v35908_v35  ;;  %29898 = vmatpush3.bf16.msra.mxu1 %v29895_v33  ;;  %39332 = vst [vmem:[#allocation47_spill] sm:$0xff] %v35920_v61  ;;  %v35928_v33 = vld [vmem:[#allocation3 + $0x91] sm:$0xff] }
 0x9d7   : > { %29900 = vmatprep.subr.bf16.mxu1 %v29899_v18  ;;  %39334 = vst [vmem:[#allocation16_spill] sm:$0xff] %v35928_v33 }
 0x9d9   : > { %27978 = vmatmul.mubr.msk.f32.gmra.mrb[36].mxu1 %vm421_vm1, %v35912_v4 }
 0x9da   : > { %27980 = vmatprep.mubr.msk.f32.mxu1 %vm421_vm1, %v35916_v56  ;;  %29902 = vmatpush3.bf16.msra.mxu1 %v29899_v18  ;;  %v35932_v18 = vld [vmem:[#allocation3 + $0xa9] sm:$0xff] }
 0x9db   : > { %29904 = vmatprep.subr.bf16.mxu1 %v29903_v10  ;;  %39335 = vst [vmem:[#allocation17_spill] sm:$0xff] %v35932_v18  ;;  %v12973_v56 = vld [vmem:[#allocation8 + $0x5b8] sm:$0xff] }
 0x9dd   : > { %27981 = vmatmul.mubr.msk.f32.gmra.mrb[38].mxu1 %vm421_vm1, %v35920_v61  ;;  %v12971_v61 = vld [vmem:[#allocation8 + $0x5a8] sm:$0xff] }
 0x9de   : > { %27983 = vmatprep.mubr.msk.f32.mxu1 %vm421_vm1, %v35924_v48  ;;  %29906 = vmatpush3.bf16.msra.mxu1 %v29903_v10  ;;  %v35944_v10 = vld [vmem:[#allocation3 + $0xd1] sm:$0xff]  ;;  %v12969_v48 = vld [vmem:[#allocation8 + $0x598] sm:$0xff] }
 0x9df   : > { %29908 = vmatprep.subr.bf16.mxu1 %v29907_v22  ;;  %39338 = vst [vmem:[#allocation20_spill] sm:$0xff] %v35944_v10 }
 0x9e1   : > { %27984 = vmatmul.mubr.msk.f32.gmra.mrb[40].mxu1 %vm421_vm1, %v35928_v33  ;;  %v12968_v33 = vld [vmem:[#allocation8 + $0x590] sm:$0xff] }
 0x9e2   : > { %27986 = vmatprep.mubr.msk.f32.mxu1 %vm421_vm1, %v35932_v18  ;;  %v35952_v18 = vld [vmem:[#allocation3 + $0xf1] sm:$0xff] }
 0x9e3   : > { %39340 = vst [vmem:[#allocation22_spill] sm:$0xff] %v35952_v18 }
 0x9e5   : > { %27987 = vmatmul.mubr.msk.f32.gmra.mrb[42].mxu1 %vm421_vm1, %v35936_v60  ;;  %v35956_v60 = vld [vmem:[#allocation3 + $0x109] sm:$0xff] }
 0x9e6   : > { %27989 = vmatprep.mubr.msk.f32.mxu1 %vm421_vm1, %v35940_v34  ;;  %39341 = vst [vmem:[#allocation49_spill] sm:$0xff] %v35956_v60  ;;  %v35960_v34 = vld [vmem:[#allocation3 + $0x111] sm:$0xff] }
 0x9e7   : > { %39342 = vst [vmem:[#allocation50_spill] sm:$0xff] %v35960_v34 }
 0x9e9   : > { %27990 = vmatmul.mubr.msk.f32.gmra.mrb[44].mxu1 %vm421_vm1, %v35944_v10  ;;  %v35964_v10 = vld [vmem:[#allocation3 + $0x129] sm:$0xff] }
 0x9ea   : > { %27992 = vmatprep.mubr.msk.f32.mxu1 %vm421_vm1, %v35948_v15  ;;  %39343 = vst [vmem:[#allocation25_spill] sm:$0xff] %v35964_v10  ;;  %v35968_v15 = vld [vmem:[#allocation3 + $0x131] sm:$0xff] }
 0x9eb   : > { %39344 = vst [vmem:[#allocation26_spill] sm:$0xff] %v35968_v15 }
 0x9ed   : > { %27993 = vmatmul.mubr.msk.f32.gmra.mrb[46].mxu1 %vm421_vm1, %v35952_v18  ;;  %v35972_v18 = vld [vmem:[#allocation3 + $0x149] sm:$0xff] }
 0x9ee   : > { %27995 = vmatprep.mubr.msk.f32.mxu1 %vm421_vm1, %v35956_v60  ;;  %39345 = vst [vmem:[#allocation27_spill] sm:$0xff] %v35972_v18  ;;  %v35976_v60 = vld [vmem:[#allocation3 + $0x151] sm:$0xff] }
 0x9ef   : > { %39346 = vst [vmem:[#allocation28_spill] sm:$0xff] %v35976_v60 }
 0x9f1   : > { %27996 = vmatmul.mubr.msk.f32.gmra.mrb[48].mxu1 %vm421_vm1, %v35960_v34  ;;  %v35980_v34 = vld [vmem:[#allocation3 + $0x169] sm:$0xff] }
 0x9f2   : > { %27998 = vmatprep.mubr.msk.f32.mxu1 %vm421_vm1, %v35964_v10  ;;  %39347 = vst [vmem:[#allocation29_spill] sm:$0xff] %v35980_v34  ;;  %v35984_v10 = vld [vmem:[#allocation3 + $0x171] sm:$0xff] }
 0x9f3   : > { %39348 = vst [vmem:[#allocation30_spill] sm:$0xff] %v35984_v10 }
 0x9f5   : > { %27999 = vmatmul.mubr.msk.f32.gmra.mrb[50].mxu1 %vm421_vm1, %v35968_v15  ;;  %v35988_v15 = vld [vmem:[#allocation3 + $0x189] sm:$0xff] }
 0x9f6   : > { %28001 = vmatprep.mubr.msk.f32.mxu1 %vm421_vm1, %v35972_v18  ;;  %39349 = vst [vmem:[#allocation31_spill] sm:$0xff] %v35988_v15  ;;  %v35992_v18 = vld [vmem:[#allocation3 + $0x191] sm:$0xff] }
 0x9f7   : > { %39350 = vst [vmem:[#allocation32_spill] sm:$0xff] %v35992_v18 }
 0x9f9   : > { %28002 = vmatmul.mubr.msk.f32.gmra.mrb[52].mxu1 %vm421_vm1, %v35976_v60  ;;  %v35996_v60 = vld [vmem:[#allocation3 + $0x1a9] sm:$0xff] }
 0x9fa   : > { %28004 = vmatprep.mubr.msk.f32.mxu1 %vm421_vm1, %v35980_v34  ;;  %39351 = vst [vmem:[#allocation33_spill] sm:$0xff] %v35996_v60  ;;  %v36000_v34 = vld [vmem:[#allocation3 + $0x1b1] sm:$0xff] }
 0x9fb   : > { %39352 = vst [vmem:[#allocation34_spill] sm:$0xff] %v36000_v34 }
 0x9fd   : > { %28005 = vmatmul.mubr.msk.f32.gmra.mrb[54].mxu1 %vm421_vm1, %v35984_v10  ;;  %v36004_v10 = vld [vmem:[#allocation3 + $0x1c9] sm:$0xff] }
 0x9fe   : > { %28007 = vmatprep.mubr.msk.f32.mxu1 %vm421_vm1, %v35988_v15  ;;  %39353 = vst [vmem:[#allocation35_spill] sm:$0xff] %v36004_v10  ;;  %v36008_v15 = vld [vmem:[#allocation3 + $0x1d1] sm:$0xff] }
 0x9ff   : > { %39354 = vst [vmem:[#allocation36_spill] sm:$0xff] %v36008_v15 }
 0xa01   : > { %28008 = vmatmul.mubr.msk.f32.gmra.mrb[56].mxu1 %vm421_vm1, %v35992_v18  ;;  %v36012_v18 = vld [vmem:[#allocation3 + $0x1e9] sm:$0xff] }
 0xa02   : > { %28010 = vmatprep.mubr.msk.f32.mxu1 %vm421_vm1, %v35996_v60  ;;  %39355 = vst [vmem:[#allocation37_spill] sm:$0xff] %v36012_v18  ;;  %v36016_v60 = vld [vmem:[#allocation3 + $0x1f1] sm:$0xff] }
 0xa03   : > { %39356 = vst [vmem:[#allocation39_spill] sm:$0xff] %v36016_v60 }
 0xa05   : > { %28011 = vmatmul.mubr.msk.f32.gmra.mrb[58].mxu1 %vm421_vm1, %v36000_v34  ;;  %v12970_v34 = vld [vmem:[#allocation8 + $0x5a0] sm:$0xff] }
 0xa06   : > { %28013 = vmatprep.mubr.msk.f32.mxu1 %vm421_vm1, %v36004_v10  ;;  %v29911_v10 = vpack.c.bf16 %v12969_v48, %v12968_v33  ;;  %v13360_v48 = vld [vmem:[#allocation8 + $0x5c0] sm:$0xff]  ;;  %v13361_v33 = vld [vmem:[#allocation8 + $0x5c8] sm:$0xff] }
 0xa09   : > { %28014 = vmatmul.mubr.msk.f32.gmra.mrb[60].mxu1 %vm421_vm1, %v36008_v15  ;;  %v12972_v15 = vld [vmem:[#allocation8 + $0x5b0] sm:$0xff] }
 0xa0a   : > { %28016 = vmatprep.mubr.msk.f32.mxu1 %vm421_vm1, %v36012_v18  ;;  %v29915_v18 = vpack.c.bf16 %v12971_v61, %v12970_v34  ;;  %v36152_v34 = vld [vmem:[#allocation3 + $0x210] sm:$0xff] }
 0xa0d   : > { %28017 = vmatmul.mubr.msk.f32.gmra.mrb[62].mxu1 %vm421_vm1, %v36016_v60 }
 0xa0e   : > { %28035 = vmatprep.mubr.msk.f32.mxu1 %vm421_vm1, %v35472_v11  ;;  %v29919_v11 = vpack.c.bf16 %v12973_v56, %v12972_v15  ;;  %v39364_v56 = vld [vmem:[#allocation41_spill] sm:$0xff] }
 0xa0f   : > { %v13757_v15 = vld [vmem:[#allocation8 + $0x618] sm:$0xff] }
 0xa11   : > { %28036 = vmatmul.mubr.msk.f32.vlgmr.msra.gmra.mrb[32].mxu1 %vm421_vm1, %v35474_v46  ;;  %v29923_v46 = vpack.c.bf16 %v13361_v33, %v13360_v48  ;;  %v13758_v48 = vld [vmem:[#allocation8 + $0x620] sm:$0xff]  ;;  %v13759_v33 = vld [vmem:[#allocation8 + $0x628] sm:$0xff] }
 0xa12   : > { %29910 = vmatpush3.bf16.msra.mxu1 %v29907_v22  ;;  %28038 = vmatprep.mubr.msk.f32.mxu1 %vm421_vm1, %v35494_v23  ;;  %v36080_v23 = vld [vmem:[#allocation3 + $0x207] sm:$0xff] }
 0xa13   : > { %29912 = vmatprep.subr.bf16.mxu1 %v29911_v10  ;;  %v39365_v22 = vld [vmem:[#allocation42_spill] sm:$0xff] }
 0xa15   : > { %28039 = vmatmul.mubr.msk.f32.gmra.mrb[34].mxu1 %vm421_vm1, %v35496_v6  ;;  %v36084_v6 = vld [vmem:[#allocation3 + $0x20f] sm:$0xff] }
 0xa16   : > { %28041 = vmatprep.mubr.msk.f32.mxu1 %vm421_vm1, %v35516_v32  ;;  %29914 = vmatpush3.bf16.msra.mxu1 %v29911_v10  ;;  %v13362_v32 = vld [vmem:[#allocation8 + $0x5d0] sm:$0xff] }
 0xa17   : > { %29916 = vmatprep.subr.bf16.mxu1 %v29915_v18  ;;  %v13756_v10 = vld [vmem:[#allocation8 + $0x610] sm:$0xff] }
 0xa19   : > { %28042 = vmatmul.mubr.msk.f32.gmra.mrb[36].mxu1 %vm421_vm1, %v35518_v43  ;;  %v13363_v43 = vld [vmem:[#allocation8 + $0x5d8] sm:$0xff] }
 0xa1a   : > { %28044 = vmatprep.mubr.msk.f32.mxu1 %vm421_vm1, %v35538_v38  ;;  %29918 = vmatpush3.bf16.msra.mxu1 %v29915_v18  ;;  %v29927_v61 = vpack.c.bf16 %v13363_v43, %v13362_v32  ;;  %v13364_v38 = vld [vmem:[#allocation8 + $0x5e0] sm:$0xff]  ;;  %v29947_v32 = vpack.c.bf16 %v13759_v33, %v13758_v48  ;;  %v13760_v43 = vld [vmem:[#allocation8 + $0x630] sm:$0xff] }
 0xa1b   : > { %29920 = vmatprep.subr.bf16.mxu1 %v29919_v11  ;;  %v36148_v18 = vld [vmem:[#allocation3 + $0x208] sm:$0xff]  ;;  %v39377_v33 = vld [vmem:[#allocation49_spill] sm:$0xff] }
 0xa1c   : > { %v39376_v48 = vld [vmem:[#allocation22_spill] sm:$0xff] }
 0xa1d   : > { %28045 = vmatmul.mubr.msk.f32.gmra.mrb[38].mxu1 %vm421_vm1, %v35540_v17  ;;  %v13365_v17 = vld [vmem:[#allocation8 + $0x5e8] sm:$0xff] }
 0xa1e   : > { %28047 = vmatprep.mubr.msk.f32.mxu1 %vm421_vm1, %v35560_v25  ;;  %29922 = vmatpush3.bf16.msra.mxu1 %v29919_v11  ;;  %v29931_v25 = vpack.c.bf16 %v13365_v17, %v13364_v38  ;;  %v29943_v11 = vpack.c.bf16 %v13757_v15, %v13756_v10  ;;  %v39367_v38 = vld [vmem:[#allocation45_spill] sm:$0xff]  ;;  %v14148_v17 = vld [vmem:[#allocation8 + $0x640] sm:$0xff]  ;;  %v39374_v15 = vld [vmem:[#allocation20_spill] sm:$0xff] }
 0xa1f   : > { %29924 = vmatprep.subr.bf16.mxu1 %v29923_v46  ;;  %v39373_v10 = vld [vmem:[#allocation19_spill] sm:$0xff] }
 0xa21   : > { %28048 = vmatmul.mubr.msk.f32.gmra.mrb[40].mxu1 %vm421_vm1, %v35562_v19  ;;  %v13366_v19 = vld [vmem:[#allocation8 + $0x5f0] sm:$0xff] }
 0xa22   : > { %28050 = vmatprep.mubr.msk.f32.mxu1 %vm421_vm1, %v35582_v50  ;;  %v13367_v50 = vld [vmem:[#allocation8 + $0x5f8] sm:$0xff] }
 0xa25   : > { %28051 = vmatmul.mubr.msk.f32.gmra.mrb[42].mxu1 %vm421_vm1, %v35584_v24  ;;  %v29935_v24 = vpack.c.bf16 %v13367_v50, %v13366_v19  ;;  %v39368_v19 = vld [vmem:[#allocation47_spill] sm:$0xff] }
 0xa26   : > { %28053 = vmatprep.mubr.msk.f32.mxu1 %vm421_vm1, %v35604_v45  ;;  %v13754_v45 = vld [vmem:[#allocation8 + $0x600] sm:$0xff] }
 0xa27   : > { %v39369_v50 = vld [vmem:[#allocation15_spill] sm:$0xff] }
 0xa29   : > { %28054 = vmatmul.mubr.msk.f32.gmra.mrb[44].mxu1 %vm421_vm1, %v35606_v8  ;;  %v13755_v8 = vld [vmem:[#allocation8 + $0x608] sm:$0xff] }
 0xa2a   : > { %28056 = vmatprep.mubr.msk.f32.mxu1 %vm421_vm1, %v35626_v3  ;;  %v29939_v3 = vpack.c.bf16 %v13755_v8, %v13754_v45  ;;  %v39370_v45 = vld [vmem:[#allocation16_spill] sm:$0xff]  ;;  %v39371_v8 = vld [vmem:[#allocation17_spill] sm:$0xff] }
 0xa2d   : > { %28057 = vmatmul.mubr.msk.f32.gmra.mrb[46].mxu1 %vm421_vm1, %v35628_v26  ;;  %v39357_v26 = vld [vmem:[#allocation40_spill] sm:$0xff] }
 0xa2e   : > { %28059 = vmatprep.mubr.msk.f32.mxu1 %vm421_vm1, %v35648_v57  ;;  %v39358_v57 = vld [vmem:[#allocation44_spill] sm:$0xff] }
 0xa31   : > { %28060 = vmatmul.mubr.msk.f32.gmra.mrb[48].mxu1 %vm421_vm1, %v35650_v13  ;;  %v39359_v13 = vld [vmem:[#allocation46_spill] sm:$0xff] }
 0xa32   : > { %28062 = vmatprep.mubr.msk.f32.mxu1 %vm421_vm1, %v35670_v41  ;;  %v39361_v41 = vld [vmem:[#allocation23_spill] sm:$0xff] }
 0xa35   : > { %28063 = vmatmul.mubr.msk.f32.gmra.mrb[50].mxu1 %vm421_vm1, %v35672_v29  ;;  %v39362_v29 = vld [vmem:[#allocation24_spill] sm:$0xff] }
 0xa36   : > { %28065 = vmatprep.mubr.msk.f32.mxu1 %vm421_vm1, %v35692_v21 }
 0xa39   : > { %28066 = vmatmul.mubr.msk.f32.gmra.mrb[52].mxu1 %vm421_vm1, %v35694_v12 }
 0xa3a   : > { %28068 = vmatprep.mubr.msk.f32.mxu1 %vm421_vm1, %v35714_v63 }
 0xa3d   : > { %28069 = vmatmul.mubr.msk.f32.gmra.mrb[54].mxu1 %vm421_vm1, %v35716_v39 }
 0xa3e   : > { %28071 = vmatprep.mubr.msk.f32.mxu1 %vm421_vm1, %v35736_v31 }
 0xa41   : > { %28072 = vmatmul.mubr.msk.f32.gmra.mrb[56].mxu1 %vm421_vm1, %v35738_v1 }
 0xa42   : > { %28074 = vmatprep.mubr.msk.f32.mxu1 %vm421_vm1, %v35757_v49 }
 0xa45   : > { %28075 = vmatmul.mubr.msk.f32.gmra.mrb[58].mxu1 %vm421_vm1, %v35759_v36 }
 0xa46   : > { %28077 = vmatprep.mubr.msk.f32.mxu1 %vm421_vm1, %v35767_v47 }
 0xa49   : > { %28078 = vmatmul.mubr.msk.f32.gmra.mrb[60].mxu1 %vm421_vm1, %v35769_v54 }
 0xa4a   : > { %28080 = vmatprep.mubr.msk.f32.mxu1 %vm421_vm1, %v36080_v23 }
 0xa4d   : > { %28081 = vmatmul.mubr.msk.f32.gmra.mrb[62].mxu1 %vm421_vm1, %v36084_v6 }
 0xa4e   : > { %28099 = vmatprep.mubr.msk.f32.mxu1 %vm421_vm1, %v35777_v44  ;;  %v39363_v44 = vld [vmem:[#allocation38_spill] sm:$0xff] }
 0xa51   : > { %28100 = vmatmul.mubr.msk.f32.vlgmr.msra.gmra.mrb[32].mxu1 %vm421_vm1, %v35782_v52  ;;  %v39360_v52 = vld [vmem:[#allocation48_spill] sm:$0xff] }
 0xa52   : > { %29926 = vmatpush3.bf16.msra.mxu1 %v29923_v46  ;;  %28102 = vmatprep.mubr.msk.f32.mxu1 %vm421_vm1, %v35786_v40  ;;  %v39366_v46 = vld [vmem:[#allocation43_spill] sm:$0xff] }
 0xa53   : > { %29928 = vmatprep.subr.bf16.mxu1 %v29927_v61 }
 0xa55   : > { %28103 = vmatmul.mubr.msk.f32.gmra.mrb[34].mxu1 %vm421_vm1, %v35790_v9 }
 0xa56   : > { %28105 = vmatprep.mubr.msk.f32.mxu1 %vm421_vm1, %v35794_v55  ;;  %29930 = vmatpush3.bf16.msra.mxu1 %v29927_v61  ;;  %v13761_v61 = vld [vmem:[#allocation8 + $0x638] sm:$0xff] }
 0xa57   : > { %29932 = vmatprep.subr.bf16.mxu1 %v29931_v25 }
 0xa59   : > { %28106 = vmatmul.mubr.msk.f32.gmra.mrb[36].mxu1 %vm421_vm1, %v35798_v0 }
 0xa5a   : > { %28108 = vmatprep.mubr.msk.f32.mxu1 %vm421_vm1, %v35802_v30  ;;  %29934 = vmatpush3.bf16.msra.mxu1 %v29931_v25  ;;  %v14149_v25 = vld [vmem:[#allocation8 + $0x648] sm:$0xff] }
 0xa5b   : > { %29936 = vmatprep.subr.bf16.mxu1 %v29935_v24 }
 0xa5d   : > { %28109 = vmatmul.mubr.msk.f32.gmra.mrb[38].mxu1 %vm421_vm1, %v35806_v16 }
 0xa5e   : > { %28111 = vmatprep.mubr.msk.f32.mxu1 %vm421_vm1, %v35810_v42  ;;  %29938 = vmatpush3.bf16.msra.mxu1 %v29935_v24  ;;  %v29955_v24 = vpack.c.bf16 %v14149_v25, %v14148_v17  ;;  %v39383_v17 = vld [vmem:[#allocation29_spill] sm:$0xff]  ;;  %v39384_v25 = vld [vmem:[#allocation30_spill] sm:$0xff] }
 0xa5f   : > { %29940 = vmatprep.subr.bf16.mxu1 %v29939_v3 }
 0xa61   : > { %28112 = vmatmul.mubr.msk.f32.gmra.mrb[40].mxu1 %vm421_vm1, %v35814_v37 }
 0xa62   : > { %28114 = vmatprep.mubr.msk.f32.mxu1 %vm421_vm1, %v35818_v53 }
 0xa65   : > { %28115 = vmatmul.mubr.msk.f32.gmra.mrb[42].mxu1 %vm421_vm1, %v35822_v58 }
 0xa66   : > { %28117 = vmatprep.mubr.msk.f32.mxu1 %vm421_vm1, %v35826_v5 }
 0xa69   : > { %28118 = vmatmul.mubr.msk.f32.gmra.mrb[44].mxu1 %vm421_vm1, %v35830_v28 }
 0xa6a   : > { %28120 = vmatprep.mubr.msk.f32.mxu1 %vm421_vm1, %v35834_v51 }
 0xa6d   : > { %28121 = vmatmul.mubr.msk.f32.gmra.mrb[46].mxu1 %vm421_vm1, %v35838_v27 }
 0xa6e   : > { %28123 = vmatprep.mubr.msk.f32.mxu1 %vm421_vm1, %v35842_v2 }
 0xa71   : > { %28124 = vmatmul.mubr.msk.f32.gmra.mrb[48].mxu1 %vm421_vm1, %v35846_v62 }
 0xa72   : > { %28126 = vmatprep.mubr.msk.f32.mxu1 %vm421_vm1, %v35850_v20 }
 0xa75   : > { %28127 = vmatmul.mubr.msk.f32.gmra.mrb[50].mxu1 %vm421_vm1, %v35854_v59 }
 0xa76   : > { %28129 = vmatprep.mubr.msk.f32.mxu1 %vm421_vm1, %v35858_v7 }
 0xa79   : > { %28130 = vmatmul.mubr.msk.f32.gmra.mrb[52].mxu1 %vm421_vm1, %v39357_v26 }
 0xa7a   : > { %28132 = vmatprep.mubr.msk.f32.mxu1 %vm421_vm1, %v39358_v57 }
 0xa7d   : > { %28133 = vmatmul.mubr.msk.f32.gmra.mrb[54].mxu1 %vm421_vm1, %v39359_v13 }
 0xa7e   : > { %28135 = vmatprep.mubr.msk.f32.mxu1 %vm421_vm1, %v39360_v52 }
 0xa81   : > { %28136 = vmatmul.mubr.msk.f32.gmra.mrb[56].mxu1 %vm421_vm1, %v39361_v41 }
 0xa82   : > { %28138 = vmatprep.mubr.msk.f32.mxu1 %vm421_vm1, %v39362_v29 }
 0xa85   : > { %28139 = vmatmul.mubr.msk.f32.gmra.mrb[58].mxu1 %vm421_vm1, %v39363_v44 }
 0xa86   : > { %28141 = vmatprep.mubr.msk.f32.mxu1 %vm421_vm1, %v39364_v56 }
 0xa89   : > { %28142 = vmatmul.mubr.msk.f32.gmra.mrb[60].mxu1 %vm421_vm1, %v39365_v22 }
 0xa8a   : > { %28144 = vmatprep.mubr.msk.f32.mxu1 %vm421_vm1, %v36148_v18 }
 0xa8d   : > { %28145 = vmatmul.mubr.msk.f32.gmra.mrb[62].mxu1 %vm421_vm1, %v36152_v34 }
 0xa8e   : > { %28163 = vmatprep.mubr.msk.f32.mxu1 %vm421_vm1, %v35900_v14  ;;  %v29951_v14 = vpack.c.bf16 %v13761_v61, %v13760_v43  ;;  %v39380_v43 = vld [vmem:[#allocation26_spill] sm:$0xff]  ;;  %v39381_v61 = vld [vmem:[#allocation27_spill] sm:$0xff] }
 0xa91   : > { %28164 = vmatmul.mubr.msk.f32.vlgmr.msra.gmra.mrb[32].mxu1 %vm421_vm1, %v39366_v46  ;;  %v39378_v46 = vld [vmem:[#allocation50_spill] sm:$0xff] }
 0xa92   : > { %29942 = vmatpush3.bf16.msra.mxu1 %v29939_v3  ;;  %28166 = vmatprep.mubr.msk.f32.mxu1 %vm421_vm1, %v35908_v35  ;;  %v39372_v3 = vld [vmem:[#allocation18_spill] sm:$0xff] }
 0xa93   : > { %29944 = vmatprep.subr.bf16.mxu1 %v29943_v11 }
 0xa95   : > { %28167 = vmatmul.mubr.msk.f32.gmra.mrb[34].mxu1 %vm421_vm1, %v35912_v4 }
 0xa96   : > { %28169 = vmatprep.mubr.msk.f32.mxu1 %vm421_vm1, %v39367_v38  ;;  %29946 = vmatpush3.bf16.msra.mxu1 %v29943_v11  ;;  %v39375_v11 = vld [vmem:[#allocation21_spill] sm:$0xff] }
 0xa97   : > { %29948 = vmatprep.subr.bf16.mxu1 %v29947_v32 }
 0xa99   : > { %28170 = vmatmul.mubr.msk.f32.gmra.mrb[36].mxu1 %vm421_vm1, %v39368_v19 }
 0xa9a   : > { %28172 = vmatprep.mubr.msk.f32.mxu1 %vm421_vm1, %v39369_v50  ;;  %29950 = vmatpush3.bf16.msra.mxu1 %v29947_v32  ;;  %v39379_v32 = vld [vmem:[#allocation25_spill] sm:$0xff] }
 0xa9b   : > { %29952 = vmatprep.subr.bf16.mxu1 %v29951_v14 }
 0xa9d   : > { %28173 = vmatmul.mubr.msk.f32.gmra.mrb[38].mxu1 %vm421_vm1, %v39370_v45 }
 0xa9e   : > { %28175 = vmatprep.mubr.msk.f32.mxu1 %vm421_vm1, %v39371_v8  ;;  %29954 = vmatpush3.bf16.msra.mxu1 %v29951_v14  ;;  %v39382_v14 = vld [vmem:[#allocation28_spill] sm:$0xff] }
 0xa9f   : > { %29956 = vmatprep.subr.bf16.mxu1 %v29955_v24 }
 0xaa1   : > { %28176 = vmatmul.mubr.msk.f32.gmra.mrb[40].mxu1 %vm421_vm1, %v39372_v3 }
 0xaa2   : > { %28178 = vmatprep.mubr.msk.f32.mxu1 %vm421_vm1, %v39373_v10  ;;  %v14155_v10 = vld [vmem:[#allocation8 + $0x678] sm:$0xff] }
 0xaa5   : > { %28179 = vmatmul.mubr.msk.f32.gmra.mrb[42].mxu1 %vm421_vm1, %v39374_v15  ;;  %v14154_v15 = vld [vmem:[#allocation8 + $0x670] sm:$0xff] }
 0xaa6   : > { %28181 = vmatprep.mubr.msk.f32.mxu1 %vm421_vm1, %v39375_v11  ;;  %v13724_v11 = vld [vmem:[#allocation3 + $0x6f] sm:$0xff] }
 0xaa9   : > { %28182 = vmatmul.mubr.msk.f32.gmra.mrb[44].mxu1 %vm421_vm1, %v39376_v48  ;;  %v14153_v48 = vld [vmem:[#allocation8 + $0x668] sm:$0xff] }
 0xaaa   : > { %28184 = vmatprep.mubr.msk.f32.mxu1 %vm421_vm1, %v39377_v33  ;;  %v39385_v33 = vld [vmem:[#allocation31_spill] sm:$0xff] }
 0xaad   : > { %28185 = vmatmul.mubr.msk.f32.gmra.mrb[46].mxu1 %vm421_vm1, %v39378_v46  ;;  %v39386_v46 = vld [vmem:[#allocation32_spill] sm:$0xff] }
 0xaae   : > { %28187 = vmatprep.mubr.msk.f32.mxu1 %vm421_vm1, %v39379_v32  ;;  %v39387_v32 = vld [vmem:[#allocation33_spill] sm:$0xff] }
 0xab1   : > { %28188 = vmatmul.mubr.msk.f32.gmra.mrb[48].mxu1 %vm421_vm1, %v39380_v43  ;;  %v39388_v43 = vld [vmem:[#allocation34_spill] sm:$0xff] }
 0xab2   : > { %28190 = vmatprep.mubr.msk.f32.mxu1 %vm421_vm1, %v39381_v61  ;;  %v39389_v61 = vld [vmem:[#allocation35_spill] sm:$0xff] }
 0xab5   : > { %28191 = vmatmul.mubr.msk.f32.gmra.mrb[50].mxu1 %vm421_vm1, %v39382_v14  ;;  %v39390_v14 = vld [vmem:[#allocation36_spill] sm:$0xff] }
 0xab6   : > { %28193 = vmatprep.mubr.msk.f32.mxu1 %vm421_vm1, %v39383_v17  ;;  %v39391_v17 = vld [vmem:[#allocation37_spill] sm:$0xff] }
 0xab9   : > { %28194 = vmatmul.mubr.msk.f32.gmra.mrb[52].mxu1 %vm421_vm1, %v39384_v25  ;;  %v14152_v25 = vld [vmem:[#allocation8 + $0x660] sm:$0xff] }
 0xaba   : > { %28196 = vmatprep.mubr.msk.f32.mxu1 %vm421_vm1, %v39385_v33  ;;  %v36216_v33 = vld [vmem:[#allocation3 + $0x209] sm:$0xff] }
 0xabb   : > { %39392 = vst [vmem:[#allocation40_spill] sm:$0xff] %v36216_v33 }
 0xabd   : > { %28197 = vmatmul.mubr.msk.f32.gmra.mrb[54].mxu1 %vm421_vm1, %v39386_v46  ;;  %v14151_v46 = vld [vmem:[#allocation8 + $0x658] sm:$0xff] }
 0xabe   : > { %28199 = vmatprep.mubr.msk.f32.mxu1 %vm421_vm1, %v39387_v32  ;;  %v36220_v32 = vld [vmem:[#allocation3 + $0x211] sm:$0xff] }
 0xabf   : > { %39393 = vst [vmem:[#allocation44_spill] sm:$0xff] %v36220_v32 }
 0xac1   : > { %28200 = vmatmul.mubr.msk.f32.gmra.mrb[56].mxu1 %vm421_vm1, %v39388_v43  ;;  %v14150_v43 = vld [vmem:[#allocation8 + $0x650] sm:$0xff] }
 0xac2   : > { %28202 = vmatprep.mubr.msk.f32.mxu1 %vm421_vm1, %v39389_v61  ;;  %v13721_v61 = vld [vmem:[#allocation3 + $0x47] sm:$0xff] }
 0xac5   : > { %28203 = vmatmul.mubr.msk.f32.gmra.mrb[58].mxu1 %vm421_vm1, %v39390_v14  ;;  %v29959_v14 = vpack.c.bf16 %v14151_v46, %v14150_v43  ;;  %v29967_v46 = vpack.c.bf16 %v14155_v10, %v14154_v15  ;;  %v13726_v43 = vld [vmem:[#allocation3 + $0x8f] sm:$0xff]  ;;  %v13731_v15 = vld [vmem:[#allocation3 + $0xe7] sm:$0xff] }
 0xac6   : > { %28205 = vmatprep.mubr.msk.f32.mxu1 %vm421_vm1, %v39391_v17  ;;  %v13722_v17 = vld [vmem:[#allocation3 + $0x4f] sm:$0xff] }
 0xac7   : > { %v13730_v10 = vld [vmem:[#allocation3 + $0xcf] sm:$0xff] }
 0xac9   : > { %28206 = vmatmul.mubr.msk.f32.gmra.mrb[60].mxu1 %vm421_vm1, %v36016_v60  ;;  %v13723_v60 = vld [vmem:[#allocation3 + $0x67] sm:$0xff] }
 0xaca   : > { %28208 = vmatprep.mubr.msk.f32.mxu1 %vm421_vm1, %v36216_v33  ;;  %v29963_v33 = vpack.c.bf16 %v14153_v48, %v14152_v25  ;;  %v13728_v48 = vld [vmem:[#allocation3 + $0xaf] sm:$0xff]  ;;  %v13735_v25 = vld [vmem:[#allocation3 + $0x127] sm:$0xff] }
 0xacd   : > { %28209 = vmatmul.mubr.msk.f32.gmra.mrb[62].mxu1 %vm421_vm1, %v36220_v32  ;;  %v13725_v32 = vld [vmem:[#allocation3 + $0x87] sm:$0xff] }
 0xace   : > { %28227 = vmatprep.mubr.msk.f32.mxu1 %vm421_vm1, %v13721_v61  ;;  %v14542_v61 = vld [vmem:[#allocation8 + $0x680] sm:$0xff] }
 0xad1   : > { %28228 = vmatmul.mubr.msk.f32.vlgmr.msra.gmra.mrb[32].mxu1 %vm421_vm1, %v13722_v17  ;;  %v14543_v17 = vld [vmem:[#allocation8 + $0x688] sm:$0xff] }
 0xad2   : > { %29958 = vmatpush3.bf16.msra.mxu1 %v29955_v24  ;;  %28230 = vmatprep.mubr.msk.f32.mxu1 %vm421_vm1, %v13723_v60  ;;  %v13727_v24 = vld [vmem:[#allocation3 + $0xa7] sm:$0xff]  ;;  %v29971_v60 = vpack.c.bf16 %v14543_v17, %v14542_v61  ;;  %v13738_v61 = vld [vmem:[#allocation3 + $0x14f] sm:$0xff] }
 0xad3   : > { %29960 = vmatprep.subr.bf16.mxu1 %v29959_v14 }
 0xad5   : > { %28231 = vmatmul.mubr.msk.f32.gmra.mrb[34].mxu1 %vm421_vm1, %v13724_v11  ;;  %v13729_v11 = vld [vmem:[#allocation3 + $0xc7] sm:$0xff] }
 0xad6   : > { %28233 = vmatprep.mubr.msk.f32.mxu1 %vm421_vm1, %v13725_v32  ;;  %29962 = vmatpush3.bf16.msra.mxu1 %v29959_v14  ;;  %v13732_v32 = vld [vmem:[#allocation3 + $0xef] sm:$0xff] }
 0xad7   : > { %29964 = vmatprep.subr.bf16.mxu1 %v29963_v33  ;;  %v13734_v14 = vld [vmem:[#allocation3 + $0x10f] sm:$0xff] }
 0xad9   : > { %28234 = vmatmul.mubr.msk.f32.gmra.mrb[36].mxu1 %vm421_vm1, %v13726_v43  ;;  %v13737_v43 = vld [vmem:[#allocation3 + $0x147] sm:$0xff] }
 0xada   : > { %28236 = vmatprep.mubr.msk.f32.mxu1 %vm421_vm1, %v13727_v24  ;;  %29966 = vmatpush3.bf16.msra.mxu1 %v29963_v33  ;;  %v13733_v33 = vld [vmem:[#allocation3 + $0x107] sm:$0xff]  ;;  %v14547_v24 = vld [vmem:[#allocation8 + $0x6a8] sm:$0xff] }
 0xadb   : > { %29968 = vmatprep.subr.bf16.mxu1 %v29967_v46 }
 0xadd   : > { %28237 = vmatmul.mubr.msk.f32.gmra.mrb[38].mxu1 %vm421_vm1, %v13728_v48  ;;  %v15013_v48 = vld [vmem:[#allocation8 + $0x6e8] sm:$0xff] }
 0xade   : > { %28239 = vmatprep.mubr.msk.f32.mxu1 %vm421_vm1, %v13729_v11  ;;  %29970 = vmatpush3.bf16.msra.mxu1 %v29967_v46  ;;  %v13736_v46 = vld [vmem:[#allocation3 + $0x12f] sm:$0xff] }
 0xadf   : > { %29972 = vmatprep.subr.bf16.mxu1 %v29971_v60 }
 0xae1   : > { %28240 = vmatmul.mubr.msk.f32.gmra.mrb[40].mxu1 %vm421_vm1, %v13730_v10 }
 0xae2   : > { %28242 = vmatprep.mubr.msk.f32.mxu1 %vm421_vm1, %v13731_v15  ;;  %v14549_v15 = vld [vmem:[#allocation8 + $0x6b8] sm:$0xff] }
 0xae5   : > { %28243 = vmatmul.mubr.msk.f32.gmra.mrb[42].mxu1 %vm421_vm1, %v13732_v32  ;;  %v15014_v32 = vld [vmem:[#allocation8 + $0x6f0] sm:$0xff] }
 0xae6   : > { %28245 = vmatprep.mubr.msk.f32.mxu1 %vm421_vm1, %v13733_v33  ;;  %v15015_v33 = vld [vmem:[#allocation8 + $0x6f8] sm:$0xff] }
 0xae9   : > { %28246 = vmatmul.mubr.msk.f32.gmra.mrb[44].mxu1 %vm421_vm1, %v13734_v14 }
 0xaea   : > { %28248 = vmatprep.mubr.msk.f32.mxu1 %vm421_vm1, %v13735_v25  ;;  %v15408_v25 = vld [vmem:[#allocation8 + $0x730] sm:$0xff] }
 0xaed   : > { %28249 = vmatmul.mubr.msk.f32.gmra.mrb[46].mxu1 %vm421_vm1, %v13736_v46  ;;  %v15409_v46 = vld [vmem:[#allocation8 + $0x738] sm:$0xff] }
 0xaee   : > { %28251 = vmatprep.mubr.msk.f32.mxu1 %vm421_vm1, %v13737_v43  ;;  %v30015_v43 = vpack.c.bf16 %v15409_v46, %v15408_v25 }
 0xaf1   : > { %28252 = vmatmul.mubr.msk.f32.gmra.mrb[48].mxu1 %vm421_vm1, %v13738_v61  ;;  %v15796_v61 = vld [vmem:[#allocation8 + $0x740] sm:$0xff] }
 0xaf2   : > { %28254 = vmatprep.mubr.msk.f32.mxu1 %vm421_vm1, %v35692_v21  ;;  %v13751_v21 = vld [vmem:[#allocation3 + $0x227] sm:$0xff] }
 0xaf5   : > { %28255 = vmatmul.mubr.msk.f32.gmra.mrb[50].mxu1 %vm421_vm1, %v35694_v12  ;;  %v14544_v12 = vld [vmem:[#allocation8 + $0x690] sm:$0xff] }
 0xaf6   : > { %28257 = vmatprep.mubr.msk.f32.mxu1 %vm421_vm1, %v35714_v63  ;;  %v15008_v63 = vld [vmem:[#allocation8 + $0x6c0] sm:$0xff] }
 0xaf9   : > { %28258 = vmatmul.mubr.msk.f32.gmra.mrb[52].mxu1 %vm421_vm1, %v35716_v39  ;;  %v15009_v39 = vld [vmem:[#allocation8 + $0x6c8] sm:$0xff] }
 0xafa   : > { %28260 = vmatprep.mubr.msk.f32.mxu1 %vm421_vm1, %v35736_v31  ;;  %v14545_v31 = vld [vmem:[#allocation8 + $0x698] sm:$0xff] }
 0xafd   : > { %28261 = vmatmul.mubr.msk.f32.gmra.mrb[54].mxu1 %vm421_vm1, %v35738_v1  ;;  %v13752_v1 = vld [vmem:[#allocation3 + $0x22f] sm:$0xff] }
 0xafe   : > { %28263 = vmatprep.mubr.msk.f32.mxu1 %vm421_vm1, %v35757_v49  ;;  %v15010_v49 = vld [vmem:[#allocation8 + $0x6d0] sm:$0xff] }
 0xb01   : > { %28264 = vmatmul.mubr.msk.f32.gmra.mrb[56].mxu1 %vm421_vm1, %v35759_v36  ;;  %v29987_v36 = vpack.c.bf16 %v15009_v39, %v15008_v63 }
 0xb02   : > { %28266 = vmatprep.mubr.msk.f32.mxu1 %vm421_vm1, %v35767_v47  ;;  %v15011_v47 = vld [vmem:[#allocation8 + $0x6d8] sm:$0xff] }
 0xb03   : > { %v29991_v17 = vpack.c.bf16 %v15011_v47, %v15010_v49  ;;  %29988 = vmatprep.subr.bf16.mxu0 %v29987_v36 }
 0xb04   : > { %29990 = vmatpush3.bf16.msra.mxu0 %v29987_v36 }
 0xb05   : > { %28267 = vmatmul.mubr.msk.f32.gmra.mrb[58].mxu1 %vm421_vm1, %v35769_v54  ;;  %v29975_v54 = vpack.c.bf16 %v14545_v31, %v14544_v12  ;;  %29992 = vmatprep.subr.bf16.mxu0 %v29991_v17  ;;  %v36397_v12 = vld [vmem:[#allocation9 + $0x2] ss:$0 sm:$0xff] }
 0xb06   : > { %28269 = vmatprep.mubr.msk.f32.mxu1 %vm421_vm1, %v36080_v23  ;;  %v14546_v23 = vld [vmem:[#allocation8 + $0x6a0] sm:$0xff] }
 0xb07   : > { %v29979_v11 = vpack.c.bf16 %v14547_v24, %v14546_v23 }
 0xb08   : > { %29994 = vmatpush3.bf16.msra.mxu0 %v29991_v17 }
 0xb09   : > { %28270 = vmatmul.mubr.msk.f32.gmra.mrb[60].mxu1 %vm421_vm1, %v36084_v6  ;;  %v15012_v6 = vld [vmem:[#allocation8 + $0x6e0] sm:$0xff] }
 0xb0a   : > { %28272 = vmatprep.mubr.msk.f32.mxu1 %vm421_vm1, %v13751_v21  ;;  %v29995_v10 = vpack.c.bf16 %v15013_v48, %v15012_v6  ;;  %v15797_v21 = vld [vmem:[#allocation8 + $0x748] sm:$0xff] }
 0xb0c   : > { %29996 = vmatprep.subr.bf16.mxu0 %v29995_v10 }
 0xb0d   : > { %28273 = vmatmul.mubr.msk.f32.gmra.mrb[62].mxu1 %vm421_vm1, %v13752_v1  ;;  %29998 = vmatpush3.bf16.msra.mxu0 %v29995_v10  ;;  %v36394_v1 = vpack.c.bf16 %v15797_v21, %v15796_v61 }
 0xb0e   : > { %28291 = vmatprep.mubr.msk.f32.mxu1 %vm421_vm1, %v35786_v40  ;;  %v14548_v40 = vld [vmem:[#allocation8 + $0x6b0] sm:$0xff] }
 0xb11   : > { %28292 = vmatmul.mubr.msk.f32.vlgmr.msra.gmra.mrb[32].mxu1 %vm421_vm1, %v35790_v9  ;;  %v29983_v9 = vpack.c.bf16 %v14549_v15, %v14548_v40 }
 0xb12   : > { %29974 = vmatpush3.bf16.msra.mxu1 %v29971_v60  ;;  %28294 = vmatprep.mubr.msk.f32.mxu1 %vm421_vm1, %v35794_v55  ;;  %v29999_v55 = vpack.c.bf16 %v15015_v33, %v15014_v32  ;;  %v15407_v60 = vld [vmem:[#allocation8 + $0x728] sm:$0xff] }
 0xb13   : > { %29976 = vmatprep.subr.bf16.mxu1 %v29975_v54 }
 0xb14   : > { %30000 = vmatprep.subr.bf16.mxu0 %v29999_v55 }
 0xb15   : > { %28295 = vmatmul.mubr.msk.f32.gmra.mrb[34].mxu1 %vm421_vm1, %v35798_v0  ;;  %30002 = vmatpush3.bf16.msra.mxu0 %v29999_v55  ;;  %v39400_v0 = vld [vmem:[#allocation25_spill] sm:$0xff] }
 0xb16   : > { %28297 = vmatprep.mubr.msk.f32.mxu1 %vm421_vm1, %v35802_v30  ;;  %29978 = vmatpush3.bf16.msra.mxu1 %v29975_v54  ;;  %v39401_v30 = vld [vmem:[#allocation26_spill] sm:$0xff] }
 0xb17   : > { %29980 = vmatprep.subr.bf16.mxu1 %v29979_v11 }
 0xb19   : > { %28298 = vmatmul.mubr.msk.f32.gmra.mrb[36].mxu1 %vm421_vm1, %v35806_v16  ;;  %v39402_v16 = vld [vmem:[#allocation27_spill] sm:$0xff] }
 0xb1a   : > { %28300 = vmatprep.mubr.msk.f32.mxu1 %vm421_vm1, %v35810_v42  ;;  %29982 = vmatpush3.bf16.msra.mxu1 %v29979_v11  ;;  %v39403_v42 = vld [vmem:[#allocation28_spill] sm:$0xff] }
 0xb1b   : > { %29984 = vmatprep.subr.bf16.mxu1 %v29983_v9 }
 0xb1d   : > { %28301 = vmatmul.mubr.msk.f32.gmra.mrb[38].mxu1 %vm421_vm1, %v35814_v37  ;;  %v39404_v37 = vld [vmem:[#allocation29_spill] sm:$0xff] }
 0xb1e   : > { %28303 = vmatprep.mubr.msk.f32.mxu1 %vm421_vm1, %v35818_v53  ;;  %29986 = vmatpush3.bf16.msra.mxu1 %v29983_v9  ;;  %v39405_v53 = vld [vmem:[#allocation30_spill] sm:$0xff] }
 0xb21   : > { %28304 = vmatmul.mubr.msk.f32.gmra.mrb[40].mxu1 %vm421_vm1, %v35822_v58  ;;  %v39406_v58 = vld [vmem:[#allocation31_spill] sm:$0xff] }
 0xb22   : > { %28306 = vmatprep.mubr.msk.f32.mxu1 %vm421_vm1, %v35826_v5  ;;  %v39407_v5 = vld [vmem:[#allocation32_spill] sm:$0xff] }
 0xb25   : > { %28307 = vmatmul.mubr.msk.f32.gmra.mrb[42].mxu1 %vm421_vm1, %v35830_v28  ;;  %v39399_v28 = vld [vmem:[#allocation50_spill] sm:$0xff] }
 0xb26   : > { %28309 = vmatprep.mubr.msk.f32.mxu1 %vm421_vm1, %v35834_v51  ;;  %v39398_v51 = vld [vmem:[#allocation49_spill] sm:$0xff] }
 0xb29   : > { %28310 = vmatmul.mubr.msk.f32.gmra.mrb[44].mxu1 %vm421_vm1, %v35838_v27  ;;  %v39397_v27 = vld [vmem:[#allocation22_spill] sm:$0xff] }
 0xb2a   : > { %28312 = vmatprep.mubr.msk.f32.mxu1 %vm421_vm1, %v35842_v2  ;;  %v39396_v2 = vld [vmem:[#allocation21_spill] sm:$0xff] }
 0xb2d   : > { %28313 = vmatmul.mubr.msk.f32.gmra.mrb[46].mxu1 %vm421_vm1, %v35846_v62  ;;  %v39395_v62 = vld [vmem:[#allocation20_spill] sm:$0xff] }
 0xb2e   : > { %28315 = vmatprep.mubr.msk.f32.mxu1 %vm421_vm1, %v35850_v20  ;;  %v39394_v20 = vld [vmem:[#allocation19_spill] sm:$0xff] }
 0xb31   : > { %28316 = vmatmul.mubr.msk.f32.gmra.mrb[48].mxu1 %vm421_vm1, %v35854_v59  ;;  %v14146_v59 = vld [vmem:[#allocation3 + $0x230] sm:$0xff] }
 0xb32   : > { %28318 = vmatprep.mubr.msk.f32.mxu1 %vm421_vm1, %v35858_v7  ;;  %v14145_v7 = vld [vmem:[#allocation3 + $0x228] sm:$0xff] }
 0xb35   : > { %28319 = vmatmul.mubr.msk.f32.gmra.mrb[50].mxu1 %vm421_vm1, %v39357_v26  ;;  %v39410_v26 = vld [vmem:[#allocation35_spill] sm:$0xff] }
 0xb36   : > { %28321 = vmatprep.mubr.msk.f32.mxu1 %vm421_vm1, %v39358_v57  ;;  %v39411_v57 = vld [vmem:[#allocation36_spill] sm:$0xff] }
 0xb39   : > { %28322 = vmatmul.mubr.msk.f32.gmra.mrb[52].mxu1 %vm421_vm1, %v39359_v13  ;;  %v39412_v13 = vld [vmem:[#allocation37_spill] sm:$0xff] }
 0xb3a   : > { %28324 = vmatprep.mubr.msk.f32.mxu1 %vm421_vm1, %v39360_v52  ;;  %v39413_v52 = vld [vmem:[#allocation39_spill] sm:$0xff] }
 0xb3d   : > { %28325 = vmatmul.mubr.msk.f32.gmra.mrb[54].mxu1 %vm421_vm1, %v39361_v41  ;;  %v39414_v41 = vld [vmem:[#allocation40_spill] sm:$0xff] }
 0xb3e   : > { %28327 = vmatprep.mubr.msk.f32.mxu1 %vm421_vm1, %v39362_v29  ;;  %v14539_v29 = vld [vmem:[#allocation3 + $0x229] sm:$0xff] }
 0xb41   : > { %28328 = vmatmul.mubr.msk.f32.gmra.mrb[56].mxu1 %vm421_vm1, %v39363_v44  ;;  %v39415_v44 = vld [vmem:[#allocation44_spill] sm:$0xff] }
 0xb42   : > { %28330 = vmatprep.mubr.msk.f32.mxu1 %vm421_vm1, %v39364_v56  ;;  %v14540_v56 = vld [vmem:[#allocation3 + $0x231] sm:$0xff] }
 0xb45   : > { %28331 = vmatmul.mubr.msk.f32.gmra.mrb[58].mxu1 %vm421_vm1, %v39365_v22  ;;  %v14975_v22 = vld [vmem:[#allocation3 + $0x7] sm:$0xff] }
 0xb46   : > { %28333 = vmatprep.mubr.msk.f32.mxu1 %vm421_vm1, %v36148_v18  ;;  %28419 = vmatprep.mubr.msk.f32.mxu0 %vm421_vm1, %v14975_v22  ;;  %v14976_v18 = vld [vmem:[#allocation3 + $0xf] sm:$0xff] }
 0xb47   : > { %28420 = vmatmul.mubr.msk.f32.vlgmr.msra.gmra.mrb[64].mxu0 %vm421_vm1, %v14976_v18 }
 0xb49   : > { %28334 = vmatmul.mubr.msk.f32.gmra.mrb[60].mxu1 %vm421_vm1, %v36152_v34  ;;  %v15402_v34 = vld [vmem:[#allocation8 + $0x700] sm:$0xff] }
 0xb4a   : > { %28336 = vmatprep.mubr.msk.f32.mxu1 %vm421_vm1, %v14145_v7 }
 0xb4d   : > { %28337 = vmatmul.mubr.msk.f32.gmra.mrb[62].mxu1 %vm421_vm1, %v14146_v59 }
 0xb4e   : > { %28355 = vmatprep.mubr.msk.f32.mxu1 %vm421_vm1, %v35908_v35  ;;  %v39408_v35 = vld [vmem:[#allocation33_spill] sm:$0xff] }
 0xb51   : > { %28356 = vmatmul.mubr.msk.f32.vlgmr.msra.gmra.mrb[32].mxu1 %vm421_vm1, %v35912_v4  ;;  %v39409_v4 = vld [vmem:[#allocation34_spill] sm:$0xff] }
 0xb52   : > { %28358 = vmatprep.mubr.msk.f32.mxu1 %vm421_vm1, %v39367_v38  ;;  %v15403_v38 = vld [vmem:[#allocation8 + $0x708] sm:$0xff] }
 0xb55   : > { %28359 = vmatmul.mubr.msk.f32.gmra.mrb[34].mxu1 %vm421_vm1, %v39368_v19  ;;  %v30003_v19 = vpack.c.bf16 %v15403_v38, %v15402_v34 }
 0xb56   : > { %28361 = vmatprep.mubr.msk.f32.mxu1 %vm421_vm1, %v39369_v50  ;;  %v15404_v50 = vld [vmem:[#allocation8 + $0x710] sm:$0xff] }
 0xb57   : > { %30004 = vmatprep.subr.bf16.mxu0 %v30003_v19 }
 0xb58   : > { %30006 = vmatpush3.bf16.msra.mxu0 %v30003_v19 }
 0xb59   : > { %28362 = vmatmul.mubr.msk.f32.gmra.mrb[36].mxu1 %vm421_vm1, %v39370_v45  ;;  %v15405_v45 = vld [vmem:[#allocation8 + $0x718] sm:$0xff] }
 0xb5a   : > { %28364 = vmatprep.mubr.msk.f32.mxu1 %vm421_vm1, %v39371_v8  ;;  %v30007_v8 = vpack.c.bf16 %v15405_v45, %v15404_v50 }
 0xb5c   : > { %30008 = vmatprep.subr.bf16.mxu0 %v30007_v8 }
 0xb5d   : > { %28365 = vmatmul.mubr.msk.f32.gmra.mrb[38].mxu1 %vm421_vm1, %v39372_v3  ;;  %30010 = vmatpush3.bf16.msra.mxu0 %v30007_v8  ;;  %v15406_v3 = vld [vmem:[#allocation8 + $0x720] sm:$0xff] }
 0xb5e   : > { %28367 = vmatprep.mubr.msk.f32.mxu1 %vm421_vm1, %v39394_v20  ;;  %v30011_v14 = vpack.c.bf16 %v15407_v60, %v15406_v3 }
 0xb60   : > { %30012 = vmatprep.subr.bf16.mxu0 %v30011_v14 }
 0xb61   : > { %28368 = vmatmul.mubr.msk.f32.gmra.mrb[40].mxu1 %vm421_vm1, %v39395_v62  ;;  %30014 = vmatpush3.bf16.msra.mxu0 %v30011_v14 }
 0xb62   : > { %28370 = vmatprep.mubr.msk.f32.mxu1 %vm421_vm1, %v39396_v2  ;;  %30016 = vmatprep.subr.bf16.mxu0 %v30015_v43 }
 0xb65   : > { %28371 = vmatmul.mubr.msk.f32.gmra.mrb[42].mxu1 %vm421_vm1, %v39397_v27  ;;  %30018 = vmatpush3.bf16.msra.mxu0 %v30015_v43 }
 0xb66   : > { %28373 = vmatprep.mubr.msk.f32.mxu1 %vm421_vm1, %v39398_v51  ;;  %30020 = vmatprep.subr.bf16.mxu0 %v36394_v1 }
 0xb69   : > { %28374 = vmatmul.mubr.msk.f32.gmra.mrb[44].mxu1 %vm421_vm1, %v39399_v28 }
 0xb6a   : > { %28376 = vmatprep.mubr.msk.f32.mxu1 %vm421_vm1, %v39400_v0 }
 0xb6d   : > { %28377 = vmatmul.mubr.msk.f32.gmra.mrb[46].mxu1 %vm421_vm1, %v39401_v30 }
 0xb6e   : > { %28379 = vmatprep.mubr.msk.f32.mxu1 %vm421_vm1, %v39402_v16 }
 0xb71   : > { %28380 = vmatmul.mubr.msk.f32.gmra.mrb[48].mxu1 %vm421_vm1, %v39403_v42 }
 0xb72   : > { %28382 = vmatprep.mubr.msk.f32.mxu1 %vm421_vm1, %v39404_v37 }
 0xb75   : > { %28383 = vmatmul.mubr.msk.f32.gmra.mrb[50].mxu1 %vm421_vm1, %v39405_v53 }
 0xb76   : > { %28385 = vmatprep.mubr.msk.f32.mxu1 %vm421_vm1, %v39406_v58 }
 0xb79   : > { %28386 = vmatmul.mubr.msk.f32.gmra.mrb[52].mxu1 %vm421_vm1, %v39407_v5 }
 0xb7a   : > { %28388 = vmatprep.mubr.msk.f32.mxu1 %vm421_vm1, %v39408_v35 }
 0xb7d   : > { %28389 = vmatmul.mubr.msk.f32.gmra.mrb[54].mxu1 %vm421_vm1, %v39409_v4 }
 0xb7e   : > { %28391 = vmatprep.mubr.msk.f32.mxu1 %vm421_vm1, %v39410_v26 }
 0xb81   : > { %28392 = vmatmul.mubr.msk.f32.gmra.mrb[56].mxu1 %vm421_vm1, %v39411_v57 }
 0xb82   : > { %28394 = vmatprep.mubr.msk.f32.mxu1 %vm421_vm1, %v39412_v13 }
 0xb85   : > { %28395 = vmatmul.mubr.msk.f32.gmra.mrb[58].mxu1 %vm421_vm1, %v39413_v52 }
 0xb86   : > { %28397 = vmatprep.mubr.msk.f32.mxu1 %vm421_vm1, %v39414_v41 }
 0xb89   : > { %28398 = vmatmul.mubr.msk.f32.gmra.mrb[60].mxu1 %vm421_vm1, %v39415_v44 }
 0xb8a   : > { %28400 = vmatprep.mubr.msk.f32.mxu1 %vm421_vm1, %v14539_v29 }
 0xb8d   : > { %28401 = vmatmul.mubr.msk.f32.gmra.mrb[62].mxu1 %vm421_vm1, %v14540_v56 }
 0xc24   : > { %v28357_v31 = vpop.f32.mrb[32].mxu1 }
 0xc25   : > { %v30379_v63 = vadd.f32 %v28357_v31, %v36397_v12  ;;  %v14712_v39 = vpop.f32.mrb[33].mxu1 }
 0xc26   : > { %v30380_v49 = vadd.f32 %v36397_v12, %v14712_v39 }
 0xc27   : > { %v14904_v36 = vmax.f32 %v30379_v63, 0.0 }
 0xc28   : > { %v14903_v47 = vmax.f32 %v30380_v49, 0.0  ;;  %v28360_v54 = vpop.f32.mrb[34].mxu1 }
 0xc29   : > { %14936 = vst.msk [vmem:[#allocation3 + $0x30] sm:$0xff] %vm421_vm1, %v14904_v36  ;;  %v30381_v23 = vadd.f32 %v28360_v54, %v36397_v12  ;;  %v14722_v17 = vpop.f32.mrb[35].mxu1 }
 0xc2a   : > { %14935 = vst.msk [vmem:[#allocation3 + $0x28] sm:$0xff] %vm421_vm1, %v14903_v47  ;;  %v30382_v24 = vadd.f32 %v36397_v12, %v14722_v17 }
 0xc2b   : > { %v14906_v6 = vmax.f32 %v30381_v23, 0.0 }
 0xc2c   : > { %v14905_v48 = vmax.f32 %v30382_v24, 0.0  ;;  %v28363_v11 = vpop.f32.mrb[36].mxu1 }
 0xc2d   : > { %14938 = vst.msk [vmem:[#allocation3 + $0x50] sm:$0xff] %vm421_vm1, %v14906_v6  ;;  %v30383_v40 = vadd.f32 %v28363_v11, %v36397_v12  ;;  %v14732_v10 = vpop.f32.mrb[37].mxu1 }
 0xc2e   : > { %14937 = vst.msk [vmem:[#allocation3 + $0x48] sm:$0xff] %vm421_vm1, %v14905_v48  ;;  %v30384_v15 = vadd.f32 %v36397_v12, %v14732_v10 }
 0xc2f   : > { %v14908_v32 = vmax.f32 %v30383_v40, 0.0 }
 0xc30   : > { %v14907_v33 = vmax.f32 %v30384_v15, 0.0  ;;  %v28366_v9 = vpop.f32.mrb[38].mxu1 }
 0xc31   : > { %14940 = vst.msk [vmem:[#allocation3 + $0x70] sm:$0xff] %vm421_vm1, %v14908_v32  ;;  %v30385_v55 = vadd.f32 %v28366_v9, %v36397_v12  ;;  %v14742_v7 = vpop.f32.mrb[39].mxu1  ;;  %v36411_v59 = vld [vmem:[#allocation3 + $0x27] sm:$0xff]  ;;  %v36413_v20 = vld [vmem:[#allocation3 + $0x2f] sm:$0xff] }
 0xc32   : > { %14939 = vst.msk [vmem:[#allocation3 + $0x68] sm:$0xff] %vm421_vm1, %v14907_v33  ;;  %v30386_v62 = vadd.f32 %v36397_v12, %v14742_v7  ;;  %28422 = vmatprep.mubr.msk.f32.mxu0 %vm421_vm1, %v36411_v59 }
 0xc33   : > { %v14910_v2 = vmax.f32 %v30385_v55, 0.0  ;;  %28423 = vmatmul.mubr.msk.f32.gmra.mrb[66].mxu0 %vm421_vm1, %v36413_v20 }
 0xc34   : > { %v14909_v27 = vmax.f32 %v30386_v62, 0.0  ;;  %v28369_v51 = vpop.f32.mrb[40].mxu1 }
 0xc35   : > { %14942 = vst.msk [vmem:[#allocation3 + $0x90] sm:$0xff] %vm421_vm1, %v14910_v2  ;;  %v30387_v28 = vadd.f32 %v28369_v51, %v36397_v12  ;;  %v14752_v0 = vpop.f32.mrb[41].mxu1  ;;  %v36423_v30 = vld [vmem:[#allocation3 + $0x47] sm:$0xff]  ;;  %v36425_v16 = vld [vmem:[#allocation3 + $0x4f] sm:$0xff] }
 0xc36   : > { %14941 = vst.msk [vmem:[#allocation3 + $0x88] sm:$0xff] %vm421_vm1, %v14909_v27  ;;  %v30388_v42 = vadd.f32 %v36397_v12, %v14752_v0  ;;  %28425 = vmatprep.mubr.msk.f32.mxu0 %vm421_vm1, %v36423_v30 }
 0xc37   : > { %v14912_v37 = vmax.f32 %v30387_v28, 0.0  ;;  %28426 = vmatmul.mubr.msk.f32.gmra.mrb[68].mxu0 %vm421_vm1, %v36425_v16 }
 0xc38   : > { %v14911_v53 = vmax.f32 %v30388_v42, 0.0  ;;  %v28372_v58 = vpop.f32.mrb[42].mxu1 }
 0xc39   : > { %14944 = vst.msk [vmem:[#allocation3 + $0xb0] sm:$0xff] %vm421_vm1, %v14912_v37  ;;  %v30389_v5 = vadd.f32 %v28372_v58, %v36397_v12  ;;  %v14762_v35 = vpop.f32.mrb[43].mxu1  ;;  %v36435_v4 = vld [vmem:[#allocation3 + $0x67] sm:$0xff]  ;;  %v36437_v26 = vld [vmem:[#allocation3 + $0x6f] sm:$0xff] }
 0xc3a   : > { %14943 = vst.msk [vmem:[#allocation3 + $0xa8] sm:$0xff] %vm421_vm1, %v14911_v53  ;;  %v30390_v57 = vadd.f32 %v36397_v12, %v14762_v35  ;;  %28428 = vmatprep.mubr.msk.f32.mxu0 %vm421_vm1, %v36435_v4 }
 0xc3b   : > { %v14914_v13 = vmax.f32 %v30389_v5, 0.0  ;;  %28429 = vmatmul.mubr.msk.f32.gmra.mrb[70].mxu0 %vm421_vm1, %v36437_v26 }
 0xc3c   : > { %v14913_v52 = vmax.f32 %v30390_v57, 0.0  ;;  %v28375_v41 = vpop.f32.mrb[44].mxu1 }
 0xc3d   : > { %14946 = vst.msk [vmem:[#allocation3 + $0xd0] sm:$0xff] %vm421_vm1, %v14914_v13  ;;  %v30391_v29 = vadd.f32 %v28375_v41, %v36397_v12  ;;  %v14772_v44 = vpop.f32.mrb[45].mxu1  ;;  %v36447_v56 = vld [vmem:[#allocation3 + $0x87] sm:$0xff]  ;;  %v36449_v22 = vld [vmem:[#allocation3 + $0x8f] sm:$0xff] }
 0xc3e   : > { %14945 = vst.msk [vmem:[#allocation3 + $0xc8] sm:$0xff] %vm421_vm1, %v14913_v52  ;;  %v30392_v18 = vadd.f32 %v36397_v12, %v14772_v44  ;;  %28431 = vmatprep.mubr.msk.f32.mxu0 %vm421_vm1, %v36447_v56 }
 0xc3f   : > { %v14916_v34 = vmax.f32 %v30391_v29, 0.0  ;;  %28432 = vmatmul.mubr.msk.f32.gmra.mrb[72].mxu0 %vm421_vm1, %v36449_v22 }
 0xc40   : > { %v14915_v38 = vmax.f32 %v30392_v18, 0.0  ;;  %v28378_v19 = vpop.f32.mrb[46].mxu1 }
 0xc41   : > { %14948 = vst.msk [vmem:[#allocation3 + $0xf0] sm:$0xff] %vm421_vm1, %v14916_v34  ;;  %v30393_v50 = vadd.f32 %v28378_v19, %v36397_v12  ;;  %v14782_v45 = vpop.f32.mrb[47].mxu1  ;;  %v36459_v8 = vld [vmem:[#allocation3 + $0xa7] sm:$0xff]  ;;  %v36461_v3 = vld [vmem:[#allocation3 + $0xaf] sm:$0xff] }
 0xc42   : > { %14947 = vst.msk [vmem:[#allocation3 + $0xe8] sm:$0xff] %vm421_vm1, %v14915_v38  ;;  %v30394_v60 = vadd.f32 %v36397_v12, %v14782_v45  ;;  %28434 = vmatprep.mubr.msk.f32.mxu0 %vm421_vm1, %v36459_v8 }
 0xc43   : > { %v14918_v14 = vmax.f32 %v30393_v50, 0.0  ;;  %28435 = vmatmul.mubr.msk.f32.gmra.mrb[74].mxu0 %vm421_vm1, %v36461_v3 }
 0xc44   : > { %v14917_v25 = vmax.f32 %v30394_v60, 0.0  ;;  %v28381_v46 = vpop.f32.mrb[48].mxu1 }
 0xc45   : > { %14950 = vst.msk [vmem:[#allocation3 + $0x110] sm:$0xff] %vm421_vm1, %v14918_v14  ;;  %v30395_v43 = vadd.f32 %v28381_v46, %v36397_v12  ;;  %v14792_v61 = vpop.f32.mrb[49].mxu1  ;;  %v36471_v21 = vld [vmem:[#allocation3 + $0xc7] sm:$0xff]  ;;  %v36473_v31 = vld [vmem:[#allocation3 + $0xcf] sm:$0xff] }
 0xc46   : > { %14949 = vst.msk [vmem:[#allocation3 + $0x108] sm:$0xff] %vm421_vm1, %v14917_v25  ;;  %v30396_v63 = vadd.f32 %v36397_v12, %v14792_v61  ;;  %28437 = vmatprep.mubr.msk.f32.mxu0 %vm421_vm1, %v36471_v21 }
 0xc47   : > { %v14920_v39 = vmax.f32 %v30395_v43, 0.0  ;;  %28438 = vmatmul.mubr.msk.f32.gmra.mrb[76].mxu0 %vm421_vm1, %v36473_v31 }
 0xc48   : > { %v14919_v49 = vmax.f32 %v30396_v63, 0.0  ;;  %v28384_v36 = vpop.f32.mrb[50].mxu1 }
 0xc49   : > { %14952 = vst.msk [vmem:[#allocation3 + $0x130] sm:$0xff] %vm421_vm1, %v14920_v39  ;;  %v30397_v47 = vadd.f32 %v28384_v36, %v36397_v12  ;;  %v14802_v54 = vpop.f32.mrb[51].mxu1  ;;  %v36483_v23 = vld [vmem:[#allocation3 + $0xe7] sm:$0xff]  ;;  %v36485_v17 = vld [vmem:[#allocation3 + $0xef] sm:$0xff] }
 0xc4a   : > { %14951 = vst.msk [vmem:[#allocation3 + $0x128] sm:$0xff] %vm421_vm1, %v14919_v49  ;;  %v30398_v24 = vadd.f32 %v36397_v12, %v14802_v54  ;;  %28440 = vmatprep.mubr.msk.f32.mxu0 %vm421_vm1, %v36483_v23 }
 0xc4b   : > { %v14922_v6 = vmax.f32 %v30397_v47, 0.0  ;;  %28441 = vmatmul.mubr.msk.f32.gmra.mrb[78].mxu0 %vm421_vm1, %v36485_v17 }
 0xc4c   : > { %v14921_v48 = vmax.f32 %v30398_v24, 0.0  ;;  %v28387_v11 = vpop.f32.mrb[52].mxu1 }
 0xc4d   : > { %14954 = vst.msk [vmem:[#allocation3 + $0x150] sm:$0xff] %vm421_vm1, %v14922_v6  ;;  %v30399_v40 = vadd.f32 %v28387_v11, %v36397_v12  ;;  %v14812_v10 = vpop.f32.mrb[53].mxu1  ;;  %v36495_v15 = vld [vmem:[#allocation3 + $0x107] sm:$0xff]  ;;  %v36497_v32 = vld [vmem:[#allocation3 + $0x10f] sm:$0xff] }
 0xc4e   : > { %14953 = vst.msk [vmem:[#allocation3 + $0x148] sm:$0xff] %vm421_vm1, %v14921_v48  ;;  %v30400_v33 = vadd.f32 %v36397_v12, %v14812_v10  ;;  %28443 = vmatprep.mubr.msk.f32.mxu0 %vm421_vm1, %v36495_v15 }
 0xc4f   : > { %v14924_v9 = vmax.f32 %v30399_v40, 0.0  ;;  %28444 = vmatmul.mubr.msk.f32.gmra.mrb[80].mxu0 %vm421_vm1, %v36497_v32 }
 0xc50   : > { %v14923_v55 = vmax.f32 %v30400_v33, 0.0  ;;  %v28390_v7 = vpop.f32.mrb[54].mxu1  ;;  %v15369_v33 = vld [vmem:[#allocation3 + $0x8] sm:$0xff] }
 0xc51   : > { %14956 = vst.msk [vmem:[#allocation3 + $0x170] sm:$0xff] %vm421_vm1, %v14924_v9  ;;  %v30401_v62 = vadd.f32 %v28390_v7, %v36397_v12  ;;  %v14822_v2 = vpop.f32.mrb[55].mxu1  ;;  %v36507_v27 = vld [vmem:[#allocation3 + $0x127] sm:$0xff]  ;;  %v36509_v51 = vld [vmem:[#allocation3 + $0x12f] sm:$0xff]  ;;  %v15798_v9 = vld [vmem:[#allocation8 + $0x750] sm:$0xff] }
 0xc52   : > { %14955 = vst.msk [vmem:[#allocation3 + $0x168] sm:$0xff] %vm421_vm1, %v14923_v55  ;;  %v30402_v28 = vadd.f32 %v36397_v12, %v14822_v2  ;;  %28446 = vmatprep.mubr.msk.f32.mxu0 %vm421_vm1, %v36507_v27  ;;  %v15799_v55 = vld [vmem:[#allocation8 + $0x758] sm:$0xff]  ;;  %v15370_v7 = vld [vmem:[#allocation3 + $0x10] sm:$0xff] }
 0xc53   : > { %v14926_v0 = vmax.f32 %v30401_v62, 0.0  ;;  %28447 = vmatmul.mubr.msk.f32.gmra.mrb[82].mxu0 %vm421_vm1, %v36509_v51  ;;  %v30023_v62 = vpack.c.bf16 %v15799_v55, %v15798_v9  ;;  %v15800_v2 = vld [vmem:[#allocation8 + $0x760] sm:$0xff] }
 0xc54   : > { %v14925_v42 = vmax.f32 %v30402_v28, 0.0  ;;  %v28393_v37 = vpop.f32.mrb[56].mxu1  ;;  %v15801_v28 = vld [vmem:[#allocation8 + $0x768] sm:$0xff] }
 0xc55   : > { %14958 = vst.msk [vmem:[#allocation3 + $0x190] sm:$0xff] %vm421_vm1, %v14926_v0  ;;  %v30403_v53 = vadd.f32 %v28393_v37, %v36397_v12  ;;  %v14832_v58 = vpop.f32.mrb[57].mxu1  ;;  %v36519_v5 = vld [vmem:[#allocation3 + $0x147] sm:$0xff]  ;;  %v36521_v35 = vld [vmem:[#allocation3 + $0x14f] sm:$0xff] }
 0xc56   : > { %14957 = vst.msk [vmem:[#allocation3 + $0x188] sm:$0xff] %vm421_vm1, %v14925_v42  ;;  %v30404_v57 = vadd.f32 %v36397_v12, %v14832_v58  ;;  %28449 = vmatprep.mubr.msk.f32.mxu0 %vm421_vm1, %v36519_v5  ;;  %v36585_v0 = vld [vmem:[#allocation3 + $0x28] sm:$0xff]  ;;  %v30027_v42 = vpack.c.bf16 %v15801_v28, %v15800_v2  ;;  %v36590_v37 = vld [vmem:[#allocation3 + $0x30] sm:$0xff] }
 0xc57   : > { %v14928_v13 = vmax.f32 %v30403_v53, 0.0  ;;  %28450 = vmatmul.mubr.msk.f32.gmra.mrb[84].mxu0 %vm421_vm1, %v36521_v35  ;;  %v15802_v53 = vld [vmem:[#allocation8 + $0x770] sm:$0xff]  ;;  %v15803_v58 = vld [vmem:[#allocation8 + $0x778] sm:$0xff] }
 0xc58   : > { %v14927_v52 = vmax.f32 %v30404_v57, 0.0  ;;  %v28396_v41 = vpop.f32.mrb[58].mxu1  ;;  %v36594_v57 = vld [vmem:[#allocation3 + $0x48] sm:$0xff]  ;;  %v36670_v9 = vld [vmem:[#allocation3 + $0x170] sm:$0xff] }
 0xc59   : > { %14960 = vst.msk [vmem:[#allocation3 + $0x1b0] sm:$0xff] %vm421_vm1, %v14928_v13  ;;  %v30405_v29 = vadd.f32 %v28396_v41, %v36397_v12  ;;  %v14842_v44 = vpop.f32.mrb[59].mxu1  ;;  %v36531_v18 = vld [vmem:[#allocation3 + $0x167] sm:$0xff]  ;;  %v36533_v34 = vld [vmem:[#allocation3 + $0x16f] sm:$0xff]  ;;  %39416 = vst [vmem:[#allocation46_spill] sm:$0xff] %v36670_v9 }
 0xc5a   : > { %14959 = vst.msk [vmem:[#allocation3 + $0x1a8] sm:$0xff] %vm421_vm1, %v14927_v52  ;;  %v30406_v38 = vadd.f32 %v36397_v12, %v14842_v44  ;;  %28452 = vmatprep.mubr.msk.f32.mxu0 %vm421_vm1, %v36531_v18  ;;  %v36598_v13 = vld [vmem:[#allocation3 + $0x50] sm:$0xff] }
 0xc5b   : > { %v14930_v19 = vmax.f32 %v30405_v29, 0.0  ;;  %28453 = vmatmul.mubr.msk.f32.gmra.mrb[86].mxu0 %vm421_vm1, %v36533_v34  ;;  %v16190_v52 = vld [vmem:[#allocation8 + $0x780] sm:$0xff]  ;;  %v16191_v41 = vld [vmem:[#allocation8 + $0x788] sm:$0xff] }
 0xc5c   : > { %v14929_v50 = vmax.f32 %v30406_v38, 0.0  ;;  %v28399_v45 = vpop.f32.mrb[60].mxu1  ;;  %v36602_v29 = vld [vmem:[#allocation3 + $0x68] sm:$0xff]  ;;  %v30035_v44 = vpack.c.bf16 %v16191_v41, %v16190_v52  ;;  %v36606_v38 = vld [vmem:[#allocation3 + $0x70] sm:$0xff]  ;;  %v16192_v52 = vld [vmem:[#allocation8 + $0x790] sm:$0xff] }
 0xc5d   : > { %14962 = vst.msk [vmem:[#allocation3 + $0x1d0] sm:$0xff] %vm421_vm1, %v14930_v19  ;;  %v30407_v60 = vadd.f32 %v28399_v45, %v36397_v12  ;;  %v14852_v14 = vpop.f32.mrb[61].mxu1  ;;  %v36543_v25 = vld [vmem:[#allocation3 + $0x187] sm:$0xff]  ;;  %v36545_v46 = vld [vmem:[#allocation3 + $0x18f] sm:$0xff] }
 0xc5e   : > { %14961 = vst.msk [vmem:[#allocation3 + $0x1c8] sm:$0xff] %vm421_vm1, %v14929_v50  ;;  %v30408_v43 = vadd.f32 %v36397_v12, %v14852_v14  ;;  %28455 = vmatprep.mubr.msk.f32.mxu0 %vm421_vm1, %v36543_v25  ;;  %v36610_v19 = vld [vmem:[#allocation3 + $0x88] sm:$0xff]  ;;  %v36614_v50 = vld [vmem:[#allocation3 + $0x90] sm:$0xff] }
 0xc5f   : > { %v14932_v61 = vmax.f32 %v30407_v60, 0.0  ;;  %28456 = vmatmul.mubr.msk.f32.gmra.mrb[88].mxu0 %vm421_vm1, %v36545_v46  ;;  %v36618_v45 = vld [vmem:[#allocation3 + $0xa8] sm:$0xff]  ;;  %v36622_v60 = vld [vmem:[#allocation3 + $0xb0] sm:$0xff] }
 0xc60   : > { %v14931_v63 = vmax.f32 %v30408_v43, 0.0  ;;  %v28402_v39 = vpop.f32.mrb[62].mxu1  ;;  %v36626_v14 = vld [vmem:[#allocation3 + $0xc8] sm:$0xff]  ;;  %v36630_v43 = vld [vmem:[#allocation3 + $0xd0] sm:$0xff] }
 0xc61   : > { %14964 = vst.msk [vmem:[#allocation3 + $0x1f0] sm:$0xff] %vm421_vm1, %v14932_v61  ;;  %v30409_v49 = vadd.f32 %v28402_v39, %v36397_v12  ;;  %v14862_v36 = vpop.f32.mrb[63].mxu1  ;;  %v36555_v47 = vld [vmem:[#allocation3 + $0x1a7] sm:$0xff]  ;;  %v36557_v54 = vld [vmem:[#allocation3 + $0x1af] sm:$0xff] }
 0xc62   : > { %14963 = vst.msk [vmem:[#allocation3 + $0x1e8] sm:$0xff] %vm421_vm1, %v14931_v63  ;;  %v30410_v24 = vadd.f32 %v36397_v12, %v14862_v36  ;;  %28458 = vmatprep.mubr.msk.f32.mxu0 %vm421_vm1, %v36555_v47  ;;  %v36634_v61 = vld [vmem:[#allocation3 + $0xe8] sm:$0xff]  ;;  %v36638_v63 = vld [vmem:[#allocation3 + $0xf0] sm:$0xff] }
 0xc63   : > { %v14934_v6 = vmax.f32 %v30409_v49, 0.0  ;;  %28459 = vmatmul.mubr.msk.f32.gmra.mrb[90].mxu0 %vm421_vm1, %v36557_v54  ;;  %v36642_v39 = vld [vmem:[#allocation3 + $0x108] sm:$0xff]  ;;  %v36646_v49 = vld [vmem:[#allocation3 + $0x110] sm:$0xff] }
 0xc64   : > { %v14933_v48 = vmax.f32 %v30410_v24, 0.0  ;;  %v36650_v36 = vld [vmem:[#allocation3 + $0x128] sm:$0xff]  ;;  %v36654_v24 = vld [vmem:[#allocation3 + $0x130] sm:$0xff] }
 0xc65   : > { %14966 = vst.msk [vmem:[#allocation3 + $0x210] sm:$0xff] %vm421_vm1, %v14934_v6  ;;  %v36566_v11 = vld [vmem:[#allocation3 + $0x1c7] sm:$0xff]  ;;  %v36568_v40 = vld [vmem:[#allocation3 + $0x1cf] sm:$0xff] }
 0xc66   : > { %14965 = vst.msk [vmem:[#allocation3 + $0x208] sm:$0xff] %vm421_vm1, %v14933_v48  ;;  %28461 = vmatprep.mubr.msk.f32.mxu0 %vm421_vm1, %v36566_v11  ;;  %v36658_v6 = vld [vmem:[#allocation3 + $0x148] sm:$0xff]  ;;  %v36662_v48 = vld [vmem:[#allocation3 + $0x150] sm:$0xff] }
 0xc67   : > { %28462 = vmatmul.mubr.msk.f32.gmra.mrb[92].mxu0 %vm421_vm1, %v36568_v40  ;;  %v36674_v55 = vld [vmem:[#allocation3 + $0x188] sm:$0xff]  ;;  %v36686_v2 = vld [vmem:[#allocation3 + $0x1b0] sm:$0xff] }
 0xc68   : > { %39417 = vst [vmem:[#allocation48_spill] sm:$0xff] %v36674_v55  ;;  %39420 = vst [vmem:[#allocation38_spill] sm:$0xff] %v36686_v2  ;;  %v36690_v28 = vld [vmem:[#allocation3 + $0x1c8] sm:$0xff] }
 0xc69   : > { %v36575_v12 = vld [vmem:[#allocation3 + $0x1e7] sm:$0xff]  ;;  %v36577_v10 = vld [vmem:[#allocation3 + $0x1ef] sm:$0xff]  ;;  %39421 = vst [vmem:[#allocation41_spill] sm:$0xff] %v36690_v28 }
 0xc6a   : > { %28464 = vmatprep.mubr.msk.f32.mxu0 %vm421_vm1, %v36575_v12  ;;  %v16193_v41 = vld [vmem:[#allocation8 + $0x798] sm:$0xff] }
 0xc6b   : > { %28465 = vmatmul.mubr.msk.f32.gmra.mrb[94].mxu0 %vm421_vm1, %v36577_v10 }
 0xc6c   : > { %28483 = vmatprep.mubr.msk.f32.mxu0 %vm421_vm1, %v15369_v33  ;;  %v36666_v33 = vld [vmem:[#allocation3 + $0x168] sm:$0xff] }
 0xc6f   : > { %28484 = vmatmul.mubr.msk.f32.vlgmr.msra.gmra.mrb[64].mxu0 %vm421_vm1, %v15370_v7  ;;  %v36678_v7 = vld [vmem:[#allocation3 + $0x190] sm:$0xff] }
 0xc70   : > { %30022 = vmatpush3.bf16.msra.mxu0 %v36394_v1  ;;  %28486 = vmatprep.mubr.msk.f32.mxu0 %vm421_vm1, %v36585_v0  ;;  %v30031_v1 = vpack.c.bf16 %v15803_v58, %v15802_v53  ;;  %39418 = vst [vmem:[#allocation23_spill] sm:$0xff] %v36678_v7  ;;  %v36698_v53 = vld [vmem:[#allocation3 + $0x1e8] sm:$0xff] }
 0xc71   : > { %30024 = vmatprep.subr.bf16.mxu0 %v30023_v62  ;;  %39423 = vst [vmem:[#allocation43_spill] sm:$0xff] %v36698_v53  ;;  %v15763_v58 = vld [vmem:[#allocation3 + $0x9] sm:$0xff] }
 0xc73   : > { %28487 = vmatmul.mubr.msk.f32.gmra.mrb[66].mxu0 %vm421_vm1, %v36590_v37 }
 0xc74   : > { %28489 = vmatprep.mubr.msk.f32.mxu0 %vm421_vm1, %v36594_v57  ;;  %30026 = vmatpush3.bf16.msra.mxu0 %v30023_v62  ;;  %v36682_v62 = vld [vmem:[#allocation3 + $0x1a8] sm:$0xff] }
 0xc75   : > { %30028 = vmatprep.subr.bf16.mxu0 %v30027_v42  ;;  %39419 = vst [vmem:[#allocation24_spill] sm:$0xff] %v36682_v62 }
 0xc77   : > { %28490 = vmatmul.mubr.msk.f32.gmra.mrb[68].mxu0 %vm421_vm1, %v36598_v13 }
 0xc78   : > { %28492 = vmatprep.mubr.msk.f32.mxu0 %vm421_vm1, %v36602_v29  ;;  %30030 = vmatpush3.bf16.msra.mxu0 %v30027_v42  ;;  %v36694_v42 = vld [vmem:[#allocation3 + $0x1d0] sm:$0xff] }
 0xc79   : > { %30032 = vmatprep.subr.bf16.mxu0 %v30031_v1  ;;  %39422 = vst [vmem:[#allocation42_spill] sm:$0xff] %v36694_v42 }
 0xc7b   : > { %28493 = vmatmul.mubr.msk.f32.gmra.mrb[70].mxu0 %vm421_vm1, %v36606_v38 }
 0xc7c   : > { %28495 = vmatprep.mubr.msk.f32.mxu0 %vm421_vm1, %v36610_v19  ;;  %30034 = vmatpush3.bf16.msra.mxu0 %v30031_v1  ;;  %v36702_v1 = vld [vmem:[#allocation3 + $0x1f0] sm:$0xff] }
 0xc7d   : > { %30036 = vmatprep.subr.bf16.mxu0 %v30035_v44  ;;  %39424 = vst [vmem:[#allocation45_spill] sm:$0xff] %v36702_v1 }
 0xc7f   : > { %28496 = vmatmul.mubr.msk.f32.gmra.mrb[72].mxu0 %vm421_vm1, %v36614_v50 }
 0xc80   : > { %28498 = vmatprep.mubr.msk.f32.mxu0 %vm421_vm1, %v36618_v45 }
 0xc83   : > { %28499 = vmatmul.mubr.msk.f32.gmra.mrb[74].mxu0 %vm421_vm1, %v36622_v60 }
 0xc84   : > { %28501 = vmatprep.mubr.msk.f32.mxu0 %vm421_vm1, %v36626_v14 }
 0xc87   : > { %28502 = vmatmul.mubr.msk.f32.gmra.mrb[76].mxu0 %vm421_vm1, %v36630_v43 }
 0xc88   : > { %28504 = vmatprep.mubr.msk.f32.mxu0 %vm421_vm1, %v36634_v61 }
 0xc8b   : > { %28505 = vmatmul.mubr.msk.f32.gmra.mrb[78].mxu0 %vm421_vm1, %v36638_v63 }
 0xc8c   : > { %28507 = vmatprep.mubr.msk.f32.mxu0 %vm421_vm1, %v36642_v39 }
 0xc8f   : > { %28508 = vmatmul.mubr.msk.f32.gmra.mrb[80].mxu0 %vm421_vm1, %v36646_v49 }
 0xc90   : > { %28510 = vmatprep.mubr.msk.f32.mxu0 %vm421_vm1, %v36650_v36 }
 0xc93   : > { %28511 = vmatmul.mubr.msk.f32.gmra.mrb[82].mxu0 %vm421_vm1, %v36654_v24 }
 0xc94   : > { %28513 = vmatprep.mubr.msk.f32.mxu0 %vm421_vm1, %v36658_v6 }
 0xc97   : > { %28514 = vmatmul.mubr.msk.f32.gmra.mrb[84].mxu0 %vm421_vm1, %v36662_v48 }
 0xc98   : > { %28516 = vmatprep.mubr.msk.f32.mxu0 %vm421_vm1, %v36666_v33 }
 0xc9b   : > { %28517 = vmatmul.mubr.msk.f32.gmra.mrb[86].mxu0 %vm421_vm1, %v36670_v9  ;;  %v16196_v9 = vld [vmem:[#allocation8 + $0x7b0] sm:$0xff] }
 0xc9c   : > { %28519 = vmatprep.mubr.msk.f32.mxu0 %vm421_vm1, %v36674_v55  ;;  %v36712_v55 = vld [vmem:[#allocation3 + $0x31] sm:$0xff] }
 0xc9d   : > { %39425 = vst [vmem:[#allocation47_spill] sm:$0xff] %v36712_v55 }
 0xc9f   : > { %28520 = vmatmul.mubr.msk.f32.gmra.mrb[88].mxu0 %vm421_vm1, %v36678_v7  ;;  %v16195_v7 = vld [vmem:[#allocation8 + $0x7a8] sm:$0xff] }
 0xca0   : > { %28522 = vmatprep.mubr.msk.f32.mxu0 %vm421_vm1, %v36682_v62  ;;  %v16194_v62 = vld [vmem:[#allocation8 + $0x7a0] sm:$0xff] }
 0xca3   : > { %28523 = vmatmul.mubr.msk.f32.gmra.mrb[90].mxu0 %vm421_vm1, %v36686_v2  ;;  %v30039_v2 = vpack.c.bf16 %v16193_v41, %v16192_v52  ;;  %v16584_v52 = vld [vmem:[#allocation8 + $0x7c0] sm:$0xff]  ;;  %v16585_v41 = vld [vmem:[#allocation8 + $0x7c8] sm:$0xff] }
 0xca4   : > { %28525 = vmatprep.mubr.msk.f32.mxu0 %vm421_vm1, %v36690_v28  ;;  %v15764_v28 = vld [vmem:[#allocation3 + $0x11] sm:$0xff] }
 0xca7   : > { %28526 = vmatmul.mubr.msk.f32.gmra.mrb[92].mxu0 %vm421_vm1, %v36694_v42  ;;  %v36708_v42 = vld [vmem:[#allocation3 + $0x29] sm:$0xff] }
 0xca8   : > { %28528 = vmatprep.mubr.msk.f32.mxu0 %vm421_vm1, %v36698_v53  ;;  %v30043_v53 = vpack.c.bf16 %v16195_v7, %v16194_v62  ;;  %v36724_v7 = vld [vmem:[#allocation3 + $0x69] sm:$0xff]  ;;  %v30051_v62 = vpack.c.bf16 %v16585_v41, %v16584_v52 }
 0xca9   : > { %39426 = vst [vmem:[#allocation15_spill] sm:$0xff] %v36724_v7  ;;  %v36748_v52 = vld [vmem:[#allocation3 + $0xc9] sm:$0xff] }
 0xcaa   : > { %39432 = vst [vmem:[#allocation21_spill] sm:$0xff] %v36748_v52  ;;  %v36756_v41 = vld [vmem:[#allocation3 + $0xe9] sm:$0xff] }
 0xcab   : > { %28529 = vmatmul.mubr.msk.f32.gmra.mrb[94].mxu0 %vm421_vm1, %v36702_v1  ;;  %v16197_v1 = vld [vmem:[#allocation8 + $0x7b8] sm:$0xff]  ;;  %39434 = vst [vmem:[#allocation49_spill] sm:$0xff] %v36756_v41 }
 0xcac   : > { %28547 = vmatprep.mubr.msk.f32.mxu0 %vm421_vm1, %v15763_v58  ;;  %v36716_v58 = vld [vmem:[#allocation3 + $0x49] sm:$0xff] }
 0xcaf   : > { %28548 = vmatmul.mubr.msk.f32.vlgmr.msra.gmra.mrb[64].mxu0 %vm421_vm1, %v15764_v28  ;;  %v36720_v28 = vld [vmem:[#allocation3 + $0x51] sm:$0xff] }
 0xcb0   : > { %30038 = vmatpush3.bf16.msra.mxu0 %v30035_v44  ;;  %28550 = vmatprep.mubr.msk.f32.mxu0 %vm421_vm1, %v36708_v42  ;;  %v30047_v44 = vpack.c.bf16 %v16197_v1, %v16196_v9  ;;  %v36732_v9 = vld [vmem:[#allocation3 + $0x89] sm:$0xff]  ;;  %v36744_v1 = vld [vmem:[#allocation3 + $0xb1] sm:$0xff] }
 0xcb1   : > { %30040 = vmatprep.subr.bf16.mxu0 %v30039_v2  ;;  %39428 = vst [vmem:[#allocation17_spill] sm:$0xff] %v36732_v9  ;;  %39431 = vst [vmem:[#allocation20_spill] sm:$0xff] %v36744_v1 }
 0xcb3   : > { %28551 = vmatmul.mubr.msk.f32.gmra.mrb[66].mxu0 %vm421_vm1, %v36712_v55  ;;  %v36728_v55 = vld [vmem:[#allocation3 + $0x71] sm:$0xff] }
 0xcb4   : > { %28553 = vmatprep.mubr.msk.f32.mxu0 %vm421_vm1, %v36716_v58  ;;  %30042 = vmatpush3.bf16.msra.mxu0 %v30039_v2  ;;  %39427 = vst [vmem:[#allocation16_spill] sm:$0xff] %v36728_v55  ;;  %v36736_v2 = vld [vmem:[#allocation3 + $0x91] sm:$0xff] }
 0xcb5   : > { %30044 = vmatprep.subr.bf16.mxu0 %v30043_v53  ;;  %39429 = vst [vmem:[#allocation18_spill] sm:$0xff] %v36736_v2 }
 0xcb7   : > { %28554 = vmatmul.mubr.msk.f32.gmra.mrb[68].mxu0 %vm421_vm1, %v36720_v28 }
 0xcb8   : > { %28556 = vmatprep.mubr.msk.f32.mxu0 %vm421_vm1, %v36724_v7  ;;  %30046 = vmatpush3.bf16.msra.mxu0 %v30043_v53  ;;  %v36740_v53 = vld [vmem:[#allocation3 + $0xa9] sm:$0xff] }
 0xcb9   : > { %30048 = vmatprep.subr.bf16.mxu0 %v30047_v44  ;;  %39430 = vst [vmem:[#allocation19_spill] sm:$0xff] %v36740_v53  ;;  %v16591_v7 = vld [vmem:[#allocation8 + $0x7f8] sm:$0xff] }
 0xcbb   : > { %28557 = vmatmul.mubr.msk.f32.gmra.mrb[70].mxu0 %vm421_vm1, %v36728_v55  ;;  %v16589_v55 = vld [vmem:[#allocation8 + $0x7e8] sm:$0xff] }
 0xcbc   : > { %28559 = vmatprep.mubr.msk.f32.mxu0 %vm421_vm1, %v36732_v9  ;;  %30050 = vmatpush3.bf16.msra.mxu0 %v30047_v44  ;;  %v36752_v44 = vld [vmem:[#allocation3 + $0xd1] sm:$0xff]  ;;  %v16587_v9 = vld [vmem:[#allocation8 + $0x7d8] sm:$0xff] }
 0xcbd   : > { %30052 = vmatprep.subr.bf16.mxu0 %v30051_v62  ;;  %39433 = vst [vmem:[#allocation22_spill] sm:$0xff] %v36752_v44 }
 0xcbf   : > { %28560 = vmatmul.mubr.msk.f32.gmra.mrb[72].mxu0 %vm421_vm1, %v36736_v2  ;;  %v16586_v2 = vld [vmem:[#allocation8 + $0x7d0] sm:$0xff] }
 0xcc0   : > { %28562 = vmatprep.mubr.msk.f32.mxu0 %vm421_vm1, %v36740_v53  ;;  %v36760_v53 = vld [vmem:[#allocation3 + $0xf1] sm:$0xff] }
 0xcc1   : > { %39435 = vst [vmem:[#allocation50_spill] sm:$0xff] %v36760_v53 }
 0xcc3   : > { %28563 = vmatmul.mubr.msk.f32.gmra.mrb[74].mxu0 %vm421_vm1, %v36744_v1  ;;  %v36764_v1 = vld [vmem:[#allocation3 + $0x109] sm:$0xff] }
 0xcc4   : > { %28565 = vmatprep.mubr.msk.f32.mxu0 %vm421_vm1, %v36748_v52  ;;  %39436 = vst [vmem:[#allocation25_spill] sm:$0xff] %v36764_v1  ;;  %v36768_v52 = vld [vmem:[#allocation3 + $0x111] sm:$0xff] }
 0xcc5   : > { %39437 = vst [vmem:[#allocation26_spill] sm:$0xff] %v36768_v52 }
 0xcc7   : > { %28566 = vmatmul.mubr.msk.f32.gmra.mrb[76].mxu0 %vm421_vm1, %v36752_v44  ;;  %v36772_v44 = vld [vmem:[#allocation3 + $0x129] sm:$0xff] }
 0xcc8   : > { %28568 = vmatprep.mubr.msk.f32.mxu0 %vm421_vm1, %v36756_v41  ;;  %39438 = vst [vmem:[#allocation27_spill] sm:$0xff] %v36772_v44  ;;  %v36776_v41 = vld [vmem:[#allocation3 + $0x131] sm:$0xff] }
 0xcc9   : > { %39439 = vst [vmem:[#allocation28_spill] sm:$0xff] %v36776_v41 }
 0xccb   : > { %28569 = vmatmul.mubr.msk.f32.gmra.mrb[78].mxu0 %vm421_vm1, %v36760_v53  ;;  %v36780_v53 = vld [vmem:[#allocation3 + $0x149] sm:$0xff] }
 0xccc   : > { %28571 = vmatprep.mubr.msk.f32.mxu0 %vm421_vm1, %v36764_v1  ;;  %39440 = vst [vmem:[#allocation29_spill] sm:$0xff] %v36780_v53  ;;  %v36784_v1 = vld [vmem:[#allocation3 + $0x151] sm:$0xff] }
 0xccd   : > { %39441 = vst [vmem:[#allocation30_spill] sm:$0xff] %v36784_v1 }
 0xccf   : > { %28572 = vmatmul.mubr.msk.f32.gmra.mrb[80].mxu0 %vm421_vm1, %v36768_v52  ;;  %v36788_v52 = vld [vmem:[#allocation3 + $0x169] sm:$0xff] }
 0xcd0   : > { %28574 = vmatprep.mubr.msk.f32.mxu0 %vm421_vm1, %v36772_v44  ;;  %39442 = vst [vmem:[#allocation31_spill] sm:$0xff] %v36788_v52  ;;  %v36792_v44 = vld [vmem:[#allocation3 + $0x171] sm:$0xff] }
 0xcd1   : > { %39443 = vst [vmem:[#allocation32_spill] sm:$0xff] %v36792_v44 }
 0xcd3   : > { %28575 = vmatmul.mubr.msk.f32.gmra.mrb[82].mxu0 %vm421_vm1, %v36776_v41  ;;  %v36796_v41 = vld [vmem:[#allocation3 + $0x189] sm:$0xff] }
 0xcd4   : > { %28577 = vmatprep.mubr.msk.f32.mxu0 %vm421_vm1, %v36780_v53  ;;  %39444 = vst [vmem:[#allocation33_spill] sm:$0xff] %v36796_v41  ;;  %v36800_v53 = vld [vmem:[#allocation3 + $0x191] sm:$0xff] }
 0xcd5   : > { %39445 = vst [vmem:[#allocation34_spill] sm:$0xff] %v36800_v53 }
 0xcd7   : > { %28578 = vmatmul.mubr.msk.f32.gmra.mrb[84].mxu0 %vm421_vm1, %v36784_v1  ;;  %v36804_v1 = vld [vmem:[#allocation3 + $0x1a9] sm:$0xff] }
 0xcd8   : > { %28580 = vmatprep.mubr.msk.f32.mxu0 %vm421_vm1, %v36788_v52  ;;  %39446 = vst [vmem:[#allocation35_spill] sm:$0xff] %v36804_v1  ;;  %v36808_v52 = vld [vmem:[#allocation3 + $0x1b1] sm:$0xff] }
 0xcd9   : > { %39447 = vst [vmem:[#allocation36_spill] sm:$0xff] %v36808_v52 }
 0xcdb   : > { %28581 = vmatmul.mubr.msk.f32.gmra.mrb[86].mxu0 %vm421_vm1, %v36792_v44  ;;  %v36812_v44 = vld [vmem:[#allocation3 + $0x1c9] sm:$0xff] }
 0xcdc   : > { %28583 = vmatprep.mubr.msk.f32.mxu0 %vm421_vm1, %v36796_v41  ;;  %39448 = vst [vmem:[#allocation37_spill] sm:$0xff] %v36812_v44  ;;  %v36816_v41 = vld [vmem:[#allocation3 + $0x1d1] sm:$0xff] }
 0xcdd   : > { %39449 = vst [vmem:[#allocation39_spill] sm:$0xff] %v36816_v41 }
 0xcdf   : > { %28584 = vmatmul.mubr.msk.f32.gmra.mrb[88].mxu0 %vm421_vm1, %v36800_v53  ;;  %v36820_v53 = vld [vmem:[#allocation3 + $0x1e9] sm:$0xff] }
 0xce0   : > { %28586 = vmatprep.mubr.msk.f32.mxu0 %vm421_vm1, %v36804_v1  ;;  %39450 = vst [vmem:[#allocation40_spill] sm:$0xff] %v36820_v53  ;;  %v36824_v1 = vld [vmem:[#allocation3 + $0x1f1] sm:$0xff] }
 0xce1   : > { %39451 = vst [vmem:[#allocation44_spill] sm:$0xff] %v36824_v1 }
 0xce3   : > { %28587 = vmatmul.mubr.msk.f32.gmra.mrb[90].mxu0 %vm421_vm1, %v36808_v52  ;;  %v16588_v52 = vld [vmem:[#allocation8 + $0x7e0] sm:$0xff] }
 0xce4   : > { %28589 = vmatprep.mubr.msk.f32.mxu0 %vm421_vm1, %v36812_v44  ;;  %v30055_v44 = vpack.c.bf16 %v16587_v9, %v16586_v2  ;;  %v16978_v9 = vld [vmem:[#allocation8 + $0x800] sm:$0xff]  ;;  %v16979_v2 = vld [vmem:[#allocation8 + $0x808] sm:$0xff] }
 0xce7   : > { %28590 = vmatmul.mubr.msk.f32.gmra.mrb[92].mxu0 %vm421_vm1, %v36816_v41  ;;  %v16590_v41 = vld [vmem:[#allocation8 + $0x7f0] sm:$0xff] }
 0xce8   : > { %28592 = vmatprep.mubr.msk.f32.mxu0 %vm421_vm1, %v36820_v53  ;;  %v30059_v53 = vpack.c.bf16 %v16589_v55, %v16588_v52  ;;  %v39458_v55 = vld [vmem:[#allocation42_spill] sm:$0xff]  ;;  %v36960_v52 = vld [vmem:[#allocation3 + $0x210] sm:$0xff] }
 0xceb   : > { %28593 = vmatmul.mubr.msk.f32.gmra.mrb[94].mxu0 %vm421_vm1, %v36824_v1 }
 0xcec   : > { %28611 = vmatprep.mubr.msk.f32.mxu0 %vm421_vm1, %v36411_v59  ;;  %v30063_v59 = vpack.c.bf16 %v16591_v7, %v16590_v41  ;;  %v39459_v7 = vld [vmem:[#allocation43_spill] sm:$0xff]  ;;  %v17375_v41 = vld [vmem:[#allocation8 + $0x858] sm:$0xff] }
 0xcef   : > { %28612 = vmatmul.mubr.msk.f32.vlgmr.msra.gmra.mrb[64].mxu0 %vm421_vm1, %v36413_v20  ;;  %v30067_v20 = vpack.c.bf16 %v16979_v2, %v16978_v9  ;;  %v17376_v9 = vld [vmem:[#allocation8 + $0x860] sm:$0xff]  ;;  %v17377_v2 = vld [vmem:[#allocation8 + $0x868] sm:$0xff] }
 0xcf0   : > { %30054 = vmatpush3.bf16.msra.mxu0 %v30051_v62  ;;  %28614 = vmatprep.mubr.msk.f32.mxu0 %vm421_vm1, %v36423_v30  ;;  %v36888_v30 = vld [vmem:[#allocation3 + $0x207] sm:$0xff] }
 0xcf1   : > { %30056 = vmatprep.subr.bf16.mxu0 %v30055_v44  ;;  %v39460_v62 = vld [vmem:[#allocation45_spill] sm:$0xff] }
 0xcf3   : > { %28615 = vmatmul.mubr.msk.f32.gmra.mrb[66].mxu0 %vm421_vm1, %v36425_v16  ;;  %v36892_v16 = vld [vmem:[#allocation3 + $0x20f] sm:$0xff] }
 0xcf4   : > { %28617 = vmatprep.mubr.msk.f32.mxu0 %vm421_vm1, %v36435_v4  ;;  %30058 = vmatpush3.bf16.msra.mxu0 %v30055_v44  ;;  %v16980_v4 = vld [vmem:[#allocation8 + $0x810] sm:$0xff] }
 0xcf5   : > { %30060 = vmatprep.subr.bf16.mxu0 %v30059_v53  ;;  %v17374_v44 = vld [vmem:[#allocation8 + $0x850] sm:$0xff] }
 0xcf7   : > { %28618 = vmatmul.mubr.msk.f32.gmra.mrb[68].mxu0 %vm421_vm1, %v36437_v26  ;;  %v16981_v26 = vld [vmem:[#allocation8 + $0x818] sm:$0xff] }
 0xcf8   : > { %28620 = vmatprep.mubr.msk.f32.mxu0 %vm421_vm1, %v36447_v56  ;;  %30062 = vmatpush3.bf16.msra.mxu0 %v30059_v53  ;;  %v30071_v56 = vpack.c.bf16 %v16981_v26, %v16980_v4  ;;  %v36956_v53 = vld [vmem:[#allocation3 + $0x208] sm:$0xff]  ;;  %v30091_v4 = vpack.c.bf16 %v17377_v2, %v17376_v9  ;;  %v17378_v26 = vld [vmem:[#allocation8 + $0x870] sm:$0xff] }
 0xcf9   : > { %30064 = vmatprep.subr.bf16.mxu0 %v30063_v59  ;;  %v39471_v9 = vld [vmem:[#allocation50_spill] sm:$0xff]  ;;  %v39472_v2 = vld [vmem:[#allocation25_spill] sm:$0xff] }
 0xcfb   : > { %28621 = vmatmul.mubr.msk.f32.gmra.mrb[70].mxu0 %vm421_vm1, %v36449_v22  ;;  %v16982_v22 = vld [vmem:[#allocation8 + $0x820] sm:$0xff] }
 0xcfc   : > { %28623 = vmatprep.mubr.msk.f32.mxu0 %vm421_vm1, %v36459_v8  ;;  %30066 = vmatpush3.bf16.msra.mxu0 %v30063_v59  ;;  %v16983_v8 = vld [vmem:[#allocation8 + $0x828] sm:$0xff]  ;;  %v30087_v59 = vpack.c.bf16 %v17375_v41, %v17374_v44  ;;  %v39468_v44 = vld [vmem:[#allocation21_spill] sm:$0xff]  ;;  %v39469_v41 = vld [vmem:[#allocation22_spill] sm:$0xff] }
 0xcfd   : > { %30068 = vmatprep.subr.bf16.mxu0 %v30067_v20 }
 0xcff   : > { %28624 = vmatmul.mubr.msk.f32.gmra.mrb[72].mxu0 %vm421_vm1, %v36461_v3  ;;  %v30075_v3 = vpack.c.bf16 %v16983_v8, %v16982_v22  ;;  %v39462_v22 = vld [vmem:[#allocation15_spill] sm:$0xff] }
 0xd00   : > { %28626 = vmatprep.mubr.msk.f32.mxu0 %vm421_vm1, %v36471_v21  ;;  %v16984_v21 = vld [vmem:[#allocation8 + $0x830] sm:$0xff]  ;;  %v17766_v8 = vld [vmem:[#allocation8 + $0x880] sm:$0xff] }
 0xd03   : > { %28627 = vmatmul.mubr.msk.f32.gmra.mrb[74].mxu0 %vm421_vm1, %v36473_v31  ;;  %v16985_v31 = vld [vmem:[#allocation8 + $0x838] sm:$0xff] }
 0xd04   : > { %28629 = vmatprep.mubr.msk.f32.mxu0 %vm421_vm1, %v36483_v23  ;;  %v30079_v23 = vpack.c.bf16 %v16985_v31, %v16984_v21  ;;  %v39463_v21 = vld [vmem:[#allocation16_spill] sm:$0xff]  ;;  %v39464_v31 = vld [vmem:[#allocation17_spill] sm:$0xff] }
 0xd07   : > { %28630 = vmatmul.mubr.msk.f32.gmra.mrb[76].mxu0 %vm421_vm1, %v36485_v17  ;;  %v17372_v17 = vld [vmem:[#allocation8 + $0x840] sm:$0xff] }
 0xd08   : > { %28632 = vmatprep.mubr.msk.f32.mxu0 %vm421_vm1, %v36495_v15  ;;  %v17373_v15 = vld [vmem:[#allocation8 + $0x848] sm:$0xff] }
 0xd0b   : > { %28633 = vmatmul.mubr.msk.f32.gmra.mrb[78].mxu0 %vm421_vm1, %v36497_v32  ;;  %v30083_v32 = vpack.c.bf16 %v17373_v15, %v17372_v17  ;;  %v39465_v17 = vld [vmem:[#allocation18_spill] sm:$0xff]  ;;  %v39466_v15 = vld [vmem:[#allocation19_spill] sm:$0xff] }
 0xd0c   : > { %28635 = vmatprep.mubr.msk.f32.mxu0 %vm421_vm1, %v36507_v27  ;;  %v39452_v27 = vld [vmem:[#allocation46_spill] sm:$0xff] }
 0xd0f   : > { %28636 = vmatmul.mubr.msk.f32.gmra.mrb[80].mxu0 %vm421_vm1, %v36509_v51  ;;  %v39453_v51 = vld [vmem:[#allocation48_spill] sm:$0xff] }
 0xd10   : > { %28638 = vmatprep.mubr.msk.f32.mxu0 %vm421_vm1, %v36519_v5  ;;  %v39454_v5 = vld [vmem:[#allocation23_spill] sm:$0xff] }
 0xd13   : > { %28639 = vmatmul.mubr.msk.f32.gmra.mrb[82].mxu0 %vm421_vm1, %v36521_v35  ;;  %v39455_v35 = vld [vmem:[#allocation24_spill] sm:$0xff] }
 0xd14   : > { %28641 = vmatprep.mubr.msk.f32.mxu0 %vm421_vm1, %v36531_v18 }
 0xd17   : > { %28642 = vmatmul.mubr.msk.f32.gmra.mrb[84].mxu0 %vm421_vm1, %v36533_v34 }
 0xd18   : > { %28644 = vmatprep.mubr.msk.f32.mxu0 %vm421_vm1, %v36543_v25 }
 0xd1b   : > { %28645 = vmatmul.mubr.msk.f32.gmra.mrb[86].mxu0 %vm421_vm1, %v36545_v46 }
 0xd1c   : > { %28647 = vmatprep.mubr.msk.f32.mxu0 %vm421_vm1, %v36555_v47 }
 0xd1f   : > { %28648 = vmatmul.mubr.msk.f32.gmra.mrb[88].mxu0 %vm421_vm1, %v36557_v54 }
 0xd20   : > { %28650 = vmatprep.mubr.msk.f32.mxu0 %vm421_vm1, %v36566_v11 }
 0xd23   : > { %28651 = vmatmul.mubr.msk.f32.gmra.mrb[90].mxu0 %vm421_vm1, %v36568_v40 }
 0xd24   : > { %28653 = vmatprep.mubr.msk.f32.mxu0 %vm421_vm1, %v36575_v12 }
 0xd27   : > { %28654 = vmatmul.mubr.msk.f32.gmra.mrb[92].mxu0 %vm421_vm1, %v36577_v10 }
 0xd28   : > { %28656 = vmatprep.mubr.msk.f32.mxu0 %vm421_vm1, %v36888_v30 }
 0xd2b   : > { %28657 = vmatmul.mubr.msk.f32.gmra.mrb[94].mxu0 %vm421_vm1, %v36892_v16 }
 0xd2c   : > { %28675 = vmatprep.mubr.msk.f32.mxu0 %vm421_vm1, %v36585_v0  ;;  %v39456_v0 = vld [vmem:[#allocation38_spill] sm:$0xff] }
 0xd2f   : > { %28676 = vmatmul.mubr.msk.f32.vlgmr.msra.gmra.mrb[64].mxu0 %vm421_vm1, %v36590_v37  ;;  %v39457_v37 = vld [vmem:[#allocation41_spill] sm:$0xff] }
 0xd30   : > { %30070 = vmatpush3.bf16.msra.mxu0 %v30067_v20  ;;  %28678 = vmatprep.mubr.msk.f32.mxu0 %vm421_vm1, %v36594_v57  ;;  %v39461_v20 = vld [vmem:[#allocation47_spill] sm:$0xff] }
 0xd31   : > { %30072 = vmatprep.subr.bf16.mxu0 %v30071_v56 }
 0xd33   : > { %28679 = vmatmul.mubr.msk.f32.gmra.mrb[66].mxu0 %vm421_vm1, %v36598_v13 }
 0xd34   : > { %28681 = vmatprep.mubr.msk.f32.mxu0 %vm421_vm1, %v36602_v29  ;;  %30074 = vmatpush3.bf16.msra.mxu0 %v30071_v56  ;;  %v17379_v56 = vld [vmem:[#allocation8 + $0x878] sm:$0xff] }
 0xd35   : > { %30076 = vmatprep.subr.bf16.mxu0 %v30075_v3 }
 0xd37   : > { %28682 = vmatmul.mubr.msk.f32.gmra.mrb[68].mxu0 %vm421_vm1, %v36606_v38 }
 0xd38   : > { %28684 = vmatprep.mubr.msk.f32.mxu0 %vm421_vm1, %v36610_v19  ;;  %30078 = vmatpush3.bf16.msra.mxu0 %v30075_v3  ;;  %v17767_v3 = vld [vmem:[#allocation8 + $0x888] sm:$0xff] }
 0xd39   : > { %30080 = vmatprep.subr.bf16.mxu0 %v30079_v23 }
 0xd3b   : > { %28685 = vmatmul.mubr.msk.f32.gmra.mrb[70].mxu0 %vm421_vm1, %v36614_v50 }
 0xd3c   : > { %28687 = vmatprep.mubr.msk.f32.mxu0 %vm421_vm1, %v36618_v45  ;;  %30082 = vmatpush3.bf16.msra.mxu0 %v30079_v23  ;;  %v30099_v23 = vpack.c.bf16 %v17767_v3, %v17766_v8  ;;  %v39478_v8 = vld [vmem:[#allocation31_spill] sm:$0xff]  ;;  %v39479_v3 = vld [vmem:[#allocation32_spill] sm:$0xff] }
 0xd3d   : > { %30084 = vmatprep.subr.bf16.mxu0 %v30083_v32 }
 0xd3f   : > { %28688 = vmatmul.mubr.msk.f32.gmra.mrb[72].mxu0 %vm421_vm1, %v36622_v60 }
 0xd40   : > { %28690 = vmatprep.mubr.msk.f32.mxu0 %vm421_vm1, %v36626_v14 }
 0xd43   : > { %28691 = vmatmul.mubr.msk.f32.gmra.mrb[74].mxu0 %vm421_vm1, %v36630_v43 }
 0xd44   : > { %28693 = vmatprep.mubr.msk.f32.mxu0 %vm421_vm1, %v36634_v61 }
 0xd47   : > { %28694 = vmatmul.mubr.msk.f32.gmra.mrb[76].mxu0 %vm421_vm1, %v36638_v63 }
 0xd48   : > { %28696 = vmatprep.mubr.msk.f32.mxu0 %vm421_vm1, %v36642_v39 }
 0xd4b   : > { %28697 = vmatmul.mubr.msk.f32.gmra.mrb[78].mxu0 %vm421_vm1, %v36646_v49 }
 0xd4c   : > { %28699 = vmatprep.mubr.msk.f32.mxu0 %vm421_vm1, %v36650_v36 }
 0xd4f   : > { %28700 = vmatmul.mubr.msk.f32.gmra.mrb[80].mxu0 %vm421_vm1, %v36654_v24 }
 0xd50   : > { %28702 = vmatprep.mubr.msk.f32.mxu0 %vm421_vm1, %v36658_v6 }
 0xd53   : > { %28703 = vmatmul.mubr.msk.f32.gmra.mrb[82].mxu0 %vm421_vm1, %v36662_v48 }
 0xd54   : > { %28705 = vmatprep.mubr.msk.f32.mxu0 %vm421_vm1, %v36666_v33 }
 0xd57   : > { %28706 = vmatmul.mubr.msk.f32.gmra.mrb[84].mxu0 %vm421_vm1, %v39452_v27 }
 0xd58   : > { %28708 = vmatprep.mubr.msk.f32.mxu0 %vm421_vm1, %v39453_v51 }
 0xd5b   : > { %28709 = vmatmul.mubr.msk.f32.gmra.mrb[86].mxu0 %vm421_vm1, %v39454_v5 }
 0xd5c   : > { %28711 = vmatprep.mubr.msk.f32.mxu0 %vm421_vm1, %v39455_v35 }
 0xd5f   : > { %28712 = vmatmul.mubr.msk.f32.gmra.mrb[88].mxu0 %vm421_vm1, %v39456_v0 }
 0xd60   : > { %28714 = vmatprep.mubr.msk.f32.mxu0 %vm421_vm1, %v39457_v37 }
 0xd63   : > { %28715 = vmatmul.mubr.msk.f32.gmra.mrb[90].mxu0 %vm421_vm1, %v39458_v55 }
 0xd64   : > { %28717 = vmatprep.mubr.msk.f32.mxu0 %vm421_vm1, %v39459_v7 }
 0xd67   : > { %28718 = vmatmul.mubr.msk.f32.gmra.mrb[92].mxu0 %vm421_vm1, %v39460_v62 }
 0xd68   : > { %28720 = vmatprep.mubr.msk.f32.mxu0 %vm421_vm1, %v36956_v53 }
 0xd6b   : > { %28721 = vmatmul.mubr.msk.f32.gmra.mrb[94].mxu0 %vm421_vm1, %v36960_v52 }
 0xd6c   : > { %28739 = vmatprep.mubr.msk.f32.mxu0 %vm421_vm1, %v36708_v42  ;;  %v30095_v42 = vpack.c.bf16 %v17379_v56, %v17378_v26  ;;  %v39475_v26 = vld [vmem:[#allocation28_spill] sm:$0xff]  ;;  %v39476_v56 = vld [vmem:[#allocation29_spill] sm:$0xff] }
 0xd6f   : > { %28740 = vmatmul.mubr.msk.f32.vlgmr.msra.gmra.mrb[64].mxu0 %vm421_vm1, %v39461_v20  ;;  %v39473_v20 = vld [vmem:[#allocation26_spill] sm:$0xff] }
 0xd70   : > { %30086 = vmatpush3.bf16.msra.mxu0 %v30083_v32  ;;  %28742 = vmatprep.mubr.msk.f32.mxu0 %vm421_vm1, %v36716_v58  ;;  %v39467_v32 = vld [vmem:[#allocation20_spill] sm:$0xff] }
 0xd71   : > { %30088 = vmatprep.subr.bf16.mxu0 %v30087_v59 }
 0xd73   : > { %28743 = vmatmul.mubr.msk.f32.gmra.mrb[66].mxu0 %vm421_vm1, %v36720_v28 }
 0xd74   : > { %28745 = vmatprep.mubr.msk.f32.mxu0 %vm421_vm1, %v39462_v22  ;;  %30090 = vmatpush3.bf16.msra.mxu0 %v30087_v59  ;;  %v39470_v59 = vld [vmem:[#allocation49_spill] sm:$0xff] }
 0xd75   : > { %30092 = vmatprep.subr.bf16.mxu0 %v30091_v4 }
 0xd77   : > { %28746 = vmatmul.mubr.msk.f32.gmra.mrb[68].mxu0 %vm421_vm1, %v39463_v21 }
 0xd78   : > { %28748 = vmatprep.mubr.msk.f32.mxu0 %vm421_vm1, %v39464_v31  ;;  %30094 = vmatpush3.bf16.msra.mxu0 %v30091_v4  ;;  %v39474_v4 = vld [vmem:[#allocation27_spill] sm:$0xff] }
 0xd79   : > { %30096 = vmatprep.subr.bf16.mxu0 %v30095_v42 }
 0xd7b   : > { %28749 = vmatmul.mubr.msk.f32.gmra.mrb[70].mxu0 %vm421_vm1, %v39465_v17 }
 0xd7c   : > { %28751 = vmatprep.mubr.msk.f32.mxu0 %vm421_vm1, %v39466_v15  ;;  %30098 = vmatpush3.bf16.msra.mxu0 %v30095_v42  ;;  %v39477_v42 = vld [vmem:[#allocation30_spill] sm:$0xff] }
 0xd7d   : > { %30100 = vmatprep.subr.bf16.mxu0 %v30099_v23 }
 0xd7f   : > { %28752 = vmatmul.mubr.msk.f32.gmra.mrb[72].mxu0 %vm421_vm1, %v39467_v32 }
 0xd80   : > { %28754 = vmatprep.mubr.msk.f32.mxu0 %vm421_vm1, %v39468_v44  ;;  %v17773_v44 = vld [vmem:[#allocation8 + $0x8b8] sm:$0xff] }
 0xd83   : > { %28755 = vmatmul.mubr.msk.f32.gmra.mrb[74].mxu0 %vm421_vm1, %v39469_v41  ;;  %v17772_v41 = vld [vmem:[#allocation8 + $0x8b0] sm:$0xff] }
 0xd84   : > { %28757 = vmatprep.mubr.msk.f32.mxu0 %vm421_vm1, %v39470_v59  ;;  %v17342_v59 = vld [vmem:[#allocation3 + $0x6f] sm:$0xff] }
 0xd87   : > { %28758 = vmatmul.mubr.msk.f32.gmra.mrb[76].mxu0 %vm421_vm1, %v39471_v9  ;;  %v17771_v9 = vld [vmem:[#allocation8 + $0x8a8] sm:$0xff] }
 0xd88   : > { %28760 = vmatprep.mubr.msk.f32.mxu0 %vm421_vm1, %v39472_v2  ;;  %v39480_v2 = vld [vmem:[#allocation33_spill] sm:$0xff] }
 0xd8b   : > { %28761 = vmatmul.mubr.msk.f32.gmra.mrb[78].mxu0 %vm421_vm1, %v39473_v20  ;;  %v39481_v20 = vld [vmem:[#allocation34_spill] sm:$0xff] }
 0xd8c   : > { %28763 = vmatprep.mubr.msk.f32.mxu0 %vm421_vm1, %v39474_v4  ;;  %v39482_v4 = vld [vmem:[#allocation35_spill] sm:$0xff] }
 0xd8f   : > { %28764 = vmatmul.mubr.msk.f32.gmra.mrb[80].mxu0 %vm421_vm1, %v39475_v26  ;;  %v39483_v26 = vld [vmem:[#allocation36_spill] sm:$0xff] }
 0xd90   : > { %28766 = vmatprep.mubr.msk.f32.mxu0 %vm421_vm1, %v39476_v56  ;;  %v39484_v56 = vld [vmem:[#allocation37_spill] sm:$0xff] }
 0xd93   : > { %28767 = vmatmul.mubr.msk.f32.gmra.mrb[82].mxu0 %vm421_vm1, %v39477_v42  ;;  %v39485_v42 = vld [vmem:[#allocation39_spill] sm:$0xff] }
 0xd94   : > { %28769 = vmatprep.mubr.msk.f32.mxu0 %vm421_vm1, %v39478_v8  ;;  %v39486_v8 = vld [vmem:[#allocation40_spill] sm:$0xff] }
 0xd97   : > { %28770 = vmatmul.mubr.msk.f32.gmra.mrb[84].mxu0 %vm421_vm1, %v39479_v3  ;;  %v17770_v3 = vld [vmem:[#allocation8 + $0x8a0] sm:$0xff] }
 0xd98   : > { %28772 = vmatprep.mubr.msk.f32.mxu0 %vm421_vm1, %v39480_v2  ;;  %v37024_v2 = vld [vmem:[#allocation3 + $0x209] sm:$0xff] }
 0xd99   : > { %39487 = vst [vmem:[#allocation46_spill] sm:$0xff] %v37024_v2 }
 0xd9b   : > { %28773 = vmatmul.mubr.msk.f32.gmra.mrb[86].mxu0 %vm421_vm1, %v39481_v20  ;;  %v17769_v20 = vld [vmem:[#allocation8 + $0x898] sm:$0xff] }
 0xd9c   : > { %28775 = vmatprep.mubr.msk.f32.mxu0 %vm421_vm1, %v39482_v4  ;;  %v37028_v4 = vld [vmem:[#allocation3 + $0x211] sm:$0xff] }
 0xd9d   : > { %39488 = vst [vmem:[#allocation48_spill] sm:$0xff] %v37028_v4 }
 0xd9f   : > { %28776 = vmatmul.mubr.msk.f32.gmra.mrb[88].mxu0 %vm421_vm1, %v39483_v26  ;;  %v17768_v26 = vld [vmem:[#allocation8 + $0x890] sm:$0xff] }
 0xda0   : > { %28778 = vmatprep.mubr.msk.f32.mxu0 %vm421_vm1, %v39484_v56  ;;  %v17339_v56 = vld [vmem:[#allocation3 + $0x47] sm:$0xff] }
 0xda3   : > { %28779 = vmatmul.mubr.msk.f32.gmra.mrb[90].mxu0 %vm421_vm1, %v39485_v42  ;;  %v30103_v42 = vpack.c.bf16 %v17769_v20, %v17768_v26  ;;  %v30111_v20 = vpack.c.bf16 %v17773_v44, %v17772_v41  ;;  %v17344_v26 = vld [vmem:[#allocation3 + $0x8f] sm:$0xff]  ;;  %v17349_v41 = vld [vmem:[#allocation3 + $0xe7] sm:$0xff] }
 0xda4   : > { %28781 = vmatprep.mubr.msk.f32.mxu0 %vm421_vm1, %v39486_v8  ;;  %v17340_v8 = vld [vmem:[#allocation3 + $0x4f] sm:$0xff] }
 0xda5   : > { %v17348_v44 = vld [vmem:[#allocation3 + $0xcf] sm:$0xff] }
 0xda7   : > { %28782 = vmatmul.mubr.msk.f32.gmra.mrb[92].mxu0 %vm421_vm1, %v36824_v1  ;;  %v17341_v1 = vld [vmem:[#allocation3 + $0x67] sm:$0xff] }
 0xda8   : > { %28784 = vmatprep.mubr.msk.f32.mxu0 %vm421_vm1, %v37024_v2  ;;  %v30107_v2 = vpack.c.bf16 %v17771_v9, %v17770_v3  ;;  %v17346_v9 = vld [vmem:[#allocation3 + $0xaf] sm:$0xff]  ;;  %v17353_v3 = vld [vmem:[#allocation3 + $0x127] sm:$0xff] }
 0xdab   : > { %28785 = vmatmul.mubr.msk.f32.gmra.mrb[94].mxu0 %vm421_vm1, %v37028_v4  ;;  %v17343_v4 = vld [vmem:[#allocation3 + $0x87] sm:$0xff] }
 0xdac   : > { %28803 = vmatprep.mubr.msk.f32.mxu0 %vm421_vm1, %v17339_v56  ;;  %v18160_v56 = vld [vmem:[#allocation8 + $0x8c0] sm:$0xff] }
 0xdaf   : > { %28804 = vmatmul.mubr.msk.f32.vlgmr.msra.gmra.mrb[64].mxu0 %vm421_vm1, %v17340_v8  ;;  %v18161_v8 = vld [vmem:[#allocation8 + $0x8c8] sm:$0xff] }
 0xdb0   : > { %30102 = vmatpush3.bf16.msra.mxu0 %v30099_v23  ;;  %28806 = vmatprep.mubr.msk.f32.mxu0 %vm421_vm1, %v17341_v1  ;;  %v17345_v23 = vld [vmem:[#allocation3 + $0xa7] sm:$0xff]  ;;  %v30115_v1 = vpack.c.bf16 %v18161_v8, %v18160_v56  ;;  %v17356_v56 = vld [vmem:[#allocation3 + $0x14f] sm:$0xff] }
 0xdb1   : > { %30104 = vmatprep.subr.bf16.mxu0 %v30103_v42  ;;  %v18165_v8 = vld [vmem:[#allocation8 + $0x8e8] sm:$0xff] }
 0xdb3   : > { %28807 = vmatmul.mubr.msk.f32.gmra.mrb[66].mxu0 %vm421_vm1, %v17342_v59  ;;  %v17347_v59 = vld [vmem:[#allocation3 + $0xc7] sm:$0xff] }
 0xdb4   : > { %28809 = vmatprep.mubr.msk.f32.mxu0 %vm421_vm1, %v17343_v4  ;;  %30106 = vmatpush3.bf16.msra.mxu0 %v30103_v42  ;;  %v17350_v4 = vld [vmem:[#allocation3 + $0xef] sm:$0xff] }
 0xdb5   : > { %30108 = vmatprep.subr.bf16.mxu0 %v30107_v2  ;;  %v17352_v42 = vld [vmem:[#allocation3 + $0x10f] sm:$0xff] }
 0xdb7   : > { %28810 = vmatmul.mubr.msk.f32.gmra.mrb[68].mxu0 %vm421_vm1, %v17344_v26  ;;  %v17355_v26 = vld [vmem:[#allocation3 + $0x147] sm:$0xff] }
 0xdb8   : > { %28812 = vmatprep.mubr.msk.f32.mxu0 %vm421_vm1, %v17345_v23  ;;  %30110 = vmatpush3.bf16.msra.mxu0 %v30107_v2  ;;  %v17351_v2 = vld [vmem:[#allocation3 + $0x107] sm:$0xff] }
 0xdb9   : > { %30112 = vmatprep.subr.bf16.mxu0 %v30111_v20  ;;  %v18628_v23 = vld [vmem:[%s38381_s5 + $0x20] sm:$0xff] }
 0xdbb   : > { %28813 = vmatmul.mubr.msk.f32.gmra.mrb[70].mxu0 %vm421_vm1, %v17346_v9 }
 0xdbc   : > { %28815 = vmatprep.mubr.msk.f32.mxu0 %vm421_vm1, %v17347_v59  ;;  %30114 = vmatpush3.bf16.msra.mxu0 %v30111_v20  ;;  %v17354_v20 = vld [vmem:[#allocation3 + $0x12f] sm:$0xff]  ;;  %v18166_v59 = vld [vmem:[#allocation8 + $0x8f0] sm:$0xff] }
 0xdbd   : > { %30116 = vmatprep.subr.bf16.mxu0 %v30115_v1 }
 0xdbf   : > { %28816 = vmatmul.mubr.msk.f32.gmra.mrb[72].mxu0 %vm421_vm1, %v17348_v44 }
 0xdc0   : > { %28818 = vmatprep.mubr.msk.f32.mxu0 %vm421_vm1, %v17349_v41  ;;  %v18167_v41 = vld [vmem:[#allocation8 + $0x8f8] sm:$0xff] }
 0xdc3   : > { %28819 = vmatmul.mubr.msk.f32.gmra.mrb[74].mxu0 %vm421_vm1, %v17350_v4  ;;  %v18630_v4 = vld [vmem:[%s38381_s5 + $0x30] sm:$0xff] }
 0xdc4   : > { %28821 = vmatprep.mubr.msk.f32.mxu0 %vm421_vm1, %v17351_v2 }
 0xdc7   : > { %28822 = vmatmul.mubr.msk.f32.gmra.mrb[76].mxu0 %vm421_vm1, %v17352_v42  ;;  %v39512_v42 = vld [vmem:[#allocation52_spill] sm:$0xff] }
 0xdc8   : > { %28824 = vmatprep.mubr.msk.f32.mxu0 %vm421_vm1, %v17353_v3 }
 0xdcb   : > { %28825 = vmatmul.mubr.msk.f32.gmra.mrb[78].mxu0 %vm421_vm1, %v17354_v20 }
 0xdcc   : > { %28827 = vmatprep.mubr.msk.f32.mxu0 %vm421_vm1, %v17355_v26 }
 0xdcf   : > { %28828 = vmatmul.mubr.msk.f32.gmra.mrb[80].mxu0 %vm421_vm1, %v17356_v56 }
 0xdd0   : > { %28830 = vmatprep.mubr.msk.f32.mxu0 %vm421_vm1, %v36531_v18  ;;  %v17369_v18 = vld [vmem:[#allocation3 + $0x227] sm:$0xff] }
 0xdd3   : > { %28831 = vmatmul.mubr.msk.f32.gmra.mrb[82].mxu0 %vm421_vm1, %v36533_v34  ;;  %v17370_v34 = vld [vmem:[#allocation3 + $0x22f] sm:$0xff] }
 0xdd4   : > { %28833 = vmatprep.mubr.msk.f32.mxu0 %vm421_vm1, %v36543_v25  ;;  %v18162_v25 = vld [vmem:[#allocation8 + $0x8d0] sm:$0xff] }
 0xdd7   : > { %28834 = vmatmul.mubr.msk.f32.gmra.mrb[84].mxu0 %vm421_vm1, %v36545_v46  ;;  %v18163_v46 = vld [vmem:[#allocation8 + $0x8d8] sm:$0xff] }
 0xdd8   : > { %28836 = vmatprep.mubr.msk.f32.mxu0 %vm421_vm1, %v36555_v47  ;;  %v18624_v47 = vld [vmem:[%s38381_s5] sm:$0xff] }
 0xddb   : > { %28837 = vmatmul.mubr.msk.f32.gmra.mrb[86].mxu0 %vm421_vm1, %v36557_v54  ;;  %v18625_v54 = vld [vmem:[%s38381_s5 + $0x8] sm:$0xff] }
 0xddc   : > { %28839 = vmatprep.mubr.msk.f32.mxu0 %vm421_vm1, %v36566_v11  ;;  %v18626_v11 = vld [vmem:[%s38381_s5 + $0x10] sm:$0xff] }
 0xddf   : > { %28840 = vmatmul.mubr.msk.f32.gmra.mrb[88].mxu0 %vm421_vm1, %v36568_v40  ;;  %v37087_v40 = vpack.c.bf16 %v18625_v54, %v18624_v47 }
 0xde0   : > { %28842 = vmatprep.mubr.msk.f32.mxu0 %vm421_vm1, %v36575_v12  ;;  %v18627_v12 = vld [vmem:[%s38381_s5 + $0x18] sm:$0xff] }
 0xde1   : > { %30275 = vmatprep.subr.bf16.mxu1 %v37087_v40 }
 0xde2   : > { %30279 = vmatpush3.bf16.msra.mxu1 %v37087_v40 }
 0xde3   : > { %28843 = vmatmul.mubr.msk.f32.gmra.mrb[90].mxu0 %vm421_vm1, %v36577_v10  ;;  %v30119_v10 = vpack.c.bf16 %v18163_v46, %v18162_v25  ;;  %v39514_v46 = vld [vmem:[#allocation54_spill] sm:$0xff] }
 0xde4   : > { %28845 = vmatprep.mubr.msk.f32.mxu0 %vm421_vm1, %v36888_v30  ;;  %v18164_v30 = vld [vmem:[#allocation8 + $0x8e0] sm:$0xff] }
 0xde5   : > { %v30123_v9 = vpack.c.bf16 %v18165_v8, %v18164_v30  ;;  %v23807_v30 = vld [vmem:[%s38381_s5 + $0x58] sm:$0xff] }
 0xde7   : > { %28846 = vmatmul.mubr.msk.f32.gmra.mrb[92].mxu0 %vm421_vm1, %v36892_v16  ;;  %v37092_v16 = vpack.c.bf16 %v18627_v12, %v18626_v11 }
 0xde8   : > { %28848 = vmatprep.mubr.msk.f32.mxu0 %vm421_vm1, %v17369_v18 }
 0xde9   : > { %30276 = vmatprep.subr.bf16.mxu1 %v37092_v16 }
 0xdea   : > { %30280 = vmatpush3.bf16.msra.mxu1 %v37092_v16 }
 0xdeb   : > { %28849 = vmatmul.mubr.msk.f32.gmra.mrb[94].mxu0 %vm421_vm1, %v17370_v34  ;;  %v39513_v34 = vld [vmem:[#allocation53_spill] sm:$0xff] }
 0xdec   : > { %28867 = vmatprep.mubr.msk.f32.mxu0 %vm421_vm1, %v36594_v57  ;;  %v18629_v57 = vld [vmem:[%s38381_s5 + $0x28] sm:$0xff] }
 0xded   : > { %v30139_v44 = vpack.c.bf16 %v18629_v57, %v18628_v23  ;;  %v39516_v23 = vld [vmem:[#allocation56_spill] sm:$0xff] }
 0xdef   : > { %28868 = vmatmul.mubr.msk.f32.vlgmr.msra.gmra.mrb[64].mxu0 %vm421_vm1, %v36598_v13  ;;  %v18631_v13 = vld [vmem:[%s38381_s5 + $0x38] sm:$0xff]  ;;  %30277 = vmatprep.subr.bf16.mxu1 %v30139_v44 }
 0xdf0   : > { %30118 = vmatpush3.bf16.msra.mxu0 %v30115_v1  ;;  %28870 = vmatprep.mubr.msk.f32.mxu0 %vm421_vm1, %v36602_v29  ;;  %v30127_v29 = vpack.c.bf16 %v18167_v41, %v18166_v59  ;;  %v30143_v1 = vpack.c.bf16 %v18631_v13, %v18630_v4 }
 0xdf1   : > { %30120 = vmatprep.subr.bf16.mxu0 %v30119_v10  ;;  %30281 = vmatpush3.bf16.msra.mxu1 %v30139_v44 }
 0xdf2   : > { %30278 = vmatprep.subr.bf16.mxu1 %v30143_v1 }
 0xdf3   : > { %28871 = vmatmul.mubr.msk.f32.gmra.mrb[66].mxu0 %vm421_vm1, %v36606_v38  ;;  %v17763_v38 = vld [vmem:[#allocation3 + $0x228] sm:$0xff] }
 0xdf4   : > { %28873 = vmatprep.mubr.msk.f32.mxu0 %vm421_vm1, %v36610_v19  ;;  %30122 = vmatpush3.bf16.msra.mxu0 %v30119_v10  ;;  %v17764_v19 = vld [vmem:[#allocation3 + $0x230] sm:$0xff] }
 0xdf5   : > { %30124 = vmatprep.subr.bf16.mxu0 %v30123_v9  ;;  %30282 = vmatpush3.bf16.msra.mxu1 %v30143_v1  ;;  %v23806_v10 = vld [vmem:[%s38381_s5 + $0x50] sm:$0xff] }
 0xdf6   : > { %v30151_v13 = vpack.c.bf16 %v23807_v30, %v23806_v10  ;;  %v39526_v30 = vld [vmem:[#allocation66_spill] sm:$0xff] }
 0xdf7   : > { %28874 = vmatmul.mubr.msk.f32.gmra.mrb[68].mxu0 %vm421_vm1, %v36614_v50  ;;  %v39489_v50 = vld [vmem:[#allocation21_spill] sm:$0xff] }
 0xdf8   : > { %28876 = vmatprep.mubr.msk.f32.mxu0 %vm421_vm1, %v36618_v45  ;;  %30126 = vmatpush3.bf16.msra.mxu0 %v30123_v9  ;;  %v39490_v45 = vld [vmem:[#allocation22_spill] sm:$0xff] }
 0xdf9   : > { %30128 = vmatprep.subr.bf16.mxu0 %v30127_v29 }
 0xdfb   : > { %28877 = vmatmul.mubr.msk.f32.gmra.mrb[70].mxu0 %vm421_vm1, %v36622_v60  ;;  %v39491_v60 = vld [vmem:[#allocation49_spill] sm:$0xff] }
 0xdfc   : > { %28879 = vmatprep.mubr.msk.f32.mxu0 %vm421_vm1, %v36626_v14  ;;  %30130 = vmatpush3.bf16.msra.mxu0 %v30127_v29  ;;  %v39492_v14 = vld [vmem:[#allocation50_spill] sm:$0xff] }
 0xdfd   : > { %30132 = vmatprep.subr.bf16.mxu0 %v37087_v40 }
 0xdff   : > { %28880 = vmatmul.mubr.msk.f32.gmra.mrb[72].mxu0 %vm421_vm1, %v36630_v43  ;;  %v39493_v43 = vld [vmem:[#allocation25_spill] sm:$0xff] }
 0xe00   : > { %28882 = vmatprep.mubr.msk.f32.mxu0 %vm421_vm1, %v36634_v61  ;;  %v39494_v61 = vld [vmem:[#allocation26_spill] sm:$0xff] }
 0xe03   : > { %28883 = vmatmul.mubr.msk.f32.gmra.mrb[74].mxu0 %vm421_vm1, %v36638_v63  ;;  %v39495_v63 = vld [vmem:[#allocation27_spill] sm:$0xff] }
 0xe04   : > { %28885 = vmatprep.mubr.msk.f32.mxu0 %vm421_vm1, %v36642_v39  ;;  %v39496_v39 = vld [vmem:[#allocation28_spill] sm:$0xff] }
 0xe07   : > { %28886 = vmatmul.mubr.msk.f32.gmra.mrb[76].mxu0 %vm421_vm1, %v36646_v49  ;;  %v39497_v49 = vld [vmem:[#allocation29_spill] sm:$0xff] }
 0xe08   : > { %28888 = vmatprep.mubr.msk.f32.mxu0 %vm421_vm1, %v36650_v36  ;;  %v39498_v36 = vld [vmem:[#allocation30_spill] sm:$0xff] }
 0xe0b   : > { %28889 = vmatmul.mubr.msk.f32.gmra.mrb[78].mxu0 %vm421_vm1, %v36654_v24  ;;  %v39499_v24 = vld [vmem:[#allocation31_spill] sm:$0xff] }
 0xe0c   : > { %28891 = vmatprep.mubr.msk.f32.mxu0 %vm421_vm1, %v36658_v6  ;;  %v39500_v6 = vld [vmem:[#allocation32_spill] sm:$0xff] }
 0xe0f   : > { %28892 = vmatmul.mubr.msk.f32.gmra.mrb[80].mxu0 %vm421_vm1, %v36662_v48  ;;  %v39501_v48 = vld [vmem:[#allocation33_spill] sm:$0xff] }
 0xe10   : > { %28894 = vmatprep.mubr.msk.f32.mxu0 %vm421_vm1, %v36666_v33  ;;  %v39502_v33 = vld [vmem:[#allocation34_spill] sm:$0xff] }
 0xe13   : > { %28895 = vmatmul.mubr.msk.f32.gmra.mrb[82].mxu0 %vm421_vm1, %v39452_v27  ;;  %v39505_v27 = vld [vmem:[#allocation37_spill] sm:$0xff] }
 0xe14   : > { %28897 = vmatprep.mubr.msk.f32.mxu0 %vm421_vm1, %v39453_v51  ;;  %v39506_v51 = vld [vmem:[#allocation39_spill] sm:$0xff] }
 0xe17   : > { %28898 = vmatmul.mubr.msk.f32.gmra.mrb[84].mxu0 %vm421_vm1, %v39454_v5  ;;  %v39507_v5 = vld [vmem:[#allocation40_spill] sm:$0xff] }
 0xe18   : > { %28900 = vmatprep.mubr.msk.f32.mxu0 %vm421_vm1, %v39455_v35  ;;  %v39508_v35 = vld [vmem:[#allocation44_spill] sm:$0xff] }
 0xe1b   : > { %28901 = vmatmul.mubr.msk.f32.gmra.mrb[86].mxu0 %vm421_vm1, %v39456_v0  ;;  %v39509_v0 = vld [vmem:[#allocation46_spill] sm:$0xff] }
 0xe1c   : > { %28903 = vmatprep.mubr.msk.f32.mxu0 %vm421_vm1, %v39457_v37  ;;  %v18157_v37 = vld [vmem:[#allocation3 + $0x229] sm:$0xff] }
 0xe1f   : > { %28904 = vmatmul.mubr.msk.f32.gmra.mrb[88].mxu0 %vm421_vm1, %v39458_v55  ;;  %v39510_v55 = vld [vmem:[#allocation48_spill] sm:$0xff] }
 0xe20   : > { %28906 = vmatprep.mubr.msk.f32.mxu0 %vm421_vm1, %v39459_v7  ;;  %v18158_v7 = vld [vmem:[#allocation3 + $0x231] sm:$0xff] }
 0xe23   : > { %28907 = vmatmul.mubr.msk.f32.gmra.mrb[90].mxu0 %vm421_vm1, %v39460_v62  ;;  %v23804_v62 = vld [vmem:[%s38381_s5 + $0x40] sm:$0xff] }
 0xe24   : > { %28909 = vmatprep.mubr.msk.f32.mxu0 %vm421_vm1, %v36956_v53  ;;  %v23805_v53 = vld [vmem:[%s38381_s5 + $0x48] sm:$0xff] }
 0xe27   : > { %28910 = vmatmul.mubr.msk.f32.gmra.mrb[92].mxu0 %vm421_vm1, %v36960_v52  ;;  %v30147_v52 = vpack.c.bf16 %v23805_v53, %v23804_v62  ;;  %v23845_v62 = vld [vmem:[%s38381_s5 + $0x88] sm:$0xff]  ;;  %v39521_v53 = vld [vmem:[#allocation61_spill] sm:$0xff] }
 0xe28   : > { %28912 = vmatprep.mubr.msk.f32.mxu0 %vm421_vm1, %v17763_v38  ;;  %v23809_v38 = vld [vmem:[%s38381_s5 + $0x68] sm:$0xff] }
 0xe29   : > { %30148 = vmatprep.subr.bf16.mxu1 %v30147_v52 }
 0xe2b   : > { %28913 = vmatmul.mubr.msk.f32.gmra.mrb[94].mxu0 %vm421_vm1, %v17764_v19  ;;  %v39517_v19 = vld [vmem:[#allocation57_spill] sm:$0xff] }
 0xe2c   : > { %28931 = vmatprep.mubr.msk.f32.mxu0 %vm421_vm1, %v36716_v58  ;;  %v39503_v58 = vld [vmem:[#allocation35_spill] sm:$0xff] }
 0xe2f   : > { %28932 = vmatmul.mubr.msk.f32.vlgmr.msra.gmra.mrb[64].mxu0 %vm421_vm1, %v36720_v28  ;;  %v39504_v28 = vld [vmem:[#allocation36_spill] sm:$0xff] }
 0xe30   : > { %28934 = vmatprep.mubr.msk.f32.mxu0 %vm421_vm1, %v39462_v22  ;;  %30134 = vmatpush3.bf16.msra.mxu0 %v37087_v40  ;;  %v37242_v22 = vld [vmem:[#allocation9 + $0x3] ss:$0 sm:$0xff] }
 0xe31   : > { %30136 = vmatprep.subr.bf16.mxu0 %v37092_v16 }
 0xe33   : > { %28935 = vmatmul.mubr.msk.f32.gmra.mrb[66].mxu0 %vm421_vm1, %v39463_v21 }
 0xe34   : > { %28937 = vmatprep.mubr.msk.f32.mxu0 %vm421_vm1, %v39464_v31  ;;  %30138 = vmatpush3.bf16.msra.mxu0 %v37092_v16  ;;  %v39515_v16 = vld [vmem:[#allocation55_spill] sm:$0xff] }
 0xe35   : > { %30140 = vmatprep.subr.bf16.mxu0 %v30139_v44 }
 0xe37   : > { %28938 = vmatmul.mubr.msk.f32.gmra.mrb[68].mxu0 %vm421_vm1, %v39465_v17 }
 0xe38   : > { %28940 = vmatprep.mubr.msk.f32.mxu0 %vm421_vm1, %v39466_v15  ;;  %30142 = vmatpush3.bf16.msra.mxu0 %v30139_v44 }
 0xe39   : > { %30144 = vmatprep.subr.bf16.mxu0 %v30143_v1 }
 0xe3b   : > { %28941 = vmatmul.mubr.msk.f32.gmra.mrb[70].mxu0 %vm421_vm1, %v39467_v32  ;;  %v39511_v32 = vld [vmem:[#allocation51_spill] sm:$0xff] }
 0xe3c   : > { %28943 = vmatprep.mubr.msk.f32.mxu0 %vm421_vm1, %v39489_v50  ;;  %30146 = vmatpush3.bf16.msra.mxu0 %v30143_v1  ;;  %v23808_v1 = vld [vmem:[%s38381_s5 + $0x60] sm:$0xff] }
 0xe3f   : > { %28944 = vmatmul.mubr.msk.f32.gmra.mrb[72].mxu0 %vm421_vm1, %v39490_v45  ;;  %v39518_v45 = vld [vmem:[#allocation58_spill] sm:$0xff] }
 0xe40   : > { %28946 = vmatprep.mubr.msk.f32.mxu0 %vm421_vm1, %v39491_v60 }
 0xe43   : > { %28947 = vmatmul.mubr.msk.f32.gmra.mrb[74].mxu0 %vm421_vm1, %v39492_v14 }
 0xe44   : > { %28949 = vmatprep.mubr.msk.f32.mxu0 %vm421_vm1, %v39493_v43 }
 0xe47   : > { %28950 = vmatmul.mubr.msk.f32.gmra.mrb[76].mxu0 %vm421_vm1, %v39494_v61 }
 0xe48   : > { %28952 = vmatprep.mubr.msk.f32.mxu0 %vm421_vm1, %v39495_v63 }
 0xe4b   : > { %28953 = vmatmul.mubr.msk.f32.gmra.mrb[78].mxu0 %vm421_vm1, %v39496_v39 }
 0xe4c   : > { %28955 = vmatprep.mubr.msk.f32.mxu0 %vm421_vm1, %v39497_v49  ;;  %v30155_v49 = vpack.c.bf16 %v23809_v38, %v23808_v1  ;;  %v39528_v1 = vld [vmem:[#allocation68_spill] sm:$0xff] }
 0xe4f   : > { %28956 = vmatmul.mubr.msk.f32.gmra.mrb[80].mxu0 %vm421_vm1, %v39498_v36 }
 0xe50   : > { %28958 = vmatprep.mubr.msk.f32.mxu0 %vm421_vm1, %v39499_v24  ;;  %v23810_v24 = vld [vmem:[%s38381_s5 + $0x70] sm:$0xff] }
 0xe53   : > { %28959 = vmatmul.mubr.msk.f32.gmra.mrb[82].mxu0 %vm421_vm1, %v39500_v6  ;;  %v23811_v6 = vld [vmem:[%s38381_s5 + $0x78] sm:$0xff] }
 0xe54   : > { %28961 = vmatprep.mubr.msk.f32.mxu0 %vm421_vm1, %v39501_v48  ;;  %v39519_v48 = vld [vmem:[#allocation59_spill] sm:$0xff] }
 0xe57   : > { %28962 = vmatmul.mubr.msk.f32.gmra.mrb[84].mxu0 %vm421_vm1, %v39502_v33 }
 0xe58   : > { %28964 = vmatprep.mubr.msk.f32.mxu0 %vm421_vm1, %v39503_v58  ;;  %v39520_v58 = vld [vmem:[#allocation60_spill] sm:$0xff] }
 0xe5b   : > { %28965 = vmatmul.mubr.msk.f32.gmra.mrb[86].mxu0 %vm421_vm1, %v39504_v28 }
 0xe5c   : > { %28967 = vmatprep.mubr.msk.f32.mxu0 %vm421_vm1, %v39505_v27 }
 0xe5f   : > { %28968 = vmatmul.mubr.msk.f32.gmra.mrb[88].mxu0 %vm421_vm1, %v39506_v51 }
 0xe60   : > { %28970 = vmatprep.mubr.msk.f32.mxu0 %vm421_vm1, %v39507_v5 }
 0xe63   : > { %28971 = vmatmul.mubr.msk.f32.gmra.mrb[90].mxu0 %vm421_vm1, %v39508_v35 }
 0xe64   : > { %28973 = vmatprep.mubr.msk.f32.mxu0 %vm421_vm1, %v39509_v0 }
 0xe67   : > { %28974 = vmatmul.mubr.msk.f32.gmra.mrb[92].mxu0 %vm421_vm1, %v39510_v55 }
 0xe68   : > { %28976 = vmatprep.mubr.msk.f32.mxu0 %vm421_vm1, %v18157_v37  ;;  %v30159_v37 = vpack.c.bf16 %v23811_v6, %v23810_v24 }
 0xe6b   : > { %28977 = vmatmul.mubr.msk.f32.gmra.mrb[94].mxu0 %vm421_vm1, %v18158_v7  ;;  %v23844_v7 = vld [vmem:[%s38381_s5 + $0x80] sm:$0xff] }
 0xf02   : > { %v28933_v21 = vpop.f32.mrb[64].mxu0 }
 0xf03   : > { %v30411_v31 = vadd.f32 %v28933_v21, %v37242_v22  ;;  %v18330_v17 = vpop.f32.mrb[65].mxu0  ;;  %v39522_v21 = vld [vmem:[#allocation62_spill] sm:$0xff] }
 0xf04   : > { %v30412_v15 = vadd.f32 %v37242_v22, %v18330_v17 }
 0xf05   : > { %v18522_v2 = vadd.f32 %v30411_v31, %v39511_v32 }
 0xf06   : > { %v18521_v3 = vadd.f32 %v30412_v15, %v39512_v42  ;;  %v28936_v20 = vpop.f32.mrb[66].mxu0 }
 0xf07   : > { %18554 = vst.msk [vmem:[#allocation3 + $0x30] sm:$0xff] %vm421_vm1, %v18522_v2  ;;  %v30413_v26 = vadd.f32 %v28936_v20, %v37242_v22  ;;  %v18340_v56 = vpop.f32.mrb[67].mxu0 }
 0xf08   : > { %18553 = vst.msk [vmem:[#allocation3 + $0x28] sm:$0xff] %vm421_vm1, %v18521_v3  ;;  %v30414_v18 = vadd.f32 %v37242_v22, %v18340_v56  ;;  %v37332_v3 = vpack.c.bf16 %v23845_v62, %v23844_v7 }
 0xf09   : > { %v18524_v25 = vadd.f32 %v30413_v26, %v39513_v34  ;;  %v39523_v26 = vld [vmem:[#allocation63_spill] sm:$0xff] }
 0xf0a   : > { %v18523_v47 = vadd.f32 %v30414_v18, %v39514_v46  ;;  %v28939_v54 = vpop.f32.mrb[68].mxu0  ;;  %v39524_v18 = vld [vmem:[#allocation64_spill] sm:$0xff] }
 0xf0b   : > { %18556 = vst.msk [vmem:[#allocation3 + $0x50] sm:$0xff] %vm421_vm1, %v18524_v25  ;;  %v30415_v11 = vadd.f32 %v28939_v54, %v37242_v22  ;;  %v18350_v40 = vpop.f32.mrb[69].mxu0 }
 0xf0c   : > { %18555 = vst.msk [vmem:[#allocation3 + $0x48] sm:$0xff] %vm421_vm1, %v18523_v47  ;;  %v30416_v12 = vadd.f32 %v37242_v22, %v18350_v40 }
 0xf0d   : > { %v18526_v8 = vadd.f32 %v30415_v11, %v39515_v16 }
 0xf0e   : > { %v18525_v57 = vadd.f32 %v30416_v12, %v39516_v23  ;;  %v28942_v9 = vpop.f32.mrb[70].mxu0  ;;  %v39525_v12 = vld [vmem:[#allocation65_spill] sm:$0xff] }
 0xf0f   : > { %18558 = vst.msk [vmem:[#allocation3 + $0x70] sm:$0xff] %vm421_vm1, %v18526_v8  ;;  %v30417_v59 = vadd.f32 %v28942_v9, %v37242_v22  ;;  %v18360_v44 = vpop.f32.mrb[71].mxu0  ;;  %v37268_v41 = vld [vmem:[#allocation3 + $0x27] sm:$0xff]  ;;  %v37270_v4 = vld [vmem:[#allocation3 + $0x2f] sm:$0xff] }
 0xf10   : > { %18557 = vst.msk [vmem:[#allocation3 + $0x68] sm:$0xff] %vm421_vm1, %v18525_v57  ;;  %v30418_v29 = vadd.f32 %v37242_v22, %v18360_v44  ;;  %28998 = vmatprep.mubr.msk.f32.mxu1 %vm421_vm1, %v37268_v41 }
 0xf11   : > { %v18528_v50 = vadd.f32 %v30417_v59, %v39517_v19  ;;  %28999 = vmatmul.mubr.msk.f32.vlgmr.msra.gmra.mrb[64].mxu1 %vm421_vm1, %v37270_v4 }
 0xf12   : > { %v18527_v60 = vadd.f32 %v30418_v29, %v39518_v45  ;;  %30150 = vmatpush3.bf16.msra.mxu1 %v30147_v52  ;;  %v28945_v14 = vpop.f32.mrb[72].mxu0 }
 0xf13   : > { %18560 = vst.msk [vmem:[#allocation3 + $0x90] sm:$0xff] %vm421_vm1, %v18528_v50  ;;  %v30419_v43 = vadd.f32 %v28945_v14, %v37242_v22  ;;  %v18370_v61 = vpop.f32.mrb[73].mxu0  ;;  %v37288_v63 = vld [vmem:[#allocation3 + $0x47] sm:$0xff]  ;;  %v37290_v39 = vld [vmem:[#allocation3 + $0x4f] sm:$0xff]  ;;  %30152 = vmatprep.subr.bf16.mxu1 %v30151_v13 }
 0xf14   : > { %18559 = vst.msk [vmem:[#allocation3 + $0x88] sm:$0xff] %vm421_vm1, %v18527_v60  ;;  %v30420_v36 = vadd.f32 %v37242_v22, %v18370_v61  ;;  %29001 = vmatprep.mubr.msk.f32.mxu1 %vm421_vm1, %v37288_v63  ;;  %v39529_v61 = vld [vmem:[#allocation69_spill] sm:$0xff] }
 0xf15   : > { %v18530_v33 = vadd.f32 %v30419_v43, %v39519_v48  ;;  %29002 = vmatmul.mubr.msk.f32.gmra.mrb[66].mxu1 %vm421_vm1, %v37290_v39 }
 0xf16   : > { %v18529_v28 = vadd.f32 %v30420_v36, %v39520_v58  ;;  %v28948_v27 = vpop.f32.mrb[74].mxu0  ;;  %30154 = vmatpush3.bf16.msra.mxu1 %v30151_v13  ;;  %v39527_v13 = vld [vmem:[#allocation67_spill] sm:$0xff]  ;;  %v39530_v36 = vld [vmem:[#allocation70_spill] sm:$0xff] }
 0xf17   : > { %18562 = vst.msk [vmem:[#allocation3 + $0xb0] sm:$0xff] %vm421_vm1, %v18530_v33  ;;  %v30421_v51 = vadd.f32 %v28948_v27, %v37242_v22  ;;  %v18380_v5 = vpop.f32.mrb[75].mxu0  ;;  %v37308_v35 = vld [vmem:[#allocation3 + $0x67] sm:$0xff]  ;;  %v37310_v0 = vld [vmem:[#allocation3 + $0x6f] sm:$0xff]  ;;  %30156 = vmatprep.subr.bf16.mxu1 %v30155_v49 }
 0xf18   : > { %18561 = vst.msk [vmem:[#allocation3 + $0xa8] sm:$0xff] %vm421_vm1, %v18529_v28  ;;  %v30422_v55 = vadd.f32 %v37242_v22, %v18380_v5  ;;  %29004 = vmatprep.mubr.msk.f32.mxu1 %vm421_vm1, %v37308_v35 }
 0xf19   : > { %v18532_v52 = vadd.f32 %v30421_v51, %v39521_v53  ;;  %29005 = vmatmul.mubr.msk.f32.gmra.mrb[68].mxu1 %vm421_vm1, %v37310_v0  ;;  %v39531_v51 = vld [vmem:[#allocation71_spill] sm:$0xff] }
 0xf1a   : > { %v18531_v31 = vadd.f32 %v30422_v55, %v39522_v21  ;;  %v28951_v17 = vpop.f32.mrb[76].mxu0  ;;  %30158 = vmatpush3.bf16.msra.mxu1 %v30155_v49 }
 0xf1b   : > { %18564 = vst.msk [vmem:[#allocation3 + $0xd0] sm:$0xff] %vm421_vm1, %v18532_v52  ;;  %v30423_v15 = vadd.f32 %v28951_v17, %v37242_v22  ;;  %v18390_v32 = vpop.f32.mrb[77].mxu0  ;;  %v37328_v2 = vld [vmem:[#allocation3 + $0x87] sm:$0xff]  ;;  %v37330_v42 = vld [vmem:[#allocation3 + $0x8f] sm:$0xff]  ;;  %30160 = vmatprep.subr.bf16.mxu1 %v30159_v37 }
 0xf1c   : > { %18563 = vst.msk [vmem:[#allocation3 + $0xc8] sm:$0xff] %vm421_vm1, %v18531_v31  ;;  %v30424_v20 = vadd.f32 %v37242_v22, %v18390_v32  ;;  %29007 = vmatprep.mubr.msk.f32.mxu1 %vm421_vm1, %v37328_v2  ;;  %v39533_v17 = vld [vmem:[#allocation73_spill] sm:$0xff]  ;;  %v39534_v32 = vld [vmem:[#allocation74_spill] sm:$0xff] }
 0xf1d   : > { %v18534_v56 = vadd.f32 %v30423_v15, %v39523_v26  ;;  %29008 = vmatmul.mubr.msk.f32.gmra.mrb[70].mxu1 %vm421_vm1, %v37330_v42 }
 0xf1e   : > { %v18533_v34 = vadd.f32 %v30424_v20, %v39524_v18  ;;  %v28954_v25 = vpop.f32.mrb[78].mxu0  ;;  %30162 = vmatpush3.bf16.msra.mxu1 %v30159_v37  ;;  %v39532_v37 = vld [vmem:[#allocation72_spill] sm:$0xff] }
 0xf1f   : > { %18566 = vst.msk [vmem:[#allocation3 + $0xf0] sm:$0xff] %vm421_vm1, %v18534_v56  ;;  %v30425_v46 = vadd.f32 %v28954_v25, %v37242_v22  ;;  %v18400_v47 = vpop.f32.mrb[79].mxu0  ;;  %v37344_v54 = vld [vmem:[#allocation3 + $0xa7] sm:$0xff]  ;;  %v37346_v11 = vld [vmem:[#allocation3 + $0xaf] sm:$0xff]  ;;  %30164 = vmatprep.subr.bf16.mxu1 %v37332_v3 }
 0xf20   : > { %18565 = vst.msk [vmem:[#allocation3 + $0xe8] sm:$0xff] %vm421_vm1, %v18533_v34  ;;  %v30426_v40 = vadd.f32 %v37242_v22, %v18400_v47  ;;  %29010 = vmatprep.mubr.msk.f32.mxu1 %vm421_vm1, %v37344_v54  ;;  %v39535_v47 = vld [vmem:[#allocation75_spill] sm:$0xff] }
 0xf21   : > { %v18536_v10 = vadd.f32 %v30425_v46, %v39525_v12  ;;  %29011 = vmatmul.mubr.msk.f32.gmra.mrb[72].mxu1 %vm421_vm1, %v37346_v11  ;;  %v39536_v12 = vld [vmem:[#allocation76_spill] sm:$0xff] }
 0xf22   : > { %v18535_v16 = vadd.f32 %v30426_v40, %v39526_v30  ;;  %v28957_v8 = vpop.f32.mrb[80].mxu0 }
 0xf23   : > { %18568 = vst.msk [vmem:[#allocation3 + $0x110] sm:$0xff] %vm421_vm1, %v18536_v10  ;;  %v30427_v23 = vadd.f32 %v28957_v8, %v37242_v22  ;;  %v18410_v57 = vpop.f32.mrb[81].mxu0  ;;  %v37359_v9 = vld [vmem:[#allocation3 + $0xc7] sm:$0xff]  ;;  %v37361_v59 = vld [vmem:[#allocation3 + $0xcf] sm:$0xff] }
 0xf24   : > { %18567 = vst.msk [vmem:[#allocation3 + $0x108] sm:$0xff] %vm421_vm1, %v18535_v16  ;;  %v30428_v44 = vadd.f32 %v37242_v22, %v18410_v57  ;;  %29013 = vmatprep.mubr.msk.f32.mxu1 %vm421_vm1, %v37359_v9 }
 0xf25   : > { %v18538_v29 = vadd.f32 %v30427_v23, %v39527_v13  ;;  %29014 = vmatmul.mubr.msk.f32.gmra.mrb[74].mxu1 %vm421_vm1, %v37361_v59  ;;  %v39537_v13 = vld [vmem:[#allocation77_spill] sm:$0xff] }
 0xf26   : > { %v18537_v38 = vadd.f32 %v30428_v44, %v39528_v1  ;;  %v28960_v19 = vpop.f32.mrb[82].mxu0  ;;  %v39538_v1 = vld [vmem:[#allocation78_spill] sm:$0xff] }
 0xf27   : > { %18570 = vst.msk [vmem:[#allocation3 + $0x130] sm:$0xff] %vm421_vm1, %v18538_v29  ;;  %v30429_v50 = vadd.f32 %v28960_v19, %v37242_v22  ;;  %v18420_v45 = vpop.f32.mrb[83].mxu0  ;;  %v37373_v60 = vld [vmem:[#allocation3 + $0xe7] sm:$0xff]  ;;  %v37375_v14 = vld [vmem:[#allocation3 + $0xef] sm:$0xff] }
 0xf28   : > { %18569 = vst.msk [vmem:[#allocation3 + $0x128] sm:$0xff] %vm421_vm1, %v18537_v38  ;;  %v30430_v43 = vadd.f32 %v37242_v22, %v18420_v45  ;;  %29016 = vmatprep.mubr.msk.f32.mxu1 %vm421_vm1, %v37373_v60 }
 0xf29   : > { %v18540_v49 = vadd.f32 %v30429_v50, %v39529_v61  ;;  %29017 = vmatmul.mubr.msk.f32.gmra.mrb[76].mxu1 %vm421_vm1, %v37375_v14 }
 0xf2a   : > { %v18539_v24 = vadd.f32 %v30430_v43, %v39530_v36  ;;  %v28963_v6 = vpop.f32.mrb[84].mxu0  ;;  %v39539_v36 = vld [vmem:[#allocation79_spill] sm:$0xff] }
 0xf2b   : > { %18572 = vst.msk [vmem:[#allocation3 + $0x150] sm:$0xff] %vm421_vm1, %v18540_v49  ;;  %v30431_v48 = vadd.f32 %v28963_v6, %v37242_v22  ;;  %v18430_v33 = vpop.f32.mrb[85].mxu0  ;;  %v37387_v58 = vld [vmem:[#allocation3 + $0x107] sm:$0xff]  ;;  %v37389_v28 = vld [vmem:[#allocation3 + $0x10f] sm:$0xff]  ;;  %v39540_v6 = vld [vmem:[#allocation80_spill] sm:$0xff] }
 0xf2c   : > { %18571 = vst.msk [vmem:[#allocation3 + $0x148] sm:$0xff] %vm421_vm1, %v18539_v24  ;;  %v30432_v27 = vadd.f32 %v37242_v22, %v18430_v33  ;;  %29019 = vmatprep.mubr.msk.f32.mxu1 %vm421_vm1, %v37387_v58 }
 0xf2d   : > { %v18542_v5 = vadd.f32 %v30431_v48, %v39531_v51  ;;  %29020 = vmatmul.mubr.msk.f32.gmra.mrb[78].mxu1 %vm421_vm1, %v37389_v28 }
 0xf2e   : > { %v18541_v55 = vadd.f32 %v30432_v27, %v39532_v37  ;;  %v28966_v7 = vpop.f32.mrb[86].mxu0 }
 0xf2f   : > { %18574 = vst.msk [vmem:[#allocation3 + $0x170] sm:$0xff] %vm421_vm1, %v18542_v5  ;;  %v30433_v62 = vadd.f32 %v28966_v7, %v37242_v22  ;;  %v18440_v53 = vpop.f32.mrb[87].mxu0  ;;  %v37401_v52 = vld [vmem:[#allocation3 + $0x127] sm:$0xff]  ;;  %v37403_v21 = vld [vmem:[#allocation3 + $0x12f] sm:$0xff] }
 0xf30   : > { %18573 = vst.msk [vmem:[#allocation3 + $0x168] sm:$0xff] %vm421_vm1, %v18541_v55  ;;  %v30434_v31 = vadd.f32 %v37242_v22, %v18440_v53  ;;  %29022 = vmatprep.mubr.msk.f32.mxu1 %vm421_vm1, %v37401_v52  ;;  %v39541_v7 = vld [vmem:[#allocation81_spill] sm:$0xff]  ;;  %v39542_v53 = vld [vmem:[#allocation82_spill] sm:$0xff] }
 0xf31   : > { %v18544_v15 = vadd.f32 %v30433_v62, %v39533_v17  ;;  %29023 = vmatmul.mubr.msk.f32.gmra.mrb[80].mxu1 %vm421_vm1, %v37403_v21 }
 0xf32   : > { %v18543_v20 = vadd.f32 %v30434_v31, %v39534_v32  ;;  %v28969_v26 = vpop.f32.mrb[88].mxu0 }
 0xf33   : > { %18576 = vst.msk [vmem:[#allocation3 + $0x190] sm:$0xff] %vm421_vm1, %v18544_v15  ;;  %v30435_v56 = vadd.f32 %v28969_v26, %v37242_v22  ;;  %v18450_v18 = vpop.f32.mrb[89].mxu0  ;;  %v37415_v34 = vld [vmem:[#allocation3 + $0x147] sm:$0xff]  ;;  %v37417_v25 = vld [vmem:[#allocation3 + $0x14f] sm:$0xff] }
 0xf34   : > { %18575 = vst.msk [vmem:[#allocation3 + $0x188] sm:$0xff] %vm421_vm1, %v18543_v20  ;;  %v30436_v46 = vadd.f32 %v37242_v22, %v18450_v18  ;;  %29025 = vmatprep.mubr.msk.f32.mxu1 %vm421_vm1, %v37415_v34  ;;  %v18985_v20 = vld [vmem:[#allocation3 + $0x8] sm:$0xff]  ;;  %v23846_v26 = vld [vmem:[%s38381_s5 + $0x90] sm:$0xff] }
 0xf35   : > { %v18546_v40 = vadd.f32 %v30435_v56, %v39535_v47  ;;  %29026 = vmatmul.mubr.msk.f32.gmra.mrb[82].mxu1 %vm421_vm1, %v37417_v25  ;;  %v23847_v56 = vld [vmem:[%s38381_s5 + $0x98] sm:$0xff]  ;;  %v18986_v18 = vld [vmem:[#allocation3 + $0x10] sm:$0xff]  ;;  %v23848_v47 = vld [vmem:[%s38381_s5 + $0xa0] sm:$0xff] }
 0xf36   : > { %v18545_v10 = vadd.f32 %v30436_v46, %v39536_v12  ;;  %v28972_v30 = vpop.f32.mrb[90].mxu0  ;;  %v30167_v46 = vpack.c.bf16 %v23847_v56, %v23846_v26  ;;  %v37501_v12 = vld [vmem:[#allocation3 + $0x28] sm:$0xff]  ;;  %v37598_v26 = vld [vmem:[#allocation3 + $0x170] sm:$0xff] }
 0xf37   : > { %18578 = vst.msk [vmem:[#allocation3 + $0x1b0] sm:$0xff] %vm421_vm1, %v18546_v40  ;;  %v30437_v16 = vadd.f32 %v28972_v30, %v37242_v22  ;;  %v18460_v8 = vpop.f32.mrb[91].mxu0  ;;  %v37429_v23 = vld [vmem:[#allocation3 + $0x167] sm:$0xff]  ;;  %v37431_v57 = vld [vmem:[#allocation3 + $0x16f] sm:$0xff] }
 0xf38   : > { %18577 = vst.msk [vmem:[#allocation3 + $0x1a8] sm:$0xff] %vm421_vm1, %v18545_v10  ;;  %v30438_v44 = vadd.f32 %v37242_v22, %v18460_v8  ;;  %29028 = vmatprep.mubr.msk.f32.mxu1 %vm421_vm1, %v37429_v23  ;;  %v23849_v40 = vld [vmem:[%s38381_s5 + $0xa8] sm:$0xff]  ;;  %v37506_v30 = vld [vmem:[#allocation3 + $0x30] sm:$0xff]  ;;  %v23851_v8 = vld [vmem:[%s38381_s5 + $0xb8] sm:$0xff] }
 0xf39   : > { %v18548_v29 = vadd.f32 %v30437_v16, %v39537_v13  ;;  %29029 = vmatmul.mubr.msk.f32.gmra.mrb[84].mxu1 %vm421_vm1, %v37431_v57  ;;  %v30171_v10 = vpack.c.bf16 %v23849_v40, %v23848_v47  ;;  %v23850_v16 = vld [vmem:[%s38381_s5 + $0xb0] sm:$0xff] }
 0xf3a   : > { %v18547_v38 = vadd.f32 %v30438_v44, %v39538_v1  ;;  %v28975_v19 = vpop.f32.mrb[92].mxu0  ;;  %v37516_v44 = vld [vmem:[#allocation3 + $0x48] sm:$0xff]  ;;  %v37520_v13 = vld [vmem:[#allocation3 + $0x50] sm:$0xff] }
 0xf3b   : > { %18580 = vst.msk [vmem:[#allocation3 + $0x1d0] sm:$0xff] %vm421_vm1, %v18548_v29  ;;  %v30439_v50 = vadd.f32 %v28975_v19, %v37242_v22  ;;  %v18470_v45 = vpop.f32.mrb[93].mxu0  ;;  %v37443_v43 = vld [vmem:[#allocation3 + $0x187] sm:$0xff]  ;;  %v37445_v61 = vld [vmem:[#allocation3 + $0x18f] sm:$0xff] }
 0xf3c   : > { %18579 = vst.msk [vmem:[#allocation3 + $0x1c8] sm:$0xff] %vm421_vm1, %v18547_v38  ;;  %v30440_v49 = vadd.f32 %v37242_v22, %v18470_v45  ;;  %29031 = vmatprep.mubr.msk.f32.mxu1 %vm421_vm1, %v37443_v43  ;;  %v23884_v29 = vld [vmem:[%s38381_s5 + $0xc0] sm:$0xff]  ;;  %v23885_v1 = vld [vmem:[%s38381_s5 + $0xc8] sm:$0xff] }
 0xf3d   : > { %v18550_v24 = vadd.f32 %v30439_v50, %v39539_v36  ;;  %29032 = vmatmul.mubr.msk.f32.gmra.mrb[86].mxu1 %vm421_vm1, %v37445_v61  ;;  %v37530_v38 = vld [vmem:[#allocation3 + $0x68] sm:$0xff]  ;;  %v30179_v19 = vpack.c.bf16 %v23885_v1, %v23884_v29  ;;  %v37534_v50 = vld [vmem:[#allocation3 + $0x70] sm:$0xff]  ;;  %v23887_v1 = vld [vmem:[%s38381_s5 + $0xd8] sm:$0xff] }
 0xf3e   : > { %v18549_v48 = vadd.f32 %v30440_v49, %v39540_v6  ;;  %v28978_v33 = vpop.f32.mrb[94].mxu0  ;;  %v37538_v45 = vld [vmem:[#allocation3 + $0x88] sm:$0xff]  ;;  %v37542_v49 = vld [vmem:[#allocation3 + $0x90] sm:$0xff] }
 0xf3f   : > { %18582 = vst.msk [vmem:[#allocation3 + $0x1f0] sm:$0xff] %vm421_vm1, %v18550_v24  ;;  %v30441_v27 = vadd.f32 %v28978_v33, %v37242_v22  ;;  %v18480_v51 = vpop.f32.mrb[95].mxu0  ;;  %v37457_v5 = vld [vmem:[#allocation3 + $0x1a7] sm:$0xff]  ;;  %v37459_v37 = vld [vmem:[#allocation3 + $0x1af] sm:$0xff] }
 0xf40   : > { %18581 = vst.msk [vmem:[#allocation3 + $0x1e8] sm:$0xff] %vm421_vm1, %v18549_v48  ;;  %v30442_v55 = vadd.f32 %v37242_v22, %v18480_v51  ;;  %29034 = vmatprep.mubr.msk.f32.mxu1 %vm421_vm1, %v37457_v5  ;;  %v37546_v36 = vld [vmem:[#allocation3 + $0xa8] sm:$0xff]  ;;  %v37550_v24 = vld [vmem:[#allocation3 + $0xb0] sm:$0xff] }
 0xf41   : > { %v18552_v62 = vadd.f32 %v30441_v27, %v39541_v7  ;;  %29035 = vmatmul.mubr.msk.f32.gmra.mrb[88].mxu1 %vm421_vm1, %v37459_v37  ;;  %v37554_v6 = vld [vmem:[#allocation3 + $0xc8] sm:$0xff]  ;;  %v37558_v48 = vld [vmem:[#allocation3 + $0xd0] sm:$0xff] }
 0xf42   : > { %v18551_v31 = vadd.f32 %v30442_v55, %v39542_v53  ;;  %v37562_v33 = vld [vmem:[#allocation3 + $0xe8] sm:$0xff]  ;;  %v37566_v27 = vld [vmem:[#allocation3 + $0xf0] sm:$0xff] }
 0xf43   : > { %18584 = vst.msk [vmem:[#allocation3 + $0x210] sm:$0xff] %vm421_vm1, %v18552_v62  ;;  %v37470_v17 = vld [vmem:[#allocation3 + $0x1c7] sm:$0xff]  ;;  %v37472_v15 = vld [vmem:[#allocation3 + $0x1cf] sm:$0xff] }
 0xf44   : > { %18583 = vst.msk [vmem:[#allocation3 + $0x208] sm:$0xff] %vm421_vm1, %v18551_v31  ;;  %29037 = vmatprep.mubr.msk.f32.mxu1 %vm421_vm1, %v37470_v17  ;;  %v37570_v51 = vld [vmem:[#allocation3 + $0x108] sm:$0xff]  ;;  %v37574_v55 = vld [vmem:[#allocation3 + $0x110] sm:$0xff] }
 0xf45   : > { %29038 = vmatmul.mubr.msk.f32.gmra.mrb[90].mxu1 %vm421_vm1, %v37472_v15  ;;  %v37578_v7 = vld [vmem:[#allocation3 + $0x128] sm:$0xff]  ;;  %v37582_v62 = vld [vmem:[#allocation3 + $0x130] sm:$0xff] }
 0xf46   : > { %v37586_v53 = vld [vmem:[#allocation3 + $0x148] sm:$0xff]  ;;  %v37590_v31 = vld [vmem:[#allocation3 + $0x150] sm:$0xff] }
 0xf47   : > { %v37479_v22 = vld [vmem:[#allocation3 + $0x1e7] sm:$0xff]  ;;  %v37481_v32 = vld [vmem:[#allocation3 + $0x1ef] sm:$0xff] }
 0xf48   : > { %29040 = vmatprep.mubr.msk.f32.mxu1 %vm421_vm1, %v37479_v22  ;;  %v37602_v56 = vld [vmem:[#allocation3 + $0x188] sm:$0xff]  ;;  %v37614_v47 = vld [vmem:[#allocation3 + $0x1b0] sm:$0xff] }
 0xf49   : > { %29041 = vmatmul.mubr.msk.f32.gmra.mrb[92].mxu1 %vm421_vm1, %v37481_v32  ;;  %39544 = vst [vmem:[#allocation24_spill] sm:$0xff] %v37614_v47  ;;  %v37618_v40 = vld [vmem:[#allocation3 + $0x1c8] sm:$0xff]  ;;  %v23886_v29 = vld [vmem:[%s38381_s5 + $0xd0] sm:$0xff] }
 0xf4a   : > { %29059 = vmatprep.mubr.msk.f32.mxu1 %vm421_vm1, %v18985_v20  ;;  %v37594_v20 = vld [vmem:[#allocation3 + $0x168] sm:$0xff]  ;;  %39545 = vst [vmem:[#allocation38_spill] sm:$0xff] %v37618_v40 }
 0xf4d   : > { %29060 = vmatmul.mubr.msk.f32.vlgmr.msra.gmra.mrb[94].mxu1 %vm421_vm1, %v18986_v18  ;;  %v37606_v18 = vld [vmem:[#allocation3 + $0x190] sm:$0xff] }
 0xf4e   : > { %30166 = vmatpush3.bf16.msra.mxu1 %v37332_v3  ;;  %29062 = vmatprep.mubr.msk.f32.mxu1 %vm421_vm1, %v37501_v12  ;;  %v30175_v3 = vpack.c.bf16 %v23851_v8, %v23850_v16  ;;  %v37626_v16 = vld [vmem:[#allocation3 + $0x1e8] sm:$0xff] }
 0xf4f   : > { %30168 = vmatprep.subr.bf16.mxu1 %v30167_v46  ;;  %39547 = vst [vmem:[#allocation42_spill] sm:$0xff] %v37626_v16  ;;  %v19379_v8 = vld [vmem:[#allocation3 + $0x9] sm:$0xff] }
 0xf51   : > { %29063 = vmatmul.mubr.msk.f32.gmra.mrb[64].mxu1 %vm421_vm1, %v37506_v30 }
 0xf52   : > { %29065 = vmatprep.mubr.msk.f32.mxu1 %vm421_vm1, %v37516_v44  ;;  %30170 = vmatpush3.bf16.msra.mxu1 %v30167_v46  ;;  %v37610_v46 = vld [vmem:[#allocation3 + $0x1a8] sm:$0xff] }
 0xf53   : > { %30172 = vmatprep.subr.bf16.mxu1 %v30171_v10  ;;  %39543 = vst [vmem:[#allocation23_spill] sm:$0xff] %v37610_v46 }
 0xf55   : > { %29066 = vmatmul.mubr.msk.f32.gmra.mrb[66].mxu1 %vm421_vm1, %v37520_v13 }
 0xf56   : > { %29068 = vmatprep.mubr.msk.f32.mxu1 %vm421_vm1, %v37530_v38  ;;  %30174 = vmatpush3.bf16.msra.mxu1 %v30171_v10  ;;  %v37622_v10 = vld [vmem:[#allocation3 + $0x1d0] sm:$0xff] }
 0xf57   : > { %30176 = vmatprep.subr.bf16.mxu1 %v30175_v3  ;;  %39546 = vst [vmem:[#allocation41_spill] sm:$0xff] %v37622_v10 }
 0xf59   : > { %29069 = vmatmul.mubr.msk.f32.gmra.mrb[68].mxu1 %vm421_vm1, %v37534_v50 }
 0xf5a   : > { %29071 = vmatprep.mubr.msk.f32.mxu1 %vm421_vm1, %v37538_v45  ;;  %30178 = vmatpush3.bf16.msra.mxu1 %v30175_v3  ;;  %v37630_v3 = vld [vmem:[#allocation3 + $0x1f0] sm:$0xff] }
 0xf5b   : > { %30180 = vmatprep.subr.bf16.mxu1 %v30179_v19  ;;  %39548 = vst [vmem:[#allocation43_spill] sm:$0xff] %v37630_v3 }
 0xf5d   : > { %29072 = vmatmul.mubr.msk.f32.gmra.mrb[70].mxu1 %vm421_vm1, %v37542_v49 }
 0xf5e   : > { %29074 = vmatprep.mubr.msk.f32.mxu1 %vm421_vm1, %v37546_v36 }
 0xf61   : > { %29075 = vmatmul.mubr.msk.f32.gmra.mrb[72].mxu1 %vm421_vm1, %v37550_v24 }
 0xf62   : > { %29077 = vmatprep.mubr.msk.f32.mxu1 %vm421_vm1, %v37554_v6 }
 0xf65   : > { %29078 = vmatmul.mubr.msk.f32.gmra.mrb[74].mxu1 %vm421_vm1, %v37558_v48 }
 0xf66   : > { %29080 = vmatprep.mubr.msk.f32.mxu1 %vm421_vm1, %v37562_v33 }
 0xf69   : > { %29081 = vmatmul.mubr.msk.f32.gmra.mrb[76].mxu1 %vm421_vm1, %v37566_v27 }
 0xf6a   : > { %29083 = vmatprep.mubr.msk.f32.mxu1 %vm421_vm1, %v37570_v51 }
 0xf6d   : > { %29084 = vmatmul.mubr.msk.f32.gmra.mrb[78].mxu1 %vm421_vm1, %v37574_v55 }
 0xf6e   : > { %29086 = vmatprep.mubr.msk.f32.mxu1 %vm421_vm1, %v37578_v7 }
 0xf71   : > { %29087 = vmatmul.mubr.msk.f32.gmra.mrb[80].mxu1 %vm421_vm1, %v37582_v62 }
 0xf72   : > { %29089 = vmatprep.mubr.msk.f32.mxu1 %vm421_vm1, %v37586_v53 }
 0xf75   : > { %29090 = vmatmul.mubr.msk.f32.gmra.mrb[82].mxu1 %vm421_vm1, %v37590_v31 }
 0xf76   : > { %29092 = vmatprep.mubr.msk.f32.mxu1 %vm421_vm1, %v37594_v20 }
 0xf79   : > { %29093 = vmatmul.mubr.msk.f32.gmra.mrb[84].mxu1 %vm421_vm1, %v37598_v26 }
 0xf7a   : > { %29095 = vmatprep.mubr.msk.f32.mxu1 %vm421_vm1, %v37602_v56 }
 0xf7d   : > { %29096 = vmatmul.mubr.msk.f32.gmra.mrb[86].mxu1 %vm421_vm1, %v37606_v18 }
 0xf7e   : > { %29098 = vmatprep.mubr.msk.f32.mxu1 %vm421_vm1, %v37610_v46  ;;  %v37648_v46 = vld [vmem:[#allocation3 + $0x29] sm:$0xff] }
 0xf7f   : > { %39549 = vst [vmem:[#allocation45_spill] sm:$0xff] %v37648_v46 }
 0xf81   : > { %29099 = vmatmul.mubr.msk.f32.gmra.mrb[88].mxu1 %vm421_vm1, %v37614_v47  ;;  %v23889_v47 = vld [vmem:[%s38381_s5 + $0xe8] sm:$0xff] }
 0xf82   : > { %29101 = vmatprep.mubr.msk.f32.mxu1 %vm421_vm1, %v37618_v40  ;;  %v30183_v40 = vpack.c.bf16 %v23887_v1, %v23886_v29  ;;  %v23890_v29 = vld [vmem:[%s38381_s5 + $0xf0] sm:$0xff]  ;;  %v23891_v1 = vld [vmem:[%s38381_s5 + $0xf8] sm:$0xff] }
 0xf85   : > { %29102 = vmatmul.mubr.msk.f32.gmra.mrb[90].mxu1 %vm421_vm1, %v37622_v10  ;;  %v19380_v10 = vld [vmem:[#allocation3 + $0x11] sm:$0xff] }
 0xf86   : > { %29104 = vmatprep.mubr.msk.f32.mxu1 %vm421_vm1, %v37626_v16  ;;  %v23888_v16 = vld [vmem:[%s38381_s5 + $0xe0] sm:$0xff] }
 0xf89   : > { %29105 = vmatmul.mubr.msk.f32.gmra.mrb[92].mxu1 %vm421_vm1, %v37630_v3  ;;  %v37652_v3 = vld [vmem:[#allocation3 + $0x31] sm:$0xff] }
 0xf8a   : > { %29123 = vmatprep.mubr.msk.f32.mxu1 %vm421_vm1, %v19379_v8  ;;  %v30187_v8 = vpack.c.bf16 %v23889_v47, %v23888_v16  ;;  %39550 = vst [vmem:[#allocation47_spill] sm:$0xff] %v37652_v3  ;;  %v37666_v47 = vld [vmem:[#allocation3 + $0x51] sm:$0xff]  ;;  %v23924_v16 = vld [vmem:[%s38381_s5 + $0x100] sm:$0xff] }
 0xf8b   : > { %39551 = vst [vmem:[#allocation15_spill] sm:$0xff] %v37666_v47 }
 0xf8d   : > { %29124 = vmatmul.mubr.msk.f32.vlgmr.msra.gmra.mrb[94].mxu1 %vm421_vm1, %v19380_v10  ;;  %v37662_v10 = vld [vmem:[#allocation3 + $0x49] sm:$0xff] }
 0xf8e   : > { %30182 = vmatpush3.bf16.msra.mxu1 %v30179_v19  ;;  %29126 = vmatprep.mubr.msk.f32.mxu1 %vm421_vm1, %v37648_v46  ;;  %v30191_v19 = vpack.c.bf16 %v23891_v1, %v23890_v29  ;;  %v23925_v46 = vld [vmem:[%s38381_s5 + $0x108] sm:$0xff]  ;;  %v37680_v29 = vld [vmem:[#allocation3 + $0x71] sm:$0xff] }
 0xf8f   : > { %30184 = vmatprep.subr.bf16.mxu1 %v30183_v40  ;;  %v37684_v1 = vld [vmem:[#allocation3 + $0x89] sm:$0xff] }
 0xf90   : > { %39552 = vst [vmem:[#allocation16_spill] sm:$0xff] %v37684_v1 }
 0xf91   : > { %29127 = vmatmul.mubr.msk.f32.gmra.mrb[64].mxu1 %vm421_vm1, %v37652_v3  ;;  %v37676_v3 = vld [vmem:[#allocation3 + $0x69] sm:$0xff] }
 0xf92   : > { %29129 = vmatprep.mubr.msk.f32.mxu1 %vm421_vm1, %v37662_v10  ;;  %30186 = vmatpush3.bf16.msra.mxu1 %v30183_v40  ;;  %v30195_v40 = vpack.c.bf16 %v23925_v46, %v23924_v16  ;;  %v37696_v46 = vld [vmem:[#allocation3 + $0xb1] sm:$0xff]  ;;  %v37700_v16 = vld [vmem:[#allocation3 + $0xc9] sm:$0xff] }
 0xf93   : > { %30188 = vmatprep.subr.bf16.mxu1 %v30187_v8  ;;  %39555 = vst [vmem:[#allocation19_spill] sm:$0xff] %v37696_v46  ;;  %39556 = vst [vmem:[#allocation20_spill] sm:$0xff] %v37700_v16 }
 0xf95   : > { %29130 = vmatmul.mubr.msk.f32.gmra.mrb[66].mxu1 %vm421_vm1, %v37666_v47  ;;  %v37688_v47 = vld [vmem:[#allocation3 + $0x91] sm:$0xff] }
 0xf96   : > { %29132 = vmatprep.mubr.msk.f32.mxu1 %vm421_vm1, %v37676_v3  ;;  %30190 = vmatpush3.bf16.msra.mxu1 %v30187_v8  ;;  %39553 = vst [vmem:[#allocation17_spill] sm:$0xff] %v37688_v47  ;;  %v37692_v8 = vld [vmem:[#allocation3 + $0xa9] sm:$0xff] }
 0xf97   : > { %30192 = vmatprep.subr.bf16.mxu1 %v30191_v19  ;;  %39554 = vst [vmem:[#allocation18_spill] sm:$0xff] %v37692_v8 }
 0xf99   : > { %29133 = vmatmul.mubr.msk.f32.gmra.mrb[68].mxu1 %vm421_vm1, %v37680_v29 }
 0xf9a   : > { %29135 = vmatprep.mubr.msk.f32.mxu1 %vm421_vm1, %v37684_v1  ;;  %30194 = vmatpush3.bf16.msra.mxu1 %v30191_v19  ;;  %v37704_v19 = vld [vmem:[#allocation3 + $0xd1] sm:$0xff]  ;;  %v23929_v1 = vld [vmem:[%s38381_s5 + $0x128] sm:$0xff] }
 0xf9b   : > { %30196 = vmatprep.subr.bf16.mxu1 %v30195_v40  ;;  %39557 = vst [vmem:[#allocation21_spill] sm:$0xff] %v37704_v19 }
 0xf9d   : > { %29136 = vmatmul.mubr.msk.f32.gmra.mrb[70].mxu1 %vm421_vm1, %v37688_v47  ;;  %v37708_v47 = vld [vmem:[#allocation3 + $0xe9] sm:$0xff] }
 0xf9e   : > { %29138 = vmatprep.mubr.msk.f32.mxu1 %vm421_vm1, %v37692_v8  ;;  %39558 = vst [vmem:[#allocation22_spill] sm:$0xff] %v37708_v47  ;;  %v37712_v8 = vld [vmem:[#allocation3 + $0xf1] sm:$0xff] }
 0xf9f   : > { %39559 = vst [vmem:[#allocation49_spill] sm:$0xff] %v37712_v8 }
 0xfa1   : > { %29139 = vmatmul.mubr.msk.f32.gmra.mrb[72].mxu1 %vm421_vm1, %v37696_v46  ;;  %v37716_v46 = vld [vmem:[#allocation3 + $0x109] sm:$0xff] }
 0xfa2   : > { %29141 = vmatprep.mubr.msk.f32.mxu1 %vm421_vm1, %v37700_v16  ;;  %39560 = vst [vmem:[#allocation50_spill] sm:$0xff] %v37716_v46  ;;  %v37720_v16 = vld [vmem:[#allocation3 + $0x111] sm:$0xff] }
 0xfa3   : > { %39561 = vst [vmem:[#allocation25_spill] sm:$0xff] %v37720_v16 }
 0xfa5   : > { %29142 = vmatmul.mubr.msk.f32.gmra.mrb[74].mxu1 %vm421_vm1, %v37704_v19  ;;  %v37724_v19 = vld [vmem:[#allocation3 + $0x129] sm:$0xff] }
 0xfa6   : > { %29144 = vmatprep.mubr.msk.f32.mxu1 %vm421_vm1, %v37708_v47  ;;  %39562 = vst [vmem:[#allocation26_spill] sm:$0xff] %v37724_v19  ;;  %v37728_v47 = vld [vmem:[#allocation3 + $0x131] sm:$0xff] }
 0xfa7   : > { %39563 = vst [vmem:[#allocation27_spill] sm:$0xff] %v37728_v47 }
 0xfa9   : > { %29145 = vmatmul.mubr.msk.f32.gmra.mrb[76].mxu1 %vm421_vm1, %v37712_v8  ;;  %v37732_v8 = vld [vmem:[#allocation3 + $0x149] sm:$0xff] }
 0xfaa   : > { %29147 = vmatprep.mubr.msk.f32.mxu1 %vm421_vm1, %v37716_v46  ;;  %39564 = vst [vmem:[#allocation28_spill] sm:$0xff] %v37732_v8  ;;  %v37736_v46 = vld [vmem:[#allocation3 + $0x151] sm:$0xff] }
 0xfab   : > { %39565 = vst [vmem:[#allocation29_spill] sm:$0xff] %v37736_v46 }
 0xfad   : > { %29148 = vmatmul.mubr.msk.f32.gmra.mrb[78].mxu1 %vm421_vm1, %v37720_v16  ;;  %v37740_v16 = vld [vmem:[#allocation3 + $0x169] sm:$0xff] }
 0xfae   : > { %29150 = vmatprep.mubr.msk.f32.mxu1 %vm421_vm1, %v37724_v19  ;;  %39566 = vst [vmem:[#allocation30_spill] sm:$0xff] %v37740_v16  ;;  %v37744_v19 = vld [vmem:[#allocation3 + $0x171] sm:$0xff] }
 0xfaf   : > { %39567 = vst [vmem:[#allocation31_spill] sm:$0xff] %v37744_v19 }
 0xfb1   : > { %29151 = vmatmul.mubr.msk.f32.gmra.mrb[80].mxu1 %vm421_vm1, %v37728_v47  ;;  %v37748_v47 = vld [vmem:[#allocation3 + $0x189] sm:$0xff] }
 0xfb2   : > { %29153 = vmatprep.mubr.msk.f32.mxu1 %vm421_vm1, %v37732_v8  ;;  %39568 = vst [vmem:[#allocation32_spill] sm:$0xff] %v37748_v47  ;;  %v37752_v8 = vld [vmem:[#allocation3 + $0x191] sm:$0xff] }
 0xfb3   : > { %39569 = vst [vmem:[#allocation33_spill] sm:$0xff] %v37752_v8 }
 0xfb5   : > { %29154 = vmatmul.mubr.msk.f32.gmra.mrb[82].mxu1 %vm421_vm1, %v37736_v46  ;;  %v37756_v46 = vld [vmem:[#allocation3 + $0x1a9] sm:$0xff] }
 0xfb6   : > { %29156 = vmatprep.mubr.msk.f32.mxu1 %vm421_vm1, %v37740_v16  ;;  %39570 = vst [vmem:[#allocation34_spill] sm:$0xff] %v37756_v46  ;;  %v37760_v16 = vld [vmem:[#allocation3 + $0x1b1] sm:$0xff] }
 0xfb7   : > { %39571 = vst [vmem:[#allocation35_spill] sm:$0xff] %v37760_v16 }
 0xfb9   : > { %29157 = vmatmul.mubr.msk.f32.gmra.mrb[84].mxu1 %vm421_vm1, %v37744_v19  ;;  %v37764_v19 = vld [vmem:[#allocation3 + $0x1c9] sm:$0xff] }
 0xfba   : > { %29159 = vmatprep.mubr.msk.f32.mxu1 %vm421_vm1, %v37748_v47  ;;  %39572 = vst [vmem:[#allocation36_spill] sm:$0xff] %v37764_v19  ;;  %v37768_v47 = vld [vmem:[#allocation3 + $0x1d1] sm:$0xff] }
 0xfbb   : > { %39573 = vst [vmem:[#allocation37_spill] sm:$0xff] %v37768_v47 }
 0xfbd   : > { %29160 = vmatmul.mubr.msk.f32.gmra.mrb[86].mxu1 %vm421_vm1, %v37752_v8  ;;  %v37772_v8 = vld [vmem:[#allocation3 + $0x1e9] sm:$0xff] }
 0xfbe   : > { %29162 = vmatprep.mubr.msk.f32.mxu1 %vm421_vm1, %v37756_v46  ;;  %39574 = vst [vmem:[#allocation39_spill] sm:$0xff] %v37772_v8  ;;  %v37776_v46 = vld [vmem:[#allocation3 + $0x1f1] sm:$0xff] }
 0xfbf   : > { %39575 = vst [vmem:[#allocation40_spill] sm:$0xff] %v37776_v46 }
 0xfc1   : > { %29163 = vmatmul.mubr.msk.f32.gmra.mrb[88].mxu1 %vm421_vm1, %v37760_v16  ;;  %v23926_v16 = vld [vmem:[%s38381_s5 + $0x110] sm:$0xff] }
 0xfc2   : > { %29165 = vmatprep.mubr.msk.f32.mxu1 %vm421_vm1, %v37764_v19  ;;  %v23927_v19 = vld [vmem:[%s38381_s5 + $0x118] sm:$0xff] }
 0xfc5   : > { %29166 = vmatmul.mubr.msk.f32.gmra.mrb[90].mxu1 %vm421_vm1, %v37768_v47  ;;  %v30199_v47 = vpack.c.bf16 %v23927_v19, %v23926_v16  ;;  %v23931_v16 = vld [vmem:[%s38381_s5 + $0x138] sm:$0xff]  ;;  %v24006_v19 = vld [vmem:[%s38381_s5 + $0x190] sm:$0xff] }
 0xfc6   : > { %29168 = vmatprep.mubr.msk.f32.mxu1 %vm421_vm1, %v37772_v8  ;;  %v23928_v8 = vld [vmem:[%s38381_s5 + $0x120] sm:$0xff] }
 0xfc9   : > { %29169 = vmatmul.mubr.msk.f32.gmra.mrb[92].mxu1 %vm421_vm1, %v37776_v46  ;;  %v30203_v46 = vpack.c.bf16 %v23929_v1, %v23928_v8  ;;  %v39581_v1 = vld [vmem:[#allocation43_spill] sm:$0xff]  ;;  %v37956_v8 = vld [vmem:[#allocation3 + $0x208] sm:$0xff] }
 0xfca   : > { %29187 = vmatprep.mubr.msk.f32.mxu1 %vm421_vm1, %v37268_v41  ;;  %v23930_v41 = vld [vmem:[%s38381_s5 + $0x130] sm:$0xff] }
 0xfcd   : > { %29188 = vmatmul.mubr.msk.f32.vlgmr.msra.gmra.mrb[94].mxu1 %vm421_vm1, %v37270_v4  ;;  %v30207_v4 = vpack.c.bf16 %v23931_v16, %v23930_v41  ;;  %v24007_v41 = vld [vmem:[%s38381_s5 + $0x198] sm:$0xff]  ;;  %v39582_v16 = vld [vmem:[#allocation45_spill] sm:$0xff] }
 0xfce   : > { %30198 = vmatpush3.bf16.msra.mxu1 %v30195_v40  ;;  %29190 = vmatprep.mubr.msk.f32.mxu1 %vm421_vm1, %v37288_v63  ;;  %v23964_v63 = vld [vmem:[%s38381_s5 + $0x140] sm:$0xff]  ;;  %v23965_v40 = vld [vmem:[%s38381_s5 + $0x148] sm:$0xff] }
 0xfcf   : > { %30200 = vmatprep.subr.bf16.mxu1 %v30199_v47 }
 0xfd1   : > { %29191 = vmatmul.mubr.msk.f32.gmra.mrb[64].mxu1 %vm421_vm1, %v37290_v39  ;;  %v30211_v39 = vpack.c.bf16 %v23965_v40, %v23964_v63  ;;  %v24008_v63 = vld [vmem:[%s38381_s5 + $0x1a0] sm:$0xff]  ;;  %v24009_v40 = vld [vmem:[%s38381_s5 + $0x1a8] sm:$0xff] }
 0xfd2   : > { %29193 = vmatprep.mubr.msk.f32.mxu1 %vm421_vm1, %v37308_v35  ;;  %30202 = vmatpush3.bf16.msra.mxu1 %v30199_v47  ;;  %v37864_v35 = vld [vmem:[#allocation3 + $0x207] sm:$0xff] }
 0xfd3   : > { %30204 = vmatprep.subr.bf16.mxu1 %v30203_v46  ;;  %v39580_v47 = vld [vmem:[#allocation42_spill] sm:$0xff] }
 0xfd5   : > { %29194 = vmatmul.mubr.msk.f32.gmra.mrb[66].mxu1 %vm421_vm1, %v37310_v0  ;;  %v37868_v0 = vld [vmem:[#allocation3 + $0x20f] sm:$0xff] }
 0xfd6   : > { %29196 = vmatprep.mubr.msk.f32.mxu1 %vm421_vm1, %v37328_v2  ;;  %30206 = vmatpush3.bf16.msra.mxu1 %v30203_v46  ;;  %v23966_v2 = vld [vmem:[%s38381_s5 + $0x150] sm:$0xff] }
 0xfd7   : > { %30208 = vmatprep.subr.bf16.mxu1 %v30207_v4  ;;  %v37960_v46 = vld [vmem:[#allocation3 + $0x210] sm:$0xff] }
 0xfd9   : > { %29197 = vmatmul.mubr.msk.f32.gmra.mrb[68].mxu1 %vm421_vm1, %v37330_v42  ;;  %v23967_v42 = vld [vmem:[%s38381_s5 + $0x158] sm:$0xff] }
 0xfda   : > { %29199 = vmatprep.mubr.msk.f32.mxu1 %vm421_vm1, %v37344_v54  ;;  %30210 = vmatpush3.bf16.msra.mxu1 %v30207_v4  ;;  %v30215_v54 = vpack.c.bf16 %v23967_v42, %v23966_v2  ;;  %v30231_v4 = vpack.c.bf16 %v24007_v41, %v24006_v19  ;;  %v30235_v2 = vpack.c.bf16 %v24009_v40, %v24008_v63  ;;  %v24010_v42 = vld [vmem:[%s38381_s5 + $0x1b0] sm:$0xff]  ;;  %v39589_v19 = vld [vmem:[#allocation20_spill] sm:$0xff]  ;;  %v39590_v41 = vld [vmem:[#allocation21_spill] sm:$0xff] }
 0xfdb   : > { %30212 = vmatprep.subr.bf16.mxu1 %v30211_v39  ;;  %v39593_v63 = vld [vmem:[#allocation50_spill] sm:$0xff]  ;;  %v39594_v40 = vld [vmem:[#allocation25_spill] sm:$0xff] }
 0xfdd   : > { %29200 = vmatmul.mubr.msk.f32.gmra.mrb[70].mxu1 %vm421_vm1, %v37346_v11  ;;  %v23968_v11 = vld [vmem:[%s38381_s5 + $0x160] sm:$0xff] }
 0xfde   : > { %29202 = vmatprep.mubr.msk.f32.mxu1 %vm421_vm1, %v37359_v9  ;;  %v23969_v9 = vld [vmem:[%s38381_s5 + $0x168] sm:$0xff] }
 0xfe1   : > { %29203 = vmatmul.mubr.msk.f32.gmra.mrb[72].mxu1 %vm421_vm1, %v37361_v59  ;;  %v30219_v59 = vpack.c.bf16 %v23969_v9, %v23968_v11  ;;  %v39584_v11 = vld [vmem:[#allocation15_spill] sm:$0xff] }
 0xfe2   : > { %29205 = vmatprep.mubr.msk.f32.mxu1 %vm421_vm1, %v37373_v60  ;;  %v23970_v60 = vld [vmem:[%s38381_s5 + $0x170] sm:$0xff] }
 0xfe5   : > { %29206 = vmatmul.mubr.msk.f32.gmra.mrb[74].mxu1 %vm421_vm1, %v37375_v14  ;;  %v23971_v14 = vld [vmem:[%s38381_s5 + $0x178] sm:$0xff] }
 0xfe6   : > { %29208 = vmatprep.mubr.msk.f32.mxu1 %vm421_vm1, %v37387_v58  ;;  %v30223_v58 = vpack.c.bf16 %v23971_v14, %v23970_v60  ;;  %v24045_v60 = vld [vmem:[%s38381_s5 + $0x1c8] sm:$0xff]  ;;  %v39585_v14 = vld [vmem:[#allocation16_spill] sm:$0xff] }
 0xfe9   : > { %29209 = vmatmul.mubr.msk.f32.gmra.mrb[76].mxu1 %vm421_vm1, %v37389_v28  ;;  %v24004_v28 = vld [vmem:[%s38381_s5 + $0x180] sm:$0xff] }
 0xfea   : > { %29211 = vmatprep.mubr.msk.f32.mxu1 %vm421_vm1, %v37401_v52  ;;  %v24005_v52 = vld [vmem:[%s38381_s5 + $0x188] sm:$0xff] }
 0xfed   : > { %29212 = vmatmul.mubr.msk.f32.gmra.mrb[78].mxu1 %vm421_vm1, %v37403_v21  ;;  %v30227_v21 = vpack.c.bf16 %v24005_v52, %v24004_v28  ;;  %v39586_v28 = vld [vmem:[#allocation17_spill] sm:$0xff]  ;;  %v39587_v52 = vld [vmem:[#allocation18_spill] sm:$0xff] }
 0xfee   : > { %29214 = vmatprep.mubr.msk.f32.mxu1 %vm421_vm1, %v37415_v34  ;;  %v39576_v34 = vld [vmem:[#allocation23_spill] sm:$0xff] }
 0xff1   : > { %29215 = vmatmul.mubr.msk.f32.gmra.mrb[80].mxu1 %vm421_vm1, %v37417_v25  ;;  %v39577_v25 = vld [vmem:[#allocation24_spill] sm:$0xff] }
 0xff2   : > { %29217 = vmatprep.mubr.msk.f32.mxu1 %vm421_vm1, %v37429_v23 }
 0xff5   : > { %29218 = vmatmul.mubr.msk.f32.gmra.mrb[82].mxu1 %vm421_vm1, %v37431_v57 }
 0xff6   : > { %29220 = vmatprep.mubr.msk.f32.mxu1 %vm421_vm1, %v37443_v43 }
 0xff9   : > { %29221 = vmatmul.mubr.msk.f32.gmra.mrb[84].mxu1 %vm421_vm1, %v37445_v61 }
 0xffa   : > { %29223 = vmatprep.mubr.msk.f32.mxu1 %vm421_vm1, %v37457_v5 }
 0xffd   : > { %29224 = vmatmul.mubr.msk.f32.gmra.mrb[86].mxu1 %vm421_vm1, %v37459_v37 }
 0xffe   : > { %29226 = vmatprep.mubr.msk.f32.mxu1 %vm421_vm1, %v37470_v17 }
0x1001   : > { %29227 = vmatmul.mubr.msk.f32.gmra.mrb[88].mxu1 %vm421_vm1, %v37472_v15 }
0x1002   : > { %29229 = vmatprep.mubr.msk.f32.mxu1 %vm421_vm1, %v37479_v22 }
0x1005   : > { %29230 = vmatmul.mubr.msk.f32.gmra.mrb[90].mxu1 %vm421_vm1, %v37481_v32 }
0x1006   : > { %29232 = vmatprep.mubr.msk.f32.mxu1 %vm421_vm1, %v37864_v35 }
0x1009   : > { %29233 = vmatmul.mubr.msk.f32.gmra.mrb[92].mxu1 %vm421_vm1, %v37868_v0 }
0x100a   : > { %29251 = vmatprep.mubr.msk.f32.mxu1 %vm421_vm1, %v37501_v12  ;;  %v39578_v12 = vld [vmem:[#allocation38_spill] sm:$0xff] }
0x100d   : > { %29252 = vmatmul.mubr.msk.f32.vlgmr.msra.gmra.mrb[94].mxu1 %vm421_vm1, %v37506_v30  ;;  %v39579_v30 = vld [vmem:[#allocation41_spill] sm:$0xff] }
0x100e   : > { %30214 = vmatpush3.bf16.msra.mxu1 %v30211_v39  ;;  %29254 = vmatprep.mubr.msk.f32.mxu1 %vm421_vm1, %v37516_v44  ;;  %v39583_v39 = vld [vmem:[#allocation47_spill] sm:$0xff] }
0x100f   : > { %30216 = vmatprep.subr.bf16.mxu1 %v30215_v54 }
0x1011   : > { %29255 = vmatmul.mubr.msk.f32.gmra.mrb[64].mxu1 %vm421_vm1, %v37520_v13 }
0x1012   : > { %29257 = vmatprep.mubr.msk.f32.mxu1 %vm421_vm1, %v37530_v38  ;;  %30218 = vmatpush3.bf16.msra.mxu1 %v30215_v54  ;;  %v24011_v54 = vld [vmem:[%s38381_s5 + $0x1b8] sm:$0xff] }
0x1013   : > { %30220 = vmatprep.subr.bf16.mxu1 %v30219_v59  ;;  %v30239_v9 = vpack.c.bf16 %v24011_v54, %v24010_v42  ;;  %v39597_v42 = vld [vmem:[#allocation28_spill] sm:$0xff]  ;;  %v39598_v54 = vld [vmem:[#allocation29_spill] sm:$0xff] }
0x1015   : > { %29258 = vmatmul.mubr.msk.f32.gmra.mrb[66].mxu1 %vm421_vm1, %v37534_v50 }
0x1016   : > { %29260 = vmatprep.mubr.msk.f32.mxu1 %vm421_vm1, %v37538_v45  ;;  %30222 = vmatpush3.bf16.msra.mxu1 %v30219_v59  ;;  %v24044_v59 = vld [vmem:[%s38381_s5 + $0x1c0] sm:$0xff] }
0x1017   : > { %30224 = vmatprep.subr.bf16.mxu1 %v30223_v58 }
0x1019   : > { %29261 = vmatmul.mubr.msk.f32.gmra.mrb[68].mxu1 %vm421_vm1, %v37542_v49 }
0x101a   : > { %29263 = vmatprep.mubr.msk.f32.mxu1 %vm421_vm1, %v37546_v36  ;;  %30226 = vmatpush3.bf16.msra.mxu1 %v30223_v58  ;;  %v30243_v58 = vpack.c.bf16 %v24045_v60, %v24044_v59  ;;  %v39600_v59 = vld [vmem:[#allocation31_spill] sm:$0xff]  ;;  %v39601_v60 = vld [vmem:[#allocation32_spill] sm:$0xff] }
0x101b   : > { %30228 = vmatprep.subr.bf16.mxu1 %v30227_v21 }
0x101d   : > { %29264 = vmatmul.mubr.msk.f32.gmra.mrb[70].mxu1 %vm421_vm1, %v37550_v24 }
0x101e   : > { %29266 = vmatprep.mubr.msk.f32.mxu1 %vm421_vm1, %v37554_v6 }
0x1021   : > { %29267 = vmatmul.mubr.msk.f32.gmra.mrb[72].mxu1 %vm421_vm1, %v37558_v48 }
0x1022   : > { %29269 = vmatprep.mubr.msk.f32.mxu1 %vm421_vm1, %v37562_v33 }
0x1025   : > { %29270 = vmatmul.mubr.msk.f32.gmra.mrb[74].mxu1 %vm421_vm1, %v37566_v27 }
0x1026   : > { %29272 = vmatprep.mubr.msk.f32.mxu1 %vm421_vm1, %v37570_v51 }
0x1029   : > { %29273 = vmatmul.mubr.msk.f32.gmra.mrb[76].mxu1 %vm421_vm1, %v37574_v55 }
0x102a   : > { %29275 = vmatprep.mubr.msk.f32.mxu1 %vm421_vm1, %v37578_v7 }
0x102d   : > { %29276 = vmatmul.mubr.msk.f32.gmra.mrb[78].mxu1 %vm421_vm1, %v37582_v62 }
0x102e   : > { %29278 = vmatprep.mubr.msk.f32.mxu1 %vm421_vm1, %v37586_v53 }
0x1031   : > { %29279 = vmatmul.mubr.msk.f32.gmra.mrb[80].mxu1 %vm421_vm1, %v37590_v31 }
0x1032   : > { %29281 = vmatprep.mubr.msk.f32.mxu1 %vm421_vm1, %v37594_v20 }
0x1035   : > { %29282 = vmatmul.mubr.msk.f32.gmra.mrb[82].mxu1 %vm421_vm1, %v37598_v26 }
0x1036   : > { %29284 = vmatprep.mubr.msk.f32.mxu1 %vm421_vm1, %v37602_v56 }
0x1039   : > { %29285 = vmatmul.mubr.msk.f32.gmra.mrb[84].mxu1 %vm421_vm1, %v37606_v18 }
0x103a   : > { %29287 = vmatprep.mubr.msk.f32.mxu1 %vm421_vm1, %v39576_v34 }
0x103d   : > { %29288 = vmatmul.mubr.msk.f32.gmra.mrb[86].mxu1 %vm421_vm1, %v39577_v25 }
0x103e   : > { %29290 = vmatprep.mubr.msk.f32.mxu1 %vm421_vm1, %v39578_v12 }
0x1041   : > { %29291 = vmatmul.mubr.msk.f32.gmra.mrb[88].mxu1 %vm421_vm1, %v39579_v30 }
0x1042   : > { %29293 = vmatprep.mubr.msk.f32.mxu1 %vm421_vm1, %v39580_v47 }
0x1045   : > { %29294 = vmatmul.mubr.msk.f32.gmra.mrb[90].mxu1 %vm421_vm1, %v39581_v1 }
0x1046   : > { %29296 = vmatprep.mubr.msk.f32.mxu1 %vm421_vm1, %v37956_v8 }
0x1049   : > { %29297 = vmatmul.mubr.msk.f32.gmra.mrb[92].mxu1 %vm421_vm1, %v37960_v46 }
0x104a   : > { %29315 = vmatprep.mubr.msk.f32.mxu1 %vm421_vm1, %v39582_v16  ;;  %v39591_v16 = vld [vmem:[#allocation22_spill] sm:$0xff] }
0x104d   : > { %29316 = vmatmul.mubr.msk.f32.vlgmr.msra.gmra.mrb[94].mxu1 %vm421_vm1, %v39583_v39  ;;  %v39595_v39 = vld [vmem:[#allocation26_spill] sm:$0xff] }
0x104e   : > { %30230 = vmatpush3.bf16.msra.mxu1 %v30227_v21  ;;  %29318 = vmatprep.mubr.msk.f32.mxu1 %vm421_vm1, %v37662_v10  ;;  %v39588_v21 = vld [vmem:[#allocation19_spill] sm:$0xff] }
0x104f   : > { %30232 = vmatprep.subr.bf16.mxu1 %v30231_v4 }
0x1051   : > { %29319 = vmatmul.mubr.msk.f32.gmra.mrb[64].mxu1 %vm421_vm1, %v39584_v11 }
0x1052   : > { %29321 = vmatprep.mubr.msk.f32.mxu1 %vm421_vm1, %v37676_v3  ;;  %30234 = vmatpush3.bf16.msra.mxu1 %v30231_v4  ;;  %v39592_v4 = vld [vmem:[#allocation49_spill] sm:$0xff] }
0x1053   : > { %30236 = vmatprep.subr.bf16.mxu1 %v30235_v2 }
0x1055   : > { %29322 = vmatmul.mubr.msk.f32.gmra.mrb[66].mxu1 %vm421_vm1, %v37680_v29 }
0x1056   : > { %29324 = vmatprep.mubr.msk.f32.mxu1 %vm421_vm1, %v39585_v14  ;;  %30238 = vmatpush3.bf16.msra.mxu1 %v30235_v2  ;;  %v39596_v2 = vld [vmem:[#allocation27_spill] sm:$0xff] }
0x1057   : > { %30240 = vmatprep.subr.bf16.mxu1 %v30239_v9 }
0x1059   : > { %29325 = vmatmul.mubr.msk.f32.gmra.mrb[68].mxu1 %vm421_vm1, %v39586_v28 }
0x105a   : > { %29327 = vmatprep.mubr.msk.f32.mxu1 %vm421_vm1, %v39587_v52  ;;  %30242 = vmatpush3.bf16.msra.mxu1 %v30239_v9  ;;  %v39599_v9 = vld [vmem:[#allocation30_spill] sm:$0xff] }
0x105b   : > { %30244 = vmatprep.subr.bf16.mxu1 %v30243_v58 }
0x105d   : > { %29328 = vmatmul.mubr.msk.f32.gmra.mrb[70].mxu1 %vm421_vm1, %v39588_v21 }
0x105e   : > { %29330 = vmatprep.mubr.msk.f32.mxu1 %vm421_vm1, %v39589_v19 }
0x1061   : > { %29331 = vmatmul.mubr.msk.f32.gmra.mrb[72].mxu1 %vm421_vm1, %v39590_v41 }
0x1062   : > { %29333 = vmatprep.mubr.msk.f32.mxu1 %vm421_vm1, %v39591_v16 }
0x1065   : > { %29334 = vmatmul.mubr.msk.f32.gmra.mrb[74].mxu1 %vm421_vm1, %v39592_v4  ;;  %v24049_v4 = vld [vmem:[%s38381_s5 + $0x1e8] sm:$0xff] }
0x1066   : > { %29336 = vmatprep.mubr.msk.f32.mxu1 %vm421_vm1, %v39593_v63  ;;  %v24048_v63 = vld [vmem:[%s38381_s5 + $0x1e0] sm:$0xff] }
0x1069   : > { %29337 = vmatmul.mubr.msk.f32.gmra.mrb[76].mxu1 %vm421_vm1, %v39594_v40  ;;  %v39602_v40 = vld [vmem:[#allocation33_spill] sm:$0xff] }
0x106a   : > { %29339 = vmatprep.mubr.msk.f32.mxu1 %vm421_vm1, %v39595_v39  ;;  %v39603_v39 = vld [vmem:[#allocation34_spill] sm:$0xff] }
0x106d   : > { %29340 = vmatmul.mubr.msk.f32.gmra.mrb[78].mxu1 %vm421_vm1, %v39596_v2  ;;  %v39604_v2 = vld [vmem:[#allocation35_spill] sm:$0xff] }
0x106e   : > { %29342 = vmatprep.mubr.msk.f32.mxu1 %vm421_vm1, %v39597_v42  ;;  %v39605_v42 = vld [vmem:[#allocation36_spill] sm:$0xff] }
0x1071   : > { %29343 = vmatmul.mubr.msk.f32.gmra.mrb[80].mxu1 %vm421_vm1, %v39598_v54  ;;  %v39606_v54 = vld [vmem:[#allocation37_spill] sm:$0xff] }
0x1072   : > { %29345 = vmatprep.mubr.msk.f32.mxu1 %vm421_vm1, %v39599_v9  ;;  %v39607_v9 = vld [vmem:[#allocation39_spill] sm:$0xff] }
0x1075   : > { %29346 = vmatmul.mubr.msk.f32.gmra.mrb[82].mxu1 %vm421_vm1, %v39600_v59  ;;  %v39608_v59 = vld [vmem:[#allocation40_spill] sm:$0xff] }
0x1076   : > { %29348 = vmatprep.mubr.msk.f32.mxu1 %vm421_vm1, %v39601_v60  ;;  %v38048_v60 = vld [vmem:[#allocation3 + $0x209] sm:$0xff] }
0x1077   : > { %39609 = vst [vmem:[#allocation44_spill] sm:$0xff] %v38048_v60 }
0x1079   : > { %29349 = vmatmul.mubr.msk.f32.gmra.mrb[84].mxu1 %vm421_vm1, %v39602_v40  ;;  %v20956_v40 = vld [vmem:[#allocation3 + $0x4f] sm:$0xff] }
0x107a   : > { %29351 = vmatprep.mubr.msk.f32.mxu1 %vm421_vm1, %v39603_v39  ;;  %v38052_v39 = vld [vmem:[#allocation3 + $0x211] sm:$0xff] }
0x107b   : > { %39610 = vst [vmem:[#allocation46_spill] sm:$0xff] %v38052_v39 }
0x107d   : > { %29352 = vmatmul.mubr.msk.f32.gmra.mrb[86].mxu1 %vm421_vm1, %v39604_v2 }
0x107e   : > { %29354 = vmatprep.mubr.msk.f32.mxu1 %vm421_vm1, %v39605_v42  ;;  %v24046_v42 = vld [vmem:[%s38381_s5 + $0x1d0] sm:$0xff] }
0x1081   : > { %29355 = vmatmul.mubr.msk.f32.gmra.mrb[88].mxu1 %vm421_vm1, %v39606_v54  ;;  %v24047_v54 = vld [vmem:[%s38381_s5 + $0x1d8] sm:$0xff] }
0x1082   : > { %29357 = vmatprep.mubr.msk.f32.mxu1 %vm421_vm1, %v39607_v9  ;;  %v20955_v9 = vld [vmem:[#allocation3 + $0x47] sm:$0xff]  ;;  %v30247_v2 = vpack.c.bf16 %v24047_v54, %v24046_v42  ;;  %v20958_v42 = vld [vmem:[#allocation3 + $0x6f] sm:$0xff] }
0x1083   : > { %v24050_v54 = vld [vmem:[%s38381_s5 + $0x1f0] sm:$0xff] }
0x1085   : > { %29358 = vmatmul.mubr.msk.f32.gmra.mrb[90].mxu1 %vm421_vm1, %v39608_v59  ;;  %v18592_v59 = vld [vmem:[#allocation3 + $0x7] sm:$0xff] }
0x1086   : > { %29360 = vmatprep.mubr.msk.f32.mxu1 %vm421_vm1, %v38048_v60  ;;  %28995 = vmatprep.mubr.msk.f32.mxu0 %vm421_vm1, %v18592_v59  ;;  %v18593_v60 = vld [vmem:[#allocation3 + $0xf] sm:$0xff]  ;;  %v24051_v59 = vld [vmem:[%s38381_s5 + $0x1f8] sm:$0xff] }
0x1087   : > { %28996 = vmatmul.mubr.msk.f32.vlgmr.msra.gmra.mrb[96].mxu0 %vm421_vm1, %v18593_v60  ;;  %v20959_v60 = vld [vmem:[#allocation3 + $0x87] sm:$0xff] }
0x1089   : > { %29361 = vmatmul.mubr.msk.f32.gmra.mrb[92].mxu1 %vm421_vm1, %v38052_v39  ;;  %v20957_v39 = vld [vmem:[#allocation3 + $0x67] sm:$0xff] }
0x108a   : > { %29379 = vmatprep.mubr.msk.f32.mxu1 %vm421_vm1, %v20955_v9  ;;  %v30251_v9 = vpack.c.bf16 %v24049_v4, %v24048_v63  ;;  %v24084_v4 = vld [vmem:[%s38381_s5 + $0x200] sm:$0xff]  ;;  %v24085_v63 = vld [vmem:[%s38381_s5 + $0x208] sm:$0xff] }
0x108d   : > { %29380 = vmatmul.mubr.msk.f32.vlgmr.msra.gmra.mrb[94].mxu1 %vm421_vm1, %v20956_v40  ;;  %v20960_v40 = vld [vmem:[#allocation3 + $0x8f] sm:$0xff] }
0x108e   : > { %30246 = vmatpush3.bf16.msra.mxu1 %v30243_v58  ;;  %29382 = vmatprep.mubr.msk.f32.mxu1 %vm421_vm1, %v20957_v39  ;;  %v30255_v58 = vpack.c.bf16 %v24051_v59, %v24050_v54  ;;  %v20961_v39 = vld [vmem:[#allocation3 + $0xa7] sm:$0xff]  ;;  %v20964_v59 = vld [vmem:[#allocation3 + $0xcf] sm:$0xff] }
0x108f   : > { %30248 = vmatprep.subr.bf16.mxu1 %v30247_v2  ;;  %v20963_v54 = vld [vmem:[#allocation3 + $0xc7] sm:$0xff] }
0x1091   : > { %29383 = vmatmul.mubr.msk.f32.gmra.mrb[64].mxu1 %vm421_vm1, %v20958_v42  ;;  %v30259_v42 = vpack.c.bf16 %v24085_v63, %v24084_v4  ;;  %v20968_v4 = vld [vmem:[#allocation3 + $0x10f] sm:$0xff]  ;;  %v20969_v63 = vld [vmem:[#allocation3 + $0x127] sm:$0xff] }
0x1092   : > { %29385 = vmatprep.mubr.msk.f32.mxu1 %vm421_vm1, %v20959_v60  ;;  %30250 = vmatpush3.bf16.msra.mxu1 %v30247_v2  ;;  %v20962_v2 = vld [vmem:[#allocation3 + $0xaf] sm:$0xff]  ;;  %v20965_v60 = vld [vmem:[#allocation3 + $0xe7] sm:$0xff] }
0x1093   : > { %30252 = vmatprep.subr.bf16.mxu1 %v30251_v9 }
0x1095   : > { %29386 = vmatmul.mubr.msk.f32.gmra.mrb[66].mxu1 %vm421_vm1, %v20960_v40  ;;  %v20966_v40 = vld [vmem:[#allocation3 + $0xef] sm:$0xff] }
0x1096   : > { %29388 = vmatprep.mubr.msk.f32.mxu1 %vm421_vm1, %v20961_v39  ;;  %30254 = vmatpush3.bf16.msra.mxu1 %v30251_v9  ;;  %v20967_v9 = vld [vmem:[#allocation3 + $0x107] sm:$0xff] }
0x1097   : > { %30256 = vmatprep.subr.bf16.mxu1 %v30255_v58  ;;  %v20971_v39 = vld [vmem:[#allocation3 + $0x147] sm:$0xff] }
0x1099   : > { %29389 = vmatmul.mubr.msk.f32.gmra.mrb[68].mxu1 %vm421_vm1, %v20962_v2  ;;  %v20972_v2 = vld [vmem:[#allocation3 + $0x14f] sm:$0xff] }
0x109a   : > { %29391 = vmatprep.mubr.msk.f32.mxu1 %vm421_vm1, %v20963_v54  ;;  %30258 = vmatpush3.bf16.msra.mxu1 %v30255_v58  ;;  %v20970_v58 = vld [vmem:[#allocation3 + $0x12f] sm:$0xff] }
0x109b   : > { %30260 = vmatprep.subr.bf16.mxu1 %v30259_v42 }
0x109d   : > { %29392 = vmatmul.mubr.msk.f32.gmra.mrb[70].mxu1 %vm421_vm1, %v20964_v59 }
0x109e   : > { %29394 = vmatprep.mubr.msk.f32.mxu1 %vm421_vm1, %v20965_v60 }
0x10a1   : > { %29395 = vmatmul.mubr.msk.f32.gmra.mrb[72].mxu1 %vm421_vm1, %v20966_v40 }
0x10a2   : > { %29397 = vmatprep.mubr.msk.f32.mxu1 %vm421_vm1, %v20967_v9 }
0x10a5   : > { %29398 = vmatmul.mubr.msk.f32.gmra.mrb[74].mxu1 %vm421_vm1, %v20968_v4 }
0x10a6   : > { %29400 = vmatprep.mubr.msk.f32.mxu1 %vm421_vm1, %v20969_v63 }
0x10a9   : > { %29401 = vmatmul.mubr.msk.f32.gmra.mrb[76].mxu1 %vm421_vm1, %v20970_v58 }
0x10aa   : > { %29403 = vmatprep.mubr.msk.f32.mxu1 %vm421_vm1, %v20971_v39 }
0x10ad   : > { %29404 = vmatmul.mubr.msk.f32.gmra.mrb[78].mxu1 %vm421_vm1, %v20972_v2 }
0x10ae   : > { %29406 = vmatprep.mubr.msk.f32.mxu1 %vm421_vm1, %v37429_v23  ;;  %v20985_v23 = vld [vmem:[#allocation3 + $0x227] sm:$0xff] }
0x10b1   : > { %29407 = vmatmul.mubr.msk.f32.gmra.mrb[80].mxu1 %vm421_vm1, %v37431_v57  ;;  %v20986_v57 = vld [vmem:[#allocation3 + $0x22f] sm:$0xff] }
0x10b2   : > { %29409 = vmatprep.mubr.msk.f32.mxu1 %vm421_vm1, %v37443_v43  ;;  %v24086_v43 = vld [vmem:[%s38381_s5 + $0x210] sm:$0xff] }
0x10b5   : > { %29410 = vmatmul.mubr.msk.f32.gmra.mrb[82].mxu1 %vm421_vm1, %v37445_v61  ;;  %v24087_v61 = vld [vmem:[%s38381_s5 + $0x218] sm:$0xff] }
0x10b6   : > { %29412 = vmatprep.mubr.msk.f32.mxu1 %vm421_vm1, %v37457_v5  ;;  %v30263_v5 = vpack.c.bf16 %v24087_v61, %v24086_v43 }
0x10b9   : > { %29413 = vmatmul.mubr.msk.f32.gmra.mrb[84].mxu1 %vm421_vm1, %v37459_v37  ;;  %v24088_v37 = vld [vmem:[%s38381_s5 + $0x220] sm:$0xff] }
0x10ba   : > { %29415 = vmatprep.mubr.msk.f32.mxu1 %vm421_vm1, %v37470_v17  ;;  %v24089_v17 = vld [vmem:[%s38381_s5 + $0x228] sm:$0xff] }
0x10bd   : > { %29416 = vmatmul.mubr.msk.f32.gmra.mrb[86].mxu1 %vm421_vm1, %v37472_v15  ;;  %v30267_v15 = vpack.c.bf16 %v24089_v17, %v24088_v37 }
0x10be   : > { %29418 = vmatprep.mubr.msk.f32.mxu1 %vm421_vm1, %v37479_v22  ;;  %v24090_v22 = vld [vmem:[%s38381_s5 + $0x230] sm:$0xff] }
0x10c1   : > { %29419 = vmatmul.mubr.msk.f32.gmra.mrb[88].mxu1 %vm421_vm1, %v37481_v32  ;;  %v24091_v32 = vld [vmem:[%s38381_s5 + $0x238] sm:$0xff] }
0x10c2   : > { %29421 = vmatprep.mubr.msk.f32.mxu1 %vm421_vm1, %v37864_v35 }
0x10c5   : > { %29422 = vmatmul.mubr.msk.f32.gmra.mrb[90].mxu1 %vm421_vm1, %v37868_v0  ;;  %v38268_v0 = vld [vmem:[#allocation11] ss:$0 sm:$0xff] }
0x10c6   : > { %29424 = vmatprep.mubr.msk.f32.mxu1 %vm421_vm1, %v20985_v23 }
0x10c9   : > { %29425 = vmatmul.mubr.msk.f32.gmra.mrb[92].mxu1 %vm421_vm1, %v20986_v57 }
0x10ca   : > { %29443 = vmatprep.mubr.msk.f32.mxu1 %vm421_vm1, %v37516_v44  ;;  %v30271_v44 = vpack.c.bf16 %v24091_v32, %v24090_v22 }
0x10cd   : > { %29444 = vmatmul.mubr.msk.f32.vlgmr.msra.gmra.mrb[94].mxu1 %vm421_vm1, %v37520_v13  ;;  %v21379_v13 = vld [vmem:[#allocation3 + $0x228] sm:$0xff] }
0x10ce   : > { %30262 = vmatpush3.bf16.msra.mxu1 %v30259_v42  ;;  %29446 = vmatprep.mubr.msk.f32.mxu1 %vm421_vm1, %v37530_v38  ;;  %v21380_v38 = vld [vmem:[#allocation3 + $0x230] sm:$0xff] }
0x10cf   : > { %30264 = vmatprep.subr.bf16.mxu1 %v30263_v5 }
0x10d1   : > { %29447 = vmatmul.mubr.msk.f32.gmra.mrb[64].mxu1 %vm421_vm1, %v37534_v50  ;;  %v39611_v50 = vld [vmem:[#allocation49_spill] sm:$0xff] }
0x10d2   : > { %29449 = vmatprep.mubr.msk.f32.mxu1 %vm421_vm1, %v37538_v45  ;;  %30266 = vmatpush3.bf16.msra.mxu1 %v30263_v5  ;;  %v39612_v45 = vld [vmem:[#allocation50_spill] sm:$0xff] }
0x10d3   : > { %30268 = vmatprep.subr.bf16.mxu1 %v30267_v15 }
0x10d5   : > { %29450 = vmatmul.mubr.msk.f32.gmra.mrb[66].mxu1 %vm421_vm1, %v37542_v49  ;;  %v39613_v49 = vld [vmem:[#allocation25_spill] sm:$0xff] }
0x10d6   : > { %29452 = vmatprep.mubr.msk.f32.mxu1 %vm421_vm1, %v37546_v36  ;;  %30270 = vmatpush3.bf16.msra.mxu1 %v30267_v15  ;;  %v39614_v36 = vld [vmem:[#allocation26_spill] sm:$0xff] }
0x10d7   : > { %30272 = vmatprep.subr.bf16.mxu1 %v30271_v44 }
0x10d9   : > { %29453 = vmatmul.mubr.msk.f32.gmra.mrb[68].mxu1 %vm421_vm1, %v37550_v24  ;;  %v39615_v24 = vld [vmem:[#allocation27_spill] sm:$0xff] }
0x10da   : > { %29455 = vmatprep.mubr.msk.f32.mxu1 %vm421_vm1, %v37554_v6  ;;  %30274 = vmatpush3.bf16.msra.mxu1 %v30271_v44  ;;  %v39616_v6 = vld [vmem:[#allocation28_spill] sm:$0xff] }
0x10dd   : > { %29456 = vmatmul.mubr.msk.f32.gmra.mrb[70].mxu1 %vm421_vm1, %v37558_v48  ;;  %v39617_v48 = vld [vmem:[#allocation29_spill] sm:$0xff] }
0x10de   : > { %29458 = vmatprep.mubr.msk.f32.mxu1 %vm421_vm1, %v37562_v33  ;;  %v39618_v33 = vld [vmem:[#allocation30_spill] sm:$0xff] }
0x10e1   : > { %29459 = vmatmul.mubr.msk.f32.gmra.mrb[72].mxu1 %vm421_vm1, %v37566_v27  ;;  %v39619_v27 = vld [vmem:[#allocation31_spill] sm:$0xff] }
0x10e2   : > { %29461 = vmatprep.mubr.msk.f32.mxu1 %vm421_vm1, %v37570_v51  ;;  %v39620_v51 = vld [vmem:[#allocation32_spill] sm:$0xff] }
0x10e5   : > { %29462 = vmatmul.mubr.msk.f32.gmra.mrb[74].mxu1 %vm421_vm1, %v37574_v55  ;;  %v39621_v55 = vld [vmem:[#allocation33_spill] sm:$0xff] }
0x10e6   : > { %29464 = vmatprep.mubr.msk.f32.mxu1 %vm421_vm1, %v37578_v7  ;;  %v39622_v7 = vld [vmem:[#allocation34_spill] sm:$0xff] }
0x10e9   : > { %29465 = vmatmul.mubr.msk.f32.gmra.mrb[76].mxu1 %vm421_vm1, %v37582_v62  ;;  %v39623_v62 = vld [vmem:[#allocation35_spill] sm:$0xff] }
0x10ea   : > { %29467 = vmatprep.mubr.msk.f32.mxu1 %vm421_vm1, %v37586_v53  ;;  %v39624_v53 = vld [vmem:[#allocation36_spill] sm:$0xff] }
0x10ed   : > { %29468 = vmatmul.mubr.msk.f32.gmra.mrb[78].mxu1 %vm421_vm1, %v37590_v31  ;;  %v39625_v31 = vld [vmem:[#allocation37_spill] sm:$0xff] }
0x10ee   : > { %29470 = vmatprep.mubr.msk.f32.mxu1 %vm421_vm1, %v37594_v20  ;;  %v39626_v20 = vld [vmem:[#allocation39_spill] sm:$0xff] }
0x10f1   : > { %29471 = vmatmul.mubr.msk.f32.gmra.mrb[80].mxu1 %vm421_vm1, %v37598_v26  ;;  %v39627_v26 = vld [vmem:[#allocation40_spill] sm:$0xff] }
0x10f2   : > { %29473 = vmatprep.mubr.msk.f32.mxu1 %vm421_vm1, %v37602_v56  ;;  %v39628_v56 = vld [vmem:[#allocation44_spill] sm:$0xff] }
0x10f5   : > { %29474 = vmatmul.mubr.msk.f32.gmra.mrb[82].mxu1 %vm421_vm1, %v37606_v18  ;;  %v21773_v18 = vld [vmem:[#allocation3 + $0x229] sm:$0xff] }
0x10f6   : > { %29476 = vmatprep.mubr.msk.f32.mxu1 %vm421_vm1, %v39576_v34 }
0x10f9   : > { %29477 = vmatmul.mubr.msk.f32.gmra.mrb[84].mxu1 %vm421_vm1, %v39577_v25 }
0x10fa   : > { %29479 = vmatprep.mubr.msk.f32.mxu1 %vm421_vm1, %v39578_v12 }
0x10fd   : > { %29480 = vmatmul.mubr.msk.f32.gmra.mrb[86].mxu1 %vm421_vm1, %v39579_v30 }
0x10fe   : > { %29482 = vmatprep.mubr.msk.f32.mxu1 %vm421_vm1, %v39580_v47 }
0x1101   : > { %29483 = vmatmul.mubr.msk.f32.gmra.mrb[88].mxu1 %vm421_vm1, %v39581_v1 }
0x1102   : > { %29485 = vmatprep.mubr.msk.f32.mxu1 %vm421_vm1, %v37956_v8 }
0x1105   : > { %29486 = vmatmul.mubr.msk.f32.gmra.mrb[90].mxu1 %vm421_vm1, %v37960_v46 }
0x1106   : > { %29488 = vmatprep.mubr.msk.f32.mxu1 %vm421_vm1, %v21379_v13 }
0x1109   : > { %29489 = vmatmul.mubr.msk.f32.gmra.mrb[92].mxu1 %vm421_vm1, %v21380_v38 }
0x110a   : > { %29507 = vmatprep.mubr.msk.f32.mxu1 %vm421_vm1, %v37662_v10  ;;  %v21774_v10 = vld [vmem:[#allocation3 + $0x231] sm:$0xff] }
0x110d   : > { %29508 = vmatmul.mubr.msk.f32.vlgmr.msra.gmra.mrb[94].mxu1 %vm421_vm1, %v39584_v11 }
0x110e   : > { %29510 = vmatprep.mubr.msk.f32.mxu1 %vm421_vm1, %v37676_v3  ;;  %v39629_v3 = vld [vmem:[#allocation46_spill] sm:$0xff] }
0x1111   : > { %29511 = vmatmul.mubr.msk.f32.gmra.mrb[64].mxu1 %vm421_vm1, %v37680_v29 }
0x1112   : > { %29513 = vmatprep.mubr.msk.f32.mxu1 %vm421_vm1, %v39585_v14 }
0x1115   : > { %29514 = vmatmul.mubr.msk.f32.gmra.mrb[66].mxu1 %vm421_vm1, %v39586_v28 }
0x1116   : > { %29516 = vmatprep.mubr.msk.f32.mxu1 %vm421_vm1, %v39587_v52 }
0x1119   : > { %29517 = vmatmul.mubr.msk.f32.gmra.mrb[68].mxu1 %vm421_vm1, %v39588_v21 }
0x111a   : > { %29519 = vmatprep.mubr.msk.f32.mxu1 %vm421_vm1, %v39589_v19 }
0x111d   : > { %29520 = vmatmul.mubr.msk.f32.gmra.mrb[70].mxu1 %vm421_vm1, %v39590_v41 }
0x111e   : > { %29522 = vmatprep.mubr.msk.f32.mxu1 %vm421_vm1, %v39591_v16 }
0x1121   : > { %29523 = vmatmul.mubr.msk.f32.gmra.mrb[72].mxu1 %vm421_vm1, %v39611_v50 }
0x1122   : > { %29525 = vmatprep.mubr.msk.f32.mxu1 %vm421_vm1, %v39612_v45 }
0x1125   : > { %29526 = vmatmul.mubr.msk.f32.gmra.mrb[74].mxu1 %vm421_vm1, %v39613_v49 }
0x1126   : > { %29528 = vmatprep.mubr.msk.f32.mxu1 %vm421_vm1, %v39614_v36 }
0x1129   : > { %29529 = vmatmul.mubr.msk.f32.gmra.mrb[76].mxu1 %vm421_vm1, %v39615_v24 }
0x112a   : > { %29531 = vmatprep.mubr.msk.f32.mxu1 %vm421_vm1, %v39616_v6 }
0x112d   : > { %29532 = vmatmul.mubr.msk.f32.gmra.mrb[78].mxu1 %vm421_vm1, %v39617_v48 }
0x112e   : > { %29534 = vmatprep.mubr.msk.f32.mxu1 %vm421_vm1, %v39618_v33 }
0x1131   : > { %29535 = vmatmul.mubr.msk.f32.gmra.mrb[80].mxu1 %vm421_vm1, %v39619_v27 }
0x1132   : > { %29537 = vmatprep.mubr.msk.f32.mxu1 %vm421_vm1, %v39620_v51 }
0x1135   : > { %29538 = vmatmul.mubr.msk.f32.gmra.mrb[82].mxu1 %vm421_vm1, %v39621_v55 }
0x1136   : > { %29540 = vmatprep.mubr.msk.f32.mxu1 %vm421_vm1, %v39622_v7 }
0x1139   : > { %29541 = vmatmul.mubr.msk.f32.gmra.mrb[84].mxu1 %vm421_vm1, %v39623_v62 }
0x113a   : > { %29543 = vmatprep.mubr.msk.f32.mxu1 %vm421_vm1, %v39624_v53 }
0x113d   : > { %29544 = vmatmul.mubr.msk.f32.gmra.mrb[86].mxu1 %vm421_vm1, %v39625_v31 }
0x113e   : > { %29546 = vmatprep.mubr.msk.f32.mxu1 %vm421_vm1, %v39626_v20 }
0x1141   : > { %29547 = vmatmul.mubr.msk.f32.gmra.mrb[88].mxu1 %vm421_vm1, %v39627_v26 }
0x1142   : > { %29549 = vmatprep.mubr.msk.f32.mxu1 %vm421_vm1, %v39628_v56 }
0x1145   : > { %29550 = vmatmul.mubr.msk.f32.gmra.mrb[90].mxu1 %vm421_vm1, %v39629_v3 }
0x1146   : > { %29552 = vmatprep.mubr.msk.f32.mxu1 %vm421_vm1, %v21773_v18 }
0x1149   : > { %29553 = vmatmul.mubr.msk.f32.gmra.mrb[92].mxu1 %vm421_vm1, %v21774_v10 }
0x115a   : > { %v28997_v29 = vpop.f32.mrb[96].mxu0 }
0x115b   : > { %v18794_v35 = vpop.f32.mrb[97].mxu0  ;;  %v18954_v34 = vadd.f32 %v28997_v29, %v38268_v0 }
0x115c   : > { %v18953_v25 = vadd.f32 %v38268_v0, %v18794_v35 }
0x11e0   : > { %v29509_v12 = vpop.f32.mrb[94].mxu1 }
0x11e1   : > { %v30444_v30 = vadd.f32 %v29509_v12, %v18954_v34  ;;  %v21946_v47 = vpop.f32.mrb[95].mxu1 }
0x11e2   : > { %v30446_v1 = vadd.f32 %v21946_v47, %v18953_v25 }
0x11e3   : > { %32075 = vtanh.f32 %v30444_v30 }
0x11e4   : > { %32077 = vtanh.f32 %v30446_v1  ;;  %v29512_v8 = vpop.f32.mrb[64].mxu1 }
0x11e5   : > { %v30447_v46 = vadd.f32 %v29512_v8, %v38268_v0  ;;  %v21956_v11 = vpop.f32.mrb[65].mxu1 }
0x11e6   : > { %v30448_v14 = vadd.f32 %v38268_v0, %v21956_v11 }
0x11e7   : > { %32079 = vtanh.f32 %v30447_v46 }
0x11e8   : > { %32081 = vtanh.f32 %v30448_v14  ;;  %v29515_v28 = vpop.f32.mrb[66].mxu1 }
0x11e9   : > { %v30449_v52 = vadd.f32 %v29515_v28, %v38268_v0  ;;  %v21966_v21 = vpop.f32.mrb[67].mxu1 }
0x11ea   : > { %v30450_v19 = vadd.f32 %v38268_v0, %v21966_v21 }
0x11eb   : > { %32083 = vtanh.f32 %v30449_v52 }
0x11ec   : > { %32085 = vtanh.f32 %v30450_v19  ;;  %v29518_v41 = vpop.f32.mrb[68].mxu1 }
0x11ed   : > { %v32076_v16 = vpop.eup %32075  ;;  %v30451_v42 = vadd.f32 %v29518_v41, %v38268_v0  ;;  %v21976_v54 = vpop.f32.mrb[69].mxu1 }
0x11ee   : > { %v32078_v59 = vpop.eup %32077  ;;  %22171 = vst.msk [vmem:[%s38281_s12 + $0x8] sm:$0xff] %vm22169_vm2, %v32076_v16  ;;  %v30452_v60 = vadd.f32 %v38268_v0, %v21976_v54 }
0x11ef   : > { %22170 = vst.msk [vmem:[%s38281_s12] sm:$0xff] %vm22169_vm2, %v32078_v59  ;;  %32087 = vtanh.f32 %v30451_v42 }
0x11f0   : > { %32089 = vtanh.f32 %v30452_v60  ;;  %v29521_v40 = vpop.f32.mrb[70].mxu1 }
0x11f1   : > { %v32080_v9 = vpop.eup %32079  ;;  %v30453_v4 = vadd.f32 %v29521_v40, %v38268_v0  ;;  %v21986_v63 = vpop.f32.mrb[71].mxu1 }
0x11f2   : > { %v32082_v58 = vpop.eup %32081  ;;  %22173 = vst.msk [vmem:[%s38281_s12 + $0x18] sm:$0xff] %vm22169_vm2, %v32080_v9  ;;  %v30454_v39 = vadd.f32 %v38268_v0, %v21986_v63 }
0x11f3   : > { %22172 = vst.msk [vmem:[%s38281_s12 + $0x10] sm:$0xff] %vm22169_vm2, %v32082_v58  ;;  %32091 = vtanh.f32 %v30453_v4 }
0x11f4   : > { %32093 = vtanh.f32 %v30454_v39  ;;  %v29524_v2 = vpop.f32.mrb[72].mxu1 }
0x11f5   : > { %v32084_v23 = vpop.eup %32083  ;;  %v30455_v57 = vadd.f32 %v29524_v2, %v38268_v0  ;;  %v21996_v43 = vpop.f32.mrb[73].mxu1 }
0x11f6   : > { %v32086_v61 = vpop.eup %32085  ;;  %22175 = vst.msk [vmem:[%s38281_s12 + $0x28] sm:$0xff] %vm22169_vm2, %v32084_v23  ;;  %v30456_v5 = vadd.f32 %v38268_v0, %v21996_v43 }
0x11f7   : > { %22174 = vst.msk [vmem:[%s38281_s12 + $0x20] sm:$0xff] %vm22169_vm2, %v32086_v61  ;;  %32095 = vtanh.f32 %v30455_v57 }
0x11f8   : > { %32097 = vtanh.f32 %v30456_v5  ;;  %v29527_v37 = vpop.f32.mrb[74].mxu1 }
0x11f9   : > { %v32088_v17 = vpop.eup %32087  ;;  %v30457_v15 = vadd.f32 %v29527_v37, %v38268_v0  ;;  %v22006_v22 = vpop.f32.mrb[75].mxu1 }
0x11fa   : > { %v32090_v32 = vpop.eup %32089  ;;  %22177 = vst.msk [vmem:[%s38281_s12 + $0x38] sm:$0xff] %vm22169_vm2, %v32088_v17  ;;  %v30458_v44 = vadd.f32 %v38268_v0, %v22006_v22 }
0x11fb   : > { %22176 = vst.msk [vmem:[%s38281_s12 + $0x30] sm:$0xff] %vm22169_vm2, %v32090_v32  ;;  %32099 = vtanh.f32 %v30457_v15 }
0x11fc   : > { %32101 = vtanh.f32 %v30458_v44  ;;  %v29530_v13 = vpop.f32.mrb[76].mxu1 }
0x11fd   : > { %v32092_v38 = vpop.eup %32091  ;;  %v30459_v50 = vadd.f32 %v29530_v13, %v38268_v0  ;;  %v22016_v45 = vpop.f32.mrb[77].mxu1 }
0x11fe   : > { %v32094_v49 = vpop.eup %32093  ;;  %22179 = vst.msk [vmem:[%s38281_s12 + $0x48] sm:$0xff] %vm22169_vm2, %v32092_v38  ;;  %v30460_v36 = vadd.f32 %v38268_v0, %v22016_v45 }
0x11ff   : > { %22178 = vst.msk [vmem:[%s38281_s12 + $0x40] sm:$0xff] %vm22169_vm2, %v32094_v49  ;;  %32103 = vtanh.f32 %v30459_v50 }
0x1200   : > { %32105 = vtanh.f32 %v30460_v36  ;;  %v29533_v24 = vpop.f32.mrb[78].mxu1 }
0x1201   : > { %v32096_v6 = vpop.eup %32095  ;;  %v30461_v48 = vadd.f32 %v29533_v24, %v38268_v0  ;;  %v22026_v33 = vpop.f32.mrb[79].mxu1 }
0x1202   : > { %v32098_v27 = vpop.eup %32097  ;;  %22181 = vst.msk [vmem:[%s38281_s12 + $0x58] sm:$0xff] %vm22169_vm2, %v32096_v6  ;;  %v30462_v51 = vadd.f32 %v38268_v0, %v22026_v33 }
0x1203   : > { %22180 = vst.msk [vmem:[%s38281_s12 + $0x50] sm:$0xff] %vm22169_vm2, %v32098_v27  ;;  %32107 = vtanh.f32 %v30461_v48 }
0x1204   : > { %32109 = vtanh.f32 %v30462_v51  ;;  %v29536_v55 = vpop.f32.mrb[80].mxu1 }
0x1205   : > { %v32100_v7 = vpop.eup %32099  ;;  %v30463_v62 = vadd.f32 %v29536_v55, %v38268_v0  ;;  %v22036_v53 = vpop.f32.mrb[81].mxu1 }
0x1206   : > { %v32102_v31 = vpop.eup %32101  ;;  %22183 = vst.msk [vmem:[%s38281_s12 + $0x68] sm:$0xff] %vm22169_vm2, %v32100_v7  ;;  %v30464_v20 = vadd.f32 %v38268_v0, %v22036_v53 }
0x1207   : > { %22182 = vst.msk [vmem:[%s38281_s12 + $0x60] sm:$0xff] %vm22169_vm2, %v32102_v31  ;;  %32111 = vtanh.f32 %v30463_v62 }
0x1208   : > { %32113 = vtanh.f32 %v30464_v20  ;;  %v29539_v26 = vpop.f32.mrb[82].mxu1 }
0x1209   : > { %v32104_v56 = vpop.eup %32103  ;;  %v30465_v18 = vadd.f32 %v29539_v26, %v38268_v0  ;;  %v22046_v3 = vpop.f32.mrb[83].mxu1 }
0x120a   : > { %v32106_v10 = vpop.eup %32105  ;;  %22185 = vst.msk [vmem:[%s38281_s12 + $0x78] sm:$0xff] %vm22169_vm2, %v32104_v56  ;;  %v30466_v29 = vadd.f32 %v38268_v0, %v22046_v3 }
0x120b   : > { %22184 = vst.msk [vmem:[%s38281_s12 + $0x70] sm:$0xff] %vm22169_vm2, %v32106_v10  ;;  %32115 = vtanh.f32 %v30465_v18 }
0x120c   : > { %32117 = vtanh.f32 %v30466_v29  ;;  %v29542_v35 = vpop.f32.mrb[84].mxu1 }
0x120d   : > { %v32108_v34 = vpop.eup %32107  ;;  %v30467_v25 = vadd.f32 %v29542_v35, %v38268_v0  ;;  %v22056_v12 = vpop.f32.mrb[85].mxu1 }
0x120e   : > { %v32110_v30 = vpop.eup %32109  ;;  %22187 = vst.msk [vmem:[%s38281_s12 + $0x88] sm:$0xff] %vm22169_vm2, %v32108_v34  ;;  %v30468_v47 = vadd.f32 %v38268_v0, %v22056_v12 }
0x120f   : > { %22186 = vst.msk [vmem:[%s38281_s12 + $0x80] sm:$0xff] %vm22169_vm2, %v32110_v30  ;;  %32119 = vtanh.f32 %v30467_v25 }
0x1210   : > { %32121 = vtanh.f32 %v30468_v47  ;;  %v29545_v1 = vpop.f32.mrb[86].mxu1 }
0x1211   : > { %v32112_v8 = vpop.eup %32111  ;;  %v30469_v46 = vadd.f32 %v29545_v1, %v38268_v0  ;;  %v22066_v11 = vpop.f32.mrb[87].mxu1 }
0x1212   : > { %v32114_v14 = vpop.eup %32113  ;;  %22189 = vst.msk [vmem:[%s38281_s12 + $0x98] sm:$0xff] %vm22169_vm2, %v32112_v8  ;;  %v30470_v28 = vadd.f32 %v38268_v0, %v22066_v11 }
0x1213   : > { %22188 = vst.msk [vmem:[%s38281_s12 + $0x90] sm:$0xff] %vm22169_vm2, %v32114_v14  ;;  %32123 = vtanh.f32 %v30469_v46 }
0x1214   : > { %32125 = vtanh.f32 %v30470_v28  ;;  %v29548_v52 = vpop.f32.mrb[88].mxu1 }
0x1215   : > { %v32116_v21 = vpop.eup %32115  ;;  %v30471_v19 = vadd.f32 %v29548_v52, %v38268_v0  ;;  %v22076_v41 = vpop.f32.mrb[89].mxu1 }
0x1216   : > { %v32118_v16 = vpop.eup %32117  ;;  %22191 = vst.msk [vmem:[%s38281_s12 + $0xa8] sm:$0xff] %vm22169_vm2, %v32116_v21  ;;  %v30472_v42 = vadd.f32 %v38268_v0, %v22076_v41 }
0x1217   : > { %22190 = vst.msk [vmem:[%s38281_s12 + $0xa0] sm:$0xff] %vm22169_vm2, %v32118_v16  ;;  %32127 = vtanh.f32 %v30471_v19 }
0x1218   : > { %32129 = vtanh.f32 %v30472_v42  ;;  %v29551_v54 = vpop.f32.mrb[90].mxu1 }
0x1219   : > { %v32120_v59 = vpop.eup %32119  ;;  %v30473_v60 = vadd.f32 %v29551_v54, %v38268_v0  ;;  %v22086_v40 = vpop.f32.mrb[91].mxu1 }
0x121a   : > { %v32122_v9 = vpop.eup %32121  ;;  %22193 = vst.msk [vmem:[%s38281_s12 + $0xb8] sm:$0xff] %vm22169_vm2, %v32120_v59  ;;  %v30474_v4 = vadd.f32 %v38268_v0, %v22086_v40 }
0x121b   : > { %22192 = vst.msk [vmem:[%s38281_s12 + $0xb0] sm:$0xff] %vm22169_vm2, %v32122_v9  ;;  %32131 = vtanh.f32 %v30473_v60 }
0x121c   : > { %32133 = vtanh.f32 %v30474_v4  ;;  %v29554_v63 = vpop.f32.mrb[92].mxu1 }
0x121d   : > { %v32124_v58 = vpop.eup %32123  ;;  %v30475_v39 = vadd.f32 %v29554_v63, %v38268_v0  ;;  %v22096_v2 = vpop.f32.mrb[93].mxu1 }
0x121e   : > { %v32126_v23 = vpop.eup %32125  ;;  %22195 = vst.msk [vmem:[%s38281_s12 + $0xc8] sm:$0xff] %vm22169_vm2, %v32124_v58  ;;  %v30476_v57 = vadd.f32 %v38268_v0, %v22096_v2 }
0x121f   : > { %22194 = vst.msk [vmem:[%s38281_s12 + $0xc0] sm:$0xff] %vm22169_vm2, %v32126_v23  ;;  %32135 = vtanh.f32 %v30475_v39 }
0x1220   : > { %32137 = vtanh.f32 %v30476_v57 }
0x1221   : > { %v32128_v43 = vpop.eup %32127 }
0x1222   : > { %v32130_v61 = vpop.eup %32129  ;;  %22197 = vst.msk [vmem:[%s38281_s12 + $0xd8] sm:$0xff] %vm22169_vm2, %v32128_v43 }
0x1223   : > { %22196 = vst.msk [vmem:[%s38281_s12 + $0xd0] sm:$0xff] %vm22169_vm2, %v32130_v61 }
0x1225   : > { %v32132_v5 = vpop.eup %32131 }
0x1226   : > { %v32134_v37 = vpop.eup %32133  ;;  %22199 = vst.msk [vmem:[%s38281_s12 + $0xe8] sm:$0xff] %vm22169_vm2, %v32132_v5 }
0x1227   : > { %22198 = vst.msk [vmem:[%s38281_s12 + $0xe0] sm:$0xff] %vm22169_vm2, %v32134_v37 }
0x1229   : > { %v32136_v17 = vpop.eup %32135 }
0x122a   : > { %v32138_v15 = vpop.eup %32137  ;;  %22201 = vst.msk [vmem:[%s38281_s12 + $0xf8] sm:$0xff] %vm22169_vm2, %v32136_v17 }
0x122b   : > { %22200 = vst.msk [vmem:[%s38281_s12 + $0xf0] sm:$0xff] %vm22169_vm2, %v32138_v15 }
0x122c PF: > { %s20_s24 = sadd.s32 1, %s32297_s24  }
0x122d   : > { %p17_p11 = scmp.ge.s32.totalorder %s20_s24, 4  }
0x122f   :  { %19 = sbr.rel (!%p17_p11) target bundleno = 3 (0x3), region = 157 }
0x1236   :  { %22223 = vsyncpa [#allocation5], 1 }
0x1237   :  { %22225 = vsyncpa [#allocation5 + $0x1], 1 }
0x1238   :  { %22226 = vsyncpa [#allocation7], 1 }
0x1239   :  { %22227 = vsyncpa [#allocation10], 1 }

</bundles_post_ra>
